<compile_context>
chip_gen: v5e
topology: v5e:2x2
jax: 0.10.0
libtpu: 0.0.40
codegen_flags: <defaults>
</compile_context>

<pallas_src>
from functools import partial

import jax
import jax.numpy as jnp
from jax import lax
from jax.experimental import pallas as pl
from jax.experimental.pallas import tpu as pltpu

DIM = 4          # `dim` of the module
HEADS = 4
DIM_HEAD = 32
HIDDEN = HEADS * DIM_HEAD  # 128
EPS = 1e-12      # F.normalize clamp


def _linear_attention_kernel(x_ref, wqkv_t_ref, wout_ref, bout_ref, g2_ref, mask_ref,
                             o_ref, *, heads, dim_head, bb, mxu_dtype, approx_recip):
    # x block: (bb, C, N), N on lanes.
    c = x_ref.shape[1]
    hidden = heads * dim_head
    scale = dim_head ** -0.5

    def recip(t):
        if approx_recip:
            return pl.reciprocal(t, approx=True)   # EUP slot (free-ish)
        return 1.0 / t

    wqkv_t = wqkv_t_ref[...].astype(jnp.float32)   # (C, 3*hidden), g1*sqrt(C) pre-folded

    # --- per-batch: RMSNorm (division only; g1*sqrt(C) folded into W) + to_qkv ---
    qs, ks, vs = [], [], []
    for bi in range(bb):
        x = x_ref[bi].astype(jnp.float32)                          # (C, N)
        nrm = jnp.sqrt(jnp.sum(x * x, axis=0, keepdims=True))      # (1, N)
        xn = x * recip(jnp.maximum(nrm, EPS))                      # (C, N)
        # (C, 3*hidden)^T @ (C, N) -> (3*hidden, N): contract dim 0 of both operands.
        qkv = lax.dot_general(wqkv_t, xn, (((0,), (0,)), ((), ())),
                              preferred_element_type=jnp.float32)  # (3*hidden, N)
        qs.append(qkv[0 * hidden:1 * hidden, :])
        ks.append(qkv[1 * hidden:2 * hidden, :])
        vs.append(qkv[2 * hidden:3 * hidden, :])

    # Stack the bb batches along the row (hidden) axis -> (bb*hidden, N).
    q = jnp.concatenate(qs, axis=0)
    k = jnp.concatenate(ks, axis=0)
    v = jnp.concatenate(vs, axis=0)

    # --- k softmax over the sequence axis (lanes), full width, one pass ---
    k = k - jnp.max(k, axis=-1, keepdims=True)
    ke = jnp.exp(k)
    k = ke * recip(jnp.sum(ke, axis=-1, keepdims=True))            # (bb*hidden, N)

    # --- q softmax over the head dim: one global column max (valid shift for every
    #     head's softmax), one full-width exp, then per-(batch,head) sums + normalize.
    #     The 1/sqrt(dim_head) scale is folded into the denominator (1,N) multiply. ---
    q = q - jnp.max(q, axis=0, keepdims=True)
    qe = jnp.exp(q)                                                # (bb*hidden, N)
    q_parts = []
    for g in range(bb * heads):
        qg = qe[g * dim_head:(g + 1) * dim_head, :]                # (D, N), sublane-aligned
        inv = recip(jnp.sum(qg, axis=0, keepdims=True)) * scale    # (1, N)
        q_parts.append(qg * inv)
    qn = jnp.concatenate(q_parts, axis=0)                          # (bb*hidden, N)

    # --- context: one K=N MXU pass over the stacked batches, masked to the
    #     per-(batch,head) block diagonal. bf16 operands, f32 accumulation. ---
    ctx = lax.dot_general(k.astype(mxu_dtype), v.astype(mxu_dtype),
                          (((1,), (1,)), ((), ())),
                          preferred_element_type=jnp.float32)      # (bbH, bbH)
    ctx = ctx * mask_ref[...]                                      # hoisted block-diag mask

    # --- out[e, n] = sum_d ctx[d, e] * q[d, n]  (K=bb*hidden MXU pass) ---
    out_full = lax.dot_general(ctx.astype(mxu_dtype), qn.astype(mxu_dtype),
                               (((0,), (0,)), ((), ())),
                               preferred_element_type=jnp.float32)  # (bbH, N)

    # --- per-batch: to_out 1x1 conv + bias, then final RMSNorm; lane-dense store ---
    wout = wout_ref[...].astype(jnp.float32)                       # (C, hidden)
    bout = bout_ref[...]
    g2 = g2_ref[...]
    for bi in range(bb):
        ob = out_full[bi * hidden:(bi + 1) * hidden, :]            # (hidden, N)
        y = jnp.dot(wout, ob, preferred_element_type=jnp.float32) + bout   # (C, N)
        ynrm = jnp.sqrt(jnp.sum(y * y, axis=0, keepdims=True))
        y = y * recip(jnp.maximum(ynrm, EPS)) * g2 * (c ** 0.5)
        o_ref[bi] = y.astype(o_ref.dtype)


def linear_attention(x_nchw, g1, wqkv, wout, bout, g2, *, heads=HEADS, dim_head=DIM_HEAD,
                     mxu_dtype=jnp.bfloat16, approx_recip=True, batch_block=None):
    b, c, h, w = x_nchw.shape
    n = h * w
    hidden = heads * dim_head

    # Pack 2 batches per grid step when possible (fills the 2x256^2 MXU on v6e/v7x
    # and amortizes per-step overhead).
    if batch_block is None:
        batch_block = 2 if (b % 2 == 0) else 1
    bb = batch_block
    assert b % bb == 0, "batch must be divisible by batch_block"

    x = x_nchw.reshape(b, c, n)            # NCHW-native: no transpose, N on lanes

    # Fold g1 * sqrt(C) into the W_qkv columns and pass the weight pre-transposed
    # as (C, 3*hidden) -> lane-dense VMEM tile, feeds the MXU without relayout.
    wqkv_t = (wqkv * (g1.reshape(1, c) * (c ** 0.5))).T            # (C, 3*hidden)

    # Hoisted block-diagonal mask over the stacked (batch x head) blocks.
    hid_tot = bb * hidden
    rows = jnp.arange(hid_tot, dtype=jnp.int32)
    bd_mask = (rows[:, None] // dim_head == rows[None, :] // dim_head).astype(jnp.float32)

    kernel = partial(_linear_attention_kernel, heads=heads, dim_head=dim_head,
                     bb=bb, mxu_dtype=mxu_dtype, approx_recip=approx_recip)
    out = pl.pallas_call(
        kernel,
        out_shape=jax.ShapeDtypeStruct((b, c, n), jnp.float32),
        grid_spec=pltpu.PrefetchScalarGridSpec(
            num_scalar_prefetch=0,
            grid=(b // bb,),
            in_specs=[
                pl.BlockSpec((bb, c, n), lambda i: (i, 0, 0)),          # x
                pl.BlockSpec((c, 3 * hidden), lambda i: (0, 0)),        # W_qkv^T (g1 folded)
                pl.BlockSpec((c, hidden), lambda i: (0, 0)),            # W_out
                pl.BlockSpec((c, 1), lambda i: (0, 0)),                 # b_out
                pl.BlockSpec((c, 1), lambda i: (0, 0)),                 # g2
                pl.BlockSpec((hid_tot, hid_tot), lambda i: (0, 0)),     # block-diag mask
            ],
            out_specs=pl.BlockSpec((bb, c, n), lambda i: (i, 0, 0)),
        ),
        compiler_params=pltpu.CompilerParams(dimension_semantics=("parallel",)),
    )(x, wqkv_t, wout, bout, g2, bd_mask)

    return out.reshape(b, c, h, w)


def linear_attention_reference(x_nchw, g1, wqkv, wout, bout, g2,
                               heads=HEADS, dim_head=DIM_HEAD):
    """Pure-JAX mirror of the PyTorch forward (for verification)."""
    b, c, hh, ww = x_nchw.shape
    n = hh * ww
    hidden = heads * dim_head
    x = x_nchw.reshape(b, c, n).astype(jnp.float32)
    nrm = jnp.sqrt(jnp.sum(x * x, axis=1, keepdims=True))
    xn = x / jnp.maximum(nrm, EPS) * g1[None] * (c ** 0.5)
    qkv = jnp.einsum('oc,bcn->bon', wqkv, xn)
    q, k, v = (qkv[:, :hidden], qkv[:, hidden:2 * hidden], qkv[:, 2 * hidden:])

    def split(t):  # (b, heads*dh, n) -> (b, heads, dh, n)
        return t.reshape(b, heads, dim_head, n)

    q, k, v = map(split, (q, k, v))
    q = jax.nn.softmax(q, axis=-2) * dim_head ** -0.5
    k = jax.nn.softmax(k, axis=-1)
    context = jnp.einsum('bhdn,bhen->bhde', k, v)
    out = jnp.einsum('bhde,bhdn->bhen', context, q)
    out = out.reshape(b, hidden, n)
    y = jnp.einsum('ch,bhn->bcn', wout, out) + bout[None]
    ynrm = jnp.sqrt(jnp.sum(y * y, axis=1, keepdims=True))
    y = y / jnp.maximum(ynrm, EPS) * g2[None] * (c ** 0.5)
    return y.reshape(b, c, hh, ww)


if __name__ == "__main__":
    key = jax.random.PRNGKey(0)
    kx, kw1, kw2, kb, kg1, kg2 = jax.random.split(key, 6)

    B, C, H, W = 2, DIM, 16, 16
    x = jax.random.normal(kx, (B, C, H, W), dtype=jnp.float32)

    # Deterministic synthetic parameters (shapes follow the module __init__,
    # conv weights with the trailing 1x1 squeezed; g perturbed to exercise broadcast).
    g1 = 1.0 + 0.1 * jax.random.normal(kg1, (C, 1), dtype=jnp.float32)        # norm.g
    wqkv = 0.1 * jax.random.normal(kw1, (3 * HIDDEN, C), dtype=jnp.float32)   # to_qkv weight
    wout = 0.1 * jax.random.normal(kw2, (C, HIDDEN), dtype=jnp.float32)       # to_out conv weight
    bout = 0.1 * jax.random.normal(kb, (C, 1), dtype=jnp.float32)             # to_out conv bias
    g2 = 1.0 + 0.1 * jax.random.normal(kg2, (C, 1), dtype=jnp.float32)        # to_out RMSNorm.g

    y_ref = linear_attention_reference(x, g1, wqkv, wout, bout, g2)

    # 1) Exact path: f32 MXU operands + exact reciprocals -> algorithmic check @ 1e-4.
    y_exact = jax.block_until_ready(
        linear_attention(x, g1, wqkv, wout, bout, g2,
                         mxu_dtype=jnp.float32, approx_recip=False))
    assert y_exact.shape == (B, C, H, W)
    err_exact = float(jnp.max(jnp.abs(y_exact - y_ref)))
    assert jnp.allclose(y_exact, y_ref, rtol=1e-4, atol=1e-4), err_exact

    # 2) Fast path (default): bf16 MXU operands with f32 accumulation + approx
    #    reciprocals -> checked at a bf16-appropriate tolerance.
    y_fast = jax.block_until_ready(linear_attention(x, g1, wqkv, wout, bout, g2))
    err_fast = float(jnp.max(jnp.abs(y_fast - y_ref)))
    assert jnp.allclose(y_fast, y_ref, rtol=2e-2, atol=2e-2), err_fast

    print("KERNEL_OK")
</pallas_src>

<mosaic_0001>
module attributes {stable_mosaic.version = 11 : i64} {
  func.func @_linear_attention_kernel(%arg0: i32, %arg1: memref<2x4x256xf32, #tpu.memory_space<vmem>>, %arg2: memref<4x384xf32, #tpu.memory_space<vmem>>, %arg3: memref<4x128xf32, #tpu.memory_space<vmem>>, %arg4: memref<4x1xf32, #tpu.memory_space<vmem>>, %arg5: memref<4x1xf32, #tpu.memory_space<vmem>>, %arg6: memref<256x256xf32, #tpu.memory_space<vmem>>, %arg7: memref<2x4x256xf32, #tpu.memory_space<vmem>>) attributes {dimension_semantics = [#tpu.dimension_semantics<parallel>], iteration_bounds = array<i64: 1>, scalar_prefetch = 0 : i64, scratch_operands = 0 : i64, tpu.core_type = #tpu.core_type<tc>, window_params = [{transform_indices = @transform_0, window_bounds = array<i64: 2, 4, 256>}, {pipeline_mode = #tpu.pipeline_mode<synchronous>, transform_indices = @transform_1, window_bounds = array<i64: 4, 384>}, {pipeline_mode = #tpu.pipeline_mode<synchronous>, transform_indices = @transform_2, window_bounds = array<i64: 4, 128>}, {pipeline_mode = #tpu.pipeline_mode<synchronous>, transform_indices = @transform_3, window_bounds = array<i64: 4, 1>}, {pipeline_mode = #tpu.pipeline_mode<synchronous>, transform_indices = @transform_4, window_bounds = array<i64: 4, 1>}, {pipeline_mode = #tpu.pipeline_mode<synchronous>, transform_indices = @transform_5, window_bounds = array<i64: 256, 256>}, {transform_indices = @transform_6, window_bounds = array<i64: 2, 4, 256>}]} {
    %c0 = arith.constant 0 : index
    %c0_0 = arith.constant 0 : index
    %0 = vector.load %arg2[%c0, %c0_0] : memref<4x384xf32, #tpu.memory_space<vmem>>, vector<4x384xf32>
    %c0_1 = arith.constant 0 : index
    %c0_2 = arith.constant 0 : index
    %c0_3 = arith.constant 0 : index
    %1 = vector.load %arg1[%c0_1, %c0_2, %c0_3] : memref<2x4x256xf32, #tpu.memory_space<vmem>>, vector<1x4x256xf32>
    %2 = vector.shape_cast %1 : vector<1x4x256xf32> to vector<4x256xf32>
    %3 = arith.mulf %2, %2 : vector<4x256xf32>
    %cst = arith.constant dense<0.000000e+00> : vector<256xf32>
    %4 = vector.multi_reduction <add>, %3, %cst [0] : vector<4x256xf32> to vector<256xf32>
    %5 = vector.shape_cast %4 : vector<256xf32> to vector<1x256xf32>
    %6 = math.sqrt %5 : vector<1x256xf32>
    %cst_4 = arith.constant 9.99999996E-13 : f32
    %7 = vector.broadcast %cst_4 : f32 to vector<1x256xf32>
    %8 = arith.maximumf %6, %7 : vector<1x256xf32>
    %cst_5 = arith.constant 1.000000e+00 : f32
    %9 = vector.broadcast %cst_5 : f32 to vector<1x256xf32>
    %10 = arith.divf %9, %8 : vector<1x256xf32>
    %11 = vector.broadcast %10 : vector<1x256xf32> to vector<4x256xf32>
    %12 = arith.mulf %2, %11 : vector<4x256xf32>
    %cst_6 = arith.constant dense<0.000000e+00> : vector<384x256xf32>
    %13 = tpu.matmul %0, %12, %cst_6 {dimension_numbers = #tpu.dot_dimension_numbers<[0], [0], [1], [1], [0, 1, 1, 1], [], []>} : vector<4x384xf32>, vector<4x256xf32>, vector<384x256xf32> -> vector<384x256xf32>
    %14 = vector.extract_strided_slice %13 {offsets = [0, 0], sizes = [128, 256], strides = [1, 1]} : vector<384x256xf32> to vector<128x256xf32>
    %15 = vector.extract_strided_slice %13 {offsets = [128, 0], sizes = [128, 256], strides = [1, 1]} : vector<384x256xf32> to vector<128x256xf32>
    %16 = vector.extract_strided_slice %13 {offsets = [256, 0], sizes = [128, 256], strides = [1, 1]} : vector<384x256xf32> to vector<128x256xf32>
    %c1 = arith.constant 1 : index
    %c0_7 = arith.constant 0 : index
    %c0_8 = arith.constant 0 : index
    %17 = vector.load %arg1[%c1, %c0_7, %c0_8] : memref<2x4x256xf32, #tpu.memory_space<vmem>>, vector<1x4x256xf32>
    %18 = vector.shape_cast %17 : vector<1x4x256xf32> to vector<4x256xf32>
    %19 = arith.mulf %18, %18 : vector<4x256xf32>
    %cst_9 = arith.constant dense<0.000000e+00> : vector<256xf32>
    %20 = vector.multi_reduction <add>, %19, %cst_9 [0] : vector<4x256xf32> to vector<256xf32>
    %21 = vector.shape_cast %20 : vector<256xf32> to vector<1x256xf32>
    %22 = math.sqrt %21 : vector<1x256xf32>
    %cst_10 = arith.constant 9.99999996E-13 : f32
    %23 = vector.broadcast %cst_10 : f32 to vector<1x256xf32>
    %24 = arith.maximumf %22, %23 : vector<1x256xf32>
    %cst_11 = arith.constant 1.000000e+00 : f32
    %25 = vector.broadcast %cst_11 : f32 to vector<1x256xf32>
    %26 = arith.divf %25, %24 : vector<1x256xf32>
    %27 = vector.broadcast %26 : vector<1x256xf32> to vector<4x256xf32>
    %28 = arith.mulf %18, %27 : vector<4x256xf32>
    %cst_12 = arith.constant dense<0.000000e+00> : vector<384x256xf32>
    %29 = tpu.matmul %0, %28, %cst_12 {dimension_numbers = #tpu.dot_dimension_numbers<[0], [0], [1], [1], [0, 1, 1, 1], [], []>} : vector<4x384xf32>, vector<4x256xf32>, vector<384x256xf32> -> vector<384x256xf32>
    %30 = vector.extract_strided_slice %29 {offsets = [0, 0], sizes = [128, 256], strides = [1, 1]} : vector<384x256xf32> to vector<128x256xf32>
    %31 = vector.extract_strided_slice %29 {offsets = [128, 0], sizes = [128, 256], strides = [1, 1]} : vector<384x256xf32> to vector<128x256xf32>
    %32 = vector.extract_strided_slice %29 {offsets = [256, 0], sizes = [128, 256], strides = [1, 1]} : vector<384x256xf32> to vector<128x256xf32>
    %33 = tpu.concatenate %14, %30 in 0 : vector<128x256xf32>, vector<128x256xf32> -> vector<256x256xf32>
    %34 = tpu.concatenate %15, %31 in 0 : vector<128x256xf32>, vector<128x256xf32> -> vector<256x256xf32>
    %35 = tpu.concatenate %16, %32 in 0 : vector<128x256xf32>, vector<128x256xf32> -> vector<256x256xf32>
    %cst_13 = arith.constant dense<0xFF800000> : vector<256xf32>
    %36 = vector.multi_reduction <maximumf>, %34, %cst_13 [1] : vector<256x256xf32> to vector<256xf32>
    %37 = vector.shape_cast %36 : vector<256xf32> to vector<256x1xf32>
    %38 = vector.broadcast %37 : vector<256x1xf32> to vector<256x256xf32>
    %39 = arith.subf %34, %38 : vector<256x256xf32>
    %40 = math.exp %39 : vector<256x256xf32>
    %cst_14 = arith.constant dense<0.000000e+00> : vector<256xf32>
    %41 = vector.multi_reduction <add>, %40, %cst_14 [1] : vector<256x256xf32> to vector<256xf32>
    %42 = vector.shape_cast %41 : vector<256xf32> to vector<256x1xf32>
    %cst_15 = arith.constant 1.000000e+00 : f32
    %43 = vector.broadcast %cst_15 : f32 to vector<256x1xf32>
    %44 = arith.divf %43, %42 : vector<256x1xf32>
    %45 = vector.broadcast %44 : vector<256x1xf32> to vector<256x256xf32>
    %46 = arith.mulf %40, %45 : vector<256x256xf32>
    %cst_16 = arith.constant dense<0xFF800000> : vector<256xf32>
    %47 = vector.multi_reduction <maximumf>, %33, %cst_16 [0] : vector<256x256xf32> to vector<256xf32>
    %48 = vector.shape_cast %47 : vector<256xf32> to vector<1x256xf32>
    %49 = vector.broadcast %48 : vector<1x256xf32> to vector<256x256xf32>
    %50 = arith.subf %33, %49 : vector<256x256xf32>
    %51 = math.exp %50 : vector<256x256xf32>
    %52 = vector.extract_strided_slice %51 {offsets = [0, 0], sizes = [32, 256], strides = [1, 1]} : vector<256x256xf32> to vector<32x256xf32>
    %cst_17 = arith.constant dense<0.000000e+00> : vector<256xf32>
    %53 = vector.multi_reduction <add>, %52, %cst_17 [0] : vector<32x256xf32> to vector<256xf32>
    %54 = vector.shape_cast %53 : vector<256xf32> to vector<1x256xf32>
    %cst_18 = arith.constant 1.000000e+00 : f32
    %55 = vector.broadcast %cst_18 : f32 to vector<1x256xf32>
    %56 = arith.divf %55, %54 : vector<1x256xf32>
    %cst_19 = arith.constant 0.176776692 : f32
    %57 = vector.broadcast %cst_19 : f32 to vector<1x256xf32>
    %58 = arith.mulf %56, %57 : vector<1x256xf32>
    %59 = vector.broadcast %58 : vector<1x256xf32> to vector<32x256xf32>
    %60 = arith.mulf %52, %59 : vector<32x256xf32>
    %61 = vector.extract_strided_slice %51 {offsets = [32, 0], sizes = [32, 256], strides = [1, 1]} : vector<256x256xf32> to vector<32x256xf32>
    %cst_20 = arith.constant dense<0.000000e+00> : vector<256xf32>
    %62 = vector.multi_reduction <add>, %61, %cst_20 [0] : vector<32x256xf32> to vector<256xf32>
    %63 = vector.shape_cast %62 : vector<256xf32> to vector<1x256xf32>
    %cst_21 = arith.constant 1.000000e+00 : f32
    %64 = vector.broadcast %cst_21 : f32 to vector<1x256xf32>
    %65 = arith.divf %64, %63 : vector<1x256xf32>
    %cst_22 = arith.constant 0.176776692 : f32
    %66 = vector.broadcast %cst_22 : f32 to vector<1x256xf32>
    %67 = arith.mulf %65, %66 : vector<1x256xf32>
    %68 = vector.broadcast %67 : vector<1x256xf32> to vector<32x256xf32>
    %69 = arith.mulf %61, %68 : vector<32x256xf32>
    %70 = vector.extract_strided_slice %51 {offsets = [64, 0], sizes = [32, 256], strides = [1, 1]} : vector<256x256xf32> to vector<32x256xf32>
    %cst_23 = arith.constant dense<0.000000e+00> : vector<256xf32>
    %71 = vector.multi_reduction <add>, %70, %cst_23 [0] : vector<32x256xf32> to vector<256xf32>
    %72 = vector.shape_cast %71 : vector<256xf32> to vector<1x256xf32>
    %cst_24 = arith.constant 1.000000e+00 : f32
    %73 = vector.broadcast %cst_24 : f32 to vector<1x256xf32>
    %74 = arith.divf %73, %72 : vector<1x256xf32>
    %cst_25 = arith.constant 0.176776692 : f32
    %75 = vector.broadcast %cst_25 : f32 to vector<1x256xf32>
    %76 = arith.mulf %74, %75 : vector<1x256xf32>
    %77 = vector.broadcast %76 : vector<1x256xf32> to vector<32x256xf32>
    %78 = arith.mulf %70, %77 : vector<32x256xf32>
    %79 = vector.extract_strided_slice %51 {offsets = [96, 0], sizes = [32, 256], strides = [1, 1]} : vector<256x256xf32> to vector<32x256xf32>
    %cst_26 = arith.constant dense<0.000000e+00> : vector<256xf32>
    %80 = vector.multi_reduction <add>, %79, %cst_26 [0] : vector<32x256xf32> to vector<256xf32>
    %81 = vector.shape_cast %80 : vector<256xf32> to vector<1x256xf32>
    %cst_27 = arith.constant 1.000000e+00 : f32
    %82 = vector.broadcast %cst_27 : f32 to vector<1x256xf32>
    %83 = arith.divf %82, %81 : vector<1x256xf32>
    %cst_28 = arith.constant 0.176776692 : f32
    %84 = vector.broadcast %cst_28 : f32 to vector<1x256xf32>
    %85 = arith.mulf %83, %84 : vector<1x256xf32>
    %86 = vector.broadcast %85 : vector<1x256xf32> to vector<32x256xf32>
    %87 = arith.mulf %79, %86 : vector<32x256xf32>
    %88 = vector.extract_strided_slice %51 {offsets = [128, 0], sizes = [32, 256], strides = [1, 1]} : vector<256x256xf32> to vector<32x256xf32>
    %cst_29 = arith.constant dense<0.000000e+00> : vector<256xf32>
    %89 = vector.multi_reduction <add>, %88, %cst_29 [0] : vector<32x256xf32> to vector<256xf32>
    %90 = vector.shape_cast %89 : vector<256xf32> to vector<1x256xf32>
    %cst_30 = arith.constant 1.000000e+00 : f32
    %91 = vector.broadcast %cst_30 : f32 to vector<1x256xf32>
    %92 = arith.divf %91, %90 : vector<1x256xf32>
    %cst_31 = arith.constant 0.176776692 : f32
    %93 = vector.broadcast %cst_31 : f32 to vector<1x256xf32>
    %94 = arith.mulf %92, %93 : vector<1x256xf32>
    %95 = vector.broadcast %94 : vector<1x256xf32> to vector<32x256xf32>
    %96 = arith.mulf %88, %95 : vector<32x256xf32>
    %97 = vector.extract_strided_slice %51 {offsets = [160, 0], sizes = [32, 256], strides = [1, 1]} : vector<256x256xf32> to vector<32x256xf32>
    %cst_32 = arith.constant dense<0.000000e+00> : vector<256xf32>
    %98 = vector.multi_reduction <add>, %97, %cst_32 [0] : vector<32x256xf32> to vector<256xf32>
    %99 = vector.shape_cast %98 : vector<256xf32> to vector<1x256xf32>
    %cst_33 = arith.constant 1.000000e+00 : f32
    %100 = vector.broadcast %cst_33 : f32 to vector<1x256xf32>
    %101 = arith.divf %100, %99 : vector<1x256xf32>
    %cst_34 = arith.constant 0.176776692 : f32
    %102 = vector.broadcast %cst_34 : f32 to vector<1x256xf32>
    %103 = arith.mulf %101, %102 : vector<1x256xf32>
    %104 = vector.broadcast %103 : vector<1x256xf32> to vector<32x256xf32>
    %105 = arith.mulf %97, %104 : vector<32x256xf32>
    %106 = vector.extract_strided_slice %51 {offsets = [192, 0], sizes = [32, 256], strides = [1, 1]} : vector<256x256xf32> to vector<32x256xf32>
    %cst_35 = arith.constant dense<0.000000e+00> : vector<256xf32>
    %107 = vector.multi_reduction <add>, %106, %cst_35 [0] : vector<32x256xf32> to vector<256xf32>
    %108 = vector.shape_cast %107 : vector<256xf32> to vector<1x256xf32>
    %cst_36 = arith.constant 1.000000e+00 : f32
    %109 = vector.broadcast %cst_36 : f32 to vector<1x256xf32>
    %110 = arith.divf %109, %108 : vector<1x256xf32>
    %cst_37 = arith.constant 0.176776692 : f32
    %111 = vector.broadcast %cst_37 : f32 to vector<1x256xf32>
    %112 = arith.mulf %110, %111 : vector<1x256xf32>
    %113 = vector.broadcast %112 : vector<1x256xf32> to vector<32x256xf32>
    %114 = arith.mulf %106, %113 : vector<32x256xf32>
    %115 = vector.extract_strided_slice %51 {offsets = [224, 0], sizes = [32, 256], strides = [1, 1]} : vector<256x256xf32> to vector<32x256xf32>
    %cst_38 = arith.constant dense<0.000000e+00> : vector<256xf32>
    %116 = vector.multi_reduction <add>, %115, %cst_38 [0] : vector<32x256xf32> to vector<256xf32>
    %117 = vector.shape_cast %116 : vector<256xf32> to vector<1x256xf32>
    %cst_39 = arith.constant 1.000000e+00 : f32
    %118 = vector.broadcast %cst_39 : f32 to vector<1x256xf32>
    %119 = arith.divf %118, %117 : vector<1x256xf32>
    %cst_40 = arith.constant 0.176776692 : f32
    %120 = vector.broadcast %cst_40 : f32 to vector<1x256xf32>
    %121 = arith.mulf %119, %120 : vector<1x256xf32>
    %122 = vector.broadcast %121 : vector<1x256xf32> to vector<32x256xf32>
    %123 = arith.mulf %115, %122 : vector<32x256xf32>
    %124 = tpu.concatenate %60, %69, %78, %87, %96, %105, %114, %123 in 0 : vector<32x256xf32>, vector<32x256xf32>, vector<32x256xf32>, vector<32x256xf32>, vector<32x256xf32>, vector<32x256xf32>, vector<32x256xf32>, vector<32x256xf32> -> vector<256x256xf32>
    %cst_41 = arith.constant dense<0.000000e+00> : vector<256x256xf32>
    %125 = tpu.matmul %46, %35, %cst_41 {dimension_numbers = #tpu.dot_dimension_numbers<[1], [1], [0], [0], [0, 0, 1, 0], [], []>} : vector<256x256xf32>, vector<256x256xf32>, vector<256x256xf32> -> vector<256x256xf32>
    %c0_42 = arith.constant 0 : index
    %c0_43 = arith.constant 0 : index
    %126 = vector.load %arg6[%c0_42, %c0_43] : memref<256x256xf32, #tpu.memory_space<vmem>>, vector<256x256xf32>
    %127 = arith.mulf %125, %126 : vector<256x256xf32>
    %cst_44 = arith.constant dense<0.000000e+00> : vector<256x256xf32>
    %128 = tpu.matmul %127, %124, %cst_44 {dimension_numbers = #tpu.dot_dimension_numbers<[0], [0], [1], [1], [0, 1, 1, 1], [], []>} : vector<256x256xf32>, vector<256x256xf32>, vector<256x256xf32> -> vector<256x256xf32>
    %c0_45 = arith.constant 0 : index
    %c0_46 = arith.constant 0 : index
    %129 = vector.load %arg3[%c0_45, %c0_46] : memref<4x128xf32, #tpu.memory_space<vmem>>, vector<4x128xf32>
    %c0_47 = arith.constant 0 : index
    %c0_48 = arith.constant 0 : index
    %130 = vector.load %arg4[%c0_47, %c0_48] : memref<4x1xf32, #tpu.memory_space<vmem>>, vector<4x1xf32>
    %c0_49 = arith.constant 0 : index
    %c0_50 = arith.constant 0 : index
    %131 = vector.load %arg5[%c0_49, %c0_50] : memref<4x1xf32, #tpu.memory_space<vmem>>, vector<4x1xf32>
    %132 = vector.extract_strided_slice %128 {offsets = [0, 0], sizes = [128, 256], strides = [1, 1]} : vector<256x256xf32> to vector<128x256xf32>
    %cst_51 = arith.constant dense<0.000000e+00> : vector<4x256xf32>
    %133 = tpu.matmul %129, %132, %cst_51 {dimension_numbers = #tpu.dot_dimension_numbers<[1], [0], [0], [1], [0, 0, 1, 1], [], []>} : vector<4x128xf32>, vector<128x256xf32>, vector<4x256xf32> -> vector<4x256xf32>
    %134 = vector.broadcast %130 : vector<4x1xf32> to vector<4x256xf32>
    %135 = arith.addf %133, %134 : vector<4x256xf32>
    %136 = arith.mulf %135, %135 : vector<4x256xf32>
    %cst_52 = arith.constant dense<0.000000e+00> : vector<256xf32>
    %137 = vector.multi_reduction <add>, %136, %cst_52 [0] : vector<4x256xf32> to vector<256xf32>
    %138 = vector.shape_cast %137 : vector<256xf32> to vector<1x256xf32>
    %139 = math.sqrt %138 : vector<1x256xf32>
    %cst_53 = arith.constant 9.99999996E-13 : f32
    %140 = vector.broadcast %cst_53 : f32 to vector<1x256xf32>
    %141 = arith.maximumf %139, %140 : vector<1x256xf32>
    %cst_54 = arith.constant 1.000000e+00 : f32
    %142 = vector.broadcast %cst_54 : f32 to vector<1x256xf32>
    %143 = arith.divf %142, %141 : vector<1x256xf32>
    %144 = vector.broadcast %143 : vector<1x256xf32> to vector<4x256xf32>
    %145 = arith.mulf %135, %144 : vector<4x256xf32>
    %146 = vector.broadcast %131 : vector<4x1xf32> to vector<4x256xf32>
    %147 = arith.mulf %145, %146 : vector<4x256xf32>
    %cst_55 = arith.constant 2.000000e+00 : f32
    %148 = vector.broadcast %cst_55 : f32 to vector<4x256xf32>
    %149 = arith.mulf %147, %148 : vector<4x256xf32>
    %c0_56 = arith.constant 0 : index
    %c0_57 = arith.constant 0 : index
    %c0_58 = arith.constant 0 : index
    %150 = vector.load %arg7[%c0_56, %c0_57, %c0_58] : memref<2x4x256xf32, #tpu.memory_space<vmem>>, vector<1x4x256xf32>
    %151 = vector.shape_cast %150 : vector<1x4x256xf32> to vector<4x256xf32>
    %152 = vector.shape_cast %149 : vector<4x256xf32> to vector<1x4x256xf32>
    tpu.vector_store %arg7[%c0_56, %c0_57, %c0_58], %152 {strides = array<i32>} : memref<2x4x256xf32, #tpu.memory_space<vmem>>, vector<1x4x256xf32>,
    %153 = vector.extract_strided_slice %128 {offsets = [128, 0], sizes = [128, 256], strides = [1, 1]} : vector<256x256xf32> to vector<128x256xf32>
    %cst_59 = arith.constant dense<0.000000e+00> : vector<4x256xf32>
    %154 = tpu.matmul %129, %153, %cst_59 {dimension_numbers = #tpu.dot_dimension_numbers<[1], [0], [0], [1], [0, 0, 1, 1], [], []>} : vector<4x128xf32>, vector<128x256xf32>, vector<4x256xf32> -> vector<4x256xf32>
    %155 = vector.broadcast %130 : vector<4x1xf32> to vector<4x256xf32>
    %156 = arith.addf %154, %155 : vector<4x256xf32>
    %157 = arith.mulf %156, %156 : vector<4x256xf32>
    %cst_60 = arith.constant dense<0.000000e+00> : vector<256xf32>
    %158 = vector.multi_reduction <add>, %157, %cst_60 [0] : vector<4x256xf32> to vector<256xf32>
    %159 = vector.shape_cast %158 : vector<256xf32> to vector<1x256xf32>
    %160 = math.sqrt %159 : vector<1x256xf32>
    %cst_61 = arith.constant 9.99999996E-13 : f32
    %161 = vector.broadcast %cst_61 : f32 to vector<1x256xf32>
    %162 = arith.maximumf %160, %161 : vector<1x256xf32>
    %cst_62 = arith.constant 1.000000e+00 : f32
    %163 = vector.broadcast %cst_62 : f32 to vector<1x256xf32>
    %164 = arith.divf %163, %162 : vector<1x256xf32>
    %165 = vector.broadcast %164 : vector<1x256xf32> to vector<4x256xf32>
    %166 = arith.mulf %156, %165 : vector<4x256xf32>
    %167 = vector.broadcast %131 : vector<4x1xf32> to vector<4x256xf32>
    %168 = arith.mulf %166, %167 : vector<4x256xf32>
    %cst_63 = arith.constant 2.000000e+00 : f32
    %169 = vector.broadcast %cst_63 : f32 to vector<4x256xf32>
    %170 = arith.mulf %168, %169 : vector<4x256xf32>
    %c1_64 = arith.constant 1 : index
    %c0_65 = arith.constant 0 : index
    %c0_66 = arith.constant 0 : index
    %171 = vector.load %arg7[%c1_64, %c0_65, %c0_66] : memref<2x4x256xf32, #tpu.memory_space<vmem>>, vector<1x4x256xf32>
    %172 = vector.shape_cast %171 : vector<1x4x256xf32> to vector<4x256xf32>
    %173 = vector.shape_cast %170 : vector<4x256xf32> to vector<1x4x256xf32>
    tpu.vector_store %arg7[%c1_64, %c0_65, %c0_66], %173 {strides = array<i32>} : memref<2x4x256xf32, #tpu.memory_space<vmem>>, vector<1x4x256xf32>,
    return
  }
  func.func @transform_0(%arg0: i32) -> (i32, i32, i32) {
    %c0_i32 = arith.constant 0 : i32
    %c0_i32_0 = arith.constant 0 : i32
    %c0_i32_1 = arith.constant 0 : i32
    return %arg0, %c0_i32, %c0_i32_0 : i32, i32, i32
  }
  func.func @transform_1(%arg0: i32) -> (i32, i32) {
    %c0_i32 = arith.constant 0 : i32
    %c0_i32_0 = arith.constant 0 : i32
    %c0_i32_1 = arith.constant 0 : i32
    return %c0_i32, %c0_i32_0 : i32, i32
  }
  func.func @transform_2(%arg0: i32) -> (i32, i32) {
    %c0_i32 = arith.constant 0 : i32
    %c0_i32_0 = arith.constant 0 : i32
    %c0_i32_1 = arith.constant 0 : i32
    return %c0_i32, %c0_i32_0 : i32, i32
  }
  func.func @transform_3(%arg0: i32) -> (i32, i32) {
    %c0_i32 = arith.constant 0 : i32
    %c0_i32_0 = arith.constant 0 : i32
    %c0_i32_1 = arith.constant 0 : i32
    return %c0_i32, %c0_i32_0 : i32, i32
  }
  func.func @transform_4(%arg0: i32) -> (i32, i32) {
    %c0_i32 = arith.constant 0 : i32
    %c0_i32_0 = arith.constant 0 : i32
    %c0_i32_1 = arith.constant 0 : i32
    return %c0_i32, %c0_i32_0 : i32, i32
  }
  func.func @transform_5(%arg0: i32) -> (i32, i32) {
    %c0_i32 = arith.constant 0 : i32
    %c0_i32_0 = arith.constant 0 : i32
    %c0_i32_1 = arith.constant 0 : i32
    return %c0_i32, %c0_i32_0 : i32, i32
  }
  func.func @transform_6(%arg0: i32) -> (i32, i32, i32) {
    %c0_i32 = arith.constant 0 : i32
    %c0_i32_0 = arith.constant 0 : i32
    %c0_i32_1 = arith.constant 0 : i32
    return %arg0, %c0_i32, %c0_i32_0 : i32, i32, i32
  }
}

</mosaic_0001>

<bundles_post_ra>
// kernel: tpu_custom_call.1
= control target key start
LH: loop header
LB: loop body
LE: loop exit
PB: predicated region body
PF: predicated region fallthrough
CT: control target
= control target key end

     0   :  { %11 = vsyncpa [#allocation3], 0  ;;  %s8505_s0 = inlined_call_operand.hbm [shape: f32[2,4,256], index: 0, kind: input, shape index: {}]   ;;  %s8506_s1 = inlined_call_operand.hbm [shape: f32[4,384], index: 1, kind: input, shape index: {}]   ;;  %s8507_s2 = inlined_call_operand.vmem [shape: f32[4,128], index: 2, kind: input, shape index: {}]   ;;  %s8508_s3 = inlined_call_operand.vmem [shape: f32[4,1], index: 3, kind: input, shape index: {}]   ;;  %s8509_s4 = inlined_call_operand.vmem [shape: f32[4,1], index: 4, kind: input, shape index: {}]   ;;  %s8510_s5 = inlined_call_operand.hbm [shape: f32[256,256], index: 5, kind: input, shape index: {}]   ;;  %s8511_s6 = inlined_call_operand.hbm [shape: f32[2,4,256], index: 6, kind: output, shape index: {}]  }
   0x1   :  { %12 = vsyncpa [#allocation6], 0  ;;  %s32_s23 = sshll.u32 %s8506_s1, 4  ;;  %s33_s23 = int_to_ptr.hbm [resolvable:$true] %s32_s23 }
   0x2   :  { %13 = vsyncpa [#allocation4], 0  ;;  %s5209_s24 = smov [#allocation5]   ;;  %s18_s28 = sshll.u32 %s8505_s0, 4  ;;  %s19_s28 = int_to_ptr.hbm [resolvable:$true] %s18_s28 }
   0x3   :  { %s34_s25 = sshll.u32 %s5209_s24, 4  ;;  %s5210_s29 = smov [#allocation2]   ;;  %s35_s25 = int_to_ptr.vmem [resolvable:$true] %s34_s25 }
   0x4   :  { %37 = dma.hbm_to_vmem [thread:$0]  %s33_s23, 192, %s35_s25, [#allocation6]  }
   0x5   :  { %s20_s30 = sshll.u32 %s5210_s29, 4  ;;  %s5211_s7 = smov 128   ;;  %s21_s30 = int_to_ptr.vmem [resolvable:$true] %s20_s30 }
   0x6   :  { %s5212_s8 = smov 8   ;;  %s48_s10 = sshll.u32 %s8510_s5, 4  ;;  %s49_s10 = int_to_ptr.hbm [resolvable:$true] %s48_s10 }
   0x7   :  { %26 = dma.hbm_to_vmem [thread:$0]  %s19_s28, 256, %s21_s30, [#allocation3], %s5211_s7, %s5211_s7, %s5212_s8  }
   0x8   :  { %s5213_s11 = smov [#allocation7]   ;;  %s5214_s0 = smov 256  }
   0x9   :  { %s50_s12 = sshll.u32 %s5213_s11, 4  ;;  %s5215_s13 = smov 16   ;;  %s51_s12 = int_to_ptr.vmem [resolvable:$true] %s50_s12 }
   0xa   :  { %56 = dma.hbm_to_vmem [thread:$0]  %s49_s10, 8192, %s51_s12, [#allocation6], %s5214_s0, %s5214_s0, %s5215_s13  }
   0xb   :  { %5203 = dma.done.wait [#allocation3], 256  }
   0xc   :  { %5204 = vsyncadd [#allocation3], 4294967040 }
   0xd   :  { %5205 = dma.done.wait [#allocation6], 8384  }
   0xe   :  { %5206 = vsyncadd [#allocation6], 4294958912  ;;  %v5269_v0 = vld [vmem:[#allocation2] sm:$0xff]  ;;  %v69_v2 = vld [vmem:[#allocation5] sm:$0xff]  ;;  %vm79_vm0 = vcmask 1043456   ;;  %s4239_s20 = sshll.u32 %s8511_s6, 4  ;;  %s4240_s20 = int_to_ptr.hbm [resolvable:$true] %s4239_s20 }
   0xf   :  { %v72_v1 = vmul.f32 %v5269_v0, %v5269_v0 }
  0x11   :  { %74 = vst [vmem:[#allocation1] ss:$2 sm:$0xff] %v72_v1 }
  0x18   :  { %v75_v3 = vld.sshfl [vmem:[#allocation1] sm:$0xff pattern:$0x75316420]  ;;  %v76_v4 = vld.sshfl [vmem:[#allocation1 + $0x8] sm:$0xff pattern:$0x75316420] }
  0x19   :  { %v80_v5 = vsel %vm79_vm0, %v75_v3, 0.0  ;;  %v87_v6 = vsel %vm79_vm0, %v76_v4, 0.0  ;;  %158 = vst [vmem:[#allocation1] ss:$2 sm:$0xff] %v69_v2  ;;  %v5279_v3 = vld [vmem:[#allocation2 + $0x8] sm:$0xff] }
  0x1a   :  { %v81_v7 = vrot.slane %v80_v5, 4  ;;  %v88_v8 = vrot.slane %v87_v6, 4  ;;  %v740_v4 = vmul.f32 %v5279_v3, %v5279_v3 }
  0x1c   :  { %v82_v9 = vadd.f32 %v81_v7, %v80_v5  ;;  %v89_v10 = vadd.f32 %v88_v8, %v87_v6 }
  0x1e   :  { %v83_v11 = vrot.slane %v82_v9, 2  ;;  %v90_v12 = vrot.slane %v89_v10, 2 }
  0x20   :  { %v84_v13 = vadd.f32 %v83_v11, %v82_v9  ;;  %v91_v14 = vadd.f32 %v90_v12, %v89_v10  ;;  %v161_v15 = vld.sshfl [vmem:[#allocation1] sm:$0xff pattern:$0x75316420]  ;;  %v5276_v1 = vld.sshfl [vmem:[#allocation1 + $0x8] sm:$0xff pattern:$0x75316420] }
  0x21   :  { %167 = vxpose.xlu0.b32.start.end [1/1] (short) %v161_v15, 128 }
  0x22   :  { %v85_v16 = vrot.slane %v84_v13, 1  ;;  %v92_v17 = vrot.slane %v91_v14, 1 }
  0x24   :  { %v86_v18 = vadd.f32 %v85_v16, %v84_v13  ;;  %v93_v19 = vadd.f32 %v92_v17, %v91_v14 }
  0x26   :  { %4723 = vrsqrt.f32 %v86_v18  ;;  %vm101_vm1 = vcmp.eq.f32.partialorder %v86_v18, inf  ;;  %v104_v31 = vand.u32 2147483648, %v86_v18  ;;  %vm103_vm2 = vcmp.eq.f32.partialorder %v86_v18, 0.0 }
  0x27   :  { %4725 = vrsqrt.f32 %v93_v19  ;;  %vm113_vm3 = vcmp.eq.f32.partialorder %v93_v19, inf  ;;  %v116_v34 = vand.u32 2147483648, %v93_v19  ;;  %vm115_vm4 = vcmp.eq.f32.partialorder %v93_v19, 0.0 }
  0x2c   :  { %v4724_v20 = vpop.eup %4723 }
  0x2d   :  { %v4726_v21 = vpop.eup %4725  ;;  %v95_v22 = vmul.f32 %v4724_v20, %v86_v18 }
  0x2e   :  { %v107_v23 = vmul.f32 %v4726_v21, %v93_v19 }
  0x2f   :  { %v96_v24 = vmul.f32 %v4724_v20, %v95_v22 }
  0x30   :  { %v108_v25 = vmul.f32 %v4726_v21, %v107_v23 }
  0x31   :  { %v97_v26 = vmul.f32 0.5, %v96_v24 }
  0x32   :  { %v109_v27 = vmul.f32 0.5, %v108_v25 }
  0x33   :  { %v98_v28 = vsub.f32 1.5, %v97_v26 }
  0x34   :  { %v110_v29 = vsub.f32 1.5, %v109_v27 }
  0x35   :  { %v99_v30 = vmul.f32 %v4724_v20, %v98_v28 }
  0x36   :  { %v111_v32 = vmul.f32 %v4726_v21, %v110_v29 }
  0x37   :  { %v100_v33 = vmul.f32 %v99_v30, %v86_v18 }
  0x38   :  { %v112_v35 = vmul.f32 %v111_v32, %v93_v19 }
  0x39   :  { %v102_v36 = vsel %vm101_vm1, %v86_v18, %v100_v33 }
  0x3a   :  { %v105_v37 = vsel %vm103_vm2, %v104_v31, %v102_v36  ;;  %v114_v38 = vsel %vm113_vm3, %v93_v19, %v112_v35 }
  0x3b   :  { %v117_v39 = vsel %vm115_vm4, %v116_v34, %v114_v38  ;;  %v118_v40 = vmax.f32 %v105_v37, 1e-12 }
  0x3c   :  { %v119_v41 = vmax.f32 %v117_v39, 1e-12 }
  0x3d   :  { %4727 = vrcp.f32 %v118_v40  ;;  %vm125_vm5 = vweird.f32 %v118_v40  ;;  %v129_v45 = vand.u32 2147483647, %v118_v40  ;;  %v131_v48 = vand.u32 2147483648, %v118_v40 }
  0x3e   :  { %4729 = vrcp.f32 %v119_v41  ;;  %v146_v49 = vand.u32 2147483648, %v119_v41  ;;  %vm140_vm7 = vweird.f32 %v119_v41  ;;  %v144_v51 = vand.u32 2147483647, %v119_v41 }
  0x3f   :  { %v132_v55 = vor.u32 1.1754944e-38, %v131_v48  ;;  %vm130_vm11 = vcmp.eq.f32.partialorder %v129_v45, 8.507059e+37 }
  0x40   :  { %v147_v56 = vor.u32 1.1754944e-38, %v146_v49  ;;  %vm145_vm12 = vcmp.eq.f32.partialorder %v144_v51, 8.507059e+37 }
  0x43   :  { %v4728_v42 = vpop.eup %4727 }
  0x44   :  { %v4730_v43 = vpop.eup %4729  ;;  %v121_v44 = vmul.f32 %v4728_v42, %v118_v40  ;;  %vm126_vm6 = vweird.f32 %v4728_v42 }
  0x45   :  { %v136_v46 = vmul.f32 %v4730_v43, %v119_v41  ;;  %vm141_vm8 = vweird.f32 %v4730_v43  ;;  %vm127_vm9 = vmor %vm125_vm5, %vm126_vm6 }
  0x46   :  { %v122_v47 = vsub.f32 1.0, %v121_v44  ;;  %vm142_vm10 = vmor %vm140_vm7, %vm141_vm8 }
  0x47   :  { %v137_v50 = vsub.f32 1.0, %v136_v46 }
  0x48   :  { %v123_v52 = vmul.f32 %v4728_v42, %v122_v47 }
  0x49   :  { %v138_v53 = vmul.f32 %v4730_v43, %v137_v50 }
  0x4a   :  { %v124_v54 = vadd.f32 %v4728_v42, %v123_v52 }
  0x4b   :  { %v139_v57 = vadd.f32 %v4730_v43, %v138_v53 }
  0x4c   :  { %v128_v58 = vsel %vm127_vm9, %v4728_v42, %v124_v54 }
  0x4d   :  { %v143_v59 = vsel %vm142_vm10, %v4730_v43, %v139_v57  ;;  %v133_v60 = vsel %vm130_vm11, %v132_v55, %v128_v58  ;;  %vm267_vm10 = vcmask 31744  }
  0x4e   :  { %v148_v61 = vsel %vm145_vm12, %v147_v56, %v143_v59 }
  0x4f   :  { %v152_v62 = vrot.slane %v148_v61, 4 }
  0x51   :  { %v153_v63 = vsel %vm79_vm0, %v133_v60, %v152_v62 }
  0x52   :  { %v155_v2 = vmul.f32 %v153_v63, %v5269_v0 }
  0x54   :  { %264 = vst [vmem:[#allocation1] ss:$2 sm:$0xff] %v155_v2 }
  0x5b   :  { %v265_v5 = vld.sshfl [vmem:[#allocation1] sm:$0xff pattern:$0x75316420]  ;;  %v266_v6 = vld.sshfl [vmem:[#allocation1 + $0x8] sm:$0xff pattern:$0x75316420] }
  0x5c   :  { %4253 = vmatpush.msk.msra.mxu0 %vm79_vm0, %v265_v5  ;;  %4302 = vmatpush.msk.msra.mxu1 %vm79_vm0, %v266_v6  ;;  %742 = vst [vmem:[#allocation1] ss:$2 sm:$0xff] %v740_v4 }
  0x63   :  { %v744_v7 = vld.sshfl [vmem:[#allocation1 + $0x8] sm:$0xff pattern:$0x75316420]  ;;  %v743_v8 = vld.sshfl [vmem:[#allocation1] sm:$0xff pattern:$0x75316420] }
  0x64   :  { %v754_v9 = vsel %vm79_vm0, %v744_v7, 0.0  ;;  %v747_v10 = vsel %vm79_vm0, %v743_v8, 0.0 }
  0x65   :  { %v755_v0 = vrot.slane %v754_v9, 4  ;;  %v748_v11 = vrot.slane %v747_v10, 4 }
  0x67   :  { %v756_v12 = vadd.f32 %v755_v0, %v754_v9  ;;  %v749_v13 = vadd.f32 %v748_v11, %v747_v10  ;;  %v70_v9 = vld [vmem:[#allocation5 + $0x8] sm:$0xf] }
  0x68   :  { %160 = vst [vmem:[#allocation1 + $0x10] ss:$2 sm:$0xff] %v70_v9 }
  0x69   :  { %v757_v14 = vrot.slane %v756_v12, 2  ;;  %v750_v15 = vrot.slane %v749_v13, 2 }
  0x6b   :  { %v758_v16 = vadd.f32 %v757_v14, %v756_v12  ;;  %v751_v17 = vadd.f32 %v750_v15, %v749_v13 }
  0x6d   :  { %v759_v18 = vrot.slane %v758_v16, 1  ;;  %v752_v19 = vrot.slane %v751_v17, 1 }
  0x6f   :  { %v760_v20 = vadd.f32 %v759_v18, %v758_v16  ;;  %v753_v21 = vadd.f32 %v752_v19, %v751_v17 }
  0x71   :  { %4731 = vrsqrt.f32 %v760_v20  ;;  %vm780_vm13 = vcmp.eq.f32.partialorder %v760_v20, inf  ;;  %v783_v35 = vand.u32 2147483648, %v760_v20  ;;  %vm782_vm14 = vcmp.eq.f32.partialorder %v760_v20, 0.0 }
  0x72   :  { %4733 = vrsqrt.f32 %v753_v21  ;;  %vm768_vm15 = vcmp.eq.f32.partialorder %v753_v21, inf  ;;  %v771_v37 = vand.u32 2147483648, %v753_v21  ;;  %vm770_vm1 = vcmp.eq.f32.partialorder %v753_v21, 0.0 }
  0x77   :  { %v4732_v22 = vpop.eup %4731 }
  0x78   :  { %v4734_v23 = vpop.eup %4733  ;;  %v774_v24 = vmul.f32 %v4732_v22, %v760_v20 }
  0x79   :  { %v762_v25 = vmul.f32 %v4734_v23, %v753_v21 }
  0x7a   :  { %v775_v26 = vmul.f32 %v4732_v22, %v774_v24 }
  0x7b   :  { %v763_v27 = vmul.f32 %v4734_v23, %v762_v25 }
  0x7c   :  { %v776_v28 = vmul.f32 0.5, %v775_v26 }
  0x7d   :  { %v764_v29 = vmul.f32 0.5, %v763_v27 }
  0x7e   :  { %v777_v30 = vsub.f32 1.5, %v776_v28 }
  0x7f   :  { %v765_v31 = vsub.f32 1.5, %v764_v29 }
  0x80   :  { %v778_v32 = vmul.f32 %v4732_v22, %v777_v30 }
  0x81   :  { %v766_v33 = vmul.f32 %v4734_v23, %v765_v31 }
  0x82   :  { %v779_v34 = vmul.f32 %v778_v32, %v760_v20 }
  0x83   :  { %v767_v36 = vmul.f32 %v766_v33, %v753_v21 }
  0x84   :  { %v781_v38 = vsel %vm780_vm13, %v760_v20, %v779_v34 }
  0x85   :  { %v769_v39 = vsel %vm768_vm15, %v753_v21, %v767_v36  ;;  %v784_v40 = vsel %vm782_vm14, %v783_v35, %v781_v38 }
  0x86   :  { %v772_v41 = vsel %vm770_vm1, %v771_v37, %v769_v39  ;;  %v786_v42 = vmax.f32 %v784_v40, 1e-12 }
  0x87   :  { %v785_v43 = vmax.f32 %v772_v41, 1e-12 }
  0x88   :  { %4735 = vrcp.f32 %v786_v42  ;;  %v813_v51 = vand.u32 2147483648, %v786_v42  ;;  %vm807_vm2 = vweird.f32 %v786_v42  ;;  %v811_v53 = vand.u32 2147483647, %v786_v42 }
  0x89   :  { %4737 = vrcp.f32 %v785_v43  ;;  %v798_v54 = vand.u32 2147483648, %v785_v43  ;;  %vm792_vm5 = vweird.f32 %v785_v43  ;;  %v796_v58 = vand.u32 2147483647, %v785_v43 }
  0x8a   :  { %v814_v56 = vor.u32 1.1754944e-38, %v813_v51  ;;  %vm812_vm8 = vcmp.eq.f32.partialorder %v811_v53, 8.507059e+37 }
  0x8b   :  { %v799_v59 = vor.u32 1.1754944e-38, %v798_v54  ;;  %vm797_vm9 = vcmp.eq.f32.partialorder %v796_v58, 8.507059e+37 }
  0x8e   :  { %v4736_v44 = vpop.eup %4735 }
  0x8f   :  { %v4738_v45 = vpop.eup %4737  ;;  %v803_v46 = vmul.f32 %v4736_v44, %v786_v42  ;;  %vm808_vm3 = vweird.f32 %v4736_v44 }
  0x90   :  { %v788_v47 = vmul.f32 %v4738_v45, %v785_v43  ;;  %vm809_vm4 = vmor %vm807_vm2, %vm808_vm3  ;;  %vm793_vm6 = vweird.f32 %v4738_v45 }
  0x91   :  { %v804_v48 = vsub.f32 1.0, %v803_v46  ;;  %vm794_vm7 = vmor %vm792_vm5, %vm793_vm6 }
  0x92   :  { %v789_v49 = vsub.f32 1.0, %v788_v47 }
  0x93   :  { %v805_v50 = vmul.f32 %v4736_v44, %v804_v48 }
  0x94   :  { %v790_v52 = vmul.f32 %v4738_v45, %v789_v49 }
  0x95   :  { %v806_v55 = vadd.f32 %v4736_v44, %v805_v50 }
  0x96   :  { %v791_v57 = vadd.f32 %v4738_v45, %v790_v52 }
  0x97   :  { %v810_v60 = vsel %vm809_vm4, %v4736_v44, %v806_v55 }
  0x98   :  { %v795_v61 = vsel %vm794_vm7, %v4738_v45, %v791_v57  ;;  %v815_v62 = vsel %vm812_vm8, %v814_v56, %v810_v60 }
  0x99   :  { %v800_v63 = vsel %vm797_vm9, %v799_v59, %v795_v61  ;;  %v819_v2 = vrot.slane %v815_v62, 4 }
  0x9b   :  { %v820_v4 = vsel %vm79_vm0, %v800_v63, %v819_v2 }
  0x9c   :  { %v822_v5 = vmul.f32 %v820_v4, %v5279_v3 }
  0x9e   :  { %824 = vst [vmem:[#allocation1] ss:$2 sm:$0xff] %v822_v5 }
  0xa1   :  { %199 = vxpose.xlu0.b32.start.end [1/1] (short) %v5276_v1, 128  ;;  %v163_v1 = vld.sshfl [vmem:[#allocation1 + $0x10] sm:$0xff pattern:$0x75316420] }
  0xa2   :  { %231 = vxpose.xlu1.b32.start.end [1/1] (short) %v163_v1, 128 }
  0xa5   :  { %v825_v6 = vld.sshfl [vmem:[#allocation1] sm:$0xff pattern:$0x75316420]  ;;  %v826_v7 = vld.sshfl [vmem:[#allocation1 + $0x8] sm:$0xff pattern:$0x75316420] }
  0xa6   :  { %4351 = vmatpush.msk.msra.mxu2 %vm79_vm0, %v825_v6  ;;  %4400 = vmatpush.msk.msra.mxu3 %vm79_vm0, %v826_v7 }
  0xc5   :  { %v183_v8 = vpop.trf.xlu0 }
  0xc6   :  { %4254 = vmatmul.msk.f32.vlgmr.msra.gmra.mxu0 %vm267_vm10, %v183_v8  ;;  %4303 = vmatmul.msk.f32.vlgmr.msra.gmra.mxu1 %vm267_vm10, %v183_v8 }
  0xc7   :  { %4352 = vmatmul.msk.f32.vlgmr.msra.gmra.mxu2 %vm267_vm10, %v183_v8  ;;  %4401 = vmatmul.msk.f32.vlgmr.msra.gmra.mxu3 %vm267_vm10, %v183_v8 }
  0xcd   :  { %v184_v3 = vpop.trf.xlu0 }
  0xce   :  { %4255 = vmatmul.msk.f32.gmra.mxu0 %vm267_vm10, %v184_v3  ;;  %4304 = vmatmul.msk.f32.gmra.mxu1 %vm267_vm10, %v184_v3 }
  0xcf   :  { %4353 = vmatmul.msk.f32.gmra.mxu2 %vm267_vm10, %v184_v3  ;;  %4402 = vmatmul.msk.f32.gmra.mxu3 %vm267_vm10, %v184_v3 }
  0xd5   :  { %v185_v10 = vpop.trf.xlu0 }
  0xd6   :  { %4256 = vmatmul.msk.f32.gmra.mxu0 %vm267_vm10, %v185_v10  ;;  %4305 = vmatmul.msk.f32.gmra.mxu1 %vm267_vm10, %v185_v10 }
  0xd7   :  { %4354 = vmatmul.msk.f32.gmra.mxu2 %vm267_vm10, %v185_v10  ;;  %4403 = vmatmul.msk.f32.gmra.mxu3 %vm267_vm10, %v185_v10 }
  0xdd   :  { %v186_v0 = vpop.trf.xlu0 }
  0xde   :  { %4257 = vmatmul.msk.f32.gmra.mxu0 %vm267_vm10, %v186_v0  ;;  %4306 = vmatmul.msk.f32.gmra.mxu1 %vm267_vm10, %v186_v0 }
  0xdf   :  { %4355 = vmatmul.msk.f32.gmra.mxu2 %vm267_vm10, %v186_v0  ;;  %4404 = vmatmul.msk.f32.gmra.mxu3 %vm267_vm10, %v186_v0 }
  0xe5   :  { %v187_v11 = vpop.trf.xlu0 }
  0xe6   :  { %4258 = vmatmul.msk.f32.gmra.mxu0 %vm267_vm10, %v187_v11  ;;  %4307 = vmatmul.msk.f32.gmra.mxu1 %vm267_vm10, %v187_v11 }
  0xe7   :  { %4356 = vmatmul.msk.f32.gmra.mxu2 %vm267_vm10, %v187_v11  ;;  %4405 = vmatmul.msk.f32.gmra.mxu3 %vm267_vm10, %v187_v11 }
  0xed   :  { %v188_v12 = vpop.trf.xlu0 }
  0xee   :  { %4259 = vmatmul.msk.f32.gmra.mxu0 %vm267_vm10, %v188_v12  ;;  %4308 = vmatmul.msk.f32.gmra.mxu1 %vm267_vm10, %v188_v12 }
  0xef   :  { %4357 = vmatmul.msk.f32.gmra.mxu2 %vm267_vm10, %v188_v12  ;;  %4406 = vmatmul.msk.f32.gmra.mxu3 %vm267_vm10, %v188_v12 }
  0xf5   :  { %v189_v13 = vpop.trf.xlu0 }
  0xf6   :  { %4260 = vmatmul.msk.f32.gmra.mxu0 %vm267_vm10, %v189_v13  ;;  %4309 = vmatmul.msk.f32.gmra.mxu1 %vm267_vm10, %v189_v13 }
  0xf7   :  { %4358 = vmatmul.msk.f32.gmra.mxu2 %vm267_vm10, %v189_v13  ;;  %4407 = vmatmul.msk.f32.gmra.mxu3 %vm267_vm10, %v189_v13 }
  0xfd   :  { %v190_v14 = vpop.trf.xlu0 }
  0xfe   :  { %4261 = vmatmul.msk.f32.gmra.mxu0 %vm267_vm10, %v190_v14  ;;  %4310 = vmatmul.msk.f32.gmra.mxu1 %vm267_vm10, %v190_v14 }
  0xff   :  { %4359 = vmatmul.msk.f32.gmra.mxu2 %vm267_vm10, %v190_v14  ;;  %4408 = vmatmul.msk.f32.gmra.mxu3 %vm267_vm10, %v190_v14 }
 0x105   :  { %v191_v15 = vpop.trf.xlu0 }
 0x106   :  { %4262 = vmatmul.msk.f32.gmra.mxu0 %vm267_vm10, %v191_v15  ;;  %4311 = vmatmul.msk.f32.gmra.mxu1 %vm267_vm10, %v191_v15 }
 0x107   :  { %4360 = vmatmul.msk.f32.gmra.mxu2 %vm267_vm10, %v191_v15  ;;  %4409 = vmatmul.msk.f32.gmra.mxu3 %vm267_vm10, %v191_v15 }
 0x10d   :  { %v192_v16 = vpop.trf.xlu0 }
 0x10e   :  { %4263 = vmatmul.msk.f32.gmra.mxu0 %vm267_vm10, %v192_v16  ;;  %4312 = vmatmul.msk.f32.gmra.mxu1 %vm267_vm10, %v192_v16 }
 0x10f   :  { %4361 = vmatmul.msk.f32.gmra.mxu2 %vm267_vm10, %v192_v16  ;;  %4410 = vmatmul.msk.f32.gmra.mxu3 %vm267_vm10, %v192_v16 }
 0x115   :  { %v193_v17 = vpop.trf.xlu0 }
 0x116   :  { %4264 = vmatmul.msk.f32.gmra.mxu0 %vm267_vm10, %v193_v17  ;;  %4313 = vmatmul.msk.f32.gmra.mxu1 %vm267_vm10, %v193_v17 }
 0x117   :  { %4362 = vmatmul.msk.f32.gmra.mxu2 %vm267_vm10, %v193_v17  ;;  %4411 = vmatmul.msk.f32.gmra.mxu3 %vm267_vm10, %v193_v17 }
 0x11d   :  { %v194_v18 = vpop.trf.xlu0 }
 0x11e   :  { %4265 = vmatmul.msk.f32.gmra.mxu0 %vm267_vm10, %v194_v18  ;;  %4314 = vmatmul.msk.f32.gmra.mxu1 %vm267_vm10, %v194_v18 }
 0x11f   :  { %4363 = vmatmul.msk.f32.gmra.mxu2 %vm267_vm10, %v194_v18  ;;  %4412 = vmatmul.msk.f32.gmra.mxu3 %vm267_vm10, %v194_v18 }
 0x125   :  { %v195_v19 = vpop.trf.xlu0 }
 0x126   :  { %4266 = vmatmul.msk.f32.gmra.mxu0 %vm267_vm10, %v195_v19  ;;  %4315 = vmatmul.msk.f32.gmra.mxu1 %vm267_vm10, %v195_v19 }
 0x127   :  { %4364 = vmatmul.msk.f32.gmra.mxu2 %vm267_vm10, %v195_v19  ;;  %4413 = vmatmul.msk.f32.gmra.mxu3 %vm267_vm10, %v195_v19 }
 0x12d   :  { %v196_v20 = vpop.trf.xlu0 }
 0x12e   :  { %4267 = vmatmul.msk.f32.gmra.mxu0 %vm267_vm10, %v196_v20  ;;  %4316 = vmatmul.msk.f32.gmra.mxu1 %vm267_vm10, %v196_v20 }
 0x12f   :  { %4365 = vmatmul.msk.f32.gmra.mxu2 %vm267_vm10, %v196_v20  ;;  %4414 = vmatmul.msk.f32.gmra.mxu3 %vm267_vm10, %v196_v20 }
 0x135   :  { %v197_v21 = vpop.trf.xlu0 }
 0x136   :  { %4268 = vmatmul.msk.f32.gmra.mxu0 %vm267_vm10, %v197_v21  ;;  %4317 = vmatmul.msk.f32.gmra.mxu1 %vm267_vm10, %v197_v21 }
 0x137   :  { %4366 = vmatmul.msk.f32.gmra.mxu2 %vm267_vm10, %v197_v21  ;;  %4415 = vmatmul.msk.f32.gmra.mxu3 %vm267_vm10, %v197_v21 }
 0x13d   :  { %v198_v22 = vpop.trf.xlu0 }
 0x13e   :  { %4269 = vmatmul.msk.f32.gmra.mxu0 %vm267_vm10, %v198_v22  ;;  %4318 = vmatmul.msk.f32.gmra.mxu1 %vm267_vm10, %v198_v22 }
 0x13f   :  { %4367 = vmatmul.msk.f32.gmra.mxu2 %vm267_vm10, %v198_v22  ;;  %4416 = vmatmul.msk.f32.gmra.mxu3 %vm267_vm10, %v198_v22 }
 0x143   :  { %v5364_v25 = vpop.f32.mrf.mxu0  ;;  %v5366_v26 = vpop.f32.mrf.mxu1 }
 0x144   :  { %8765 = vst [vmem:[#allocation12_spill] sm:$0xff] %v5364_v25 }
 0x145   :  { %v215_v23 = vpop.trf.xlu0 }
 0x146   :  { %4270 = vmatmul.msk.f32.gmra.mxu0 %vm267_vm10, %v215_v23  ;;  %4319 = vmatmul.msk.f32.gmra.mxu1 %vm267_vm10, %v215_v23  ;;  %v247_v21 = vpop.trf.xlu1 }
 0x147   :  { %4368 = vmatmul.msk.f32.gmra.mxu2 %vm267_vm10, %v215_v23  ;;  %4417 = vmatmul.msk.f32.gmra.mxu3 %vm267_vm10, %v215_v23 }
 0x14a   :  { %v5372_v28 = vpop.f32.mrf.mxu2  ;;  %v5374_v29 = vpop.f32.mrf.mxu3 }
 0x14b   :  { %8766 = vst [vmem:[#allocation13_spill] sm:$0xff] %v5372_v28  ;;  %v5376_v30 = vpop.f32.mrf.mxu0  ;;  %v5378_v31 = vpop.f32.mrf.mxu1 }
 0x14c   :  { %8767 = vst [vmem:[#allocation14_spill] sm:$0xff] %v5374_v29 }
 0x14d   :  { %v216_v24 = vpop.trf.xlu0 }
 0x14e   :  { %4271 = vmatmul.msk.f32.gmra.mxu0 %vm267_vm10, %v216_v24  ;;  %4320 = vmatmul.msk.f32.gmra.mxu1 %vm267_vm10, %v216_v24 }
 0x14f   :  { %4369 = vmatmul.msk.f32.gmra.mxu2 %vm267_vm10, %v216_v24  ;;  %4418 = vmatmul.msk.f32.gmra.mxu3 %vm267_vm10, %v216_v24 }
 0x152   :  { %v5384_v33 = vpop.f32.mrf.mxu2  ;;  %v5386_v34 = vpop.f32.mrf.mxu3 }
 0x153   :  { %8768 = vst [vmem:[#allocation15_spill] sm:$0xff] %v5384_v33  ;;  %v5388_v35 = vpop.f32.mrf.mxu0  ;;  %v5390_v36 = vpop.f32.mrf.mxu1 }
 0x154   :  { %8769 = vst [vmem:[#allocation16_spill] sm:$0xff] %v5386_v34 }
 0x155   :  { %v217_v27 = vpop.trf.xlu0  ;;  %8770 = vst [vmem:[#allocation17_spill] sm:$0xff] %v5388_v35 }
 0x156   :  { %4272 = vmatmul.msk.f32.gmra.mxu0 %vm267_vm10, %v217_v27  ;;  %4321 = vmatmul.msk.f32.gmra.mxu1 %vm267_vm10, %v217_v27 }
 0x157   :  { %4370 = vmatmul.msk.f32.gmra.mxu2 %vm267_vm10, %v217_v27  ;;  %4419 = vmatmul.msk.f32.gmra.mxu3 %vm267_vm10, %v217_v27 }
 0x15a   :  { %v5396_v38 = vpop.f32.mrf.mxu2  ;;  %v5398_v40 = vpop.f32.mrf.mxu3 }
 0x15b   :  { %8771 = vst [vmem:[#allocation18_spill] sm:$0xff] %v5396_v38  ;;  %v5400_v41 = vpop.f32.mrf.mxu0  ;;  %v5404_v42 = vpop.f32.mrf.mxu1 }
 0x15c   :  { %8772 = vst [vmem:[#allocation19_spill] sm:$0xff] %v5398_v40 }
 0x15d   :  { %v218_v32 = vpop.trf.xlu0 }
 0x15e   :  { %4273 = vmatmul.msk.f32.gmra.mxu0 %vm267_vm10, %v218_v32  ;;  %4322 = vmatmul.msk.f32.gmra.mxu1 %vm267_vm10, %v218_v32 }
 0x15f   :  { %4371 = vmatmul.msk.f32.gmra.mxu2 %vm267_vm10, %v218_v32  ;;  %4420 = vmatmul.msk.f32.gmra.mxu3 %vm267_vm10, %v218_v32  ;;  %v248_v32 = vpop.trf.xlu1 }
 0x162   :  { %v5410_v44 = vpop.f32.mrf.mxu2  ;;  %v5414_v45 = vpop.f32.mrf.mxu3 }
 0x163   :  { %8773 = vst [vmem:[#allocation20_spill] sm:$0xff] %v5410_v44  ;;  %v5416_v46 = vpop.f32.mrf.mxu0  ;;  %v5418_v47 = vpop.f32.mrf.mxu1 }
 0x164   :  { %8774 = vst [vmem:[#allocation21_spill] sm:$0xff] %v5414_v45 }
 0x165   :  { %v219_v37 = vpop.trf.xlu0 }
 0x166   :  { %4274 = vmatmul.msk.f32.gmra.mxu0 %vm267_vm10, %v219_v37  ;;  %4323 = vmatmul.msk.f32.gmra.mxu1 %vm267_vm10, %v219_v37 }
 0x167   :  { %4372 = vmatmul.msk.f32.gmra.mxu2 %vm267_vm10, %v219_v37  ;;  %4421 = vmatmul.msk.f32.gmra.mxu3 %vm267_vm10, %v219_v37 }
 0x16a   :  { %v5424_v49 = vpop.f32.mrf.mxu2  ;;  %v5426_v50 = vpop.f32.mrf.mxu3 }
 0x16b   :  { %8775 = vst [vmem:[#allocation22_spill] sm:$0xff] %v5424_v49  ;;  %v5428_v51 = vpop.f32.mrf.mxu0  ;;  %v5430_v52 = vpop.f32.mrf.mxu1 }
 0x16c   :  { %8776 = vst [vmem:[#allocation23_spill] sm:$0xff] %v5426_v50 }
 0x16d   :  { %v220_v39 = vpop.trf.xlu0  ;;  %8777 = vst [vmem:[#allocation24_spill] sm:$0xff] %v5430_v52 }
 0x16e   :  { %4275 = vmatmul.msk.f32.gmra.mxu0 %vm267_vm10, %v220_v39  ;;  %4324 = vmatmul.msk.f32.gmra.mxu1 %vm267_vm10, %v220_v39 }
 0x16f   :  { %4373 = vmatmul.msk.f32.gmra.mxu2 %vm267_vm10, %v220_v39  ;;  %4422 = vmatmul.msk.f32.gmra.mxu3 %vm267_vm10, %v220_v39 }
 0x172   :  { %v5436_v54 = vpop.f32.mrf.mxu2  ;;  %v5438_v55 = vpop.f32.mrf.mxu3 }
 0x173   :  { %8778 = vst [vmem:[#allocation25_spill] sm:$0xff] %v5436_v54  ;;  %v5440_v56 = vpop.f32.mrf.mxu0  ;;  %v5442_v57 = vpop.f32.mrf.mxu1 }
 0x174   :  { %8779 = vst [vmem:[#allocation26_spill] sm:$0xff] %v5438_v55 }
 0x175   :  { %v221_v43 = vpop.trf.xlu0  ;;  %8780 = vst [vmem:[#allocation27_spill] sm:$0xff] %v5442_v57 }
 0x176   :  { %4276 = vmatmul.msk.f32.gmra.mxu0 %vm267_vm10, %v221_v43  ;;  %4325 = vmatmul.msk.f32.gmra.mxu1 %vm267_vm10, %v221_v43 }
 0x177   :  { %4374 = vmatmul.msk.f32.gmra.mxu2 %vm267_vm10, %v221_v43  ;;  %4423 = vmatmul.msk.f32.gmra.mxu3 %vm267_vm10, %v221_v43 }
 0x17a   :  { %v5448_v59 = vpop.f32.mrf.mxu2  ;;  %v5450_v61 = vpop.f32.mrf.mxu3 }
 0x17b   :  { %8781 = vst [vmem:[#allocation28_spill] sm:$0xff] %v5448_v59  ;;  %v5452_v62 = vpop.f32.mrf.mxu0  ;;  %v5456_v63 = vpop.f32.mrf.mxu1 }
 0x17c   :  { %8782 = vst [vmem:[#allocation29_spill] sm:$0xff] %v5450_v61 }
 0x17d   :  { %v222_v48 = vpop.trf.xlu0  ;;  %8783 = vst [vmem:[#allocation30_spill] sm:$0xff] %v5456_v63 }
 0x17e   :  { %4277 = vmatmul.msk.f32.gmra.mxu0 %vm267_vm10, %v222_v48  ;;  %4326 = vmatmul.msk.f32.gmra.mxu1 %vm267_vm10, %v222_v48 }
 0x17f   :  { %4375 = vmatmul.msk.f32.gmra.mxu2 %vm267_vm10, %v222_v48  ;;  %4424 = vmatmul.msk.f32.gmra.mxu3 %vm267_vm10, %v222_v48 }
 0x182   :  { %v5462_v4 = vpop.f32.mrf.mxu2  ;;  %v5466_v5 = vpop.f32.mrf.mxu3 }
 0x183   :  { %8784 = vst [vmem:[#allocation31_spill] sm:$0xff] %v5466_v5  ;;  %v5468_v6 = vpop.f32.mrf.mxu0  ;;  %v5470_v7 = vpop.f32.mrf.mxu1 }
 0x184   :  { %8785 = vst [vmem:[#allocation32_spill] sm:$0xff] %v5470_v7 }
 0x185   :  { %v223_v53 = vpop.trf.xlu0 }
 0x186   :  { %4278 = vmatmul.msk.f32.gmra.mxu0 %vm267_vm10, %v223_v53  ;;  %4327 = vmatmul.msk.f32.gmra.mxu1 %vm267_vm10, %v223_v53 }
 0x187   :  { %4376 = vmatmul.msk.f32.gmra.mxu2 %vm267_vm10, %v223_v53  ;;  %4425 = vmatmul.msk.f32.gmra.mxu3 %vm267_vm10, %v223_v53 }
 0x18a   :  { %v5476_v9 = vpop.f32.mrf.mxu2  ;;  %v5478_v3 = vpop.f32.mrf.mxu3 }
 0x18b   :  { %8786 = vst [vmem:[#allocation33_spill] sm:$0xff] %v5478_v3  ;;  %v5480_v1 = vpop.f32.mrf.mxu0  ;;  %v5482_v10 = vpop.f32.mrf.mxu1 }
 0x18c   :  { %8787 = vst [vmem:[#allocation34_spill] sm:$0xff] %v5482_v10 }
 0x18d   :  { %v224_v58 = vpop.trf.xlu0 }
 0x18e   :  { %4279 = vmatmul.msk.f32.gmra.mxu0 %vm267_vm10, %v224_v58  ;;  %4328 = vmatmul.msk.f32.gmra.mxu1 %vm267_vm10, %v224_v58 }
 0x18f   :  { %4377 = vmatmul.msk.f32.gmra.mxu2 %vm267_vm10, %v224_v58  ;;  %4426 = vmatmul.msk.f32.gmra.mxu3 %vm267_vm10, %v224_v58 }
 0x192   :  { %v5488_v11 = vpop.f32.mrf.mxu2  ;;  %v5490_v12 = vpop.f32.mrf.mxu3 }
 0x193   :  { %8788 = vst [vmem:[#allocation35_spill] sm:$0xff] %v5490_v12  ;;  %v5492_v13 = vpop.f32.mrf.mxu0  ;;  %v5494_v14 = vpop.f32.mrf.mxu1 }
 0x194   :  { %8789 = vst [vmem:[#allocation36_spill] sm:$0xff] %v5494_v14 }
 0x195   :  { %v225_v60 = vpop.trf.xlu0 }
 0x196   :  { %4280 = vmatmul.msk.f32.gmra.mxu0 %vm267_vm10, %v225_v60  ;;  %4329 = vmatmul.msk.f32.gmra.mxu1 %vm267_vm10, %v225_v60 }
 0x197   :  { %4378 = vmatmul.msk.f32.gmra.mxu2 %vm267_vm10, %v225_v60  ;;  %4427 = vmatmul.msk.f32.gmra.mxu3 %vm267_vm10, %v225_v60 }
 0x19a   :  { %v5500_v16 = vpop.f32.mrf.mxu2  ;;  %v5502_v18 = vpop.f32.mrf.mxu3 }
 0x19b   :  { %8790 = vst [vmem:[#allocation37_spill] sm:$0xff] %v5502_v18  ;;  %v5506_v19 = vpop.f32.mrf.mxu0  ;;  %v5508_v20 = vpop.f32.mrf.mxu1 }
 0x19c   :  { %8791 = vst [vmem:[#allocation38_spill] sm:$0xff] %v5508_v20 }
 0x19d   :  { %v226_v2 = vpop.trf.xlu0 }
 0x19e   :  { %4281 = vmatmul.msk.f32.gmra.mxu0 %vm267_vm10, %v226_v2  ;;  %4330 = vmatmul.msk.f32.gmra.mxu1 %vm267_vm10, %v226_v2 }
 0x19f   :  { %4379 = vmatmul.msk.f32.gmra.mxu2 %vm267_vm10, %v226_v2  ;;  %4428 = vmatmul.msk.f32.gmra.mxu3 %vm267_vm10, %v226_v2 }
 0x1a2   :  { %v5514_v22 = vpop.f32.mrf.mxu2  ;;  %v5518_v23 = vpop.f32.mrf.mxu3 }
 0x1a3   :  { %8792 = vst [vmem:[#allocation39_spill] sm:$0xff] %v5518_v23  ;;  %v5520_v24 = vpop.f32.mrf.mxu0  ;;  %v5522_v27 = vpop.f32.mrf.mxu1 }
 0x1a4   :  { %8793 = vst [vmem:[#allocation40_spill] sm:$0xff] %v5522_v27 }
 0x1a5   :  { %v227_v8 = vpop.trf.xlu0 }
 0x1a6   :  { %4282 = vmatmul.msk.f32.gmra.mxu0 %vm267_vm10, %v227_v8  ;;  %4331 = vmatmul.msk.f32.gmra.mxu1 %vm267_vm10, %v227_v8 }
 0x1a7   :  { %4380 = vmatmul.msk.f32.gmra.mxu2 %vm267_vm10, %v227_v8  ;;  %4429 = vmatmul.msk.f32.gmra.mxu3 %vm267_vm10, %v227_v8 }
 0x1aa   :  { %v5528_v37 = vpop.f32.mrf.mxu2  ;;  %v5530_v39 = vpop.f32.mrf.mxu3 }
 0x1ab   :  { %8794 = vst [vmem:[#allocation41_spill] sm:$0xff] %v5530_v39  ;;  %v5532_v43 = vpop.f32.mrf.mxu0  ;;  %v5534_v48 = vpop.f32.mrf.mxu1 }
 0x1ac   :  { %8795 = vst [vmem:[#allocation42_spill] sm:$0xff] %v5534_v48 }
 0x1ad   :  { %v228_v0 = vpop.trf.xlu0 }
 0x1ae   :  { %4283 = vmatmul.msk.f32.gmra.mxu0 %vm267_vm10, %v228_v0  ;;  %4332 = vmatmul.msk.f32.gmra.mxu1 %vm267_vm10, %v228_v0 }
 0x1af   :  { %4381 = vmatmul.msk.f32.gmra.mxu2 %vm267_vm10, %v228_v0  ;;  %4430 = vmatmul.msk.f32.gmra.mxu3 %vm267_vm10, %v228_v0 }
 0x1b2   :  { %v5536_v53 = vpop.f32.mrf.mxu2  ;;  %v5538_v58 = vpop.f32.mrf.mxu3 }
 0x1b3   :  { %8796 = vst [vmem:[#allocation43_spill] sm:$0xff] %v5538_v58  ;;  %v5540_v60 = vpop.f32.mrf.mxu0  ;;  %v5542_v2 = vpop.f32.mrf.mxu1 }
 0x1b4   :  { %8797 = vst [vmem:[#allocation44_spill] sm:$0xff] %v5542_v2  ;;  %v249_v58 = vpop.trf.xlu1 }
 0x1b5   :  { %v229_v15 = vpop.trf.xlu0 }
 0x1b6   :  { %4284 = vmatmul.msk.f32.gmra.mxu0 %vm267_vm10, %v229_v15  ;;  %4333 = vmatmul.msk.f32.gmra.mxu1 %vm267_vm10, %v229_v15 }
 0x1b7   :  { %4382 = vmatmul.msk.f32.gmra.mxu2 %vm267_vm10, %v229_v15  ;;  %4431 = vmatmul.msk.f32.gmra.mxu3 %vm267_vm10, %v229_v15 }
 0x1ba   :  { %v5544_v8 = vpop.f32.mrf.mxu2  ;;  %v5546_v0 = vpop.f32.mrf.mxu3 }
 0x1bb   :  { %8798 = vst [vmem:[#allocation45_spill] sm:$0xff] %v5544_v8  ;;  %v5548_v15 = vpop.f32.mrf.mxu0 }
 0x1bc   :  { %8799 = vst [vmem:[#allocation46_spill] sm:$0xff] %v5546_v0 }
 0x1bd   :  { %v230_v17 = vpop.trf.xlu0 }
 0x1be   :  { %4285 = vmatmul.msk.f32.gmra.mxu0 %vm267_vm10, %v230_v17  ;;  %4334 = vmatmul.msk.f32.gmra.mxu1 %vm267_vm10, %v230_v17 }
 0x1bf   :  { %4383 = vmatmul.msk.f32.gmra.mxu2 %vm267_vm10, %v230_v17  ;;  %4432 = vmatmul.msk.f32.gmra.mxu3 %vm267_vm10, %v230_v17  ;;  %v5550_v17 = vpop.f32.mrf.mxu1 }
 0x1c0   :  { %8800 = vst [vmem:[#allocation47_spill] sm:$0xff] %v5550_v17 }
 0x1c3   :  { %v5556_v48 = vpop.f32.mrf.mxu0 }
 0x1c4   :  { %8803 = vst [vmem:[#allocation50_spill] sm:$0xff] %v5556_v48 }
 0x1c6   :  { %4286 = vmatmul.msk.f32.gmra.mxu0 %vm267_vm10, %v247_v21  ;;  %4335 = vmatmul.msk.f32.gmra.mxu1 %vm267_vm10, %v247_v21 }
 0x1c7   :  { %4384 = vmatmul.msk.f32.gmra.mxu2 %vm267_vm10, %v247_v21  ;;  %4433 = vmatmul.msk.f32.gmra.mxu3 %vm267_vm10, %v247_v21  ;;  %v5552_v21 = vpop.f32.mrf.mxu2  ;;  %v5558_v20 = vpop.f32.mrf.mxu1 }
 0x1c8   :  { %8801 = vst [vmem:[#allocation48_spill] sm:$0xff] %v5552_v21  ;;  %v1153_v0 = vmax.f32 %v5556_v48, %v5558_v20 }
 0x1c9   :  { %8804 = vst [vmem:[#allocation51_spill] sm:$0xff] %v5558_v20 }
 0x1ca   :  { %1154 = vmax.xlane.f32.xlu1 %v1153_v0 }
 0x1cb   :  { %v5568_v17 = vpop.f32.mrf.mxu0 }
 0x1cc   :  { %8807 = vst [vmem:[#allocation54_spill] sm:$0xff] %v5568_v17 }
 0x1ce   :  { %4287 = vmatmul.msk.f32.gmra.mxu0 %vm267_vm10, %v248_v32  ;;  %4336 = vmatmul.msk.f32.gmra.mxu1 %vm267_vm10, %v248_v32 }
 0x1cf   :  { %4385 = vmatmul.msk.f32.gmra.mxu2 %vm267_vm10, %v248_v32  ;;  %4434 = vmatmul.msk.f32.gmra.mxu3 %vm267_vm10, %v248_v32  ;;  %v5554_v32 = vpop.f32.mrf.mxu3  ;;  %v5560_v39 = vpop.f32.mrf.mxu2 }
 0x1d0   :  { %8802 = vst [vmem:[#allocation49_spill] sm:$0xff] %v5554_v32  ;;  %v5570_v21 = vpop.f32.mrf.mxu1 }
 0x1d1   :  { %8805 = vst [vmem:[#allocation52_spill] sm:$0xff] %v5560_v39  ;;  %v1156_v39 = vmax.f32 %v5568_v17, %v5570_v21 }
 0x1d2   :  { %8808 = vst [vmem:[#allocation55_spill] sm:$0xff] %v5570_v21 }
 0x1d3   :  { %1157 = vmax.xlane.f32.xlu2 %v1156_v39  ;;  %v5582_v20 = vpop.f32.mrf.mxu0 }
 0x1d4   :  { %8811 = vst [vmem:[#allocation58_spill] sm:$0xff] %v5582_v20 }
 0x1d6   :  { %4288 = vmatmul.msk.f32.gmra.mxu0 %vm267_vm10, %v249_v58  ;;  %4337 = vmatmul.msk.f32.gmra.mxu1 %vm267_vm10, %v249_v58 }
 0x1d7   :  { %v5562_v2 = vpop.f32.mrf.mxu3  ;;  %4386 = vmatmul.msk.f32.gmra.mxu2 %vm267_vm10, %v249_v58  ;;  %4435 = vmatmul.msk.f32.gmra.mxu3 %vm267_vm10, %v249_v58  ;;  %v5576_v32 = vpop.f32.mrf.mxu2 }
 0x1d8   :  { %8806 = vst [vmem:[#allocation53_spill] sm:$0xff] %v5562_v2  ;;  %v250_v2 = vpop.trf.xlu1  ;;  %v5584_v48 = vpop.f32.mrf.mxu1 }
 0x1d9   :  { %8809 = vst [vmem:[#allocation56_spill] sm:$0xff] %v5576_v32  ;;  %v1159_v39 = vmax.f32 %v5582_v20, %v5584_v48 }
 0x1da   :  { %8812 = vst [vmem:[#allocation59_spill] sm:$0xff] %v5584_v48 }
 0x1db   :  { %1160 = vmax.xlane.f32.xlu2 %v1159_v39  ;;  %v5596_v17 = vpop.f32.mrf.mxu0  ;;  %v2095_v39 = vmax.f32 %v5384_v33, %v5372_v28 }
 0x1dc   :  { %8815 = vst [vmem:[#allocation62_spill] sm:$0xff] %v5596_v17 }
 0x1de   :  { %4289 = vmatmul.msk.f32.gmra.mxu0 %vm267_vm10, %v250_v2  ;;  %4338 = vmatmul.msk.f32.gmra.mxu1 %vm267_vm10, %v250_v2 }
 0x1df   :  { %v5578_v27 = vpop.f32.mrf.mxu3  ;;  %4387 = vmatmul.msk.f32.gmra.mxu2 %vm267_vm10, %v250_v2  ;;  %4436 = vmatmul.msk.f32.gmra.mxu3 %vm267_vm10, %v250_v2  ;;  %v5590_v0 = vpop.f32.mrf.mxu2 }
 0x1e0   :  { %8810 = vst [vmem:[#allocation57_spill] sm:$0xff] %v5578_v27  ;;  %v251_v58 = vpop.trf.xlu1  ;;  %v5598_v32 = vpop.f32.mrf.mxu1 }
 0x1e1   :  { %8813 = vst [vmem:[#allocation60_spill] sm:$0xff] %v5590_v0 }
 0x1e2   :  { %8816 = vst [vmem:[#allocation63_spill] sm:$0xff] %v5598_v32 }
 0x1e3   :  { %v5610_v27 = vpop.f32.mrf.mxu0 }
 0x1e4   :  { %8819 = vst [vmem:[#allocation66_spill] sm:$0xff] %v5610_v27 }
 0x1e6   :  { %4290 = vmatmul.msk.f32.gmra.mxu0 %vm267_vm10, %v251_v58  ;;  %4339 = vmatmul.msk.f32.gmra.mxu1 %vm267_vm10, %v251_v58 }
 0x1e7   :  { %v5592_v21 = vpop.f32.mrf.mxu3  ;;  %4388 = vmatmul.msk.f32.gmra.mxu2 %vm267_vm10, %v251_v58  ;;  %4437 = vmatmul.msk.f32.gmra.mxu3 %vm267_vm10, %v251_v58  ;;  %v5602_v48 = vpop.f32.mrf.mxu2  ;;  %v2097_v58 = vmax.f32 %v2095_v39, %v5396_v38 }
 0x1e8   :  { %8814 = vst [vmem:[#allocation61_spill] sm:$0xff] %v5592_v21  ;;  %v252_v2 = vpop.trf.xlu1  ;;  %v5612_v23 = vpop.f32.mrf.mxu1 }
 0x1e9   :  { %8817 = vst [vmem:[#allocation64_spill] sm:$0xff] %v5602_v48  ;;  %v2099_v10 = vmax.f32 %v2097_v58, %v5410_v44  ;;  %v2082_v44 = vmax.f32 %v5376_v30, %v5400_v41 }
 0x1ea   :  { %8820 = vst [vmem:[#allocation67_spill] sm:$0xff] %v5612_v23 }
 0x1eb   :  { %v2101_v33 = vmax.f32 %v2099_v10, %v5424_v49  ;;  %v5626_v8 = vpop.f32.mrf.mxu0  ;;  %v2081_v10 = vmax.f32 %v5364_v25, %v5388_v35 }
 0x1ec   :  { %8823 = vst [vmem:[#allocation70_spill] sm:$0xff] %v5626_v8 }
 0x1ed   :  { %v2103_v14 = vmax.f32 %v2101_v33, %v5436_v54  ;;  %v2132_v33 = vmax.f32 %v5386_v34, %v5374_v29  ;;  %v2083_v58 = vmax.f32 %v2081_v10, %v5416_v46 }
 0x1ee   :  { %4291 = vmatmul.msk.f32.gmra.mxu0 %vm267_vm10, %v252_v2  ;;  %4340 = vmatmul.msk.f32.gmra.mxu1 %vm267_vm10, %v252_v2 }
 0x1ef   :  { %v5606_v20 = vpop.f32.mrf.mxu3  ;;  %4389 = vmatmul.msk.f32.gmra.mxu2 %vm267_vm10, %v252_v2  ;;  %4438 = vmatmul.msk.f32.gmra.mxu3 %vm267_vm10, %v252_v2  ;;  %v5619_v18 = vpop.f32.mrf.mxu2  ;;  %v2105_v39 = vmax.f32 %v2103_v14, %v5448_v59  ;;  %v2134_v49 = vmax.f32 %v2132_v33, %v5398_v40  ;;  %v2085_v38 = vmax.f32 %v2083_v58, %v5440_v56 }
 0x1f0   :  { %8818 = vst [vmem:[#allocation65_spill] sm:$0xff] %v5606_v20  ;;  %v253_v28 = vpop.trf.xlu1  ;;  %v5628_v2 = vpop.f32.mrf.mxu1  ;;  %v2084_v14 = vmax.f32 %v2082_v44, %v5428_v51 }
 0x1f1   :  { %8821 = vst [vmem:[#allocation68_spill] sm:$0xff] %v5619_v18  ;;  %v2107_v54 = vmax.f32 %v2105_v39, %v5462_v4  ;;  %v2136_v35 = vmax.f32 %v2134_v49, %v5414_v45  ;;  %v2087_v10 = vmax.f32 %v2085_v38, %v5468_v6 }
 0x1f2   :  { %8824 = vst [vmem:[#allocation71_spill] sm:$0xff] %v5628_v2 }
 0x1f3   :  { %v2138_v33 = vmax.f32 %v2136_v35, %v5426_v50  ;;  %v5656_v49 = vpop.f32.mrf.mxu0  ;;  %v2089_v38 = vmax.f32 %v2087_v10, %v5492_v13  ;;  %v1162_v35 = vmax.f32 %v5596_v17, %v5598_v32  ;;  %v8836_v32 = vld [vmem:[#allocation37_spill] sm:$0xff] }
 0x1f4   :  { %8827 = vst [vmem:[#allocation74_spill] sm:$0xff] %v5656_v49 }
 0x1f5   :  { %v2091_v40 = vmax.f32 %v2089_v38, %v5520_v24  ;;  %1163 = vmax.xlane.f32.xlu2 %v1162_v35 }
 0x1f6   :  { %4292 = vmatmul.msk.f32.gmra.mxu0 %vm267_vm10, %v253_v28  ;;  %4341 = vmatmul.msk.f32.gmra.mxu1 %vm267_vm10, %v253_v28 }
 0x1f7   :  { %v5622_v63 = vpop.f32.mrf.mxu3  ;;  %4390 = vmatmul.msk.f32.gmra.mxu2 %vm267_vm10, %v253_v28  ;;  %4439 = vmatmul.msk.f32.gmra.mxu3 %vm267_vm10, %v253_v28  ;;  %v2109_v28 = vmax.f32 %v2107_v54, %v5476_v9  ;;  %v5646_v25 = vpop.f32.mrf.mxu2  ;;  %v2086_v54 = vmax.f32 %v2084_v14, %v5452_v62  ;;  %v2140_v14 = vmax.f32 %v2138_v33, %v5438_v55  ;;  %v8835_v55 = vld [vmem:[#allocation36_spill] sm:$0xff] }
 0x1f8   :  { %8822 = vst [vmem:[#allocation69_spill] sm:$0xff] %v5622_v63  ;;  %v254_v59 = vpop.trf.xlu1  ;;  %v5658_v44 = vpop.f32.mrf.mxu1 }
 0x1f9   :  { %8825 = vst [vmem:[#allocation72_spill] sm:$0xff] %v5646_v25  ;;  %v2096_v39 = vmax.f32 %v5488_v11, %v2109_v28  ;;  %v1207_v28 = vmax.f32 %v5590_v0, %v5592_v21  ;;  %v2088_v50 = vmax.f32 %v2086_v54, %v5480_v1  ;;  %v2142_v10 = vmax.f32 %v2140_v14, %v5450_v61 }
 0x1fa   :  { %8828 = vst [vmem:[#allocation75_spill] sm:$0xff] %v5658_v44  ;;  %v2093_v0 = vmax.f32 %v2091_v40, %v5540_v60  ;;  %v1210_v14 = vmax.f32 %v5602_v48, %v5606_v20  ;;  %v2119_v40 = vmax.f32 %v5378_v31, %v5404_v42 }
 0x1fb   :  { %v2098_v58 = vmax.f32 %v2096_v39, %v5500_v16  ;;  %1208 = vmax.xlane.f32.xlu1 %v1207_v28  ;;  %v2090_v39 = vmax.f32 %v2088_v50, %v5506_v19  ;;  %v2144_v54 = vmax.f32 %v2142_v10, %v5466_v5  ;;  %v1165_v50 = vmax.f32 %v5610_v27, %v5612_v23 }
 0x1fc   :  { %v2121_v23 = vmax.f32 %v2119_v40, %v5430_v52  ;;  %v8839_v40 = vld [vmem:[#allocation40_spill] sm:$0xff] }
 0x1fd   :  { %v2100_v45 = vmax.f32 %v2098_v58, %v5514_v22  ;;  %v2092_v58 = vmax.f32 %v2090_v39, %v5532_v43  ;;  %v2146_v10 = vmax.f32 %v2144_v54, %v5478_v3  ;;  %1166 = vmax.xlane.f32.xlu2 %v1165_v50  ;;  %v8834_v54 = vld [vmem:[#allocation30_spill] sm:$0xff] }
 0x1fe   :  { %4293 = vmatmul.msk.f32.gmra.mxu0 %vm267_vm10, %v254_v59  ;;  %4342 = vmatmul.msk.f32.gmra.mxu1 %vm267_vm10, %v254_v59  ;;  %v2123_v3 = vmax.f32 %v2121_v23, %v8834_v54  ;;  %v1168_v23 = vmax.f32 %v5626_v8, %v5628_v2  ;;  %v8847_v50 = vld [vmem:[#allocation38_spill] sm:$0xff] }
 0x1ff   :  { %v5650_v34 = vpop.f32.mrf.mxu3  ;;  %4391 = vmatmul.msk.f32.gmra.mxu2 %vm267_vm10, %v254_v59  ;;  %4440 = vmatmul.msk.f32.gmra.mxu3 %vm267_vm10, %v254_v59  ;;  %v2118_v59 = vmax.f32 %v5366_v26, %v5390_v36  ;;  %v2102_v21 = vmax.f32 %v2100_v45, %v5528_v37  ;;  %v5681_v28 = vpop.f32.mrf.mxu2  ;;  %v2094_v48 = vmax.f32 %v2092_v58, %v5548_v15  ;;  %v8838_v58 = vld [vmem:[#allocation39_spill] sm:$0xff]  ;;  %v8849_v2 = vld [vmem:[#allocation42_spill] sm:$0xff] }
 0x200   :  { %8826 = vst [vmem:[#allocation73_spill] sm:$0xff] %v5650_v34  ;;  %v255_v38 = vpop.trf.xlu1  ;;  %v5698_v39 = vpop.f32.mrf.mxu1  ;;  %v2133_v5 = vmax.f32 %v5490_v12, %v2146_v10  ;;  %v8841_v10 = vld [vmem:[#allocation48_spill] sm:$0xff]  ;;  %v8851_v12 = vld [vmem:[#allocation46_spill] sm:$0xff] }
 0x201   :  { %v2120_v33 = vmax.f32 %v2118_v59, %v5418_v47  ;;  %8829 = vst [vmem:[#allocation76_spill] sm:$0xff] %v5681_v28  ;;  %v2104_v35 = vmax.f32 %v2102_v21, %v5536_v53  ;;  %v5696_v21 = vpop.f32.mrf.mxu0 }
 0x202   :  { %8831 = vst [vmem:[#allocation78_spill] sm:$0xff] %v5696_v21  ;;  %v2135_v17 = vmax.f32 %v2133_v5, %v8836_v32  ;;  %v8850_v32 = vld [vmem:[#allocation47_spill] sm:$0xff] }
 0x203   :  { %v2122_v59 = vmax.f32 %v2120_v33, %v5442_v57  ;;  %8832 = vst [vmem:[#allocation79_spill] sm:$0xff] %v5698_v39  ;;  %v2106_v20 = vmax.f32 %v2104_v35, %v2093_v0  ;;  %v8833_v33 = vld [vmem:[#allocation45_spill] sm:$0xff]  ;;  %1211 = vmax.xlane.f32.xlu1 %v1210_v14  ;;  %v8837_v0 = vld [vmem:[#allocation34_spill] sm:$0xff]  ;;  %v1213_v14 = vmax.f32 %v5619_v18, %v5622_v63  ;;  %v8848_v63 = vld [vmem:[#allocation43_spill] sm:$0xff] }
 0x204   :  { %v2125_v35 = vmax.f32 %v2123_v3, %v8837_v0  ;;  %v2137_v57 = vmax.f32 %v2135_v17, %v8838_v58 }
 0x205   :  { %v2124_v27 = vmax.f32 %v2122_v59, %v5470_v7  ;;  %v2108_v61 = vmax.f32 %v2106_v20, %v8833_v33  ;;  %1169 = vmax.xlane.f32.xlu2 %v1168_v23 }
 0x206   :  { %4294 = vmatmul.msk.f32.gmra.mxu0 %vm267_vm10, %v255_v38  ;;  %4343 = vmatmul.msk.f32.gmra.mxu1 %vm267_vm10, %v255_v38 }
 0x207   :  { %v5688_v45 = vpop.f32.mrf.mxu3  ;;  %4392 = vmatmul.msk.f32.gmra.mxu2 %vm267_vm10, %v255_v38  ;;  %4441 = vmatmul.msk.f32.gmra.mxu3 %vm267_vm10, %v255_v38  ;;  %v2126_v29 = vmax.f32 %v2124_v27, %v8835_v55  ;;  %v2110_v38 = vmax.f32 %v2108_v61, %v2094_v48  ;;  %v5713_v7 = vpop.f32.mrf.mxu2  ;;  %v8843_v61 = vld [vmem:[#allocation41_spill] sm:$0xff] }
 0x208   :  { %8830 = vst [vmem:[#allocation77_spill] sm:$0xff] %v5688_v45  ;;  %v256_v59 = vpop.trf.xlu1  ;;  %v2139_v5 = vmax.f32 %v2137_v57, %v8843_v61  ;;  %v5728_v17 = vpop.f32.mrf.mxu1 }
 0x209   :  { %v2128_v52 = vmax.f32 %v2126_v29, %v8839_v40  ;;  %8840 = vst [vmem:[#allocation45_spill] sm:$0xff] %v5713_v7  ;;  %v2111_v20 = vmax.f32 %v8841_v10, %v2110_v38  ;;  %v8844_v29 = vld [vmem:[#allocation44_spill] sm:$0xff]  ;;  %v5726_v48 = vpop.f32.mrf.mxu0  ;;  %v2127_v38 = vmax.f32 %v2125_v35, %v8847_v50  ;;  %v1171_v35 = vmax.f32 %v5656_v49, %v5658_v44 }
 0x20a   :  { %8845 = vst [vmem:[#allocation48_spill] sm:$0xff] %v5726_v48  ;;  %v2141_v18 = vmax.f32 %v2139_v5, %v8848_v63  ;;  %v1174_v44 = vmax.f32 %v5696_v21, %v5698_v39 }
 0x20b   :  { %v2130_v3 = vmax.f32 %v2128_v52, %v8844_v29  ;;  %8846 = vst [vmem:[#allocation41_spill] sm:$0xff] %v5728_v17  ;;  %v2129_v8 = vmax.f32 %v2127_v38, %v8849_v2  ;;  %v2112_v58 = vrot.slane %v2111_v20, 4  ;;  %1214 = vmax.xlane.f32.xlu1 %v1213_v14  ;;  %v8856_v14 = vld [vmem:[#allocation49_spill] sm:$0xff] }
 0x20d   :  { %v2143_v57 = vmax.f32 %v2141_v18, %v2130_v3  ;;  %v2131_v52 = vmax.f32 %v2129_v8, %v8850_v32  ;;  %v2113_v0 = vmax.f32 %v2111_v20, %v2112_v58  ;;  %1172 = vmax.xlane.f32.xlu2 %v1171_v35 }
 0x20e   :  { %4295 = vmatmul.msk.f32.gmra.mxu0 %vm267_vm10, %v256_v59  ;;  %4344 = vmatmul.msk.f32.gmra.mxu1 %vm267_vm10, %v256_v59 }
 0x20f   :  { %v5720_v27 = vpop.f32.mrf.mxu3  ;;  %4393 = vmatmul.msk.f32.gmra.mxu2 %vm267_vm10, %v256_v59  ;;  %4442 = vmatmul.msk.f32.gmra.mxu3 %vm267_vm10, %v256_v59  ;;  %v2145_v29 = vmax.f32 %v2143_v57, %v8851_v12  ;;  %v5737_v55 = vpop.f32.mrf.mxu2  ;;  %v1216_v59 = vmax.f32 %v5646_v25, %v5650_v34  ;;  %v2114_v20 = vrot.slane %v2113_v0, 2  ;;  %v1219_v25 = vmax.f32 %v5681_v28, %v5688_v45 }
 0x210   :  { %8842 = vst [vmem:[#allocation30_spill] sm:$0xff] %v5720_v27  ;;  %v257_v40 = vpop.trf.xlu1  ;;  %v5749_v8 = vpop.f32.mrf.mxu1  ;;  %v1222_v45 = vmax.f32 %v5713_v7, %v5720_v27  ;;  %v1177_v28 = vmax.f32 %v5726_v48, %v5728_v17 }
 0x211   :  { %8852 = vst [vmem:[#allocation38_spill] sm:$0xff] %v5737_v55  ;;  %v5747_v18 = vpop.f32.mrf.mxu0  ;;  %v2147_v58 = vmax.f32 %v2145_v29, %v2131_v52  ;;  %v2115_v57 = vmax.f32 %v2113_v0, %v2114_v20 }
 0x212   :  { %8854 = vst [vmem:[#allocation42_spill] sm:$0xff] %v5747_v18 }
 0x213   :  { %8855 = vst [vmem:[#allocation47_spill] sm:$0xff] %v5749_v8  ;;  %v2148_v23 = vmax.f32 %v8856_v14, %v2147_v58  ;;  %1217 = vmax.xlane.f32.xlu1 %v1216_v59  ;;  %v2116_v0 = vrot.slane %v2115_v57, 1 }
 0x215   :  { %v2149_v34 = vrot.slane %v2148_v23, 4  ;;  %1175 = vmax.xlane.f32.xlu2 %v1174_v44  ;;  %v5772_v58 = vmax.f32 %v2115_v57, %v2116_v0 }
 0x216   :  { %4296 = vmatmul.msk.f32.gmra.mxu0 %vm267_vm10, %v257_v40  ;;  %4345 = vmatmul.msk.f32.gmra.mxu1 %vm267_vm10, %v257_v40 }
 0x217   :  { %v5743_v5 = vpop.f32.mrf.mxu3  ;;  %4394 = vmatmul.msk.f32.gmra.mxu2 %vm267_vm10, %v257_v40  ;;  %4443 = vmatmul.msk.f32.gmra.mxu3 %vm267_vm10, %v257_v40  ;;  %v5754_v38 = vpop.f32.mrf.mxu2  ;;  %v2150_v52 = vmax.f32 %v2148_v23, %v2149_v34  ;;  %v2211_v44 = vsub.f32 %v5528_v37, %v5772_v58  ;;  %v8987_v21 = vsub.f32 %v5514_v22, %v5772_v58 }
 0x218   :  { %8853 = vst [vmem:[#allocation43_spill] sm:$0xff] %v5743_v5  ;;  %v258_v3 = vpop.trf.xlu1  ;;  %v5766_v29 = vpop.f32.mrf.mxu1  ;;  %v1225_v17 = vmax.f32 %v5737_v55, %v5743_v5 }
 0x219   :  { %8857 = vst [vmem:[#allocation46_spill] sm:$0xff] %v5754_v38  ;;  %v5764_v40 = vpop.f32.mrf.mxu0  ;;  %v2151_v20 = vrot.slane %v2150_v52, 2  ;;  %v2331_v27 = vmul.f32 1.442695, %v2211_v44  ;;  %v2217_v44 = vsub.f32 %v8841_v10, %v5772_v58 }
 0x21a   :  { %8859 = vst [vmem:[#allocation80_spill] sm:$0xff] %v5764_v40 }
 0x21b   :  { %8860 = vst [vmem:[#allocation81_spill] sm:$0xff] %v5766_v29  ;;  %1220 = vmax.xlane.f32.xlu1 %v1219_v25  ;;  %v2152_v23 = vmax.f32 %v2150_v52, %v2151_v20  ;;  %v2215_v52 = vsub.f32 %v8833_v33, %v5772_v58  ;;  %4739 = vpow2.f32 %v2331_v27 }
 0x21d   :  { %1178 = vmax.xlane.f32.xlu2 %v1177_v28  ;;  %v2153_v7 = vrot.slane %v2152_v23, 1 }
 0x21e   :  { %4297 = vmatmul.msk.f32.gmra.mxu0 %vm267_vm10, %v258_v3  ;;  %4346 = vmatmul.msk.f32.gmra.mxu1 %vm267_vm10, %v258_v3 }
 0x21f   :  { %v5760_v49 = vpop.f32.mrf.mxu3  ;;  %4395 = vmatmul.msk.f32.gmra.mxu2 %vm267_vm10, %v258_v3  ;;  %4444 = vmatmul.msk.f32.gmra.mxu3 %vm267_vm10, %v258_v3  ;;  %v5770_v35 = vpop.f32.mrf.mxu2  ;;  %v2213_v3 = vsub.f32 %v5536_v53, %v5772_v58  ;;  %v5812_v20 = vmax.f32 %v2152_v23, %v2153_v7  ;;  %v1183_v7 = vmax.f32 %v5764_v40, %v5766_v29  ;;  %v8992_v29 = vld [vmem:[#allocation66_spill] sm:$0xff] }
 0x220   :  { %8858 = vst [vmem:[#allocation49_spill] sm:$0xff] %v5760_v49  ;;  %v259_v59 = vpop.trf.xlu1  ;;  %v5784_v34 = vpop.f32.mrf.mxu1  ;;  %v1228_v33 = vmax.f32 %v5754_v38, %v5760_v49 }
 0x221   :  { %8861 = vst [vmem:[#allocation82_spill] sm:$0xff] %v5770_v35  ;;  %v5782_v25 = vpop.f32.mrf.mxu0  ;;  %v2335_v37 = vmul.f32 1.442695, %v2213_v3  ;;  %v2339_v3 = vmul.f32 1.442695, %v2215_v52  ;;  %v2214_v10 = vsub.f32 %v8848_v63, %v5812_v20  ;;  %v2216_v49 = vsub.f32 %v8851_v12, %v5812_v20 }
 0x222   :  { %8863 = vst [vmem:[#allocation84_spill] sm:$0xff] %v5782_v25 }
 0x223   :  { %8864 = vst [vmem:[#allocation85_spill] sm:$0xff] %v5784_v34  ;;  %1223 = vmax.xlane.f32.xlu1 %v1222_v45  ;;  %4741 = vpow2.f32 %v2335_v37  ;;  %v2343_v37 = vmul.f32 1.442695, %v2217_v44  ;;  %v2337_v52 = vmul.f32 1.442695, %v2214_v10  ;;  %v1186_v44 = vmax.f32 %v5782_v25, %v5784_v34 }
 0x224   :  { %4743 = vpow2.f32 %v2339_v3  ;;  %v2218_v10 = vsub.f32 %v8856_v14, %v5812_v20 }
 0x225   :  { %4745 = vpow2.f32 %v2343_v37  ;;  %v2341_v37 = vmul.f32 1.442695, %v2216_v49 }
 0x226   :  { %4298 = vmatmul.msk.f32.gmra.mxu0 %vm267_vm10, %v259_v59  ;;  %4347 = vmatmul.msk.f32.gmra.mxu1 %vm267_vm10, %v259_v59 }
 0x227   :  { %v5778_v39 = vpop.f32.mrf.mxu3  ;;  %4396 = vmatmul.msk.f32.gmra.mxu2 %vm267_vm10, %v259_v59  ;;  %4445 = vmatmul.msk.f32.gmra.mxu3 %vm267_vm10, %v259_v59  ;;  %v5792_v0 = vpop.f32.mrf.mxu2  ;;  %v1180_v59 = vmax.f32 %v5747_v18, %v5749_v8  ;;  %v2327_v8 = vmul.f32 1.442695, %v8987_v21 }
 0x228   :  { %8862 = vst [vmem:[#allocation83_spill] sm:$0xff] %v5778_v39  ;;  %v260_v57 = vpop.trf.xlu1  ;;  %v5804_v53 = vpop.f32.mrf.mxu1 }
 0x229   :  { %8865 = vst [vmem:[#allocation86_spill] sm:$0xff] %v5792_v0  ;;  %v5802_v28 = vpop.f32.mrf.mxu0  ;;  %1181 = vmax.xlane.f32.xlu2 %v1180_v59 }
 0x22a   :  { %8867 = vst [vmem:[#allocation88_spill] sm:$0xff] %v5802_v28  ;;  %v1189_v45 = vmax.f32 %v5802_v28, %v5804_v53  ;;  %v2345_v28 = vmul.f32 1.442695, %v2218_v10 }
 0x22b   :  { %8868 = vst [vmem:[#allocation89_spill] sm:$0xff] %v5804_v53  ;;  %1226 = vmax.xlane.f32.xlu1 %v1225_v17 }
 0x22c   :  { %1190 = vmax.xlane.f32.xlu0 %v1189_v45 }
 0x22e   :  { %4299 = vmatmul.msk.f32.gmra.mxu0 %vm267_vm10, %v260_v57  ;;  %4348 = vmatmul.msk.f32.gmra.mxu1 %vm267_vm10, %v260_v57 }
 0x22f   :  { %v5798_v48 = vpop.f32.mrf.mxu3  ;;  %4397 = vmatmul.msk.f32.gmra.mxu2 %vm267_vm10, %v260_v57  ;;  %4446 = vmatmul.msk.f32.gmra.mxu3 %vm267_vm10, %v260_v57  ;;  %v5816_v55 = vpop.f32.mrf.mxu2  ;;  %v2212_v57 = vsub.f32 %v8843_v61, %v5812_v20 }
 0x230   :  { %8866 = vst [vmem:[#allocation87_spill] sm:$0xff] %v5798_v48  ;;  %v261_v5 = vpop.trf.xlu1  ;;  %v5832_v23 = vpop.f32.mrf.mxu1 }
 0x231   :  { %8869 = vst [vmem:[#allocation90_spill] sm:$0xff] %v5816_v55  ;;  %v5830_v17 = vpop.f32.mrf.mxu0  ;;  %v5836_v61 = vpop.eup %4739  ;;  %v2333_v45 = vmul.f32 1.442695, %v2212_v57  ;;  %1184 = vmax.xlane.f32.xlu2 %v1183_v7 }
 0x232   :  { %8871 = vst [vmem:[#allocation92_spill] sm:$0xff] %v5830_v17  ;;  %v5838_v59 = vpop.eup %4741 }
 0x233   :  { %8872 = vst [vmem:[#allocation93_spill] sm:$0xff] %v5832_v23  ;;  %1229 = vmax.xlane.f32.xlu1 %v1228_v33  ;;  %v2753_v63 = vadd.f32 %v5838_v59, %v5836_v61  ;;  %4747 = vpow2.f32 %v2333_v45  ;;  %v5854_v57 = vpop.eup %4743 }
 0x234   :  { %8873 = vst [vmem:[#allocation94_spill] sm:$0xff] %v5836_v61  ;;  %4749 = vpow2.f32 %v2337_v52  ;;  %v5865_v45 = vpop.eup %4745 }
 0x235   :  { %8874 = vst [vmem:[#allocation95_spill] sm:$0xff] %v5838_v59  ;;  %v2754_v7 = vadd.f32 %v5854_v57, %v2753_v63  ;;  %4751 = vpow2.f32 %v2341_v37 }
 0x236   :  { %4300 = vmatmul.msk.f32.gmra.mxu0 %vm267_vm10, %v261_v5  ;;  %4349 = vmatmul.msk.f32.gmra.mxu1 %vm267_vm10, %v261_v5  ;;  %8877 = vst [vmem:[#allocation98_spill] sm:$0xff] %v5854_v57  ;;  %v8888_v57 = vld [vmem:[#allocation52_spill] sm:$0xff]  ;;  %4753 = vpow2.f32 %v2345_v28 }
 0x237   :  { %v5824_v27 = vpop.f32.mrf.mxu3  ;;  %4398 = vmatmul.msk.f32.gmra.mxu2 %vm267_vm10, %v261_v5  ;;  %4447 = vmatmul.msk.f32.gmra.mxu3 %vm267_vm10, %v261_v5  ;;  %v5844_v53 = vpop.f32.mrf.mxu2  ;;  %v1231_v5 = vmax.f32 %v5770_v35, %v5778_v39  ;;  %8880 = vst [vmem:[#allocation101_spill] sm:$0xff] %v5865_v45  ;;  %v2755_v52 = vadd.f32 %v5865_v45, %v2754_v7  ;;  %v8887_v7 = vld [vmem:[#allocation53_spill] sm:$0xff] }
 0x238   :  { %8870 = vst [vmem:[#allocation91_spill] sm:$0xff] %v5824_v27  ;;  %v262_v38 = vpop.trf.xlu1  ;;  %v5858_v33 = vpop.f32.mrf.mxu1  ;;  %v1201_v45 = vmax.f32 %v8888_v57, %v8887_v7  ;;  %v1237_v25 = vmax.f32 %v5816_v55, %v5824_v27  ;;  %v8897_v57 = vld [vmem:[#allocation12_spill] sm:$0xff]  ;;  %v2157_v27 = vsub.f32 %v5376_v30, %v5772_v58 }
 0x239   :  { %8875 = vst [vmem:[#allocation96_spill] sm:$0xff] %v5844_v53  ;;  %v5856_v12 = vpop.f32.mrf.mxu0  ;;  %1187 = vmax.xlane.f32.xlu2 %v1186_v44  ;;  %v5867_v61 = vpop.eup %4747 }
 0x23a   :  { %8878 = vst [vmem:[#allocation99_spill] sm:$0xff] %v5856_v12  ;;  %v5870_v59 = vpop.eup %4749 }
 0x23b   :  { %8879 = vst [vmem:[#allocation100_spill] sm:$0xff] %v5858_v33  ;;  %1232 = vmax.xlane.f32.xlu1 %v1231_v5  ;;  %v2756_v5 = vrot.slane %v2755_v52, 4  ;;  %v2762_v44 = vadd.f32 %v5870_v59, %v5867_v61  ;;  %v5886_v10 = vpop.eup %4751 }
 0x23c   :  { %8881 = vst [vmem:[#allocation102_spill] sm:$0xff] %v5867_v61  ;;  %v5895_v35 = vpop.eup %4753 }
 0x23d   :  { %8882 = vst [vmem:[#allocation103_spill] sm:$0xff] %v5870_v59  ;;  %v2757_v37 = vadd.f32 %v2756_v5, %v2755_v52  ;;  %v8896_v52 = vld [vmem:[#allocation56_spill] sm:$0xff]  ;;  %v2155_v59 = vsub.f32 %v8897_v57, %v5772_v58 }
 0x23e   :  { %4301 = vmatmul.msk.f32.gmra.mxu0 %vm267_vm10, %v262_v38  ;;  %4350 = vmatmul.msk.f32.gmra.mxu1 %vm267_vm10, %v262_v38  ;;  %8889 = vst [vmem:[#allocation108_spill] sm:$0xff] %v5886_v10 }
 0x23f   :  { %v5850_v3 = vpop.f32.mrf.mxu3  ;;  %4399 = vmatmul.msk.f32.gmra.mxu2 %vm267_vm10, %v262_v38  ;;  %4448 = vmatmul.msk.f32.gmra.mxu3 %vm267_vm10, %v262_v38  ;;  %v5872_v34 = vpop.f32.mrf.mxu2  ;;  %v1234_v38 = vmax.f32 %v5792_v0, %v5798_v48  ;;  %v2763_v48 = vadd.f32 %v5886_v10, %v2762_v44  ;;  %8892 = vst [vmem:[#allocation111_spill] sm:$0xff] %v5895_v35  ;;  %v2758_v28 = vrot.slane %v2757_v37, 2  ;;  %v2219_v30 = vmul.f32 1.442695, %v2155_v59 }
 0x240   :  { %8876 = vst [vmem:[#allocation97_spill] sm:$0xff] %v5850_v3  ;;  %v5880_v14 = vpop.f32.mrf.mxu1  ;;  %v2169_v59 = vsub.f32 %v5452_v62, %v5772_v58  ;;  %v2173_v62 = vsub.f32 %v5480_v1, %v5772_v58 }
 0x241   :  { %8883 = vst [vmem:[#allocation104_spill] sm:$0xff] %v5872_v34  ;;  %v5878_v49 = vpop.f32.mrf.mxu0  ;;  %1202 = vmax.xlane.f32.xlu2 %v1201_v45  ;;  %v2764_v45 = vadd.f32 %v5895_v35, %v2763_v48  ;;  %v2759_v44 = vadd.f32 %v2758_v28, %v2757_v37  ;;  %v1240_v48 = vmax.f32 %v5844_v53, %v5850_v3  ;;  %4755 = vpow2.f32 %v2219_v30 }
 0x242   :  { %8885 = vst [vmem:[#allocation106_spill] sm:$0xff] %v5878_v49  ;;  %v2165_v3 = vsub.f32 %v5428_v51, %v5772_v58 }
 0x243   :  { %8886 = vst [vmem:[#allocation107_spill] sm:$0xff] %v5880_v14  ;;  %1235 = vmax.xlane.f32.xlu1 %v1234_v38  ;;  %v8895_v38 = vld [vmem:[#allocation57_spill] sm:$0xff]  ;;  %v2765_v10 = vrot.slane %v2764_v45, 4  ;;  %v2760_v28 = vrot.slane %v2759_v44, 1 }
 0x244   :  { %v1204_v5 = vmax.f32 %v8896_v52, %v8895_v38  ;;  %v2223_v38 = vmul.f32 1.442695, %v2157_v27 }
 0x246   :  { %4757 = vpow2.f32 %v2223_v38  ;;  %v1158_v1 = vpop.xlane.xlu2 %1157 }
 0x247   :  { %v5876_v63 = vpop.f32.mrf.mxu3  ;;  %v5889_v0 = vpop.f32.mrf.mxu2 }
 0x248   :  { %8884 = vst [vmem:[#allocation105_spill] sm:$0xff] %v5876_v63  ;;  %v5899_v7 = vpop.f32.mrf.mxu1 }
 0x249   :  { %8890 = vst [vmem:[#allocation109_spill] sm:$0xff] %v5889_v0  ;;  %v5897_v61 = vpop.f32.mrf.mxu0  ;;  %1205 = vmax.xlane.f32.xlu2 %v1204_v5  ;;  %v2766_v5 = vadd.f32 %v2765_v10, %v2764_v45  ;;  %v5930_v10 = vadd.f32 %v2760_v28, %v2759_v44  ;;  %v1243_v44 = vmax.f32 %v5872_v34, %v5876_v63  ;;  %v8907_v28 = vld [vmem:[#allocation51_spill] sm:$0xff] }
 0x24a   :  { %8893 = vst [vmem:[#allocation112_spill] sm:$0xff] %v5897_v61 }
 0x24b   :  { %8894 = vst [vmem:[#allocation113_spill] sm:$0xff] %v5899_v7  ;;  %1238 = vmax.xlane.f32.xlu1 %v1237_v25  ;;  %v8899_v7 = vld [vmem:[#allocation17_spill] sm:$0xff]  ;;  %v2161_v25 = vsub.f32 %v5400_v41, %v5772_v58  ;;  %v2167_v41 = vsub.f32 %v5440_v56, %v5772_v58  ;;  %v2767_v45 = vrot.slane %v2766_v5, 2 }
 0x24c   :  { %v2159_v61 = vsub.f32 %v8899_v7, %v5772_v58  ;;  %v2163_v7 = vsub.f32 %v5416_v46, %v5772_v58  ;;  %8903 = vst [vmem:[#allocation116_spill] sm:$0xff] %v5930_v10  ;;  %v2171_v46 = vsub.f32 %v5468_v6, %v5772_v58 }
 0x24e   :  { %v2227_v53 = vmul.f32 1.442695, %v2159_v61  ;;  %v2235_v27 = vmul.f32 1.442695, %v2163_v7  ;;  %v8905_v61 = vld [vmem:[#allocation50_spill] sm:$0xff]  ;;  %v1195_v7 = vmax.f32 %v5856_v12, %v5858_v33 }
 0x24f   :  { %v5893_v39 = vpop.f32.mrf.mxu3  ;;  %v5908_v55 = vpop.f32.mrf.mxu2 }
 0x250   :  { %8891 = vst [vmem:[#allocation110_spill] sm:$0xff] %v5893_v39  ;;  %v5920_v57 = vpop.f32.mrf.mxu1  ;;  %4759 = vpow2.f32 %v2227_v53  ;;  %v2768_v53 = vadd.f32 %v2767_v45, %v2766_v5 }
 0x251   :  { %8898 = vst [vmem:[#allocation12_spill] sm:$0xff] %v5908_v55  ;;  %v5918_v37 = vpop.f32.mrf.mxu0  ;;  %v1192_v55 = vmax.f32 %v5830_v17, %v5832_v23  ;;  %v8959_v17 = vld [vmem:[#allocation62_spill] sm:$0xff] }
 0x252   :  { %8901 = vst [vmem:[#allocation114_spill] sm:$0xff] %v5918_v37 }
 0x253   :  { %8902 = vst [vmem:[#allocation115_spill] sm:$0xff] %v5920_v57  ;;  %1241 = vmax.xlane.f32.xlu1 %v1240_v48  ;;  %1193 = vmax.xlane.f32.xlu2 %v1192_v55  ;;  %v1155_v57 = vpop.xlane.xlu1 %1154  ;;  %v2239_v55 = vmul.f32 1.442695, %v2165_v3  ;;  %v2247_v3 = vmul.f32 1.442695, %v2169_v59  ;;  %v2179_v59 = vsub.f32 %v5520_v24, %v5772_v58  ;;  %v8914_v24 = vld [vmem:[#allocation13_spill] sm:$0xff] }
 0x254   :  { %v1249_v56 = vsub.f32 %v8905_v61, %v1155_v57  ;;  %v1250_v6 = vsub.f32 %v8907_v28, %v1155_v57  ;;  %v2175_v61 = vsub.f32 %v5492_v13, %v5772_v58  ;;  %v2177_v57 = vsub.f32 %v5506_v19, %v5772_v58 }
 0x255   :  { %v2181_v13 = vsub.f32 %v5532_v43, %v5772_v58  ;;  %v2769_v19 = vrot.slane %v2768_v53, 1  ;;  %v2187_v28 = vsub.f32 %v8914_v24, %v5772_v58 }
 0x256   :  { %v1315_v45 = vmul.f32 1.442695, %v1250_v6  ;;  %v2263_v6 = vmul.f32 1.442695, %v2177_v57 }
 0x257   :  { %v5914_v35 = vpop.f32.mrf.mxu3  ;;  %v5936_v51 = vpop.f32.mrf.mxu2 }
 0x258   :  { %8900 = vst [vmem:[#allocation17_spill] sm:$0xff] %v5914_v35  ;;  %v2231_v35 = vmul.f32 1.442695, %v2161_v25  ;;  %v2243_v25 = vmul.f32 1.442695, %v2167_v41  ;;  %v5948_v38 = vpop.f32.mrf.mxu1 }
 0x259   :  { %8904 = vst [vmem:[#allocation117_spill] sm:$0xff] %v5936_v51  ;;  %v5946_v30 = vpop.f32.mrf.mxu0  ;;  %v1313_v41 = vmul.f32 1.442695, %v1249_v56 }
 0x25a   :  { %4761 = vpow2.f32 %v2231_v35  ;;  %8908 = vst [vmem:[#allocation51_spill] sm:$0xff] %v5946_v30  ;;  %v5955_v35 = vpop.eup %4755  ;;  %v2271_v30 = vmul.f32 1.442695, %v2181_v13 }
 0x25b   :  { %8909 = vst [vmem:[#allocation118_spill] sm:$0xff] %v5948_v38  ;;  %4763 = vrcp.f32 %v5930_v10  ;;  %1244 = vmax.xlane.f32.xlu1 %v1243_v44  ;;  %1196 = vmax.xlane.f32.xlu2 %v1195_v7  ;;  %v5959_v5 = vpop.eup %4757  ;;  %v2185_v44 = vsub.f32 %v5548_v15, %v5772_v58  ;;  %v2259_v7 = vmul.f32 1.442695, %v2175_v61  ;;  %v8920_v15 = vld [vmem:[#allocation15_spill] sm:$0xff]  ;;  %v2267_v61 = vmul.f32 1.442695, %v2179_v59 }
 0x25c   :  { %4765 = vpow2.f32 %v2235_v27  ;;  %8910 = vst [vmem:[#allocation119_spill] sm:$0xff] %v5955_v35  ;;  %v2183_v27 = vsub.f32 %v5540_v60, %v5772_v58  ;;  %v8917_v60 = vld [vmem:[#allocation54_spill] sm:$0xff]  ;;  %v2189_v24 = vsub.f32 %v8920_v15, %v5772_v58  ;;  %v8928_v59 = vld [vmem:[#allocation20_spill] sm:$0xff] }
 0x25d   :  { %4767 = vpow2.f32 %v2239_v55  ;;  %8911 = vst [vmem:[#allocation120_spill] sm:$0xff] %v5959_v5  ;;  %v2255_v55 = vmul.f32 1.442695, %v2173_v62  ;;  %v1251_v51 = vsub.f32 %v8917_v60, %v1158_v1  ;;  %v1246_v62 = vmax.f32 %v5889_v0, %v5893_v39  ;;  %v8925_v60 = vld [vmem:[#allocation18_spill] sm:$0xff] }
 0x25e   :  { %4769 = vpow2.f32 %v2243_v25  ;;  %v2191_v39 = vsub.f32 %v8925_v60, %v5772_v58  ;;  %v5997_v0 = vadd.f32 %v2769_v19, %v2768_v53  ;;  %v8931_v60 = vld [vmem:[#allocation25_spill] sm:$0xff]  ;;  %v8932_v19 = vld [vmem:[#allocation28_spill] sm:$0xff] }
 0x25f   :  { %v5941_v48 = vpop.f32.mrf.mxu3  ;;  %4771 = vpow2.f32 %v2247_v3  ;;  %v5975_v43 = vpop.f32.mrf.mxu2 }
 0x260   :  { %8906 = vst [vmem:[#allocation50_spill] sm:$0xff] %v5941_v48  ;;  %v2251_v48 = vmul.f32 1.442695, %v2171_v46  ;;  %v5965_v46 = vpop.eup %4759  ;;  %v5991_v57 = vpop.f32.mrf.mxu1 }
 0x261   :  { %8912 = vst [vmem:[#allocation121_spill] sm:$0xff] %v5965_v46  ;;  %v5969_v56 = vpop.eup %4761  ;;  %v5989_v38 = vpop.f32.mrf.mxu0 }
 0x262   :  { %8913 = vst [vmem:[#allocation122_spill] sm:$0xff] %v5969_v56  ;;  %4773 = vpow2.f32 %v2251_v48  ;;  %v5977_v25 = vpop.eup %4763  ;;  %v8921_v48 = vld [vmem:[#allocation55_spill] sm:$0xff] }
 0x263   :  { %8915 = vst [vmem:[#allocation13_spill] sm:$0xff] %v5975_v43  ;;  %4775 = vpow2.f32 %v1313_v41  ;;  %v5984_v37 = vpop.eup %4765  ;;  %v1252_v43 = vsub.f32 %v8921_v48, %v1158_v1  ;;  %v2193_v1 = vsub.f32 %v8928_v59, %v5772_v58  ;;  %1247 = vmax.xlane.f32.xlu1 %v1246_v62  ;;  %v1161_v48 = vpop.xlane.xlu2 %1160 }
 0x264   :  { %8916 = vst [vmem:[#allocation123_spill] sm:$0xff] %v5977_v25  ;;  %4777 = vpow2.f32 %v1315_v45  ;;  %v5993_v41 = vpop.eup %4767  ;;  %v8929_v45 = vld [vmem:[#allocation22_spill] sm:$0xff]  ;;  %v8969_v25 = vsub.f32 %v5476_v9, %v5772_v58  ;;  %v8975_v9 = vld [vmem:[#allocation21_spill] sm:$0xff] }
 0x265   :  { %8919 = vst [vmem:[#allocation124_spill] sm:$0xff] %v5984_v37  ;;  %4779 = vpow2.f32 %v2255_v55  ;;  %v6001_v15 = vpop.eup %4769  ;;  %v2283_v55 = vmul.f32 1.442695, %v2187_v28  ;;  %v2291_v28 = vmul.f32 1.442695, %v2191_v39 }
 0x266   :  { %8922 = vst [vmem:[#allocation15_spill] sm:$0xff] %v5989_v38  ;;  %4781 = vpow2.f32 %v2259_v7  ;;  %v1317_v38 = vmul.f32 1.442695, %v1251_v51  ;;  %v1319_v7 = vmul.f32 1.442695, %v1252_v43 }
 0x267   :  { %v5982_v3 = vpop.f32.mrf.mxu3  ;;  %8923 = vst [vmem:[#allocation55_spill] sm:$0xff] %v5991_v57  ;;  %v6007_v57 = vpop.eup %4771  ;;  %4783 = vpow2.f32 %v2263_v6  ;;  %v2275_v6 = vmul.f32 1.442695, %v2183_v27  ;;  %v8938_v27 = vld [vmem:[#allocation58_spill] sm:$0xff] }
 0x268   :  { %8918 = vst [vmem:[#allocation54_spill] sm:$0xff] %v5982_v3  ;;  %v1198_v3 = vmax.f32 %v5878_v49, %v5880_v14  ;;  %v6013_v52 = vpop.eup %4773  ;;  %4785 = vpow2.f32 %v2267_v61  ;;  %v2279_v61 = vmul.f32 1.442695, %v2185_v44  ;;  %v6032_v13 = vpop.f32.mrf.mxu2  ;;  %v1253_v53 = vsub.f32 %v8938_v27, %v1161_v48 }
 0x269   :  { %8924 = vst [vmem:[#allocation125_spill] sm:$0xff] %v5993_v41  ;;  %v6019_v14 = vpop.eup %4775  ;;  %4787 = vrcp.f32 %v5997_v0  ;;  %v2287_v44 = vmul.f32 1.442695, %v2189_v24  ;;  %v6048_v12 = vpop.f32.mrf.mxu1  ;;  %v8948_v24 = vld [vmem:[#allocation32_spill] sm:$0xff] }
 0x26a   :  { %8926 = vst [vmem:[#allocation18_spill] sm:$0xff] %v5997_v0  ;;  %1199 = vmax.xlane.f32.xlu2 %v1198_v3  ;;  %v6026_v62 = vpop.eup %4777  ;;  %4789 = vpow2.f32 %v2271_v30  ;;  %v8941_v30 = vld [vmem:[#allocation59_spill] sm:$0xff] }
 0x26b   :  { %8927 = vst [vmem:[#allocation126_spill] sm:$0xff] %v6001_v15  ;;  %v6034_v59 = vpop.eup %4779  ;;  %4791 = vpow2.f32 %v1317_v38  ;;  %v1254_v3 = vsub.f32 %v8941_v30, %v1161_v48  ;;  %v1441_v27 = vadd.f32 %v6026_v62, %v6019_v14  ;;  %v8945_v48 = vld [vmem:[#allocation24_spill] sm:$0xff]  ;;  %v2295_v30 = vmul.f32 1.442695, %v2193_v1  ;;  %v8964_v0 = vld [vmem:[#allocation63_spill] sm:$0xff] }
 0x26c   :  { %8930 = vst [vmem:[#allocation20_spill] sm:$0xff] %v6007_v57  ;;  %v6041_v33 = vpop.eup %4781  ;;  %4793 = vpow2.f32 %v1319_v7  ;;  %v8949_v7 = vld [vmem:[#allocation34_spill] sm:$0xff]  ;;  %v8951_v38 = vld [vmem:[#allocation36_spill] sm:$0xff] }
 0x26d   :  { %8933 = vst [vmem:[#allocation22_spill] sm:$0xff] %v6013_v52  ;;  %v6050_v51 = vpop.eup %4783  ;;  %4795 = vpow2.f32 %v2275_v6  ;;  %v1321_v6 = vmul.f32 1.442695, %v1253_v53  ;;  %v8952_v53 = vsub.f32 %v8929_v45, %v5772_v58  ;;  %v8957_v45 = vld [vmem:[#allocation44_spill] sm:$0xff] }
 0x26e   :  { %8934 = vst [vmem:[#allocation25_spill] sm:$0xff] %v6019_v14  ;;  %4797 = vpow2.f32 %v2279_v61  ;;  %v1323_v61 = vmul.f32 1.442695, %v1254_v3  ;;  %v8954_v14 = vld [vmem:[#allocation40_spill] sm:$0xff]  ;;  %v6092_v34 = vpop.xlane.xlu1 %1208 }
 0x26f   :  { %8935 = vst [vmem:[#allocation28_spill] sm:$0xff] %v6026_v62  ;;  %v6039_v49 = vpop.f32.mrf.mxu3  ;;  %4799 = vpow2.f32 %v2283_v55  ;;  %v1164_v55 = vpop.xlane.xlu2 %1163 }
 0x270   :  { %8936 = vst [vmem:[#allocation127_spill] sm:$0xff] %v6032_v13  ;;  %v6046_v13 = vpop.f32.mrf.mxu0  ;;  %4801 = vpow2.f32 %v2287_v44  ;;  %v8955_v44 = vsub.f32 %v8931_v60, %v5772_v58  ;;  %v1255_v3 = vsub.f32 %v8959_v17, %v1164_v55 }
 0x271   :  { %8937 = vst [vmem:[#allocation128_spill] sm:$0xff] %v6034_v59  ;;  %4803 = vpow2.f32 %v2291_v28 }
 0x272   :  { %8939 = vst [vmem:[#allocation58_spill] sm:$0xff] %v6039_v49  ;;  %v6056_v49 = vpop.eup %4785  ;;  %1442 = vadd.xlane.f32.xlu2 %v1441_v27  ;;  %v2299_v27 = vmul.f32 1.442695, %v8952_v53  ;;  %v2303_v63 = vmul.f32 1.442695, %v8955_v44  ;;  %4805 = vpow2.f32 %v2295_v30  ;;  %v8958_v53 = vsub.f32 %v8932_v19, %v5772_v58 }
 0x273   :  { %8940 = vst [vmem:[#allocation129_spill] sm:$0xff] %v6041_v33  ;;  %v6062_v43 = vpop.eup %4787  ;;  %4807 = vpow2.f32 %v1321_v6  ;;  %v1256_v19 = vsub.f32 %v8964_v0, %v1164_v55  ;;  %v6116_v6 = vpop.f32.mrf.mxu1  ;;  %v2315_v44 = vmul.f32 1.442695, %v8969_v25  ;;  %v8971_v0 = vld [vmem:[#allocation16_spill] sm:$0xff]  ;;  %v8972_v55 = vld [vmem:[#allocation19_spill] sm:$0xff] }
 0x274   :  { %8942 = vst [vmem:[#allocation59_spill] sm:$0xff] %v6046_v13  ;;  %v6068_v62 = vpop.eup %4789  ;;  %v2307_v1 = vmul.f32 1.442695, %v8958_v53  ;;  %4809 = vpow2.f32 %v1323_v61  ;;  %v8981_v25 = vld [vmem:[#allocation31_spill] sm:$0xff] }
 0x275   :  { %8943 = vst [vmem:[#allocation130_spill] sm:$0xff] %v6048_v12  ;;  %v8947_v12 = vld [vmem:[#allocation27_spill] sm:$0xff]  ;;  %v6074_v13 = vpop.eup %4791  ;;  %4811 = vpow2.f32 %v2299_v27 }
 0x276   :  { %8944 = vst [vmem:[#allocation131_spill] sm:$0xff] %v6050_v51  ;;  %v6083_v39 = vpop.eup %4793  ;;  %4813 = vpow2.f32 %v2303_v63  ;;  %v8976_v27 = vld [vmem:[#allocation23_spill] sm:$0xff]  ;;  %v1327_v63 = vmul.f32 1.442695, %v1256_v19 }
 0x277   :  { %8946 = vst [vmem:[#allocation24_spill] sm:$0xff] %v6062_v43  ;;  %v6094_v23 = vpop.eup %4795  ;;  %v6102_v43 = vpop.f32.mrf.mxu2  ;;  %4815 = vpow2.f32 %v2307_v1 }
 0x278   :  { %8950 = vst [vmem:[#allocation27_spill] sm:$0xff] %v6074_v13  ;;  %v6104_v60 = vpop.f32.mrf.mxu3  ;;  %v6106_v30 = vpop.eup %4797 }
 0x279   :  { %8953 = vst [vmem:[#allocation32_spill] sm:$0xff] %v6083_v39  ;;  %v6114_v53 = vpop.f32.mrf.mxu0  ;;  %v6118_v17 = vpop.eup %4799 }
 0x27a   :  { %8956 = vst [vmem:[#allocation34_spill] sm:$0xff] %v6092_v34  ;;  %v8963_v34 = vsub.f32 %v5462_v4, %v5772_v58  ;;  %v1444_v4 = vadd.f32 %v6083_v39, %v6074_v13  ;;  %v1325_v13 = vmul.f32 1.442695, %v1255_v3  ;;  %v8982_v39 = vld [vmem:[#allocation33_spill] sm:$0xff]  ;;  %v8983_v3 = vsub.f32 %v5500_v16, %v5772_v58  ;;  %v1167_v1 = vpop.xlane.xlu2 %1166 }
 0x27b   :  { %8960 = vst [vmem:[#allocation36_spill] sm:$0xff] %v6102_v43  ;;  %v1257_v19 = vsub.f32 %v8992_v29, %v1167_v1  ;;  %v6191_v29 = vpop.f32.mrf.mxu1 }
 0x27c   :  { %8961 = vst [vmem:[#allocation40_spill] sm:$0xff] %v6104_v60  ;;  %v2311_v28 = vmul.f32 1.442695, %v8963_v34  ;;  %v8968_v60 = vld [vmem:[#allocation14_spill] sm:$0xff]  ;;  %v6127_v34 = vpop.eup %4801  ;;  %1445 = vadd.xlane.f32.xlu2 %v1444_v4  ;;  %v2323_v4 = vmul.f32 1.442695, %v8983_v3  ;;  %v8991_v3 = vsub.f32 %v5366_v26, %v5812_v20 }
 0x27d   :  { %8962 = vst [vmem:[#allocation44_spill] sm:$0xff] %v6106_v30  ;;  %v6136_v10 = vpop.eup %4803  ;;  %v8998_v26 = vld [vmem:[#allocation67_spill] sm:$0xff] }
 0x27e   :  { %8965 = vst [vmem:[#allocation62_spill] sm:$0xff] %v6114_v53  ;;  %v8973_v53 = vsub.f32 %v5488_v11, %v5772_v58  ;;  %v6142_v61 = vpop.eup %4805  ;;  %v8979_v11 = vld [vmem:[#allocation29_spill] sm:$0xff]  ;;  %4817 = vpow2.f32 %v2311_v28  ;;  %v8996_v58 = vsub.f32 %v5378_v31, %v5812_v20  ;;  %v9003_v31 = vsub.f32 %v5418_v47, %v5812_v20 }
 0x27f   :  { %8966 = vst [vmem:[#allocation63_spill] sm:$0xff] %v6116_v6  ;;  %v8978_v6 = vld [vmem:[#allocation26_spill] sm:$0xff]  ;;  %v6148_v40 = vpop.eup %4807  ;;  %4819 = vpow2.f32 %v2315_v44  ;;  %v6176_v28 = vpop.f32.mrf.mxu2  ;;  %v8997_v44 = vsub.f32 %v5390_v36, %v5812_v20 }
 0x280   :  { %8967 = vst [vmem:[#allocation132_spill] sm:$0xff] %v6118_v17  ;;  %v2319_v43 = vmul.f32 1.442695, %v8973_v53  ;;  %v6157_v18 = vpop.eup %4809  ;;  %v2221_v53 = vmul.f32 1.442695, %v8991_v3  ;;  %v6178_v22 = vpop.f32.mrf.mxu3  ;;  %v1258_v3 = vsub.f32 %v8998_v26, %v1167_v1  ;;  %v9005_v1 = vsub.f32 %v8945_v48, %v5812_v20 }
 0x281   :  { %8970 = vst [vmem:[#allocation14_spill] sm:$0xff] %v6127_v34  ;;  %v6168_v30 = vpop.eup %4811  ;;  %v1447_v36 = vadd.f32 %v6157_v18, %v6148_v40  ;;  %v9006_v26 = vsub.f32 %v8947_v12, %v5812_v20  ;;  %v9010_v48 = vsub.f32 %v8949_v7, %v5812_v20  ;;  %v1329_v12 = vmul.f32 1.442695, %v1257_v19 }
 0x282   :  { %8974 = vst [vmem:[#allocation16_spill] sm:$0xff] %v6136_v10  ;;  %4821 = vpow2.f32 %v2319_v43  ;;  %v6180_v21 = vpop.eup %4813  ;;  %v2225_v43 = vmul.f32 1.442695, %v8996_v58  ;;  %v2237_v58 = vmul.f32 1.442695, %v9003_v31 }
 0x283   :  { %8977 = vst [vmem:[#allocation19_spill] sm:$0xff] %v6142_v61  ;;  %v6166_v61 = vpop.xlane.xlu1 %1211  ;;  %4823 = vpow2.f32 %v1325_v13  ;;  %v6189_v13 = vpop.f32.mrf.mxu0 }
 0x284   :  { %8980 = vst [vmem:[#allocation21_spill] sm:$0xff] %v6148_v40  ;;  %4825 = vpow2.f32 %v1327_v63  ;;  %1448 = vadd.xlane.f32.xlu2 %v1447_v36  ;;  %v9016_v36 = vsub.f32 %v8849_v2, %v5812_v20  ;;  %v2405_v2 = vadd.f32 %v5993_v41, %v5984_v37  ;;  %v9032_v41 = vsub.f32 %v8972_v55, %v5812_v20 }
 0x285   :  { %8984 = vst [vmem:[#allocation23_spill] sm:$0xff] %v6157_v18  ;;  %4827 = vpow2.f32 %v2323_v4  ;;  %v9009_v4 = vsub.f32 %v8948_v24, %v5812_v20  ;;  %v9013_v24 = vsub.f32 %v8847_v50, %v5812_v20  ;;  %v9027_v18 = vsub.f32 %v8971_v0, %v5812_v20 }
 0x286   :  { %8988 = vst [vmem:[#allocation26_spill] sm:$0xff] %v6166_v61  ;;  %v2229_v61 = vmul.f32 1.442695, %v8997_v44  ;;  %v2241_v44 = vmul.f32 1.442695, %v9005_v1  ;;  %4829 = vpow2.f32 %v2327_v8 }
 0x287   :  { %8989 = vst [vmem:[#allocation29_spill] sm:$0xff] %v6168_v30  ;;  %v6221_v31 = vmul.f32 1.442695, %v9009_v4  ;;  %v6226_v1 = vmul.f32 1.442695, %v9010_v48  ;;  %4831 = vpow2.f32 %v2221_v53  ;;  %v9015_v53 = vsub.f32 %v8954_v14, %v5812_v20 }
 0x288   :  { %8993 = vst [vmem:[#allocation31_spill] sm:$0xff] %v6176_v28  ;;  %v6193_v28 = vpop.eup %4815  ;;  %4833 = vpow2.f32 %v2225_v43  ;;  %v1331_v4 = vmul.f32 1.442695, %v1258_v3  ;;  %v2273_v48 = vmul.f32 1.442695, %v9016_v36  ;;  %v9019_v43 = vsub.f32 %v8850_v32, %v5812_v20 }
 0x289   :  { %8994 = vst [vmem:[#allocation33_spill] sm:$0xff] %v6178_v22  ;;  %v9002_v22 = vsub.f32 %v5404_v42, %v5812_v20  ;;  %v6203_v63 = vpop.eup %4817  ;;  %v9007_v42 = vsub.f32 %v8834_v54, %v5812_v20  ;;  %v9012_v54 = vsub.f32 %v8951_v38, %v5812_v20  ;;  %v2269_v19 = vmul.f32 1.442695, %v9015_v53 }
 0x28a   :  { %8995 = vst [vmem:[#allocation66_spill] sm:$0xff] %v6180_v21  ;;  %v6216_v47 = vpop.eup %4819  ;;  %v9017_v38 = vsub.f32 %v8957_v45, %v5812_v20  ;;  %4835 = vpow2.f32 %v2229_v61  ;;  %v6258_v3 = vmul.f32 1.442695, %v9019_v43  ;;  %v2347_v14 = vadd.f32 %v5959_v5, %v5955_v35  ;;  %v1170_v45 = vpop.xlane.xlu2 %1169 }
 0x28b   :  { %8999 = vst [vmem:[#allocation67_spill] sm:$0xff] %v6189_v13  ;;  %v2233_v16 = vmul.f32 1.442695, %v9002_v22  ;;  %v6214_v22 = vmul.f32 1.442695, %v9007_v42  ;;  %v9022_v61 = vsub.f32 %v8968_v60, %v5812_v20  ;;  %v2463_v32 = vadd.f32 %v6034_v59, %v6013_v52  ;;  %v6276_v43 = vpop.f32.mrf.mxu2  ;;  %v6278_v35 = vpop.f32.mrf.mxu3 }
 0x28c   :  { %9000 = vst [vmem:[#allocation133_spill] sm:$0xff] %v6191_v29  ;;  %v2245_v29 = vmul.f32 1.442695, %v9006_v26  ;;  %v6228_v26 = vpop.eup %4821  ;;  %v6233_v8 = vmul.f32 1.442695, %v9012_v54  ;;  %v2521_v60 = vadd.f32 %v6068_v62, %v6056_v49 }
 0x28d   :  { %9001 = vst [vmem:[#allocation134_spill] sm:$0xff] %v6193_v28  ;;  %v6238_v42 = vmul.f32 1.442695, %v9013_v24  ;;  %v6240_v7 = vpop.eup %4823  ;;  %v6251_v54 = vmul.f32 1.442695, %v9017_v38  ;;  %4837 = vpow2.f32 %v2233_v16  ;;  %v6264_v24 = vpop.xlane.xlu1 %1214  ;;  %v9023_v16 = vld [vmem:[#allocation70_spill] sm:$0xff] }
 0x28e   :  { %9004 = vst [vmem:[#allocation135_spill] sm:$0xff] %v6203_v63  ;;  %v6253_v50 = vpop.eup %4825  ;;  %v6271_v36 = vmul.f32 1.442695, %v9022_v61  ;;  %4839 = vpow2.f32 %v1329_v12  ;;  %v1259_v38 = vsub.f32 %v9023_v16, %v1170_v45  ;;  %v6285_v40 = vmul.f32 1.442695, %v9027_v18  ;;  %v9028_v61 = vld [vmem:[#allocation71_spill] sm:$0xff]  ;;  %v6290_v12 = vpop.f32.mrf.mxu0 }
 0x28f   :  { %9008 = vst [vmem:[#allocation136_spill] sm:$0xff] %v6216_v47  ;;  %v6266_v53 = vpop.eup %4827  ;;  %4841 = vpow2.f32 %v1331_v4  ;;  %v6292_v16 = vpop.f32.mrf.mxu1  ;;  %v2579_v18 = vadd.f32 %v6127_v34, %v6118_v17  ;;  %v1450_v0 = vadd.f32 %v6253_v50, %v6240_v7  ;;  %v2464_v34 = vadd.f32 %v6041_v33, %v2463_v32  ;;  %v9119_v33 = vld [vmem:[#allocation85_spill] sm:$0xff] }
 0x290   :  { %9011 = vst [vmem:[#allocation137_spill] sm:$0xff] %v6228_v26  ;;  %v6280_v5 = vpop.eup %4829  ;;  %4843 = vpow2.f32 %v2237_v58  ;;  %v9036_v58 = vsub.f32 %v8976_v27, %v5812_v20  ;;  %v9040_v27 = vsub.f32 %v8979_v11, %v5812_v20  ;;  %v2637_v32 = vadd.f32 %v6180_v21, %v6168_v30  ;;  %v9055_v30 = vld [vmem:[#allocation19_spill] sm:$0xff] }
 0x291   :  { %9014 = vst [vmem:[#allocation138_spill] sm:$0xff] %v6240_v7  ;;  %v6294_v37 = vpop.eup %4831  ;;  %4845 = vpow2.f32 %v2241_v44  ;;  %1451 = vadd.xlane.f32.xlu2 %v1450_v0  ;;  %v9038_v44 = vsub.f32 %v8978_v6, %v5812_v20 }
 0x292   :  { %9018 = vst [vmem:[#allocation139_spill] sm:$0xff] %v6253_v50  ;;  %v6305_v4 = vpop.eup %4833  ;;  %v6319_v17 = vmul.f32 1.442695, %v9036_v58  ;;  %4847 = vpow2.f32 %v2245_v29  ;;  %v1333_v50 = vmul.f32 1.442695, %v1259_v38  ;;  %v2580_v38 = vadd.f32 %v6136_v10, %v2579_v18 }
 0x293   :  { %9020 = vst [vmem:[#allocation140_spill] sm:$0xff] %v6264_v24  ;;  %v1260_v24 = vsub.f32 %v9028_v61, %v1170_v45  ;;  %v9034_v45 = vsub.f32 %v8975_v9, %v5812_v20  ;;  %v6314_v55 = vpop.eup %4835  ;;  %4849 = vpow2.f32 %v2269_v19  ;;  %v6335_v29 = vmul.f32 1.442695, %v9040_v27  ;;  %v9046_v27 = vld [vmem:[#allocation74_spill] sm:$0xff] }
 0x294   :  { %9021 = vst [vmem:[#allocation141_spill] sm:$0xff] %v6266_v53  ;;  %v6322_v9 = vpop.eup %4837  ;;  %4851 = vpow2.f32 %v2273_v48  ;;  %v9042_v19 = vsub.f32 %v8981_v25, %v5812_v20  ;;  %v1173_v48 = vpop.xlane.xlu2 %1172  ;;  %v9045_v18 = vsub.f32 %v8982_v39, %v5812_v20  ;;  %v2465_v25 = vadd.f32 %v6050_v51, %v2464_v34  ;;  %v9051_v39 = vld [vmem:[#allocation75_spill] sm:$0xff] }
 0x295   :  { %9024 = vst [vmem:[#allocation70_spill] sm:$0xff] %v6276_v43  ;;  %v6310_v61 = vmul.f32 1.442695, %v9034_v45  ;;  %v2348_v43 = vadd.f32 %v5965_v46, %v2347_v14  ;;  %v6327_v14 = vmul.f32 1.442695, %v9038_v44  ;;  %v6330_v7 = vpop.eup %4839  ;;  %4853 = vpow2.f32 %v6214_v22  ;;  %v6350_v0 = vpop.xlane.xlu1 %1217  ;;  %v9050_v46 = vld [vmem:[#allocation44_spill] sm:$0xff] }
 0x296   :  { %9025 = vst [vmem:[#allocation142_spill] sm:$0xff] %v6278_v35  ;;  %v6299_v35 = vmul.f32 1.442695, %v9032_v41  ;;  %v2406_v41 = vadd.f32 %v6001_v15, %v2405_v2  ;;  %v2522_v2 = vadd.f32 %v6094_v23, %v2521_v60  ;;  %v1335_v45 = vmul.f32 1.442695, %v1260_v24  ;;  %v6340_v6 = vpop.eup %4841  ;;  %v6361_v22 = vpop.f32.mrf.mxu2 }
 0x297   :  { %9026 = vst [vmem:[#allocation143_spill] sm:$0xff] %v6280_v5  ;;  %v6345_v60 = vmul.f32 1.442695, %v9042_v19  ;;  %v2349_v24 = vadd.f32 %v5969_v56, %v2348_v43  ;;  %v6352_v58 = vpop.eup %4843  ;;  %v6357_v44 = vmul.f32 1.442695, %v9045_v18  ;;  %4855 = vpow2.f32 %v1333_v50  ;;  %v6363_v43 = vpop.f32.mrf.mxu3 }
 0x298   :  { %9029 = vst [vmem:[#allocation71_spill] sm:$0xff] %v6290_v12  ;;  %v2407_v11 = vadd.f32 %v6007_v57, %v2406_v41  ;;  %v1261_v19 = vsub.f32 %v9046_v27, %v1173_v48  ;;  %v6365_v41 = vpop.eup %4845  ;;  %v2695_v10 = vadd.f32 %v6228_v26, %v6216_v47  ;;  %v2523_v56 = vadd.f32 %v9050_v46, %v2522_v2  ;;  %v6373_v34 = vpop.f32.mrf.mxu1  ;;  %v9057_v2 = vld [vmem:[#allocation35_spill] sm:$0xff] }
 0x299   :  { %9030 = vst [vmem:[#allocation144_spill] sm:$0xff] %v6292_v16  ;;  %4857 = vpow2.f32 %v1335_v45  ;;  %v1262_v18 = vsub.f32 %v9051_v39, %v1173_v48  ;;  %v6375_v50 = vpop.eup %4847  ;;  %v2638_v27 = vadd.f32 %v6193_v28, %v2637_v32  ;;  %v2581_v21 = vadd.f32 %v9055_v30, %v2580_v38 }
 0x29a   :  { %9031 = vst [vmem:[#allocation145_spill] sm:$0xff] %v6294_v37  ;;  %4859 = vpow2.f32 %v6221_v31  ;;  %v1453_v15 = vadd.f32 %v6340_v6, %v6330_v7  ;;  %v6382_v57 = vpop.eup %4849  ;;  %v9058_v45 = vsub.f32 %v9057_v2, %v5812_v20  ;;  %v2350_v39 = vrot.slane %v2349_v24, 4  ;;  %v9060_v31 = vld [vmem:[#allocation37_spill] sm:$0xff] }
 0x29b   :  { %9033 = vst [vmem:[#allocation146_spill] sm:$0xff] %v6305_v4  ;;  %4861 = vpow2.f32 %v6226_v1  ;;  %v2408_v47 = vrot.slane %v2407_v11, 4  ;;  %v9061_v32 = vsub.f32 %v9060_v31, %v5812_v20  ;;  %v2696_v1 = vadd.f32 %v6266_v53, %v2695_v10 }
 0x29c   :  { %9035 = vst [vmem:[#allocation147_spill] sm:$0xff] %v6314_v55  ;;  %v6387_v48 = vmul.f32 1.442695, %v9058_v45  ;;  %4863 = vpow2.f32 %v6251_v54  ;;  %1454 = vadd.xlane.f32.xlu2 %v1453_v15  ;;  %v2524_v2 = vrot.slane %v2523_v56, 4  ;;  %v1339_v45 = vmul.f32 1.442695, %v1262_v18 }
 0x29d   :  { %9037 = vst [vmem:[#allocation148_spill] sm:$0xff] %v6322_v9  ;;  %v6395_v38 = vmul.f32 1.442695, %v9061_v32  ;;  %4865 = vpow2.f32 %v6258_v3  ;;  %v2639_v54 = vadd.f32 %v6203_v63, %v2638_v27  ;;  %v2582_v15 = vrot.slane %v2581_v21, 4  ;;  %v6418_v26 = vpop.xlane.xlu1 %1220 }
 0x29e   :  { %9039 = vst [vmem:[#allocation149_spill] sm:$0xff] %v6330_v7  ;;  %v1337_v7 = vmul.f32 1.442695, %v1261_v19  ;;  %4867 = vpow2.f32 %v6271_v36  ;;  %v2351_v3 = vadd.f32 %v2350_v39, %v2349_v24  ;;  %v6416_v18 = vadd.f32 %v2408_v47, %v2407_v11  ;;  %v9073_v39 = vld [vmem:[#allocation79_spill] sm:$0xff] }
 0x29f   :  { %9041 = vst [vmem:[#allocation150_spill] sm:$0xff] %v6340_v6  ;;  %v2466_v6 = vrot.slane %v2465_v25, 4  ;;  %4869 = vpow2.f32 %v6285_v40  ;;  %v2356_v36 = vadd.f32 %v6305_v4, %v6294_v37  ;;  %v6427_v40 = vpop.f32.mrf.mxu2  ;;  %v6429_v53 = vpop.f32.mrf.mxu3  ;;  %v2697_v47 = vadd.f32 %v6280_v5, %v2696_v1 }
 0x2a0   :  { %9043 = vst [vmem:[#allocation151_spill] sm:$0xff] %v6350_v0  ;;  %v6371_v0 = vpop.f32.mrf.mxu0  ;;  %4871 = vpow2.f32 %v1337_v7  ;;  %v2525_v11 = vadd.f32 %v2524_v2, %v2523_v56  ;;  %v6437_v37 = vpop.f32.mrf.mxu1  ;;  %v2414_v7 = vadd.f32 %v6365_v41, %v6352_v58  ;;  %v2583_v2 = vadd.f32 %v2582_v15, %v2581_v21 }
 0x2a1   :  { %9044 = vst [vmem:[#allocation152_spill] sm:$0xff] %v6352_v58  ;;  %v6424_v27 = vadd.f32 %v2466_v6, %v2465_v25  ;;  %4873 = vpow2.f32 %v1339_v45  ;;  %v2640_v25 = vrot.slane %v2639_v54, 4  ;;  %v2352_v45 = vrot.slane %v2351_v3, 2 }
 0x2a2   :  { %9047 = vst [vmem:[#allocation74_spill] sm:$0xff] %v6361_v22  ;;  %v9064_v22 = vld [vmem:[#allocation39_spill] sm:$0xff]  ;;  %4875 = vpow2.f32 %v6233_v8  ;;  %v2357_v8 = vadd.f32 %v6314_v55, %v2356_v36 }
 0x2a3   :  { %9048 = vst [vmem:[#allocation153_spill] sm:$0xff] %v6363_v43  ;;  %v6390_v43 = vpop.eup %4851  ;;  %v9065_v31 = vsub.f32 %v9064_v22, %v5812_v20  ;;  %v1176_v20 = vpop.xlane.xlu2 %1175  ;;  %4877 = vpow2.f32 %v6238_v42  ;;  %v2641_v36 = vadd.f32 %v2640_v25, %v2639_v54  ;;  %v9082_v54 = vld [vmem:[#allocation48_spill] sm:$0xff] }
 0x2a4   :  { %9049 = vst [vmem:[#allocation154_spill] sm:$0xff] %v6365_v41  ;;  %v6398_v30 = vpop.eup %4853  ;;  %v2530_v10 = vadd.f32 %v6390_v43, %v6382_v57  ;;  %4879 = vpow2.f32 %v6299_v35  ;;  %v2415_v35 = vadd.f32 %v6375_v50, %v2414_v7 }
 0x2a5   :  { %9052 = vst [vmem:[#allocation44_spill] sm:$0xff] %v6371_v0  ;;  %v6402_v28 = vpop.eup %4855  ;;  %v6407_v32 = vmul.f32 1.442695, %v9065_v31  ;;  %v9069_v31 = vld [vmem:[#allocation78_spill] sm:$0xff]  ;;  %4881 = vpow2.f32 %v6319_v17  ;;  %v6469_v55 = vpop.xlane.xlu1 %1223 }
 0x2a6   :  { %9053 = vst [vmem:[#allocation75_spill] sm:$0xff] %v6373_v34  ;;  %v6411_v19 = vpop.eup %4857  ;;  %v1263_v63 = vsub.f32 %v9069_v31, %v1176_v20  ;;  %4883 = vpow2.f32 %v6327_v14  ;;  %v2358_v14 = vadd.f32 %v6322_v9, %v2357_v8 }
 0x2a7   :  { %9054 = vst [vmem:[#allocation155_spill] sm:$0xff] %v6375_v50  ;;  %v6420_v22 = vpop.eup %4859  ;;  %v1456_v31 = vadd.f32 %v6411_v19, %v6402_v28  ;;  %4885 = vpow2.f32 %v6357_v44  ;;  %v6477_v25 = vpop.f32.mrf.mxu2 }
 0x2a8   :  { %9056 = vst [vmem:[#allocation156_spill] sm:$0xff] %v6382_v57  ;;  %v6431_v24 = vpop.eup %4861  ;;  %v6435_v13 = vpop.f32.mrf.mxu0  ;;  %v1341_v4 = vmul.f32 1.442695, %v1263_v63 }
 0x2a9   :  { %9059 = vst [vmem:[#allocation35_spill] sm:$0xff] %v6390_v43  ;;  %v6439_v6 = vpop.eup %4863  ;;  %1457 = vadd.xlane.f32.xlu2 %v1456_v31  ;;  %v2472_v42 = vadd.f32 %v6431_v24, %v6420_v22  ;;  %v2526_v31 = vrot.slane %v2525_v11, 2  ;;  %v6479_v50 = vpop.f32.mrf.mxu3 }
 0x2aa   :  { %9062 = vst [vmem:[#allocation37_spill] sm:$0xff] %v6398_v30  ;;  %v6446_v1 = vpop.eup %4865  ;;  %v2531_v56 = vadd.f32 %v6439_v6, %v2530_v10  ;;  %v2698_v10 = vrot.slane %v2697_v47, 4  ;;  %4887 = vpow2.f32 %v1341_v4  ;;  %v6487_v8 = vpop.f32.mrf.mxu1 }
 0x2ab   :  { %9063 = vst [vmem:[#allocation157_spill] sm:$0xff] %v6402_v28  ;;  %v2584_v28 = vrot.slane %v2583_v2, 2 }
 0x2ac   :  { %9066 = vst [vmem:[#allocation39_spill] sm:$0xff] %v6411_v19  ;;  %v2468_v19 = vrot.slane %v6424_v27, 2  ;;  %v2532_v17 = vadd.f32 %v6446_v1, %v2531_v56 }
 0x2ad   :  { %9067 = vst [vmem:[#allocation158_spill] sm:$0xff] %v6418_v26  ;;  %v1264_v26 = vsub.f32 %v9073_v39, %v1176_v20  ;;  %v6450_v20 = vpop.eup %4867  ;;  %v2410_v39 = vrot.slane %v6416_v18, 2 }
 0x2ae   :  { %9068 = vst [vmem:[#allocation159_spill] sm:$0xff] %v6420_v22  ;;  %v6455_v58 = vpop.eup %4869  ;;  %v6474_v22 = vadd.f32 %v2352_v45, %v2351_v3  ;;  %v2416_v45 = vadd.f32 %v6398_v30, %v2415_v35 }
 0x2af   :  { %9070 = vst [vmem:[#allocation78_spill] sm:$0xff] %v6427_v40  ;;  %v1343_v21 = vmul.f32 1.442695, %v1264_v26  ;;  %v6460_v15 = vpop.eup %4871  ;;  %v1179_v26 = vpop.xlane.xlu2 %1178  ;;  %v2588_v4 = vadd.f32 %v6455_v58, %v6450_v20  ;;  %v9107_v40 = vld [vmem:[#allocation80_spill] sm:$0xff] }
 0x2b0   :  { %9071 = vst [vmem:[#allocation160_spill] sm:$0xff] %v6429_v53  ;;  %v6465_v63 = vpop.eup %4873  ;;  %v1265_v7 = vsub.f32 %v9082_v54, %v1179_v26  ;;  %v6485_v53 = vpop.f32.mrf.mxu0  ;;  %v6504_v54 = vadd.f32 %v2410_v39, %v6416_v18  ;;  %v2417_v18 = vrot.slane %v2416_v45, 4 }
 0x2b1   :  { %9072 = vst [vmem:[#allocation161_spill] sm:$0xff] %v6431_v24  ;;  %v6471_v41 = vpop.eup %4875  ;;  %v2699_v24 = vadd.f32 %v2698_v10, %v2697_v47  ;;  %4889 = vpow2.f32 %v1343_v21  ;;  %v2642_v10 = vrot.slane %v2641_v36, 2  ;;  %v2527_v21 = vadd.f32 %v2526_v31, %v2525_v11  ;;  %v6532_v9 = vpop.f32.mrf.mxu3 }
 0x2b2   :  { %9074 = vst [vmem:[#allocation79_spill] sm:$0xff] %v6435_v13  ;;  %v6481_v44 = vpop.eup %4877  ;;  %v2473_v56 = vadd.f32 %v6471_v41, %v2472_v42  ;;  %4891 = vpow2.f32 %v6387_v48  ;;  %v1459_v42 = vadd.f32 %v6465_v63, %v6460_v15  ;;  %v2359_v48 = vrot.slane %v2358_v14, 4 }
 0x2b3   :  { %9075 = vst [vmem:[#allocation162_spill] sm:$0xff] %v6437_v37  ;;  %v6489_v3 = vpop.eup %4879  ;;  %4893 = vpow2.f32 %v6310_v61  ;;  %v6512_v61 = vadd.f32 %v2584_v28, %v2583_v2  ;;  %v2700_v39 = vrot.slane %v2699_v24, 2  ;;  %v6523_v28 = vpop.xlane.xlu1 %1226 }
 0x2b4   :  { %9076 = vst [vmem:[#allocation163_spill] sm:$0xff] %v6450_v20  ;;  %v6497_v47 = vpop.eup %4881  ;;  %4895 = vpow2.f32 %v6335_v29  ;;  %v1345_v20 = vmul.f32 1.442695, %v1265_v7  ;;  %1460 = vadd.xlane.f32.xlu2 %v1459_v42  ;;  %v2589_v29 = vadd.f32 %v6489_v3, %v2588_v4  ;;  %v2360_v42 = vadd.f32 %v2359_v48, %v2358_v14  ;;  %v9095_v4 = vld [vmem:[#allocation42_spill] sm:$0xff] }
 0x2b5   :  { %9077 = vst [vmem:[#allocation164_spill] sm:$0xff] %v6455_v58  ;;  %4897 = vpow2.f32 %v6345_v60  ;;  %v6527_v60 = vadd.f32 %v2642_v10, %v2641_v36  ;;  %v2418_v36 = vadd.f32 %v2417_v18, %v2416_v45  ;;  %v6543_v10 = vadd.f32 %v2700_v39, %v2699_v24 }
 0x2b6   :  { %9078 = vst [vmem:[#allocation165_spill] sm:$0xff] %v6460_v15  ;;  %v6510_v15 = vadd.f32 %v2468_v19, %v6424_v27  ;;  %4899 = vpow2.f32 %v6395_v38  ;;  %v2528_v27 = vrot.slane %v2527_v21, 1  ;;  %v2361_v45 = vrot.slane %v2360_v42, 2 }
 0x2b7   :  { %9079 = vst [vmem:[#allocation166_spill] sm:$0xff] %v6465_v63  ;;  %v2474_v63 = vadd.f32 %v6481_v44, %v2473_v56  ;;  %4901 = vpow2.f32 %v1345_v20  ;;  %v2412_v24 = vrot.slane %v6504_v54, 1 }
 0x2b8   :  { %9080 = vst [vmem:[#allocation167_spill] sm:$0xff] %v6469_v55  ;;  %v9086_v55 = vld [vmem:[#allocation41_spill] sm:$0xff] }
 0x2b9   :  { %9081 = vst [vmem:[#allocation168_spill] sm:$0xff] %v6471_v41  ;;  %v1266_v5 = vsub.f32 %v9086_v55, %v1179_v26  ;;  %v2533_v55 = vrot.slane %v2532_v17, 4  ;;  %v6500_v26 = vpop.eup %4883  ;;  %v6581_v12 = vpop.f32.mrf.mxu3 }
 0x2ba   :  { %9083 = vst [vmem:[#allocation48_spill] sm:$0xff] %v6477_v25  ;;  %v6506_v35 = vpop.eup %4885  ;;  %v2646_v56 = vadd.f32 %v6500_v26, %v6497_v47  ;;  %v9118_v25 = vld [vmem:[#allocation84_spill] sm:$0xff] }
 0x2bb   :  { %9084 = vst [vmem:[#allocation169_spill] sm:$0xff] %v6479_v50  ;;  %v1347_v11 = vmul.f32 1.442695, %v1266_v5  ;;  %v6514_v31 = vpop.eup %4887  ;;  %v2534_v19 = vadd.f32 %v2533_v55, %v2532_v17  ;;  %v1182_v5 = vpop.xlane.xlu2 %1181  ;;  %v2354_v17 = vrot.slane %v6474_v22, 1  ;;  %v9099_v55 = vld [vmem:[#allocation47_spill] sm:$0xff] }
 0x2bc   :  { %9085 = vst [vmem:[#allocation170_spill] sm:$0xff] %v6481_v44  ;;  %v6518_v7 = vpop.eup %4889  ;;  %v1267_v58 = vsub.f32 %v9095_v4, %v1182_v5  ;;  %v6547_v4 = vpop.f32.mrf.mxu1 }
 0x2bd   :  { %9087 = vst [vmem:[#allocation41_spill] sm:$0xff] %v6489_v3  ;;  %v6525_v2 = vpop.eup %4891  ;;  %v6530_v3 = vpop.f32.mrf.mxu2  ;;  %4903 = vpow2.f32 %v1347_v11  ;;  %v1462_v48 = vadd.f32 %v6518_v7, %v6514_v31  ;;  %v6576_v44 = vadd.f32 %v2354_v17, %v6474_v22 }
 0x2be   :  { %9088 = vst [vmem:[#allocation171_spill] sm:$0xff] %v6497_v47  ;;  %v6534_v38 = vpop.eup %4893  ;;  %v2475_v47 = vrot.slane %v2474_v63, 4  ;;  %v2704_v30 = vadd.f32 %v6525_v2, %v6506_v35  ;;  %4905 = vpow2.f32 %v6407_v32  ;;  %v2702_v32 = vrot.slane %v6543_v10, 1 }
 0x2bf   :  { %9089 = vst [vmem:[#allocation172_spill] sm:$0xff] %v6500_v26  ;;  %v6538_v26 = vpop.f32.mrf.mxu0  ;;  %v6540_v14 = vpop.eup %4895  ;;  %v2590_v20 = vadd.f32 %v6534_v38, %v2589_v29  ;;  %v1349_v29 = vmul.f32 1.442695, %v1267_v58  ;;  %1463 = vadd.xlane.f32.xlu2 %v1462_v48 }
 0x2c0   :  { %9090 = vst [vmem:[#allocation173_spill] sm:$0xff] %v6506_v35  ;;  %v2647_v11 = vadd.f32 %v6540_v14, %v2646_v56  ;;  %v6554_v41 = vpop.eup %4897  ;;  %v2476_v39 = vadd.f32 %v2475_v47, %v2474_v63  ;;  %v6571_v47 = vpop.xlane.xlu1 %1229 }
 0x2c1   :  { %9091 = vst [vmem:[#allocation174_spill] sm:$0xff] %v6514_v31  ;;  %v6558_v18 = vpop.eup %4899  ;;  %v2586_v31 = vrot.slane %v6512_v61, 1 }
 0x2c2   :  { %9092 = vst [vmem:[#allocation175_spill] sm:$0xff] %v6518_v7  ;;  %v2470_v7 = vrot.slane %v6510_v15, 1  ;;  %v2705_v58 = vadd.f32 %v6558_v18, %v2704_v30  ;;  %v2648_v48 = vadd.f32 %v6554_v41, %v2647_v11  ;;  %v2477_v30 = vrot.slane %v2476_v39, 2  ;;  %v9108_v11 = vld [vmem:[#allocation81_spill] sm:$0xff] }
 0x2c3   :  { %9093 = vst [vmem:[#allocation176_spill] sm:$0xff] %v6523_v28  ;;  %v1268_v28 = vsub.f32 %v9099_v55, %v1182_v5  ;;  %v2535_v5 = vrot.slane %v2534_v19, 2  ;;  %v6552_v55 = vadd.f32 %v2528_v27, %v2527_v21  ;;  %v2591_v21 = vrot.slane %v2590_v20, 4 }
 0x2c4   :  { %9094 = vst [vmem:[#allocation177_spill] sm:$0xff] %v6525_v2  ;;  %v2419_v27 = vrot.slane %v2418_v36, 2  ;;  %v6573_v2 = vadd.f32 %v2361_v45, %v2360_v42  ;;  %v6592_v45 = vadd.f32 %v2470_v7, %v6510_v15 }
 0x2c5   :  { %9096 = vst [vmem:[#allocation42_spill] sm:$0xff] %v6530_v3  ;;  %v1351_v56 = vmul.f32 1.442695, %v1268_v28  ;;  %v2536_v63 = vadd.f32 %v2535_v5, %v2534_v19  ;;  %4907 = vrcp.f32 %v6552_v55  ;;  %v1185_v28 = vpop.xlane.xlu2 %1184  ;;  %v6579_v52 = vpop.f32.mrf.mxu2  ;;  %v6584_v19 = vadd.f32 %v2412_v24, %v6504_v54 }
 0x2c6   :  { %9097 = vst [vmem:[#allocation178_spill] sm:$0xff] %v6532_v9  ;;  %4909 = vpow2.f32 %v1349_v29  ;;  %v1269_v16 = vsub.f32 %v9107_v40, %v1185_v28  ;;  %v1270_v5 = vsub.f32 %v9108_v11, %v1185_v28  ;;  %v2592_v22 = vadd.f32 %v2591_v21, %v2590_v20  ;;  %v6596_v29 = vpop.f32.mrf.mxu1  ;;  %v9111_v28 = vld [vmem:[#allocation123_spill] sm:$0xff] }
 0x2c7   :  { %9098 = vst [vmem:[#allocation179_spill] sm:$0xff] %v6534_v38  ;;  %v6562_v38 = vpop.eup %4901  ;;  %4911 = vpow2.f32 %v1351_v56  ;;  %v2420_v17 = vadd.f32 %v2419_v27, %v2418_v36  ;;  %v2649_v24 = vrot.slane %v2648_v48, 4  ;;  %v2537_v56 = vrot.slane %v2536_v63, 1 }
 0x2c8   :  { %9100 = vst [vmem:[#allocation47_spill] sm:$0xff] %v6540_v14  ;;  %v2644_v14 = vrot.slane %v6527_v60, 1  ;;  %v6566_v35 = vpop.eup %4903  ;;  %v6603_v20 = vadd.f32 %v2586_v31, %v6512_v61  ;;  %4913 = vrcp.f32 %v6576_v44  ;;  %v1353_v15 = vmul.f32 1.442695, %v1269_v16 }
 0x2c9   :  { %9101 = vst [vmem:[#allocation180_spill] sm:$0xff] %v6554_v41  ;;  %v6589_v42 = vpop.eup %4905  ;;  %v1465_v40 = vadd.f32 %v6566_v35, %v6562_v38  ;;  %v9110_v41 = vld [vmem:[#allocation116_spill] sm:$0xff]  ;;  %v2478_v36 = vadd.f32 %v2477_v30, %v2476_v39  ;;  %4915 = vrcp.f32 %v6584_v19  ;;  %v1355_v27 = vmul.f32 1.442695, %v1270_v5  ;;  %v9116_v5 = vld [vmem:[#allocation82_spill] sm:$0xff] }
 0x2ca   :  { %9102 = vst [vmem:[#allocation181_spill] sm:$0xff] %v6558_v18  ;;  %v2706_v54 = vadd.f32 %v6589_v42, %v2705_v58  ;;  %v2772_v11 = vmul.f32 %v9111_v28, %v9110_v41  ;;  %v2363_v18 = vrot.slane %v6573_v2, 1  ;;  %v6609_v21 = vadd.f32 %v2644_v14, %v6527_v60  ;;  %v1233_v60 = vpop.xlane.xlu1 %1232 }
 0x2cb   :  { %9103 = vst [vmem:[#allocation182_spill] sm:$0xff] %v6562_v38  ;;  %1466 = vadd.xlane.f32.xlu2 %v1465_v40  ;;  %v6606_v7 = vpop.eup %4907  ;;  %v2421_v38 = vrot.slane %v2420_v17, 1  ;;  %v6615_v61 = vadd.f32 %v2702_v32, %v6543_v10  ;;  %4917 = vrcp.f32 %v6592_v45  ;;  %v2650_v40 = vadd.f32 %v2649_v24, %v2648_v48  ;;  %v6627_v32 = vpop.f32.mrf.mxu3 }
 0x2cc   :  { %9104 = vst [vmem:[#allocation183_spill] sm:$0xff] %v6566_v35  ;;  %v6612_v58 = vpop.eup %4909  ;;  %v2593_v35 = vrot.slane %v2592_v22, 2  ;;  %v2707_v31 = vrot.slane %v2706_v54, 4  ;;  %v6620_v39 = vadd.f32 %v2537_v56, %v2536_v63  ;;  %v2773_v30 = vsub.f32 1.0, %v2772_v11 }
 0x2cd   :  { %9105 = vst [vmem:[#allocation184_spill] sm:$0xff] %v6571_v47  ;;  %v6587_v47 = vpop.f32.mrf.mxu0  ;;  %v6618_v16 = vpop.eup %4911  ;;  %4919 = vpow2.f32 %v1353_v15  ;;  %v2479_v34 = vrot.slane %v2478_v36, 1  ;;  %v2540_v24 = vmul.f32 %v6606_v7, %v6552_v55  ;;  %vm2544_vm11 = vweird.f32 %v6552_v55 }
 0x2ce   :  { %9106 = vst [vmem:[#allocation185_spill] sm:$0xff] %v6576_v44  ;;  %v1188_v14 = vpop.xlane.xlu2 %1187  ;;  %v1301_v44 = vsub.f32 %v9116_v5, %v1233_v60  ;;  %v6625_v10 = vpop.f32.mrf.mxu2  ;;  %4921 = vpow2.f32 %v1355_v27  ;;  %v6636_v11 = vadd.f32 %v2593_v35, %v2592_v22  ;;  %v2708_v27 = vadd.f32 %v2707_v31, %v2706_v54 }
 0x2cf   :  { %9109 = vst [vmem:[#allocation80_spill] sm:$0xff] %v6589_v42  ;;  %v9117_v42 = vld [vmem:[#allocation83_spill] sm:$0xff]  ;;  %v1271_v59 = vsub.f32 %v9118_v25, %v1188_v14  ;;  %v1272_v48 = vsub.f32 %v9119_v33, %v1188_v14  ;;  %v6634_v56 = vpop.eup %4913  ;;  %v1468_v25 = vadd.f32 %v6618_v16, %v6612_v58  ;;  %v2651_v33 = vrot.slane %v2650_v40, 2  ;;  %v1191_v54 = vpop.xlane.xlu0 %1190 }
 0x2d0   :  { %9112 = vst [vmem:[#allocation81_spill] sm:$0xff] %v6603_v20  ;;  %v1302_v50 = vsub.f32 %v9117_v42, %v1233_v60  ;;  %v1417_v42 = vmul.f32 1.442695, %v1301_v44  ;;  %v6640_v60 = vpop.f32.mrf.mxu1  ;;  %v6642_v5 = vpop.eup %4915  ;;  %v6645_v14 = vadd.f32 %v2363_v18, %v6573_v2  ;;  %4923 = vrcp.f32 %v6620_v39 }
 0x2d1   :  { %9113 = vst [vmem:[#allocation116_spill] sm:$0xff] %v6609_v21  ;;  %v6648_v0 = vpop.eup %4917  ;;  %v6650_v35 = vadd.f32 %v2421_v38, %v2420_v17  ;;  %v2774_v44 = vmul.f32 %v9111_v28, %v2773_v30  ;;  %v6653_v22 = vadd.f32 %v2479_v34, %v2478_v36  ;;  %v2541_v31 = vsub.f32 1.0, %v2540_v24 }
 0x2d2   :  { %9114 = vst [vmem:[#allocation123_spill] sm:$0xff] %v6612_v58  ;;  %v1419_v15 = vmul.f32 1.442695, %v1302_v50  ;;  %4925 = vpow2.f32 %v1417_v42  ;;  %v1357_v50 = vmul.f32 1.442695, %v1271_v59  ;;  %v2595_v2 = vrot.slane %v6636_v11, 1  ;;  %v6666_v34 = vpop.xlane.xlu1 %1235 }
 0x2d3   :  { %9115 = vst [vmem:[#allocation186_spill] sm:$0xff] %v6618_v16  ;;  %1469 = vadd.xlane.f32.xlu2 %v1468_v25  ;;  %v1359_v16 = vmul.f32 1.442695, %v1272_v48  ;;  %v6655_v58 = vpop.eup %4919  ;;  %v2548_v38 = vand.u32 2147483647, %v6552_v55  ;;  %v2550_v18 = vand.u32 2147483648, %v6552_v55  ;;  %v6663_v30 = vadd.f32 %v2651_v33, %v2650_v40 }
 0x2d4   :  { %9120 = vst [vmem:[#allocation82_spill] sm:$0xff] %v6634_v56  ;;  %4927 = vpow2.f32 %v1419_v15  ;;  %v6661_v59 = vpop.eup %4921  ;;  %v2709_v17 = vrot.slane %v2708_v27, 2  ;;  %vm2777_vm12 = vweird.f32 %v9111_v28  ;;  %v9127_v48 = vld [vmem:[#allocation88_spill] sm:$0xff]  ;;  %v6675_v15 = vpop.f32.mrf.mxu3  ;;  %v2775_v40 = vadd.f32 %v9111_v28, %v2774_v44  ;;  %v9128_v25 = vld [vmem:[#allocation18_spill] sm:$0xff] }
 0x2d5   :  { %v6630_v63 = vpop.f32.mrf.mxu0  ;;  %9121 = vst [vmem:[#allocation83_spill] sm:$0xff] %v6645_v14  ;;  %4929 = vrcp.f32 %v6603_v20  ;;  %v1273_v24 = vsub.f32 %v9127_v48, %v1191_v54  ;;  %v9129_v33 = vld [vmem:[#allocation24_spill] sm:$0xff]  ;;  %v2782_v48 = vand.u32 2147483648, %v9110_v41  ;;  %v1471_v44 = vadd.f32 %v6661_v59, %v6655_v58 }
 0x2d6   :  { %9122 = vst [vmem:[#allocation84_spill] sm:$0xff] %v6650_v35  ;;  %4931 = vrcp.f32 %v6609_v21  ;;  %v6668_v36 = vpop.xlane.xlu2 %1202  ;;  %v6673_v42 = vpop.f32.mrf.mxu2  ;;  %v2787_v20 = vmul.f32 %v9129_v33, %v9128_v25  ;;  %vm2776_vm13 = vweird.f32 %v9110_v41  ;;  %v2551_v37 = vor.u32 1.1754944e-38, %v2550_v18 }
 0x2d7   :  { %9123 = vst [vmem:[#allocation85_spill] sm:$0xff] %v6655_v58  ;;  %4933 = vpow2.f32 %v1357_v50  ;;  %v6680_v56 = vpop.eup %4923  ;;  %v2542_v50 = vmul.f32 %v6606_v7, %v2541_v31  ;;  %v2653_v31 = vrot.slane %v6663_v30, 1  ;;  %vm6702_vm14 = vmor %vm2776_vm13, %vm2777_vm12  ;;  %v1361_v58 = vmul.f32 1.442695, %v1273_v24 }
 0x2d8   :  { %9124 = vst [vmem:[#allocation187_spill] sm:$0xff] %v6661_v59  ;;  %4935 = vpow2.f32 %v1359_v16  ;;  %v6687_v3 = vpop.eup %4925  ;;  %v2780_v16 = vand.u32 2147483647, %v9110_v41  ;;  %vm6710_vm15 = vcmp.eq.f32.partialorder %v2548_v38, 8.507059e+37  ;;  %v2779_v18 = vsel %vm6702_vm14, %v9111_v28, %v2775_v40 }
 0x2d9   :  { %9125 = vst [vmem:[#allocation188_spill] sm:$0xff] %v6666_v34  ;;  %v9130_v34 = vld [vmem:[#allocation89_spill] sm:$0xff]  ;;  %4937 = vrcp.f32 %v6615_v61  ;;  %v2543_v51 = vadd.f32 %v6606_v7, %v2542_v50  ;;  %vm2545_vm1 = vweird.f32 %v6606_v7  ;;  %v2783_v24 = vor.u32 1.1754944e-38, %v2782_v48  ;;  %v9142_v48 = vld [vmem:[#allocation90_spill] sm:$0xff] }
 0x2da   :  { %9126 = vst [vmem:[#allocation189_spill] sm:$0xff] %v6668_v36  ;;  %v1274_v21 = vsub.f32 %v9130_v34, %v1191_v54  ;;  %v6692_v36 = vpop.f32.mrf.mxu1  ;;  %v6696_v54 = vpop.eup %4927  ;;  %v2710_v34 = vadd.f32 %v2709_v17, %v2708_v27  ;;  %4939 = vrcp.f32 %v6645_v14  ;;  %v2788_v17 = vsub.f32 1.0, %v2787_v20  ;;  %vm6748_vm3 = vmor %vm2544_vm11, %vm2545_vm1 }
 0x2db   :  { %9131 = vst [vmem:[#allocation88_spill] sm:$0xff] %v6687_v3  ;;  %v6706_v59 = vpop.eup %4929  ;;  %v1519_v41 = vadd.f32 %v6696_v54, %v6687_v3  ;;  %1472 = vadd.xlane.f32.xlu2 %v1471_v44  ;;  %v6724_v38 = vadd.f32 %v2595_v2, %v6636_v11  ;;  %4941 = vrcp.f32 %v6650_v35  ;;  %vm2781_vm2 = vcmp.eq.f32.partialorder %v2780_v16, 8.507059e+37  ;;  %v9143_v16 = vld [vmem:[#allocation91_spill] sm:$0xff] }
 0x2dc   :  { %9132 = vst [vmem:[#allocation18_spill] sm:$0xff] %v6696_v54  ;;  %v6717_v14 = vpop.eup %4931  ;;  %v1363_v43 = vmul.f32 1.442695, %v1274_v21  ;;  %v2555_v57 = vmul.f32 %v6680_v56, %v6620_v39  ;;  %v2711_v20 = vrot.slane %v2710_v34, 1  ;;  %4943 = vrcp.f32 %v6653_v22  ;;  %v1239_v21 = vpop.xlane.xlu1 %1238 }
 0x2dd   :  { %v6683_v9 = vpop.f32.mrf.mxu0  ;;  %9135 = vst [vmem:[#allocation24_spill] sm:$0xff] %v6706_v59  ;;  %v6721_v59 = vpop.eup %4933  ;;  %1520 = vadd.xlane.f32.xlu1 %v1519_v41  ;;  %v2784_v50 = vsel %vm2781_vm2, %v2783_v24, %v2779_v18  ;;  %v2482_v11 = vmul.f32 %v6648_v0, %v6592_v45  ;;  %4945 = vpow2.f32 %v1361_v58  ;;  %v1305_v44 = vsub.f32 %v9142_v48, %v1239_v21  ;;  %v9153_v18 = vld [vmem:[#allocation92_spill] sm:$0xff] }
 0x2de   :  { %9138 = vst [vmem:[#allocation89_spill] sm:$0xff] %v6717_v14  ;;  %v6729_v28 = vpop.eup %4935  ;;  %v6732_v40 = vpop.xlane.xlu2 %1205  ;;  %v1306_v41 = vsub.f32 %v9143_v16, %v1239_v21  ;;  %v2789_v24 = vmul.f32 %v9129_v33, %v2788_v17  ;;  %v6756_v58 = vadd.f32 %v2653_v31, %v6663_v30  ;;  %4947 = vpow2.f32 %v1363_v43 }
 0x2df   :  { %9139 = vst [vmem:[#allocation190_spill] sm:$0xff] %v6721_v59  ;;  %v6736_v2 = vpop.eup %4937  ;;  %v6740_v54 = vpop.f32.mrf.mxu2  ;;  %v2547_v48 = vsel %vm6748_vm3, %v6606_v7, %v2543_v51  ;;  %v2565_v16 = vand.u32 2147483648, %v6620_v39  ;;  %v1425_v55 = vmul.f32 1.442695, %v1305_v44  ;;  %v1474_v14 = vadd.f32 %v6729_v28, %v6721_v59  ;;  %v9150_v44 = vld [vmem:[#allocation101_spill] sm:$0xff] }
 0x2e0   :  { %9140 = vst [vmem:[#allocation191_spill] sm:$0xff] %v6729_v28  ;;  %v6742_v3 = vpop.f32.mrf.mxu3  ;;  %v6753_v35 = vpop.eup %4939  ;;  %v2556_v17 = vsub.f32 1.0, %v2555_v57  ;;  %4949 = vrcp.f32 %v6724_v38  ;;  %v2801_v43 = vmul.f32 0.17677669, %v2784_v50  ;;  %v2483_v30 = vsub.f32 1.0, %v2482_v11 }
 0x2e1   :  { %9141 = vst [vmem:[#allocation192_spill] sm:$0xff] %v6732_v40  ;;  %v1427_v40 = vmul.f32 1.442695, %v1306_v41  ;;  %v6767_v31 = vpop.eup %4941  ;;  %4951 = vpow2.f32 %v1425_v55  ;;  %vm2559_vm4 = vweird.f32 %v6620_v39  ;;  %v2563_v51 = vand.u32 2147483647, %v6620_v39 }
 0x2e2   :  { %9146 = vst [vmem:[#allocation90_spill] sm:$0xff] %v6753_v35  ;;  %v735_v13 = vpop.f32.mrf.mxu1  ;;  %v6764_v35 = vadd.f32 %v2711_v20, %v2710_v34  ;;  %v2790_v7 = vadd.f32 %v9129_v33, %v2789_v24  ;;  %vm2792_vm5 = vweird.f32 %v9129_v33  ;;  %v6773_v57 = vpop.eup %4943  ;;  %v2795_v34 = vand.u32 2147483647, %v9128_v25 }
 0x2e3   :  { %2924 = vmatpush.xpose.msra.mxu1 %v735_v13  ;;  %1475 = vadd.xlane.f32.xlu2 %v1474_v14  ;;  %4953 = vpow2.f32 %v1427_v40  ;;  %v2552_v13 = vsel %vm6710_vm15, %v2551_v37, %v2547_v48  ;;  %v2797_v20 = vand.u32 2147483648, %v9128_v25  ;;  %v6779_v50 = vpop.eup %4945  ;;  %v2557_v14 = vmul.f32 %v6680_v56, %v2556_v17 }
 0x2e4   :  { %9147 = vst [vmem:[#allocation91_spill] sm:$0xff] %v6779_v50  ;;  %4955 = vrcp.f32 %v6756_v58  ;;  %v6784_v11 = vor.u32 1.1754944e-38, %v2565_v16  ;;  %vm2791_vm6 = vweird.f32 %v9128_v25  ;;  %v6787_v40 = vpop.eup %4947  ;;  %v6790_v37 = vpop.xlane.xlu1 %1241  ;;  %v6794_v41 = vmul.f32 %v9150_v44, %v2801_v43 }
 0x2e5   :  { %v574_v21 = vpop.f32.mrf.mxu0  ;;  %9148 = vst [vmem:[#allocation193_spill] sm:$0xff] %v6787_v40  ;;  %4957 = vrcp.f32 %v6764_v35  ;;  %vm2560_vm7 = vweird.f32 %v6680_v56  ;;  %vm6799_vm8 = vmor %vm2791_vm6, %vm2792_vm5  ;;  %v2484_v25 = vmul.f32 %v6648_v0, %v2483_v30  ;;  %vm6806_vm9 = vcmp.eq.f32.partialorder %v2563_v51, 8.507059e+37  ;;  %v9157_v30 = vld [vmem:[#allocation98_spill] sm:$0xff] }
 0x2e6   :  { %2811 = vmatpush.xpose.msra.mxu0 %v574_v21  ;;  %9149 = vst [vmem:[#allocation194_spill] sm:$0xff] %v6790_v37  ;;  %v1194_v27 = vpop.xlane.xlu2 %1193  ;;  %v9154_v21 = vld [vmem:[#allocation93_spill] sm:$0xff]  ;;  %v2794_v44 = vsel %vm6799_vm8, %v9129_v33, %v2790_v7  ;;  %v6813_v28 = vpop.eup %4949  ;;  %v6816_v59 = vmul.f32 %v9157_v30, %v2801_v43  ;;  %vm2796_vm10 = vcmp.eq.f32.partialorder %v2795_v34, 8.507059e+37  ;;  %v1477_v37 = vadd.f32 %v6787_v40, %v6779_v50  ;;  %vm6859_vm13 = vmor %vm2559_vm4, %vm2560_vm7 }
 0x2e7   :  { %2925 = vmatpush.xpose.msra.mxu1 %v6692_v36  ;;  %v1275_v24 = vsub.f32 %v9153_v18, %v1194_v27  ;;  %v1276_v48 = vsub.f32 %v9154_v21, %v1194_v27  ;;  %v989_v16 = vpop.f32.mrf.mxu2  ;;  %v2569_v36 = vmul.f32 0.17677669, %v2552_v13  ;;  %v9158_v18 = vld [vmem:[#allocation95_spill] sm:$0xff]  ;;  %v2798_v13 = vor.u32 1.1754944e-38, %v2797_v20  ;;  %v6821_v51 = vpop.eup %4951 }
 0x2e8   :  { %v1150_v55 = vpop.f32.mrf.mxu3  ;;  %3037 = vmatpush.xpose.msra.mxu2 %v989_v16  ;;  %v6819_v27 = vmul.f32 %v9158_v18, %v2801_v43  ;;  %9159 = vst [vmem:[#allocation101_spill] sm:$0xff] %v6821_v51  ;;  %v2558_v33 = vadd.f32 %v6680_v56, %v2557_v14  ;;  %vm2487_vm11 = vweird.f32 %v6648_v0  ;;  %v2485_v34 = vadd.f32 %v6648_v0, %v2484_v25 }
 0x2e9   :  { %3150 = vmatpush.xpose.msra.mxu3 %v1150_v55  ;;  %v1365_v21 = vmul.f32 1.442695, %v1275_v24  ;;  %v6828_v7 = vpop.eup %4953  ;;  %v2799_v16 = vsel %vm2796_vm10, %v2798_v13, %v2794_v44  ;;  %v2714_v20 = vmul.f32 %v6736_v2, %v6615_v61  ;;  %v6839_v14 = vmul.f32 %v9050_v46, %v2569_v36  ;;  %v9161_v55 = vld [vmem:[#allocation94_spill] sm:$0xff] }
 0x2ea   :  { %2812 = vmatpush.xpose.msra.mxu0 %v6683_v9  ;;  %9160 = vst [vmem:[#allocation92_spill] sm:$0xff] %v6828_v7  ;;  %v1367_v9 = vmul.f32 1.442695, %v1276_v48  ;;  %v6834_v24 = vpop.eup %4955  ;;  %v6842_v30 = vmul.f32 %v9161_v55, %v2801_v43  ;;  %vm2486_vm12 = vweird.f32 %v6592_v45  ;;  %v6850_v25 = vmul.f32 %v6094_v23, %v2569_v36 }
 0x2eb   :  { %2926 = vmatpush.xpose.msra.mxu1 %v6640_v60  ;;  %1478 = vadd.xlane.f32.xlu2 %v1477_v37  ;;  %v6845_v60 = vpop.eup %4957  ;;  %v6853_v48 = vmul.f32 %v6068_v62, %v2569_v36  ;;  %v2490_v43 = vand.u32 2147483647, %v6592_v45  ;;  %4959 = vpow2.f32 %v1365_v21  ;;  %v6867_v23 = vmul.f32 %v6056_v49, %v2569_v36  ;;  %vm6876_vm14 = vmor %vm2486_vm12, %vm2487_vm11  ;;  %v9166_v36 = vld [vmem:[#allocation104_spill] sm:$0xff]  ;;  %v9168_v21 = vld [vmem:[#allocation99_spill] sm:$0xff] }
 0x2ec   :  { %3038 = vmatpush.xpose.msra.mxu2 %v6740_v54  ;;  %v2492_v54 = vand.u32 2147483648, %v6592_v45  ;;  %v2562_v62 = vsel %vm6859_vm13, %v6680_v56, %v2558_v33  ;;  %4961 = vpow2.f32 %v1367_v9  ;;  %v1245_v37 = vpop.xlane.xlu1 %1244  ;;  %v2489_v49 = vsel %vm6876_vm14, %v6648_v0, %v2485_v34  ;;  %v9167_v45 = vld [vmem:[#allocation105_spill] sm:$0xff] }
 0x2ed   :  { %3151 = vmatpush.xpose.msra.mxu3 %v6742_v3  ;;  %v2802_v3 = vmul.f32 0.17677669, %v2799_v16  ;;  %v2497_v56 = vmul.f32 %v6773_v57, %v6653_v22  ;;  %v1309_v18 = vsub.f32 %v9166_v36, %v1245_v37  ;;  %v1310_v13 = vsub.f32 %v9167_v45, %v1245_v37  ;;  %v9169_v16 = vld [vmem:[#allocation100_spill] sm:$0xff]  ;;  %v9176_v36 = vld [vmem:[#allocation103_spill] sm:$0xff]  ;;  %v9177_v45 = vld [vmem:[#allocation102_spill] sm:$0xff] }
 0x2ee   :  { %2813 = vmatpush.xpose.msra.mxu0 %v6630_v63  ;;  %v1525_v63 = vadd.f32 %v6828_v7, %v6821_v51  ;;  %v1197_v44 = vpop.xlane.xlu2 %1196  ;;  %v2567_v0 = vsel %vm6806_vm9, %v6784_v11, %v2562_v62  ;;  %vm2491_vm15 = vcmp.eq.f32.partialorder %v2490_v43, 8.507059e+37  ;;  %v2722_v34 = vand.u32 2147483647, %v6615_v61  ;;  %v9171_v43 = vld [vmem:[#allocation111_spill] sm:$0xff] }
 0x2ef   :  { %2927 = vmatpush.xpose.msra.mxu1 %v6596_v29  ;;  %v1277_v33 = vsub.f32 %v9168_v21, %v1197_v44  ;;  %v1278_v9 = vsub.f32 %v9169_v16, %v1197_v44  ;;  %v2493_v29 = vor.u32 1.1754944e-38, %v2492_v54  ;;  %vm2718_vm1 = vweird.f32 %v6615_v61 }
 0x2f0   :  { %1526 = vadd.xlane.f32.xlu1 %v1525_v63  ;;  %3039 = vmatpush.xpose.msra.mxu2 %v6673_v42  ;;  %v1435_v63 = vmul.f32 1.442695, %v1310_v13  ;;  %vm2719_vm2 = vweird.f32 %v6736_v2  ;;  %v2570_v17 = vmul.f32 0.17677669, %v2567_v0  ;;  %v6904_v54 = vmul.f32 %v9171_v43, %v2802_v3 }
 0x2f1   :  { %3152 = vmatpush.xpose.msra.mxu3 %v6675_v15  ;;  %v1369_v55 = vmul.f32 1.442695, %v1277_v33  ;;  %v1371_v46 = vmul.f32 1.442695, %v1278_v9  ;;  %v2494_v42 = vsel %vm2491_vm15, %v2493_v29, %v2489_v49  ;;  %v6901_v11 = vpop.eup %4959  ;;  %v2498_v62 = vsub.f32 1.0, %v2497_v56  ;;  %v9179_v33 = vld [vmem:[#allocation107_spill] sm:$0xff]  ;;  %vm6957_vm4 = vmor %vm2718_vm1, %vm2719_vm2 }
 0x2f2   :  { %2814 = vmatpush.xpose.msra.mxu0 %v6587_v47  ;;  %v2715_v47 = vsub.f32 1.0, %v2714_v20  ;;  %v1433_v20 = vmul.f32 1.442695, %v1309_v18  ;;  %9170 = vst [vmem:[#allocation93_spill] sm:$0xff] %v6901_v11  ;;  %v6906_v39 = vpop.eup %4961  ;;  %v2729_v44 = vmul.f32 %v6845_v60, %v6764_v35  ;;  %vm6921_vm3 = vcmp.eq.f32.partialorder %v2722_v34, 8.507059e+37 }
 0x2f3   :  { %2928 = vmatpush.xpose.msra.mxu1 %v6547_v4  ;;  %9172 = vst [vmem:[#allocation98_spill] sm:$0xff] %v6906_v39  ;;  %v9173_v4 = vld [vmem:[#allocation108_spill] sm:$0xff]  ;;  %v1480_v49 = vadd.f32 %v6906_v39, %v6901_v11  ;;  %v6928_v18 = vmul.f32 %v9176_v36, %v2802_v3  ;;  %v6931_v13 = vmul.f32 %v9177_v45, %v2802_v3  ;;  %vm2502_vm5 = vweird.f32 %v6773_v57 }
 0x2f4   :  { %v2716_v15 = vmul.f32 %v6736_v2, %v2715_v47  ;;  %4963 = vpow2.f32 %v1433_v20  ;;  %3040 = vmatpush.xpose.msra.mxu2 %v6625_v10  ;;  %v6912_v37 = vmul.f32 %v9173_v4, %v2802_v3  ;;  %v6919_v47 = vmul.f32 0.17677669, %v2494_v42 }
 0x2f5   :  { %4965 = vpow2.f32 %v1435_v63  ;;  %3153 = vmatpush.xpose.msra.mxu3 %v6627_v32  ;;  %1481 = vadd.xlane.f32.xlu2 %v1480_v49  ;;  %v2499_v9 = vmul.f32 %v6773_v57, %v2498_v62  ;;  %v2424_v0 = vmul.f32 %v6642_v5, %v6584_v19  ;;  %v6944_v3 = vmul.f32 %v6439_v6, %v2570_v17  ;;  %v9190_v49 = vld [vmem:[#allocation189_spill] sm:$0xff] }
 0x2f6   :  { %2815 = vmatpush.xpose.msra.mxu0 %v6538_v26  ;;  %v2724_v26 = vand.u32 2147483648, %v6615_v61  ;;  %4967 = vpow2.f32 %v1369_v55  ;;  %v1200_v32 = vpop.xlane.xlu2 %1199  ;;  %v2717_v56 = vadd.f32 %v6736_v2, %v2716_v15  ;;  %v2730_v34 = vsub.f32 1.0, %v2729_v44  ;;  %v9181_v55 = vld [vmem:[#allocation79_spill] sm:$0xff] }
 0x2f7   :  { %4969 = vpow2.f32 %v1371_v46  ;;  %2929 = vmatpush.xpose.msra.mxu1 %v6487_v8  ;;  %v1280_v16 = vsub.f32 %v9179_v33, %v1200_v32  ;;  %v6941_v8 = vmul.f32 %v6446_v1, %v2570_v17  ;;  %v9182_v46 = vld [vmem:[#allocation131_spill] sm:$0xff]  ;;  %v9186_v1 = vld [vmem:[#allocation156_spill] sm:$0xff]  ;;  %v2507_v61 = vand.u32 2147483648, %v6653_v22  ;;  %v9193_v33 = vld [vmem:[#allocation53_spill] sm:$0xff] }
 0x2f8   :  { %3041 = vmatpush.xpose.msra.mxu2 %v6579_v52  ;;  %v2725_v29 = vor.u32 1.1754944e-38, %v2724_v26  ;;  %v6951_v42 = vmul.f32 %v9182_v46, %v6919_v47  ;;  %v6965_v15 = vmul.f32 %v9186_v1, %v2570_v17  ;;  %v9188_v26 = vld [vmem:[#allocation162_spill] sm:$0xff]  ;;  %v2721_v4 = vsel %vm6957_vm4, %v6736_v2, %v2717_v56  ;;  %v9196_v46 = vld [vmem:[#allocation116_spill] sm:$0xff]  ;;  %v9197_v52 = vld [vmem:[#allocation89_spill] sm:$0xff] }
 0x2f9   :  { %3154 = vmatpush.xpose.msra.mxu3 %v6581_v12  ;;  %v9185_v12 = vld [vmem:[#allocation35_spill] sm:$0xff]  ;;  %v1375_v62 = vmul.f32 1.442695, %v1280_v16  ;;  %v2500_v45 = vadd.f32 %v6773_v57, %v2499_v9  ;;  %v1282_v2 = vsub.f32 %v9193_v33, %v9190_v49  ;;  %v9194_v56 = vld [vmem:[#allocation42_spill] sm:$0xff]  ;;  %vm2501_vm6 = vweird.f32 %v6653_v22  ;;  %v9199_v1 = vld [vmem:[#allocation129_spill] sm:$0xff] }
 0x2fa   :  { %2816 = vmatpush.xpose.msra.mxu0 %v6485_v53  ;;  %v9178_v53 = vld [vmem:[#allocation106_spill] sm:$0xff]  ;;  %v6946_v20 = vpop.eup %4963  ;;  %v6962_v6 = vmul.f32 %v9185_v12, %v2570_v17  ;;  %v2656_v12 = vmul.f32 %v9197_v52, %v9196_v46  ;;  %vm7011_vm7 = vmor %vm2501_vm6, %vm2502_vm5  ;;  %vm2734_vm8 = vweird.f32 %v6845_v60  ;;  %v2508_v10 = vor.u32 1.1754944e-38, %v2507_v61  ;;  %v9208_v61 = vld [vmem:[#allocation144_spill] sm:$0xff] }
 0x2fb   :  { %v1279_v21 = vsub.f32 %v9178_v53, %v1200_v32  ;;  %9180 = vst [vmem:[#allocation95_spill] sm:$0xff] %v6946_v20  ;;  %v6967_v43 = vpop.eup %4965  ;;  %2930 = vmatpush.xpose.msra.mxu1 %v9188_v26  ;;  %v9191_v32 = vld [vmem:[#allocation52_spill] sm:$0xff]  ;;  %v2425_v53 = vsub.f32 1.0, %v2424_v0  ;;  %v9195_v16 = vld [vmem:[#allocation178_spill] sm:$0xff]  ;;  %v6997_v26 = vmul.f32 %v9199_v1, %v6919_v47  ;;  %vm2733_vm10 = vweird.f32 %v6764_v35 }
 0x2fc   :  { %9187 = vst [vmem:[#allocation94_spill] sm:$0xff] %v6967_v43  ;;  %v6975_v44 = vpop.eup %4967  ;;  %v1281_v36 = vsub.f32 %v9191_v32, %v9190_v49  ;;  %v1531_v17 = vadd.f32 %v6967_v43, %v6946_v20  ;;  %3042 = vmatpush.xpose.msra.mxu2 %v9194_v56  ;;  %v9198_v0 = vld [vmem:[#allocation44_spill] sm:$0xff]  ;;  %v2505_v49 = vand.u32 2147483647, %v6653_v22  ;;  %vm2429_vm11 = vweird.f32 %v6642_v5  ;;  %vm7040_vm12 = vmor %vm2733_vm10, %vm2734_vm8  ;;  %v9225_v20 = vld [vmem:[#allocation74_spill] sm:$0xff] }
 0x2fd   :  { %v1373_v63 = vmul.f32 1.442695, %v1279_v21  ;;  %9189 = vst [vmem:[#allocation104_spill] sm:$0xff] %v6975_v44  ;;  %v6982_v21 = vpop.eup %4969  ;;  %3155 = vmatpush.xpose.msra.mxu3 %v9195_v16  ;;  %v9204_v16 = vld [vmem:[#allocation48_spill] sm:$0xff]  ;;  %vm2428_vm13 = vweird.f32 %v6584_v19  ;;  %vm2661_vm1 = vweird.f32 %v9197_v52  ;;  %vm2444_vm6 = vweird.f32 %v6767_v31 }
 0x2fe   :  { %2817 = vmatpush.xpose.msra.mxu0 %v9181_v55  ;;  %9192 = vst [vmem:[#allocation105_spill] sm:$0xff] %v6982_v21  ;;  %v2731_v55 = vmul.f32 %v6845_v60, %v2730_v34  ;;  %1532 = vadd.xlane.f32.xlu1 %v1531_v17  ;;  %v1483_v9 = vadd.f32 %v6982_v21, %v6975_v44  ;;  %v7000_v32 = vpop.xlane.xlu2 %1442  ;;  %v9200_v34 = vld [vmem:[#allocation75_spill] sm:$0xff]  ;;  %v9201_v17 = vld [vmem:[#allocation128_spill] sm:$0xff]  ;;  %v1377_v22 = vmul.f32 1.442695, %v1281_v36  ;;  %vm2506_vm9 = vcmp.eq.f32.partialorder %v2505_v49, 8.507059e+37  ;;  %vm7077_vm15 = vmor %vm2428_vm13, %vm2429_vm11 }
 0x2ff   :  { %4971 = vpow2.f32 %v1373_v63  ;;  %2931 = vmatpush.xpose.msra.mxu1 %v9200_v34  ;;  %v2726_v63 = vsel %vm6921_vm3, %v2725_v29, %v2721_v4  ;;  %v7007_v33 = vmul.f32 %v9201_v17, %v6919_v47  ;;  %v2426_v29 = vmul.f32 %v6642_v5, %v2425_v53  ;;  %v9206_v17 = vld [vmem:[#allocation71_spill] sm:$0xff] }
 0x300   :  { %4973 = vpow2.f32 %v1375_v62  ;;  %1484 = vadd.xlane.f32.xlu2 %v1483_v9  ;;  %v2504_v62 = vsel %vm7011_vm7, %v6773_v57, %v2500_v45  ;;  %v1379_v4 = vmul.f32 1.442695, %v1282_v2  ;;  %3043 = vmatpush.xpose.msra.mxu2 %v9204_v16  ;;  %v2732_v1 = vadd.f32 %v6845_v60, %v2731_v55  ;;  %v9207_v9 = vld [vmem:[#allocation22_spill] sm:$0xff]  ;;  %v9210_v55 = vld [vmem:[#allocation192_spill] sm:$0xff]  ;;  %v9255_v44 = vld [vmem:[#allocation31_spill] sm:$0xff] }
 0x301   :  { %4975 = vrcp.f32 %v7000_v32  ;;  %v2657_v34 = vsub.f32 1.0, %v2656_v12  ;;  %v2743_v36 = vmul.f32 0.17677669, %v2726_v63  ;;  %v7027_v56 = vmul.f32 %v9207_v9, %v6919_v47  ;;  %v9211_v12 = vld [vmem:[#allocation56_spill] sm:$0xff]  ;;  %v9220_v47 = vld [vmem:[#allocation143_spill] sm:$0xff] }
 0x302   :  { %2818 = vmatpush.xpose.msra.mxu0 %v9198_v0  ;;  %v9205_v0 = vld [vmem:[#allocation169_spill] sm:$0xff]  ;;  %v2739_v57 = vand.u32 2147483648, %v6764_v35  ;;  %v2509_v45 = vsel %vm2506_vm9, %v2508_v10, %v2504_v62  ;;  %v2737_v53 = vand.u32 2147483647, %v6764_v35  ;;  %4977 = vpow2.f32 %v1377_v22  ;;  %v9216_v22 = vld [vmem:[#allocation78_spill] sm:$0xff] }
 0x303   :  { %3156 = vmatpush.xpose.msra.mxu3 %v9205_v0  ;;  %2932 = vmatpush.xpose.msra.mxu1 %v9208_v61  ;;  %v1283_v63 = vsub.f32 %v9211_v12, %v9210_v55  ;;  %v2427_v49 = vadd.f32 %v6642_v5, %v2426_v29  ;;  %v2434_v62 = vand.u32 2147483648, %v6584_v19  ;;  %4979 = vpow2.f32 %v1379_v4  ;;  %v9215_v35 = vld [vmem:[#allocation57_spill] sm:$0xff]  ;;  %v9217_v0 = vld [vmem:[#allocation160_spill] sm:$0xff]  ;;  %v9218_v61 = vld [vmem:[#allocation67_spill] sm:$0xff] }
 0x304   :  { %v1284_v16 = vsub.f32 %v9215_v35, %v9210_v55  ;;  %3044 = vmatpush.xpose.msra.mxu2 %v9216_v22  ;;  %v2658_v9 = vmul.f32 %v9197_v52, %v2657_v34  ;;  %v2740_v12 = vor.u32 1.1754944e-38, %v2739_v57  ;;  %v2432_v4 = vand.u32 2147483647, %v6584_v19  ;;  %v9219_v22 = vld [vmem:[#allocation133_spill] sm:$0xff]  ;;  %v9233_v19 = vld [vmem:[#allocation136_spill] sm:$0xff] }
 0x305   :  { %v7034_v2 = vpop.eup %4971  ;;  %vm2738_vm14 = vcmp.eq.f32.partialorder %v2737_v53, 8.507059e+37  ;;  %v1381_v57 = vmul.f32 1.442695, %v1283_v63  ;;  %v2435_v53 = vor.u32 1.1754944e-38, %v2434_v62  ;;  %v9228_v63 = vld [vmem:[#allocation62_spill] sm:$0xff]  ;;  %vm2660_vm3 = vweird.f32 %v9196_v46 }
 0x306   :  { %2819 = vmatpush.xpose.msra.mxu0 %v9206_v17  ;;  %9209 = vst [vmem:[#allocation99_spill] sm:$0xff] %v7034_v2  ;;  %v7046_v10 = vpop.eup %4973  ;;  %v2736_v17 = vsel %vm7040_vm12, %v6845_v60, %v2732_v1  ;;  %v7063_v35 = vpop.xlane.xlu2 %1445  ;;  %v7067_v60 = vmul.f32 %v9220_v47, %v2743_v36  ;;  %v9221_v1 = vld [vmem:[#allocation141_spill] sm:$0xff]  ;;  %v2431_v47 = vsel %vm7077_vm15, %v6642_v5, %v2427_v49  ;;  %vm2433_vm2 = vcmp.eq.f32.partialorder %v2432_v4, 8.507059e+37  ;;  %v9230_v49 = vld [vmem:[#allocation63_spill] sm:$0xff]  ;;  %vm7110_vm4 = vmor %vm2660_vm3, %vm2661_vm1 }
 0x307   :  { %9214 = vst [vmem:[#allocation100_spill] sm:$0xff] %v7046_v10  ;;  %3157 = vmatpush.xpose.msra.mxu3 %v9217_v0  ;;  %v1486_v29 = vadd.f32 %v7046_v10, %v7034_v2  ;;  %v7061_v55 = vpop.eup %4975  ;;  %2933 = vmatpush.xpose.msra.mxu1 %v9219_v22  ;;  %v7070_v34 = vmul.f32 %v9221_v1, %v2743_v36  ;;  %v9222_v0 = vld [vmem:[#allocation137_spill] sm:$0xff]  ;;  %v1383_v1 = vmul.f32 1.442695, %v1284_v16  ;;  %v2666_v5 = vand.u32 2147483648, %v9196_v46 }
 0x308   :  { %v7073_v43 = vmul.f32 %v9222_v0, %v2743_v36  ;;  %v2741_v22 = vsel %vm2738_vm14, %v2740_v12, %v2736_v17  ;;  %3045 = vmatpush.xpose.msra.mxu2 %v9225_v20  ;;  %v9226_v0 = vld [vmem:[#allocation153_spill] sm:$0xff]  ;;  %v2659_v7 = vadd.f32 %v9197_v52, %v2658_v9  ;;  %v7088_v51 = vpop.eup %4977  ;;  %4981 = vrcp.f32 %v7063_v35  ;;  %v9231_v9 = vld [vmem:[#allocation34_spill] sm:$0xff] }
 0x309   :  { %1487 = vadd.xlane.f32.xlu2 %v1486_v29  ;;  %9227 = vst [vmem:[#allocation111_spill] sm:$0xff] %v7088_v51  ;;  %v7095_v20 = vpop.eup %4979  ;;  %v2744_v62 = vmul.f32 0.17677669, %v2741_v22  ;;  %v2436_v16 = vsel %vm2433_vm2, %v2435_v53, %v2431_v47  ;;  %v2664_v17 = vand.u32 2147483647, %v9196_v46  ;;  %v9232_v29 = vld [vmem:[#allocation60_spill] sm:$0xff]  ;;  %4983 = vpow2.f32 %v1381_v57 }
 0x30a   :  { %2820 = vmatpush.xpose.msra.mxu0 %v9218_v61  ;;  %v2512_v61 = vmul.f32 0.17677669, %v2509_v45  ;;  %v1538_v45 = vmul.f32 %v7061_v55, %v7000_v32  ;;  %9229 = vst [vmem:[#allocation108_spill] sm:$0xff] %v7095_v20  ;;  %v1285_v12 = vsub.f32 %v9232_v29, %v9231_v9  ;;  %v7103_v4 = vmul.f32 %v9233_v19, %v2743_v36  ;;  %v9239_v22 = vld [vmem:[#allocation61_spill] sm:$0xff]  ;;  %v9240_v46 = vld [vmem:[#allocation70_spill] sm:$0xff]  ;;  %v9242_v57 = vld [vmem:[#allocation84_spill] sm:$0xff] }
 0x30b   :  { %3158 = vmatpush.xpose.msra.mxu3 %v9226_v0  ;;  %2934 = vmatpush.xpose.msra.mxu1 %v9230_v49  ;;  %v9235_v0 = vld [vmem:[#allocation170_spill] sm:$0xff]  ;;  %v1286_v47 = vsub.f32 %v9239_v22, %v9231_v9  ;;  %4985 = vpow2.f32 %v1383_v1  ;;  %v2663_v36 = vsel %vm7110_vm4, %v9197_v52, %v2659_v7  ;;  %v2439_v49 = vmul.f32 %v6767_v31, %v9242_v57  ;;  %v9247_v7 = vld [vmem:[#allocation168_spill] sm:$0xff]  ;;  %v9249_v10 = vld [vmem:[#allocation181_spill] sm:$0xff] }
 0x30c   :  { %9234 = vst [vmem:[#allocation103_spill] sm:$0xff] %v7103_v4  ;;  %3046 = vmatpush.xpose.msra.mxu2 %v9240_v46  ;;  %v9241_v53 = vld [vmem:[#allocation142_spill] sm:$0xff]  ;;  %v1539_v29 = vsub.f32 1.0, %v1538_v45  ;;  %v1489_v19 = vadd.f32 %v7095_v20, %v7088_v51  ;;  %v2453_v2 = vmul.f32 0.17677669, %v2436_v16  ;;  %v2667_v9 = vor.u32 1.1754944e-38, %v2666_v5 }
 0x30d   :  { %v9244_v22 = vld [vmem:[#allocation130_spill] sm:$0xff]  ;;  %v9245_v46 = vld [vmem:[#allocation80_spill] sm:$0xff]  ;;  %vm2665_vm5 = vcmp.eq.f32.partialorder %v2664_v17, 8.507059e+37  ;;  %v7133_v52 = vmul.f32 %v9247_v7, %v2512_v61  ;;  %v7136_v45 = vmul.f32 %v9249_v10, %v2744_v62  ;;  %v1385_v21 = vmul.f32 1.442695, %v1285_v12  ;;  %v9253_v5 = vld [vmem:[#allocation177_spill] sm:$0xff] }
 0x30e   :  { %2821 = vmatpush.xpose.msra.mxu0 %v9228_v63  ;;  %v7106_v63 = vmul.f32 %v9235_v0, %v2512_v61  ;;  %v9243_v0 = vld [vmem:[#allocation59_spill] sm:$0xff]  ;;  %v7126_v1 = vpop.xlane.xlu2 %1448  ;;  %v2668_v20 = vsel %vm2665_vm5, %v2667_v9, %v2663_v36  ;;  %v7142_v51 = vmul.f32 %v9253_v5, %v2744_v62  ;;  %v9256_v17 = vld [vmem:[#allocation33_spill] sm:$0xff]  ;;  %v2440_v36 = vsub.f32 1.0, %v2439_v49  ;;  %v9263_v5 = vld [vmem:[#allocation20_spill] sm:$0xff] }
 0x30f   :  { %3159 = vmatpush.xpose.msra.mxu3 %v9241_v53  ;;  %2935 = vmatpush.xpose.msra.mxu1 %v9244_v22  ;;  %v7130_v53 = vmul.f32 %v9245_v46, %v2744_v62  ;;  %9248 = vst [vmem:[#allocation107_spill] sm:$0xff] %v7133_v52  ;;  %v7144_v22 = vpop.eup %4981  ;;  %v1387_v46 = vmul.f32 1.442695, %v1286_v47  ;;  %v9257_v7 = vld [vmem:[#allocation159_spill] sm:$0xff]  ;;  %v9259_v10 = vld [vmem:[#allocation173_spill] sm:$0xff]  ;;  %v1540_v9 = vmul.f32 %v7061_v55, %v1539_v29  ;;  %4987 = vpow2.f32 %v1385_v21  ;;  %v9324_v4 = vld [vmem:[#allocation12_spill] sm:$0xff] }
 0x310   :  { %9236 = vst [vmem:[#allocation102_spill] sm:$0xff] %v7106_v63  ;;  %3047 = vmatpush.xpose.msra.mxu2 %v9255_v44  ;;  %v7149_v39 = vmul.f32 %v9257_v7, %v2512_v61  ;;  %v7152_v12 = vmul.f32 %v9259_v10, %v2744_v62  ;;  %v7159_v11 = vmul.f32 %v9263_v5, %v2453_v2  ;;  %v2447_v44 = vand.u32 2147483647, %v9242_v57  ;;  %v9269_v7 = vld [vmem:[#allocation125_spill] sm:$0xff]  ;;  %v9272_v5 = vld [vmem:[#allocation64_spill] sm:$0xff] }
 0x311   :  { %9246 = vst [vmem:[#allocation106_spill] sm:$0xff] %v7130_v53  ;;  %1490 = vadd.xlane.f32.xlu2 %v1489_v19  ;;  %v7154_v19 = vpop.eup %4983  ;;  %v2685_v62 = vmul.f32 0.17677669, %v2668_v20  ;;  %v7170_v10 = vmul.f32 %v9269_v7, %v2453_v2  ;;  %v2671_v29 = vmul.f32 %v6834_v24, %v6756_v58  ;;  %v1553_v50 = vmul.f32 %v7144_v22, %v7063_v35  ;;  %v9275_v20 = vld [vmem:[#allocation65_spill] sm:$0xff]  ;;  %v9277_v7 = vld [vmem:[#allocation40_spill] sm:$0xff] }
 0x312   :  { %2822 = vmatpush.xpose.msra.mxu0 %v9243_v0  ;;  %9250 = vst [vmem:[#allocation79_spill] sm:$0xff] %v7136_v45  ;;  %v9251_v0 = vld [vmem:[#allocation161_spill] sm:$0xff]  ;;  %v7163_v47 = vpop.eup %4985  ;;  %vm2443_vm7 = vweird.f32 %v9242_v57  ;;  %4989 = vpow2.f32 %v1387_v46  ;;  %v2441_v21 = vmul.f32 %v6767_v31, %v2440_v36  ;;  %vm1543_vm8 = vweird.f32 %v7061_v55  ;;  %v9278_v46 = vld [vmem:[#allocation51_spill] sm:$0xff] }
 0x313   :  { %v7139_v16 = vmul.f32 %v9251_v0, %v2512_v61  ;;  %9254 = vst [vmem:[#allocation35_spill] sm:$0xff] %v7142_v51  ;;  %3160 = vmatpush.xpose.msra.mxu3 %v9256_v17  ;;  %v9262_v0 = vld [vmem:[#allocation15_spill] sm:$0xff]  ;;  %v9267_v17 = vld [vmem:[#allocation126_spill] sm:$0xff]  ;;  %4991 = vrcp.f32 %v7126_v1  ;;  %v2672_v36 = vsub.f32 1.0, %v2671_v29  ;;  %vm2676_vm9 = vweird.f32 %v6834_v24  ;;  %v9303_v63 = vld [vmem:[#allocation13_spill] sm:$0xff] }
 0x314   :  { %9258 = vst [vmem:[#allocation156_spill] sm:$0xff] %v7149_v39  ;;  %v9266_v61 = vld [vmem:[#allocation55_spill] sm:$0xff]  ;;  %v7167_v49 = vmul.f32 %v9267_v17, %v2453_v2  ;;  %v9276_v17 = vld [vmem:[#allocation36_spill] sm:$0xff]  ;;  %vm1542_vm10 = vweird.f32 %v7000_v32  ;;  %v1546_v51 = vand.u32 2147483647, %v7000_v32  ;;  %vm2675_vm12 = vweird.f32 %v6756_v58  ;;  %vm7253_vm15 = vmor %vm2443_vm7, %vm2444_vm6 }
 0x315   :  { %9252 = vst [vmem:[#allocation131_spill] sm:$0xff] %v7139_v16  ;;  %2936 = vmatpush.xpose.msra.mxu1 %v9266_v61  ;;  %3048 = vmatpush.xpose.msra.mxu2 %v9276_v17  ;;  %v9280_v17 = vld [vmem:[#allocation185_spill] sm:$0xff]  ;;  %vm7205_vm11 = vmor %vm1542_vm10, %vm1543_vm8  ;;  %v9284_v29 = vld [vmem:[#allocation127_spill] sm:$0xff]  ;;  %vm7231_vm13 = vcmp.eq.f32.partialorder %v2447_v44, 8.507059e+37  ;;  %vm1558_vm3 = vweird.f32 %v7144_v22  ;;  %vm1557_vm5 = vweird.f32 %v7063_v35 }
 0x316   :  { %9260 = vst [vmem:[#allocation162_spill] sm:$0xff] %v7152_v12  ;;  %2823 = vmatpush.xpose.msra.mxu0 %v9262_v0  ;;  %v9271_v0 = vld [vmem:[#allocation26_spill] sm:$0xff]  ;;  %v9273_v12 = vld [vmem:[#allocation124_spill] sm:$0xff]  ;;  %v9286_v16 = vld [vmem:[#allocation135_spill] sm:$0xff]  ;;  %vm1547_vm14 = vcmp.eq.f32.partialorder %v1546_v51, 8.507059e+37  ;;  %v2681_v51 = vand.u32 2147483648, %v6756_v58  ;;  %vm2370_vm2 = vweird.f32 %v9280_v17 }
 0x317   :  { %9261 = vst [vmem:[#allocation189_spill] sm:$0xff] %v7154_v19  ;;  %v1287_v40 = vsub.f32 %v9272_v5, %v9271_v0  ;;  %v7179_v39 = vmul.f32 %v9273_v12, %v2453_v2  ;;  %v1288_v61 = vsub.f32 %v9275_v20, %v9271_v0  ;;  %3161 = vmatpush.xpose.msra.mxu3 %v9277_v7  ;;  %v2449_v5 = vand.u32 2147483648, %v9242_v57  ;;  %v7195_v0 = vpop.xlane.xlu2 %1451  ;;  %v9279_v20 = vld [vmem:[#allocation118_spill] sm:$0xff]  ;;  %v9310_v57 = vld [vmem:[#allocation81_spill] sm:$0xff]  ;;  %vm7300_vm6 = vmor %vm2675_vm12, %vm2676_vm9 }
 0x318   :  { %9264 = vst [vmem:[#allocation52_spill] sm:$0xff] %v7159_v11  ;;  %v1492_v2 = vadd.f32 %v7163_v47, %v7154_v19  ;;  %v1548_v12 = vand.u32 2147483648, %v7000_v32  ;;  %v9290_v32 = vld [vmem:[#allocation66_spill] sm:$0xff]  ;;  %vm7312_vm7 = vmor %vm1557_vm5, %vm1558_vm3 }
 0x319   :  { %9265 = vst [vmem:[#allocation53_spill] sm:$0xff] %v7163_v47  ;;  %2937 = vmatpush.xpose.msra.mxu1 %v9279_v20  ;;  %v1554_v47 = vsub.f32 1.0, %v1553_v50  ;;  %3049 = vmatpush.xpose.msra.mxu2 %v9284_v29  ;;  %v9285_v20 = vld [vmem:[#allocation58_spill] sm:$0xff]  ;;  %v7218_v50 = vmul.f32 %v9290_v32, %v2685_v62  ;;  %v2679_v32 = vand.u32 2147483647, %v6756_v58 }
 0x31a   :  { %9268 = vst [vmem:[#allocation42_spill] sm:$0xff] %v7167_v49  ;;  %2824 = vmatpush.xpose.msra.mxu0 %v9278_v46  ;;  %1493 = vadd.xlane.f32.xlu2 %v1492_v2  ;;  %v1391_v46 = vmul.f32 1.442695, %v1288_v61  ;;  %v7212_v49 = vmul.f32 %v9286_v16, %v2685_v62  ;;  %v7221_v61 = vpop.eup %4987  ;;  %v9293_v29 = vld [vmem:[#allocation114_spill] sm:$0xff]  ;;  %v2442_v16 = vadd.f32 %v6767_v31, %v2441_v21  ;;  %v1549_v19 = vor.u32 1.1754944e-38, %v1548_v12 }
 0x31b   :  { %9270 = vst [vmem:[#allocation178_spill] sm:$0xff] %v7170_v10  ;;  %v1541_v10 = vadd.f32 %v7061_v55, %v1540_v9  ;;  %v9281_v9 = vld [vmem:[#allocation82_spill] sm:$0xff]  ;;  %3162 = vmatpush.xpose.msra.mxu3 %v9285_v20  ;;  %v9294_v20 = vld [vmem:[#allocation29_spill] sm:$0xff]  ;;  %v1555_v44 = vmul.f32 %v7144_v22, %v1554_v47  ;;  %v2450_v21 = vor.u32 1.1754944e-38, %v2449_v5  ;;  %v9307_v47 = vld [vmem:[#allocation112_spill] sm:$0xff]  ;;  %vm7264_vm1 = vcmp.eq.f32.partialorder %v2679_v32, 8.507059e+37 }
 0x31c   :  { %9274 = vst [vmem:[#allocation116_spill] sm:$0xff] %v7179_v39  ;;  %v2366_v7 = vmul.f32 %v9281_v9, %v9280_v17  ;;  %v1389_v39 = vmul.f32 1.442695, %v1287_v40  ;;  %v9288_v40 = vld [vmem:[#allocation134_spill] sm:$0xff]  ;;  %v7228_v52 = vmul.f32 %v9294_v20, %v2685_v62  ;;  %v9302_v20 = vld [vmem:[#allocation69_spill] sm:$0xff]  ;;  %v9311_v5 = vld [vmem:[#allocation24_spill] sm:$0xff]  ;;  %vm2371_vm4 = vweird.f32 %v9281_v9 }
 0x31d   :  { %9287 = vst [vmem:[#allocation89_spill] sm:$0xff] %v7212_v49  ;;  %v7215_v45 = vmul.f32 %v9288_v40, %v2685_v62  ;;  %v1545_v2 = vsel %vm7205_vm11, %v7061_v55, %v1541_v10  ;;  %v9300_v49 = vld [vmem:[#allocation68_spill] sm:$0xff]  ;;  %v9301_v55 = vld [vmem:[#allocation115_spill] sm:$0xff]  ;;  %v2673_v10 = vmul.f32 %v6834_v24, %v2672_v36  ;;  %3050 = vmatpush.xpose.msra.mxu2 %v9303_v63  ;;  %v9313_v32 = vld [vmem:[#allocation25_spill] sm:$0xff]  ;;  %vm2602_vm11 = vweird.f32 %v9310_v57 }
 0x31e   :  { %9291 = vst [vmem:[#allocation129_spill] sm:$0xff] %v7218_v50  ;;  %2825 = vmatpush.xpose.msra.mxu0 %v9293_v29  ;;  %v7236_v50 = vpop.eup %4989  ;;  %2938 = vmatpush.xpose.msra.mxu1 %v9301_v55  ;;  %v2367_v62 = vsub.f32 1.0, %v2366_v7  ;;  %4993 = vpow2.f32 %v1389_v39  ;;  %v1550_v53 = vsel %vm1547_vm14, %v1549_v19, %v1545_v2  ;;  %v2446_v63 = vsel %vm7253_vm15, %v6767_v31, %v2442_v16  ;;  %v9312_v19 = vld [vmem:[#allocation113_spill] sm:$0xff]  ;;  %vm7353_vm10 = vmor %vm2370_vm2, %vm2371_vm4 }
 0x31f   :  { %9289 = vst [vmem:[#allocation44_spill] sm:$0xff] %v7215_v45  ;;  %v9299_v45 = vld [vmem:[#allocation140_spill] sm:$0xff]  ;;  %v7242_v29 = vpop.eup %4991  ;;  %4995 = vpow2.f32 %v1391_v46  ;;  %v1495_v39 = vadd.f32 %v7236_v50, %v7221_v61  ;;  %v7271_v36 = vmul.f32 %v9311_v5, %v9310_v57  ;;  %v7275_v2 = vpop.xlane.xlu2 %1454  ;;  %v2674_v31 = vadd.f32 %v6834_v24, %v2673_v10  ;;  %v9316_v10 = vld [vmem:[#allocation50_spill] sm:$0xff]  ;;  %v9323_v40 = vld [vmem:[#allocation73_spill] sm:$0xff] }
 0x320   :  { %9292 = vst [vmem:[#allocation75_spill] sm:$0xff] %v7221_v61  ;;  %v1289_v11 = vsub.f32 %v9300_v49, %v9299_v45  ;;  %v9304_v49 = vld [vmem:[#allocation54_spill] sm:$0xff]  ;;  %v1568_v46 = vmul.f32 %v7242_v29, %v7126_v1  ;;  %v2368_v16 = vmul.f32 %v9281_v9, %v2367_v62  ;;  %v2017_v55 = vmul.f32 %v9313_v32, %v1550_v53 }
 0x321   :  { %9295 = vst [vmem:[#allocation128_spill] sm:$0xff] %v7228_v52  ;;  %v1290_v52 = vsub.f32 %v9302_v20, %v9299_v45  ;;  %3163 = vmatpush.xpose.msra.mxu3 %v9304_v49  ;;  %v9314_v20 = vld [vmem:[#allocation28_spill] sm:$0xff]  ;;  %v1556_v12 = vadd.f32 %v7144_v22, %v1555_v44  ;;  %4997 = vrcp.f32 %v7195_v0  ;;  %v2374_v44 = vand.u32 2147483647, %v9280_v17 }
 0x322   :  { %9298 = vst [vmem:[#allocation48_spill] sm:$0xff] %v7236_v50  ;;  %2826 = vmatpush.xpose.msra.mxu0 %v9307_v47  ;;  %v1393_v7 = vmul.f32 1.442695, %v1289_v11  ;;  %2939 = vmatpush.xpose.msra.mxu1 %v9312_v19  ;;  %v7282_v49 = vmul.f32 %v9314_v20, %v1550_v53  ;;  %v1563_v47 = vand.u32 2147483648, %v7063_v35  ;;  %v9315_v19 = vld [vmem:[#allocation117_spill] sm:$0xff]  ;;  %v1569_v20 = vsub.f32 1.0, %v1568_v46 }
 0x323   :  { %1496 = vadd.xlane.f32.xlu2 %v1495_v39  ;;  %v1395_v11 = vmul.f32 1.442695, %v1290_v52  ;;  %3051 = vmatpush.xpose.msra.mxu2 %v9315_v19  ;;  %v1561_v53 = vand.u32 2147483647, %v7063_v35  ;;  %v2376_v39 = vand.u32 2147483648, %v9280_v17  ;;  %v2451_v58 = vsel %vm7231_vm13, %v2450_v21, %v2446_v63  ;;  %v9321_v46 = vld [vmem:[#allocation151_spill] sm:$0xff] }
 0x324   :  { %v7291_v62 = vpop.eup %4993  ;;  %v2678_v19 = vsel %vm7300_vm6, %v6834_v24, %v2674_v31  ;;  %4999 = vpow2.f32 %v1393_v7  ;;  %v2369_v61 = vadd.f32 %v9281_v9, %v2368_v16  ;;  %v1292_v21 = vsub.f32 %v9323_v40, %v9321_v46  ;;  %v9325_v24 = vld [vmem:[#allocation17_spill] sm:$0xff]  ;;  %v9338_v40 = vld [vmem:[#allocation76_spill] sm:$0xff] }
 0x325   :  { %3164 = vmatpush.xpose.msra.mxu3 %v9316_v10  ;;  %2827 = vmatmul.f32.vlgmr.msra.gmra.mxu0 %v2017_v55  ;;  %v7306_v32 = vpop.eup %4995  ;;  %v2599_v10 = vsub.f32 1.0, %v7271_v36  ;;  %5001 = vpow2.f32 %v1395_v11  ;;  %v1564_v63 = vor.u32 1.1754944e-38, %v1563_v47  ;;  %v2682_v36 = vor.u32 1.1754944e-38, %v2681_v51 }
 0x326   :  { %2940 = vmatmul.f32.vlgmr.msra.gmra.mxu1 %v7282_v49  ;;  %3519 = vmatpush.msra.mxu0 %v6839_v14  ;;  %v9322_v14 = vld [vmem:[#allocation72_spill] sm:$0xff]  ;;  %v1498_v7 = vadd.f32 %v7306_v32, %v7291_v62  ;;  %vm1562_vm8 = vcmp.eq.f32.partialorder %v1561_v53, 8.507059e+37  ;;  %vm7338_vm9 = vcmp.eq.f32.partialorder %v2374_v44, 8.507059e+37  ;;  %v2373_v45 = vsel %vm7353_vm10, %v9281_v9, %v2369_v61  ;;  %v9332_v9 = vld [vmem:[#allocation27_spill] sm:$0xff] }
 0x327   :  { %3632 = vmatpush.msra.mxu1 %v6794_v41  ;;  %v1291_v50 = vsub.f32 %v9322_v14, %v9321_v46  ;;  %v1560_v41 = vsel %vm7312_vm7, %v7144_v22, %v1556_v12  ;;  %3052 = vmatpush.xpose.msra.mxu2 %v9324_v4  ;;  %v7336_v22 = vmul.f32 0.17677669, %v2451_v58  ;;  %v7342_v16 = vpop.eup %4997  ;;  %v1570_v4 = vmul.f32 %v7242_v29, %v1569_v20  ;;  %v7345_v12 = vpop.xlane.xlu2 %1457  ;;  %v9330_v20 = vld [vmem:[#allocation83_spill] sm:$0xff]  ;;  %v9357_v14 = vld [vmem:[#allocation106_spill] sm:$0xff] }
 0x328   :  { %3520 = vmatpush.msra.mxu0 %v6850_v25  ;;  %v1565_v51 = vsel %vm1562_vm8, %v1564_v63, %v1560_v41  ;;  %v2683_v11 = vsel %vm7264_vm1, %v2682_v36, %v2678_v19  ;;  %v2606_v25 = vand.u32 2147483647, %v9310_v57  ;;  %v2377_v53 = vor.u32 1.1754944e-38, %v2376_v39  ;;  %v9337_v41 = vld [vmem:[#allocation158_spill] sm:$0xff]  ;;  %v9339_v63 = vld [vmem:[#allocation77_spill] sm:$0xff] }
 0x329   :  { %3165 = vmatpush.xpose.msra.mxu3 %v9325_v24  ;;  %3633 = vmatpush.msra.mxu1 %v6816_v59  ;;  %v1397_v47 = vmul.f32 1.442695, %v1291_v50  ;;  %v2600_v52 = vmul.f32 %v9311_v5, %v2599_v10  ;;  %v1399_v17 = vmul.f32 1.442695, %v1292_v21  ;;  %vm2603_vm12 = vweird.f32 %v9311_v5  ;;  %v9331_v50 = vld [vmem:[#allocation90_spill] sm:$0xff]  ;;  %v9334_v10 = vld [vmem:[#allocation32_spill] sm:$0xff] }
 0x32a   :  { %3521 = vmatpush.msra.mxu0 %v6853_v48  ;;  %3053 = vmatmul.f32.vlgmr.msra.gmra.mxu2 %v2017_v55  ;;  %v2608_v44 = vand.u32 2147483648, %v9310_v57  ;;  %v2381_v35 = vmul.f32 %v9331_v50, %v9330_v20  ;;  %v7369_v58 = vpop.eup %4999  ;;  %v1583_v48 = vmul.f32 %v7342_v16, %v7195_v0  ;;  %v7376_v61 = vmul.f32 %v9332_v9, %v1565_v51  ;;  %vm7443_vm2 = vmor %vm2602_vm11, %vm2603_vm12  ;;  %v9347_v57 = vld [vmem:[#allocation47_spill] sm:$0xff] }
 0x32b   :  { %1499 = vadd.xlane.f32.xlu2 %v1498_v7  ;;  %3634 = vmatpush.msra.mxu1 %v6819_v27  ;;  %v9333_v27 = vld [vmem:[#allocation37_spill] sm:$0xff]  ;;  %v7382_v39 = vmul.f32 0.17677669, %v2683_v11  ;;  %v7384_v19 = vpop.eup %5001  ;;  %v2020_v46 = vmul.f32 %v9334_v10, %v1565_v51  ;;  %vm1573_vm13 = vweird.f32 %v7242_v29  ;;  %vm7393_vm14 = vcmp.eq.f32.partialorder %v2606_v25, 8.507059e+37  ;;  %v9349_v10 = vld [vmem:[#allocation172_spill] sm:$0xff] }
 0x32c   :  { %3166 = vmatmul.f32.vlgmr.msra.gmra.mxu3 %v7282_v49  ;;  %3522 = vmatpush.msra.mxu0 %v6867_v23  ;;  %v7380_v55 = vmul.f32 %v9333_v27, %v7336_v22  ;;  %v1571_v49 = vadd.f32 %v7242_v29, %v1570_v4  ;;  %v2378_v23 = vsel %vm7338_vm9, %v2377_v53, %v2373_v45  ;;  %5003 = vpow2.f32 %v1397_v47  ;;  %v9346_v47 = vld [vmem:[#allocation154_spill] sm:$0xff] }
 0x32d   :  { %3635 = vmatpush.msra.mxu1 %v6842_v30  ;;  %3745 = vmatpush.msra.mxu2 %v6941_v8  ;;  %v1293_v21 = vsub.f32 %v9338_v40, %v9337_v41  ;;  %v1578_v30 = vand.u32 2147483648, %v7126_v1  ;;  %v2601_v8 = vadd.f32 %v9311_v5, %v2600_v52  ;;  %5005 = vpow2.f32 %v1399_v17 }
 0x32e   :  { %3858 = vmatpush.msra.mxu3 %v6904_v54  ;;  %2830 = vmatmul.f32.gmra.mxu0 %v7376_v61  ;;  %v1294_v24 = vsub.f32 %v9339_v63, %v9337_v41  ;;  %vm1572_vm15 = vweird.f32 %v7126_v1  ;;  %v1576_v36 = vand.u32 2147483647, %v7126_v1  ;;  %v1584_v7 = vsub.f32 1.0, %v1583_v48  ;;  %v9355_v63 = vld [vmem:[#allocation23_spill] sm:$0xff] }
 0x32f   :  { %2943 = vmatmul.f32.gmra.mxu1 %v2020_v46  ;;  %3523 = vmatpush.msra.mxu0 %v6951_v42  ;;  %5007 = vrcp.f32 %v7275_v2  ;;  %v1501_v54 = vadd.f32 %v7384_v19, %v7369_v58  ;;  %vm7415_vm1 = vmor %vm1572_vm15, %vm1573_vm13  ;;  %v2382_v4 = vsub.f32 1.0, %v2381_v35  ;;  %v7419_v42 = vpop.xlane.xlu2 %1460  ;;  %v2613_v11 = vmul.f32 %v6813_v28, %v6724_v38 }
 0x330   :  { %3636 = vmatpush.msra.mxu1 %v7067_v60  ;;  %3746 = vmatpush.msra.mxu2 %v6944_v3  ;;  %v1575_v1 = vsel %vm7415_vm1, %v7242_v29, %v1571_v49  ;;  %v7426_v60 = vmul.f32 0.17677669, %v2378_v23  ;;  %v9342_v3 = vld [vmem:[#allocation155_spill] sm:$0xff]  ;;  %v1401_v59 = vmul.f32 1.442695, %v1293_v21  ;;  %v1579_v25 = vor.u32 1.1754944e-38, %v1578_v30 }
 0x331   :  { %3859 = vmatpush.msra.mxu3 %v6912_v37  ;;  %3524 = vmatpush.msra.mxu0 %v6997_v26  ;;  %v7430_v51 = vmul.f32 %v9342_v3, %v7336_v22  ;;  %v9343_v37 = vld [vmem:[#allocation180_spill] sm:$0xff]  ;;  %v7449_v45 = vmul.f32 %v9346_v47, %v7336_v22  ;;  %v1403_v53 = vmul.f32 1.442695, %v1294_v24  ;;  %vm1577_vm3 = vcmp.eq.f32.partialorder %v1576_v36, 8.507059e+37  ;;  %v9351_v23 = vld [vmem:[#allocation45_spill] sm:$0xff]  ;;  %v9353_v21 = vld [vmem:[#allocation103_spill] sm:$0xff] }
 0x332   :  { %3637 = vmatpush.msra.mxu1 %v7070_v34  ;;  %v7437_v26 = vmul.f32 %v9343_v37, %v7382_v39  ;;  %3747 = vmatpush.msra.mxu2 %v6962_v6  ;;  %v2605_v34 = vsel %vm7443_vm2, %v9311_v5, %v2601_v8  ;;  %v7458_v52 = vmul.f32 %v9347_v57, %v7382_v39  ;;  %v7460_v17 = vpop.eup %5003  ;;  %v2609_v48 = vor.u32 1.1754944e-38, %v2608_v44  ;;  %v9348_v5 = vld [vmem:[#allocation122_spill] sm:$0xff]  ;;  %v9350_v44 = vld [vmem:[#allocation167_spill] sm:$0xff]  ;;  %v9354_v30 = vld [vmem:[#allocation21_spill] sm:$0xff] }
 0x333   :  { %1502 = vadd.xlane.f32.xlu2 %v1501_v54  ;;  %3860 = vmatpush.msra.mxu3 %v6928_v18  ;;  %v1585_v35 = vmul.f32 %v7342_v16, %v1584_v7  ;;  %v1580_v6 = vsel %vm1577_vm3, %v1579_v25, %v1575_v1  ;;  %v2383_v18 = vmul.f32 %v9331_v50, %v2382_v4  ;;  %v7466_v9 = vpop.eup %5005  ;;  %vm2385_vm4 = vweird.f32 %v9330_v20  ;;  %v9361_v29 = vld [vmem:[#allocation89_spill] sm:$0xff]  ;;  %v9362_v47 = vld [vmem:[#allocation107_spill] sm:$0xff] }
 0x334   :  { %3525 = vmatpush.msra.mxu0 %v7007_v33  ;;  %3638 = vmatpush.msra.mxu1 %v7073_v43  ;;  %v7472_v27 = vmul.f32 %v9348_v5, %v7426_v60  ;;  %v7476_v49 = vmul.f32 %v9349_v10, %v7382_v39  ;;  %v2614_v43 = vsub.f32 1.0, %v2613_v11  ;;  %5009 = vpow2.f32 %v1401_v59  ;;  %v9358_v11 = vld [vmem:[#allocation52_spill] sm:$0xff] }
 0x335   :  { %3748 = vmatpush.msra.mxu2 %v6965_v15  ;;  %3861 = vmatpush.msra.mxu3 %v6931_v13  ;;  %v7479_v33 = vpop.eup %5007  ;;  %v1295_v41 = vsub.f32 %v9351_v23, %v9350_v44  ;;  %v2610_v13 = vsel %vm7393_vm14, %v2609_v48, %v2605_v34  ;;  %vm2386_vm5 = vweird.f32 %v9331_v50  ;;  %5011 = vpow2.f32 %v1403_v53  ;;  %v9352_v15 = vld [vmem:[#allocation30_spill] sm:$0xff]  ;;  %v9365_v34 = vld [vmem:[#allocation121_spill] sm:$0xff]  ;;  %v9366_v48 = vld [vmem:[#allocation79_spill] sm:$0xff] }
 0x336   :  { %3056 = vmatmul.f32.gmra.mxu2 %v7376_v61  ;;  %3169 = vmatmul.f32.gmra.mxu3 %v2020_v46  ;;  %v1296_v40 = vsub.f32 %v9352_v15, %v9350_v44  ;;  %v2021_v8 = vmul.f32 %v9354_v30, %v1580_v6  ;;  %v7493_v24 = vmul.f32 %v9355_v63, %v1580_v6  ;;  %v9356_v46 = vld [vmem:[#allocation102_spill] sm:$0xff]  ;;  %vm1588_vm6 = vweird.f32 %v7342_v16  ;;  %vm7518_vm8 = vmor %vm2385_vm4, %vm2386_vm5  ;;  %v9368_v23 = vld [vmem:[#allocation44_spill] sm:$0xff] }
 0x337   :  { %3526 = vmatpush.msra.mxu0 %v7027_v56  ;;  %3639 = vmatpush.msra.mxu1 %v9353_v21  ;;  %v1504_v61 = vadd.f32 %v7466_v9, %v7460_v17  ;;  %v1586_v36 = vadd.f32 %v7342_v16, %v1585_v35  ;;  %v2384_v56 = vadd.f32 %v9331_v50, %v2383_v18  ;;  %v1593_v7 = vand.u32 2147483648, %v7195_v0  ;;  %v7505_v31 = vpop.xlane.xlu2 %1463  ;;  %v9367_v18 = vld [vmem:[#allocation42_spill] sm:$0xff] }
 0x338   :  { %3749 = vmatpush.msra.mxu2 %v9356_v46  ;;  %3862 = vmatpush.msra.mxu3 %v9357_v14  ;;  %v1598_v54 = vmul.f32 %v7479_v33, %v7275_v2  ;;  %v2391_v4 = vand.u32 2147483648, %v9330_v20  ;;  %v2615_v1 = vmul.f32 %v6813_v28, %v2614_v43  ;;  %v1405_v3 = vmul.f32 1.442695, %v1295_v41  ;;  %v9369_v41 = vld [vmem:[#allocation131_spill] sm:$0xff]  ;;  %v9373_v30 = vld [vmem:[#allocation178_spill] sm:$0xff]  ;;  %v9375_v14 = vld [vmem:[#allocation129_spill] sm:$0xff] }
 0x339   :  { %2833 = vmatmul.f32.gmra.mxu0 %v2021_v8  ;;  %2946 = vmatmul.f32.gmra.mxu1 %v7493_v24  ;;  %vm1587_vm7 = vweird.f32 %v7195_v0  ;;  %5013 = vrcp.f32 %v7345_v12  ;;  %v1591_v59 = vand.u32 2147483647, %v7195_v0  ;;  %v1407_v37 = vmul.f32 1.442695, %v1296_v40  ;;  %v9371_v40 = vld [vmem:[#allocation38_spill] sm:$0xff] }
 0x33a   :  { %3527 = vmatpush.msra.mxu0 %v9358_v11  ;;  %3640 = vmatpush.msra.mxu1 %v9361_v29  ;;  %vm7526_vm9 = vmor %vm1587_vm7, %vm1588_vm6  ;;  %v7530_v0 = vmul.f32 0.17677669, %v2610_v13  ;;  %v7534_v57 = vmul.f32 %v9365_v34, %v7426_v60  ;;  %v2389_v35 = vand.u32 2147483647, %v9330_v20  ;;  %v7537_v6 = vpop.eup %5009  ;;  %v2388_v10 = vsel %vm7518_vm8, %v9331_v50, %v2384_v56  ;;  %v9372_v50 = vld [vmem:[#allocation35_spill] sm:$0xff] }
 0x33b   :  { %1505 = vadd.xlane.f32.xlu2 %v1504_v61  ;;  %3750 = vmatpush.msra.mxu2 %v9362_v47  ;;  %v1590_v5 = vsel %vm7526_vm9, %v7342_v16, %v1586_v36  ;;  %vm2617_vm10 = vweird.f32 %v6724_v38  ;;  %vm2618_vm11 = vweird.f32 %v6813_v28  ;;  %v7549_v43 = vpop.eup %5011  ;;  %v1594_v20 = vor.u32 1.1754944e-38, %v1593_v7  ;;  %v9370_v16 = vld [vmem:[#allocation176_spill] sm:$0xff]  ;;  %v9374_v61 = vld [vmem:[#allocation43_spill] sm:$0xff] }
 0x33c   :  { %3863 = vmatpush.msra.mxu3 %v9366_v48  ;;  %3528 = vmatpush.msra.mxu0 %v9367_v18  ;;  %v1599_v44 = vsub.f32 1.0, %v1598_v54  ;;  %v2392_v13 = vor.u32 1.1754944e-38, %v2391_v4  ;;  %v2616_v15 = vadd.f32 %v6813_v28, %v2615_v1  ;;  %5015 = vpow2.f32 %v1405_v3  ;;  %v9376_v36 = vld [vmem:[#allocation156_spill] sm:$0xff]  ;;  %v9377_v1 = vld [vmem:[#allocation162_spill] sm:$0xff]  ;;  %v9378_v3 = vld [vmem:[#allocation19_spill] sm:$0xff] }
 0x33d   :  { %3641 = vmatpush.msra.mxu1 %v9368_v23  ;;  %3751 = vmatpush.msra.mxu2 %v9369_v41  ;;  %v1297_v21 = vsub.f32 %v9371_v40, %v9370_v16  ;;  %vm1592_vm12 = vcmp.eq.f32.partialorder %v1591_v59, 8.507059e+37  ;;  %v2623_v63 = vand.u32 2147483648, %v6724_v38  ;;  %5017 = vpow2.f32 %v1407_v37  ;;  %v9379_v59 = vld [vmem:[#allocation120_spill] sm:$0xff]  ;;  %vm7577_vm14 = vmor %vm2617_vm10, %vm2618_vm11  ;;  %v9384_v48 = vld [vmem:[#allocation138_spill] sm:$0xff] }
 0x33e   :  { %3864 = vmatpush.msra.mxu3 %v9372_v50  ;;  %3529 = vmatpush.msra.mxu0 %v9373_v30  ;;  %v1298_v46 = vsub.f32 %v9374_v61, %v9370_v16  ;;  %v1595_v56 = vsel %vm1592_vm12, %v1594_v20, %v1590_v5  ;;  %v2621_v7 = vand.u32 2147483647, %v6724_v38  ;;  %v1507_v4 = vadd.f32 %v7549_v43, %v7537_v6  ;;  %v9383_v38 = vld [vmem:[#allocation128_spill] sm:$0xff]  ;;  %v9385_v5 = vld [vmem:[#allocation139_spill] sm:$0xff]  ;;  %v9389_v30 = vld [vmem:[#allocation49_spill] sm:$0xff] }
 0x33f   :  { %3642 = vmatpush.msra.mxu1 %v9375_v14  ;;  %3752 = vmatpush.msra.mxu2 %v9376_v36  ;;  %v7564_v54 = vpop.eup %5013  ;;  %v2635_v11 = vmul.f32 %v9378_v3, %v7530_v0  ;;  %v2399_v25 = vmul.f32 %v9379_v59, %v7426_v60  ;;  %vm2390_vm13 = vcmp.eq.f32.partialorder %v2389_v35, 8.507059e+37  ;;  %v1600_v29 = vmul.f32 %v7479_v33, %v1599_v44  ;;  %v7582_v47 = vpop.xlane.xlu2 %1466  ;;  %v9388_v16 = vld [vmem:[#allocation16_spill] sm:$0xff]  ;;  %v9390_v61 = vld [vmem:[#allocation14_spill] sm:$0xff] }
 0x340   :  { %3865 = vmatpush.msra.mxu3 %v9377_v1  ;;  %3059 = vmatmul.f32.gmra.mxu2 %v2021_v8  ;;  %v9382_v8 = vld [vmem:[#allocation116_spill] sm:$0xff]  ;;  %v2393_v53 = vsel %vm2390_vm13, %v2392_v13, %v2388_v10  ;;  %v2620_v34 = vsel %vm7577_vm14, %v6813_v28, %v2616_v15  ;;  %v1409_v35 = vmul.f32 1.442695, %v1297_v21  ;;  %v2023_v18 = vmul.f32 %v9384_v48, %v1595_v56  ;;  %v9387_v13 = vld [vmem:[#allocation46_spill] sm:$0xff]  ;;  %v9400_v48 = vld [vmem:[#allocation149_spill] sm:$0xff] }
 0x341   :  { %3172 = vmatmul.f32.gmra.mxu3 %v7493_v24  ;;  %3530 = vmatpush.msra.mxu0 %v9382_v8  ;;  %v2024_v20 = vmul.f32 %v9385_v5, %v1595_v56  ;;  %v2624_v44 = vor.u32 1.1754944e-38, %v2623_v63  ;;  %v1411_v23 = vmul.f32 1.442695, %v1298_v46  ;;  %v1608_v41 = vand.u32 2147483648, %v7275_v2  ;;  %v9386_v10 = vld [vmem:[#allocation184_spill] sm:$0xff] }
 0x342   :  { %3643 = vmatpush.msra.mxu1 %v9383_v38  ;;  %v1613_v24 = vmul.f32 %v7564_v54, %v7345_v12  ;;  %3753 = vmatpush.msra.mxu2 %v7380_v55  ;;  %vm2622_vm15 = vcmp.eq.f32.partialorder %v2621_v7, 8.507059e+37  ;;  %v7597_v28 = vpop.eup %5015  ;;  %v1299_v15 = vsub.f32 %v9387_v13, %v9386_v10  ;;  %5019 = vrcp.f32 %v7419_v42  ;;  %v9393_v56 = vld [vmem:[#allocation152_spill] sm:$0xff]  ;;  %v9404_v13 = vld [vmem:[#allocation86_spill] sm:$0xff] }
 0x343   :  { %1508 = vadd.xlane.f32.xlu2 %v1507_v4  ;;  %3866 = vmatpush.msra.mxu3 %v7437_v26  ;;  %v2633_v40 = vmul.f32 %v9388_v16, %v7530_v0  ;;  %v2625_v21 = vsel %vm2622_vm15, %v2624_v44, %v2620_v34  ;;  %v7604_v50 = vpop.eup %5017  ;;  %vm1602_vm1 = vweird.f32 %v7275_v2  ;;  %v1601_v55 = vadd.f32 %v7479_v33, %v1600_v29  ;;  %v9405_v16 = vld [vmem:[#allocation87_spill] sm:$0xff] }
 0x344   :  { %2836 = vmatmul.f32.gmra.mxu0 %v2023_v18  ;;  %2949 = vmatmul.f32.gmra.mxu1 %v2024_v20  ;;  %vm1603_vm2 = vweird.f32 %v7479_v33  ;;  %v1606_v26 = vand.u32 2147483647, %v7275_v2  ;;  %5021 = vpow2.f32 %v1409_v35  ;;  %v1300_v63 = vsub.f32 %v9389_v30, %v9386_v10 }
 0x345   :  { %3531 = vmatpush.msra.mxu0 %v7472_v27  ;;  %3644 = vmatpush.msra.mxu1 %v2635_v11  ;;  %v2631_v46 = vmul.f32 %v9390_v61, %v7530_v0  ;;  %v7617_v14 = vmul.f32 0.17677669, %v2393_v53  ;;  %vm7619_vm3 = vmor %vm1602_vm1, %vm1603_vm2  ;;  %5023 = vpow2.f32 %v1411_v23  ;;  %v1609_v36 = vor.u32 1.1754944e-38, %v1608_v41  ;;  %v9401_v23 = vld [vmem:[#allocation150_spill] sm:$0xff] }
 0x346   :  { %3754 = vmatpush.msra.mxu2 %v7430_v51  ;;  %3867 = vmatpush.msra.mxu3 %v7458_v52  ;;  %v1614_v2 = vsub.f32 1.0, %v1613_v24  ;;  %v1605_v51 = vsel %vm7619_vm3, %v7479_v33, %v1601_v55  ;;  %v1510_v52 = vadd.f32 %v7604_v50, %v7597_v28  ;;  %v2456_v7 = vmul.f32 %v9393_v56, %v7336_v22  ;;  %v9396_v22 = vld [vmem:[#allocation132_spill] sm:$0xff]  ;;  %v9402_v24 = vld [vmem:[#allocation146_spill] sm:$0xff] }
 0x347   :  { %3532 = vmatpush.msra.mxu0 %v7534_v57  ;;  %3645 = vmatpush.msra.mxu1 %v2633_v40  ;;  %v2628_v4 = vmul.f32 0.17677669, %v2625_v21  ;;  %vm1607_vm4 = vcmp.eq.f32.partialorder %v1606_v26, 8.507059e+37  ;;  %v1413_v1 = vmul.f32 1.442695, %v1299_v15  ;;  %v7633_v3 = vpop.xlane.xlu2 %1469  ;;  %v9394_v57 = vld [vmem:[#allocation171_spill] sm:$0xff]  ;;  %v2629_v29 = vmul.f32 %v9396_v22, %v7530_v0 }
 0x348   :  { %3755 = vmatpush.msra.mxu2 %v7449_v45  ;;  %3868 = vmatpush.msra.mxu3 %v7476_v49  ;;  %v2688_v33 = vmul.f32 %v9394_v57, %v7382_v39  ;;  %v1610_v11 = vsel %vm1607_vm4, %v1609_v36, %v1605_v51  ;;  %v7637_v59 = vpop.eup %5019  ;;  %v1415_v37 = vmul.f32 1.442695, %v1300_v63  ;;  %v9395_v45 = vld [vmem:[#allocation119_spill] sm:$0xff]  ;;  %v1615_v8 = vmul.f32 %v7564_v54, %v1614_v2  ;;  %v9406_v21 = vld [vmem:[#allocation41_spill] sm:$0xff] }
 0x349   :  { %3533 = vmatpush.msra.mxu0 %v2399_v25  ;;  %3646 = vmatpush.msra.mxu1 %v2631_v46  ;;  %v2397_v49 = vmul.f32 %v9395_v45, %v7426_v60  ;;  %v9397_v25 = vld [vmem:[#allocation148_spill] sm:$0xff]  ;;  %v9398_v39 = vld [vmem:[#allocation147_spill] sm:$0xff]  ;;  %v1623_v38 = vand.u32 2147483648, %v7345_v12  ;;  %5025 = vrcp.f32 %v7505_v31  ;;  %v2025_v5 = vmul.f32 %v9400_v48, %v1610_v11  ;;  %v9408_v51 = vld [vmem:[#allocation145_spill] sm:$0xff] }
 0x34a   :  { %3756 = vmatpush.msra.mxu2 %v2456_v7  ;;  %3869 = vmatpush.msra.mxu3 %v2688_v33  ;;  %v2404_v53 = vmul.f32 %v9397_v25, %v7617_v14  ;;  %v2402_v34 = vmul.f32 %v9398_v39, %v7617_v14  ;;  %v7648_v35 = vpop.eup %5021  ;;  %v9399_v60 = vld [vmem:[#allocation179_spill] sm:$0xff]  ;;  %5027 = vpow2.f32 %v1413_v1  ;;  %v2026_v41 = vmul.f32 %v9401_v23, %v1610_v11  ;;  %v9407_v46 = vld [vmem:[#allocation164_spill] sm:$0xff] }
 0x34b   :  { %1511 = vadd.xlane.f32.xlu2 %v1510_v52  ;;  %3062 = vmatmul.f32.gmra.mxu2 %v2023_v18  ;;  %v2636_v0 = vmul.f32 %v9399_v60, %v2628_v4  ;;  %v7654_v44 = vpop.eup %5023  ;;  %v1628_v18 = vmul.f32 %v7637_v59, %v7419_v42  ;;  %v2400_v10 = vmul.f32 %v9402_v24, %v7617_v14  ;;  %5029 = vpow2.f32 %v1415_v37  ;;  %v9409_v1 = vld [vmem:[#allocation163_spill] sm:$0xff]  ;;  %v9413_v25 = vld [vmem:[#allocation96_spill] sm:$0xff] }
 0x34c   :  { %3175 = vmatmul.f32.gmra.mxu3 %v2024_v20  ;;  %3534 = vmatpush.msra.mxu0 %v2397_v49  ;;  %v9403_v20 = vld [vmem:[#allocation188_spill] sm:$0xff]  ;;  %v2634_v55 = vmul.f32 %v9406_v21, %v2628_v4  ;;  %vm1617_vm5 = vweird.f32 %v7345_v12  ;;  %v1616_v26 = vadd.f32 %v7564_v54, %v1615_v8  ;;  %vm1618_vm6 = vweird.f32 %v7564_v54  ;;  %v9412_v8 = vld [vmem:[#allocation194_spill] sm:$0xff] }
 0x34d   :  { %3647 = vmatpush.msra.mxu1 %v2629_v29  ;;  %3757 = vmatpush.msra.mxu2 %v2404_v53  ;;  %v1303_v15 = vsub.f32 %v9404_v13, %v9403_v20  ;;  %v1304_v40 = vsub.f32 %v9405_v16, %v9403_v20  ;;  %v1621_v30 = vand.u32 2147483647, %v7345_v12  ;;  %v1624_v63 = vor.u32 1.1754944e-38, %v1623_v38  ;;  %vm1619_vm7 = vmor %vm1617_vm5, %vm1618_vm6  ;;  %v1248_v20 = vpop.xlane.xlu1 %1247 }
 0x34e   :  { %3870 = vmatpush.msra.mxu3 %v2636_v0  ;;  %2839 = vmatmul.f32.gmra.mxu0 %v2025_v5  ;;  %v1513_v61 = vadd.f32 %v7654_v44, %v7648_v35  ;;  %v2632_v27 = vmul.f32 %v9407_v46, %v2628_v4  ;;  %v1629_v36 = vsub.f32 1.0, %v1628_v18  ;;  %v2398_v52 = vmul.f32 %v9408_v51, %v7617_v14  ;;  %v9418_v46 = vld [vmem:[#allocation110_spill] sm:$0xff] }
 0x34f   :  { %2952 = vmatmul.f32.gmra.mxu1 %v2026_v41  ;;  %3758 = vmatpush.msra.mxu2 %v2402_v34  ;;  %v7673_v2 = vpop.xlane.xlu2 %1472  ;;  %v1620_v56 = vsel %vm1619_vm7, %v7564_v54, %v1616_v26  ;;  %vm1622_vm8 = vcmp.eq.f32.partialorder %v1621_v30, 8.507059e+37  ;;  %v7678_v7 = vpop.eup %5025  ;;  %v1421_v12 = vmul.f32 1.442695, %v1303_v15  ;;  %v2630_v57 = vmul.f32 %v9409_v1, %v2628_v4  ;;  %v9410_v54 = vld [vmem:[#allocation157_spill] sm:$0xff]  ;;  %v9411_v4 = vld [vmem:[#allocation39_spill] sm:$0xff]  ;;  %v9416_v30 = vld [vmem:[#allocation166_spill] sm:$0xff] }
 0x350   :  { %3871 = vmatpush.msra.mxu3 %v2634_v55  ;;  %v1625_v33 = vsel %vm1622_vm8, %v1624_v63, %v1620_v56  ;;  %v7681_v11 = vpop.eup %5027  ;;  %v1423_v37 = vmul.f32 1.442695, %v1304_v40  ;;  %5031 = vrcp.f32 %v7582_v47  ;;  %v1630_v49 = vmul.f32 %v7637_v59, %v1629_v36  ;;  %v9414_v34 = vld [vmem:[#allocation97_spill] sm:$0xff] }
 0x351   :  { %3759 = vmatpush.msra.mxu2 %v2400_v10  ;;  %v7683_v45 = vpop.eup %5029  ;;  %v2027_v14 = vmul.f32 %v9410_v54, %v1625_v33  ;;  %v1643_v22 = vmul.f32 %v7678_v7, %v7505_v31  ;;  %v2028_v29 = vmul.f32 %v9411_v4, %v1625_v33  ;;  %5033 = vpow2.f32 %v1421_v12  ;;  %v9415_v55 = vld [vmem:[#allocation165_spill] sm:$0xff] }
 0x352   :  { %3872 = vmatpush.msra.mxu3 %v2632_v27  ;;  %v1307_v53 = vsub.f32 %v9413_v25, %v9412_v8  ;;  %v1638_v39 = vand.u32 2147483648, %v7419_v42  ;;  %5035 = vpow2.f32 %v1423_v37  ;;  %v1308_v38 = vsub.f32 %v9414_v34, %v9412_v8  ;;  %v9419_v25 = vld [vmem:[#allocation174_spill] sm:$0xff] }
 0x353   :  { %1514 = vadd.xlane.f32.xlu2 %v1513_v61  ;;  %3760 = vmatpush.msra.mxu2 %v2398_v52  ;;  %v1636_v60 = vand.u32 2147483647, %v7419_v42  ;;  %v1516_v0 = vadd.f32 %v7683_v45, %v7681_v11  ;;  %vm1632_vm9 = vweird.f32 %v7419_v42  ;;  %v1644_v48 = vsub.f32 1.0, %v1643_v22 }
 0x354   :  { %3873 = vmatpush.msra.mxu3 %v2630_v57  ;;  %3065 = vmatmul.f32.gmra.mxu2 %v2025_v5  ;;  %v1631_v18 = vadd.f32 %v7637_v59, %v1630_v49  ;;  %vm1633_vm10 = vweird.f32 %v7637_v59  ;;  %v1639_v24 = vor.u32 1.1754944e-38, %v1638_v39  ;;  %v1431_v10 = vmul.f32 1.442695, %v1308_v38 }
 0x355   :  { %3178 = vmatmul.f32.gmra.mxu3 %v2026_v41  ;;  %v1429_v41 = vmul.f32 1.442695, %v1307_v53  ;;  %vm1634_vm11 = vmor %vm1632_vm9, %vm1633_vm10  ;;  %vm1637_vm12 = vcmp.eq.f32.partialorder %v1636_v60, 8.507059e+37  ;;  %5037 = vrcp.f32 %v7633_v3  ;;  %v1645_v40 = vmul.f32 %v7678_v7, %v1644_v48  ;;  %v9420_v53 = vld [vmem:[#allocation175_spill] sm:$0xff] }
 0x356   :  { %2842 = vmatmul.f32.gmra.mxu0 %v2027_v14  ;;  %v7704_v23 = vpop.eup %5031  ;;  %v1635_v13 = vsel %vm1634_vm11, %v7637_v59, %v1631_v18  ;;  %v9417_v59 = vld [vmem:[#allocation109_spill] sm:$0xff]  ;;  %v1312_v27 = vsub.f32 %v9418_v46, %v1248_v20  ;;  %v1653_v36 = vand.u32 2147483648, %v7505_v31  ;;  %v1651_v52 = vand.u32 2147483647, %v7505_v31 }
 0x357   :  { %2955 = vmatmul.f32.gmra.mxu1 %v2028_v29  ;;  %v7700_v5 = vpop.xlane.xlu2 %1475  ;;  %v7707_v15 = vpop.eup %5033  ;;  %v1640_v42 = vsel %vm1637_vm12, %v1639_v24, %v1635_v13  ;;  %v1658_v21 = vmul.f32 %v7704_v23, %v7582_v47  ;;  %5039 = vpow2.f32 %v1429_v41  ;;  %v1311_v61 = vsub.f32 %v9417_v59, %v1248_v20 }
 0x358   :  { %v7710_v16 = vpop.eup %5035  ;;  %v2029_v26 = vmul.f32 %v9415_v55, %v1640_v42  ;;  %v2030_v63 = vmul.f32 %v9416_v30, %v1640_v42  ;;  %5041 = vpow2.f32 %v1431_v10  ;;  %vm1647_vm13 = vweird.f32 %v7505_v31  ;;  %v9422_v55 = vld [vmem:[#allocation183_spill] sm:$0xff] }
 0x359   :  { %v1522_v51 = vadd.f32 %v7710_v16, %v7707_v15  ;;  %v1659_v56 = vsub.f32 1.0, %v1658_v21  ;;  %v1646_v12 = vadd.f32 %v7678_v7, %v1645_v40  ;;  %vm1648_vm14 = vweird.f32 %v7678_v7  ;;  %v9421_v21 = vld [vmem:[#allocation182_spill] sm:$0xff] }
 0x35a   :  { %v1437_v57 = vmul.f32 1.442695, %v1311_v61  ;;  %vm1649_vm15 = vmor %vm1647_vm13, %vm1648_vm14  ;;  %v1439_v33 = vmul.f32 1.442695, %v1312_v27  ;;  %v1654_v37 = vor.u32 1.1754944e-38, %v1653_v36  ;;  %5043 = vrcp.f32 %v7673_v2 }
 0x35b   :  { %1517 = vadd.xlane.f32.xlu2 %v1516_v0  ;;  %v7726_v1 = vpop.eup %5037  ;;  %vm1652_vm1 = vcmp.eq.f32.partialorder %v1651_v52, 8.507059e+37  ;;  %v1660_v22 = vmul.f32 %v7704_v23, %v1659_v56  ;;  %v1668_v8 = vand.u32 2147483648, %v7582_v47  ;;  %v1666_v34 = vand.u32 2147483647, %v7582_v47 }
 0x35c   :  { %3068 = vmatmul.f32.gmra.mxu2 %v2027_v14  ;;  %v1650_v14 = vsel %vm1649_vm15, %v7678_v7, %v1646_v12  ;;  %v1673_v4 = vmul.f32 %v7726_v1, %v7633_v3  ;;  %5045 = vpow2.f32 %v1437_v57  ;;  %vm1662_vm2 = vweird.f32 %v7582_v47  ;;  %v9423_v57 = vld [vmem:[#allocation123_spill] sm:$0xff] }
 0x35d   :  { %3181 = vmatmul.f32.gmra.mxu3 %v2028_v29  ;;  %v7731_v49 = vpop.eup %5039  ;;  %v1655_v29 = vsel %vm1652_vm1, %v1654_v37, %v1650_v14  ;;  %5047 = vpow2.f32 %v1439_v33  ;;  %v1661_v0 = vadd.f32 %v7704_v23, %v1660_v22  ;;  %vm1663_vm3 = vweird.f32 %v7704_v23  ;;  %v9424_v37 = vld [vmem:[#allocation186_spill] sm:$0xff] }
 0x35e   :  { %2845 = vmatmul.f32.gmra.mxu0 %v2029_v26  ;;  %v7734_v31 = vpop.eup %5041  ;;  %v2031_v7 = vmul.f32 %v9419_v25, %v1655_v29  ;;  %v2032_v39 = vmul.f32 %v9420_v53, %v1655_v29  ;;  %v1674_v60 = vsub.f32 1.0, %v1673_v4  ;;  %v1669_v18 = vor.u32 1.1754944e-38, %v1668_v8  ;;  %vm1664_vm4 = vmor %vm1662_vm2, %vm1663_vm3 }
 0x35f   :  { %2958 = vmatmul.f32.gmra.mxu1 %v2030_v63  ;;  %v7728_v54 = vpop.xlane.xlu2 %1478  ;;  %v1528_v38 = vadd.f32 %v7734_v31, %v7731_v49  ;;  %v1665_v41 = vsel %vm1664_vm4, %v7704_v23, %v1661_v0  ;;  %vm1667_vm5 = vcmp.eq.f32.partialorder %v1666_v34, 8.507059e+37  ;;  %5049 = vrcp.f32 %v7700_v5  ;;  %v9426_v0 = vld [vmem:[#allocation187_spill] sm:$0xff] }
 0x360   :  { %v5044_v48 = vpop.eup %5043  ;;  %v1670_v10 = vsel %vm1667_vm5, %v1669_v18, %v1665_v41  ;;  %v1675_v47 = vmul.f32 %v7726_v1, %v1674_v60  ;;  %v1683_v40 = vand.u32 2147483648, %v7633_v3  ;;  %v1681_v30 = vand.u32 2147483647, %v7633_v3 }
 0x361   :  { %v1688_v13 = vmul.f32 %v5044_v48, %v7673_v2  ;;  %v2033_v23 = vmul.f32 %v9421_v21, %v1670_v10  ;;  %vm1677_vm6 = vweird.f32 %v7633_v3  ;;  %vm1678_vm7 = vweird.f32 %v7726_v1 }
 0x362   :  { %v7749_v24 = vpop.eup %5045  ;;  %v1676_v61 = vadd.f32 %v7726_v1, %v1675_v47  ;;  %v1684_v27 = vor.u32 1.1754944e-38, %v1683_v40  ;;  %vm1679_vm8 = vmor %vm1677_vm6, %vm1678_vm7  ;;  %vm1682_vm9 = vcmp.eq.f32.partialorder %v1681_v30, 8.507059e+37  ;;  %5051 = vrcp.f32 %v7728_v54  ;;  %v9427_v30 = vld [vmem:[#allocation190_spill] sm:$0xff] }
 0x363   :  { %1523 = vadd.xlane.f32.xlu2 %v1522_v51  ;;  %v7752_v20 = vpop.eup %5047  ;;  %v1689_v59 = vsub.f32 1.0, %v1688_v13  ;;  %v1698_v12 = vand.u32 2147483648, %v7673_v2  ;;  %v1696_v22 = vand.u32 2147483647, %v7673_v2  ;;  %vm1692_vm10 = vweird.f32 %v7673_v2 }
 0x364   :  { %3071 = vmatmul.f32.gmra.mxu2 %v2029_v26  ;;  %v2034_v26 = vmul.f32 %v9422_v55, %v1670_v10  ;;  %v1680_v36 = vsel %vm1679_vm8, %v7726_v1, %v1676_v61  ;;  %vm1693_vm11 = vweird.f32 %v5044_v48  ;;  %v1713_v2 = vand.u32 2147483648, %v7700_v5 }
 0x365   :  { %3184 = vmatmul.f32.gmra.mxu3 %v2030_v63  ;;  %v1534_v63 = vadd.f32 %v7752_v20, %v7749_v24  ;;  %v5050_v46 = vpop.eup %5049  ;;  %v1685_v51 = vsel %vm1682_vm9, %v1684_v27, %v1680_v36  ;;  %v1690_v52 = vmul.f32 %v5044_v48, %v1689_v59  ;;  %v1699_v8 = vor.u32 1.1754944e-38, %v1698_v12  ;;  %vm1694_vm12 = vmor %vm1692_vm10, %vm1693_vm11  ;;  %v9428_v59 = vld [vmem:[#allocation191_spill] sm:$0xff] }
 0x366   :  { %2848 = vmatmul.f32.gmra.mxu0 %v2031_v7  ;;  %v1703_v56 = vmul.f32 %v5050_v46, %v7700_v5  ;;  %v2035_v33 = vmul.f32 %v9423_v57, %v1685_v51  ;;  %v2036_v14 = vmul.f32 %v9424_v37, %v1685_v51  ;;  %vm1697_vm13 = vcmp.eq.f32.partialorder %v1696_v22, 8.507059e+37 }
 0x367   :  { %2961 = vmatmul.f32.gmra.mxu1 %v2032_v39  ;;  %v1691_v4 = vadd.f32 %v5044_v48, %v1690_v52  ;;  %v1711_v41 = vand.u32 2147483647, %v7700_v5  ;;  %vm1707_vm14 = vweird.f32 %v7700_v5  ;;  %vm1708_vm15 = vweird.f32 %v5050_v46 }
 0x368   :  { %v7756_v42 = vpop.xlane.xlu2 %1481  ;;  %v1704_v1 = vsub.f32 1.0, %v1703_v56  ;;  %v5052_v29 = vpop.eup %5051  ;;  %v1714_v13 = vor.u32 1.1754944e-38, %v1713_v2  ;;  %vm1709_vm1 = vmor %vm1707_vm14, %vm1708_vm15  ;;  %v1728_v5 = vand.u32 2147483648, %v7728_v54  ;;  %v1726_v27 = vand.u32 2147483647, %v7728_v54 }
 0x369   :  { %v1695_v25 = vsel %vm1694_vm12, %v5044_v48, %v1691_v4  ;;  %5053 = vrcp.f32 %v7756_v42  ;;  %vm1712_vm2 = vcmp.eq.f32.partialorder %v1711_v41, 8.507059e+37  ;;  %vm1722_vm3 = vweird.f32 %v7728_v54 }
 0x36a   :  { %v1705_v53 = vmul.f32 %v5050_v46, %v1704_v1  ;;  %vm1723_vm4 = vweird.f32 %v5052_v29  ;;  %v1729_v52 = vor.u32 1.1754944e-38, %v1728_v5  ;;  %vm1727_vm6 = vcmp.eq.f32.partialorder %v1726_v27, 8.507059e+37  ;;  %v9430_v1 = vld [vmem:[#allocation193_spill] sm:$0xff] }
 0x36b   :  { %1529 = vadd.xlane.f32.xlu2 %v1528_v38  ;;  %v9425_v38 = vld [vmem:[#allocation85_spill] sm:$0xff]  ;;  %vm1724_vm5 = vmor %vm1722_vm3, %vm1723_vm4  ;;  %vm1737_vm7 = vweird.f32 %v7756_v42 }
 0x36c   :  { %3074 = vmatmul.f32.gmra.mxu2 %v2031_v7  ;;  %v1700_v7 = vsel %vm1697_vm13, %v1699_v8, %v1695_v25  ;;  %v1706_v10 = vadd.f32 %v5050_v46, %v1705_v53 }
 0x36d   :  { %3187 = vmatmul.f32.gmra.mxu3 %v2032_v39  ;;  %v1718_v39 = vmul.f32 %v5052_v29, %v7728_v54  ;;  %v2037_v60 = vmul.f32 %v9425_v38, %v1700_v7  ;;  %v2038_v18 = vmul.f32 %v9426_v0, %v1700_v7  ;;  %v1743_v54 = vand.u32 2147483648, %v7756_v42 }
 0x36e   :  { %2851 = vmatmul.f32.gmra.mxu0 %v2033_v23  ;;  %v1710_v40 = vsel %vm1709_vm1, %v5050_v46, %v1706_v10 }
 0x36f   :  { %2964 = vmatmul.f32.gmra.mxu1 %v2034_v26  ;;  %v1719_v48 = vsub.f32 1.0, %v1718_v39  ;;  %v5054_v47 = vpop.eup %5053  ;;  %v1715_v21 = vsel %vm1712_vm2, %v1714_v13, %v1710_v40  ;;  %v1744_v53 = vor.u32 1.1754944e-38, %v1743_v54 }
 0x370   :  { %v1733_v55 = vmul.f32 %v5054_v47, %v7756_v42  ;;  %v2040_v61 = vmul.f32 %v9428_v59, %v1715_v21  ;;  %vm1738_vm8 = vweird.f32 %v5054_v47 }
 0x371   :  { %vm1739_vm9 = vmor %vm1737_vm7, %vm1738_vm8 }
 0x372   :  { %v1734_v46 = vsub.f32 1.0, %v1733_v55 }
 0x373   :  { %1535 = vadd.xlane.f32.xlu2 %v1534_v63  ;;  %v7770_v3 = vpop.xlane.xlu2 %1484  ;;  %v2039_v63 = vmul.f32 %v9427_v30, %v1715_v21 }
 0x374   :  { %3077 = vmatmul.f32.gmra.mxu2 %v2033_v23  ;;  %5055 = vrcp.f32 %v7770_v3  ;;  %v1720_v23 = vmul.f32 %v5052_v29, %v1719_v48  ;;  %v1735_v57 = vmul.f32 %v5054_v47, %v1734_v46  ;;  %v9432_v48 = vld [vmem:[#allocation98_spill] sm:$0xff]  ;;  %vm1752_vm11 = vweird.f32 %v7770_v3  ;;  %v9434_v46 = vld [vmem:[#allocation105_spill] sm:$0xff] }
 0x375   :  { %3190 = vmatmul.f32.gmra.mxu3 %v2034_v26 }
 0x376   :  { %2854 = vmatmul.f32.gmra.mxu0 %v2035_v33  ;;  %v1721_v36 = vadd.f32 %v5052_v29, %v1720_v23  ;;  %v1736_v25 = vadd.f32 %v5054_v47, %v1735_v57 }
 0x377   :  { %2967 = vmatmul.f32.gmra.mxu1 %v2036_v14 }
 0x378   :  { %v1725_v56 = vsel %vm1724_vm5, %v5052_v29, %v1721_v36  ;;  %v1741_v29 = vand.u32 2147483647, %v7756_v42  ;;  %v1740_v39 = vsel %vm1739_vm9, %v5054_v47, %v1736_v25  ;;  %v1758_v42 = vand.u32 2147483648, %v7770_v3 }
 0x379   :  { %v1730_v12 = vsel %vm1727_vm6, %v1729_v52, %v1725_v56  ;;  %v1756_v47 = vand.u32 2147483647, %v7770_v3 }
 0x37a   :  { %v5056_v51 = vpop.eup %5055  ;;  %v2042_v4 = vmul.f32 %v9430_v1, %v1730_v12  ;;  %vm1742_vm10 = vcmp.eq.f32.partialorder %v1741_v29, 8.507059e+37  ;;  %v1759_v23 = vor.u32 1.1754944e-38, %v1758_v42 }
 0x37b   :  { %v1745_v2 = vsel %vm1742_vm10, %v1744_v53, %v1740_v39  ;;  %vm1753_vm12 = vweird.f32 %v5056_v51  ;;  %vm1757_vm14 = vcmp.eq.f32.partialorder %v1756_v47, 8.507059e+37 }
 0x37c   :  { %3080 = vmatmul.f32.gmra.mxu2 %v2035_v33  ;;  %v7779_v34 = vpop.xlane.xlu2 %1487  ;;  %v1748_v33 = vmul.f32 %v5056_v51, %v7770_v3  ;;  %v2044_v10 = vmul.f32 %v9432_v48, %v1745_v2  ;;  %vm1754_vm13 = vmor %vm1752_vm11, %vm1753_vm12 }
 0x37d   :  { %3193 = vmatmul.f32.gmra.mxu3 %v2036_v14  ;;  %5057 = vrcp.f32 %v7779_v34  ;;  %v9429_v14 = vld [vmem:[#allocation91_spill] sm:$0xff]  ;;  %v1773_v3 = vand.u32 2147483648, %v7779_v34  ;;  %vm1767_vm15 = vweird.f32 %v7779_v34 }
 0x37e   :  { %2857 = vmatmul.f32.gmra.mxu0 %v2037_v60  ;;  %v2041_v22 = vmul.f32 %v9429_v14, %v1730_v12  ;;  %v1749_v8 = vsub.f32 1.0, %v1748_v33 }
 0x37f   :  { %2970 = vmatmul.f32.gmra.mxu1 %v2038_v18  ;;  %v1774_v57 = vor.u32 1.1754944e-38, %v1773_v3 }
 0x380   :  { %v1750_v38 = vmul.f32 %v5056_v51, %v1749_v8  ;;  %v9435_v8 = vld [vmem:[#allocation99_spill] sm:$0xff] }
 0x382   :  { %v1751_v40 = vadd.f32 %v5056_v51, %v1750_v38 }
 0x383   :  { %v5058_v7 = vpop.eup %5057 }
 0x384   :  { %3083 = vmatmul.f32.gmra.mxu2 %v2037_v60  ;;  %v7788_v26 = vpop.xlane.xlu2 %1490  ;;  %v1763_v60 = vmul.f32 %v5058_v7, %v7779_v34  ;;  %v1755_v55 = vsel %vm1754_vm13, %v5056_v51, %v1751_v40  ;;  %v1771_v51 = vand.u32 2147483647, %v7779_v34  ;;  %vm1768_vm1 = vweird.f32 %v5058_v7  ;;  %v9437_v40 = vld [vmem:[#allocation111_spill] sm:$0xff] }
 0x385   :  { %3196 = vmatmul.f32.gmra.mxu3 %v2038_v18  ;;  %5059 = vrcp.f32 %v7788_v26  ;;  %v9431_v18 = vld [vmem:[#allocation93_spill] sm:$0xff]  ;;  %v1760_v5 = vsel %vm1757_vm14, %v1759_v23, %v1755_v55  ;;  %vm1769_vm2 = vmor %vm1767_vm15, %vm1768_vm1  ;;  %v1788_v29 = vand.u32 2147483648, %v7788_v26  ;;  %v1786_v39 = vand.u32 2147483647, %v7788_v26  ;;  %v9438_v55 = vld [vmem:[#allocation108_spill] sm:$0xff] }
 0x386   :  { %2860 = vmatmul.f32.gmra.mxu0 %v2039_v63  ;;  %v2043_v41 = vmul.f32 %v9431_v18, %v1745_v2  ;;  %v1764_v13 = vsub.f32 1.0, %v1763_v60  ;;  %v2046_v36 = vmul.f32 %v9434_v46, %v1760_v5  ;;  %vm1772_vm3 = vcmp.eq.f32.partialorder %v1771_v51, 8.507059e+37 }
 0x387   :  { %2973 = vmatmul.f32.gmra.mxu1 %v2040_v61  ;;  %vm1782_vm4 = vweird.f32 %v7788_v26  ;;  %v1789_v42 = vor.u32 1.1754944e-38, %v1788_v29  ;;  %vm1787_vm7 = vcmp.eq.f32.partialorder %v1786_v39, 8.507059e+37 }
 0x388   :  { %v1765_v30 = vmul.f32 %v5058_v7, %v1764_v13 }
 0x38a   :  { %v1766_v56 = vadd.f32 %v5058_v7, %v1765_v30 }
 0x38b   :  { %v5060_v21 = vpop.eup %5059 }
 0x38c   :  { %3086 = vmatmul.f32.gmra.mxu2 %v2039_v63  ;;  %v1778_v63 = vmul.f32 %v5060_v21, %v7788_v26  ;;  %v1770_v33 = vsel %vm1769_vm2, %v5058_v7, %v1766_v56  ;;  %v9436_v7 = vld [vmem:[#allocation100_spill] sm:$0xff]  ;;  %vm1783_vm5 = vweird.f32 %v5060_v21 }
 0x38d   :  { %v7797_v37 = vpop.xlane.xlu2 %1493  ;;  %3199 = vmatmul.f32.gmra.mxu3 %v2040_v61  ;;  %v9433_v61 = vld [vmem:[#allocation104_spill] sm:$0xff]  ;;  %v1775_v14 = vsel %vm1772_vm3, %v1774_v57, %v1770_v33  ;;  %vm1784_vm6 = vmor %vm1782_vm4, %vm1783_vm5 }
 0x38e   :  { %2863 = vmatmul.f32.gmra.mxu0 %v2041_v22  ;;  %5061 = vrcp.f32 %v7797_v37  ;;  %v2045_v27 = vmul.f32 %v9433_v61, %v1760_v5  ;;  %v1779_v52 = vsub.f32 1.0, %v1778_v63  ;;  %v2047_v25 = vmul.f32 %v9435_v8, %v1775_v14 }
 0x38f   :  { %2976 = vmatmul.f32.gmra.mxu1 %v2042_v4  ;;  %v2048_v53 = vmul.f32 %v9436_v7, %v1775_v14  ;;  %v1803_v26 = vand.u32 2147483648, %v7797_v37  ;;  %v1801_v30 = vand.u32 2147483647, %v7797_v37  ;;  %vm1797_vm8 = vweird.f32 %v7797_v37  ;;  %v9439_v14 = vld [vmem:[#allocation189_spill] sm:$0xff] }
 0x390   :  { %v1780_v1 = vmul.f32 %v5060_v21, %v1779_v52 }
 0x391   :  { %vm1802_vm11 = vcmp.eq.f32.partialorder %v1801_v30, 8.507059e+37 }
 0x392   :  { %v1781_v38 = vadd.f32 %v5060_v21, %v1780_v1 }
 0x394   :  { %3089 = vmatmul.f32.gmra.mxu2 %v2041_v22  ;;  %v5062_v12 = vpop.eup %5061  ;;  %v1785_v18 = vsel %vm1784_vm6, %v5060_v21, %v1781_v38 }
 0x395   :  { %3202 = vmatmul.f32.gmra.mxu3 %v2042_v4  ;;  %v1793_v4 = vmul.f32 %v5062_v12, %v7797_v37  ;;  %vm1798_vm9 = vweird.f32 %v5062_v12 }
 0x396   :  { %v7806_v0 = vpop.xlane.xlu2 %1496  ;;  %2866 = vmatmul.f32.gmra.mxu0 %v2043_v41  ;;  %vm1799_vm10 = vmor %vm1797_vm8, %vm1798_vm9 }
 0x397   :  { %2979 = vmatmul.f32.gmra.mxu1 %v2044_v10  ;;  %5063 = vrcp.f32 %v7806_v0  ;;  %v1794_v2 = vsub.f32 1.0, %v1793_v4  ;;  %v1818_v37 = vand.u32 2147483648, %v7806_v0  ;;  %v9440_v4 = vld [vmem:[#allocation53_spill] sm:$0xff]  ;;  %vm1812_vm12 = vweird.f32 %v7806_v0 }
 0x399   :  { %v1795_v48 = vmul.f32 %v5062_v12, %v1794_v2  ;;  %v1819_v38 = vor.u32 1.1754944e-38, %v1818_v37 }
 0x39b   :  { %v1796_v3 = vadd.f32 %v5062_v12, %v1795_v48 }
 0x39c   :  { %3092 = vmatmul.f32.gmra.mxu2 %v2043_v41  ;;  %v1790_v41 = vsel %vm1787_vm7, %v1789_v42, %v1785_v18 }
 0x39d   :  { %3205 = vmatmul.f32.gmra.mxu3 %v2044_v10  ;;  %v5064_v60 = vpop.eup %5063  ;;  %v2049_v23 = vmul.f32 %v9437_v40, %v1790_v41  ;;  %v2050_v5 = vmul.f32 %v9438_v55, %v1790_v41  ;;  %v1800_v51 = vsel %vm1799_vm10, %v5062_v12, %v1796_v3 }
 0x39e   :  { %v7815_v59 = vpop.xlane.xlu2 %1499  ;;  %2869 = vmatmul.f32.gmra.mxu0 %v2045_v27  ;;  %v1808_v10 = vmul.f32 %v5064_v60, %v7806_v0  ;;  %vm1813_vm13 = vweird.f32 %v5064_v60 }
 0x39f   :  { %2982 = vmatmul.f32.gmra.mxu1 %v2046_v36  ;;  %5065 = vrcp.f32 %v7815_v59  ;;  %vm1814_vm14 = vmor %vm1812_vm12, %vm1813_vm13  ;;  %vm1827_vm1 = vweird.f32 %v7815_v59 }
 0x3a0   :  { %v1809_v63 = vsub.f32 1.0, %v1808_v10  ;;  %v1833_v10 = vand.u32 2147483648, %v7815_v59 }
 0x3a2   :  { %v7822_v54 = vpop.f32.mrf.mxu0  ;;  %v1810_v56 = vmul.f32 %v5064_v60, %v1809_v63 }
 0x3a3   :  { %v7825_v22 = vpop.f32.mrf.mxu1 }
 0x3a4   :  { %3095 = vmatmul.f32.gmra.mxu2 %v2045_v27 }
 0x3a5   :  { %3208 = vmatmul.f32.gmra.mxu3 %v2046_v36  ;;  %v5066_v46 = vpop.eup %5065  ;;  %v1804_v36 = vor.u32 1.1754944e-38, %v1803_v26  ;;  %v9441_v26 = vld [vmem:[#allocation75_spill] sm:$0xff] }
 0x3a6   :  { %v7828_v34 = vpop.xlane.xlu2 %1502  ;;  %2872 = vmatmul.f32.gmra.mxu0 %v2047_v25  ;;  %v1823_v57 = vmul.f32 %v5066_v46, %v7815_v59  ;;  %vm1828_vm2 = vweird.f32 %v5066_v46 }
 0x3a7   :  { %2985 = vmatmul.f32.gmra.mxu1 %v2048_v53  ;;  %5067 = vrcp.f32 %v7828_v34  ;;  %v1805_v52 = vsel %vm1802_vm11, %v1804_v36, %v1800_v51  ;;  %v1834_v51 = vor.u32 1.1754944e-38, %v1833_v10  ;;  %vm1829_vm3 = vmor %vm1827_vm1, %vm1828_vm2  ;;  %vm1842_vm5 = vweird.f32 %v7828_v34 }
 0x3a8   :  { %v2051_v1 = vmul.f32 %v9439_v14, %v1805_v52  ;;  %v2052_v29 = vmul.f32 %v9440_v4, %v1805_v52  ;;  %v1824_v7 = vsub.f32 1.0, %v1823_v57 }
 0x3aa   :  { %v1825_v48 = vmul.f32 %v5066_v46, %v1824_v7 }
 0x3ab   :  { %v7839_v13 = vpop.f32.mrf.mxu0 }
 0x3ac   :  { %3098 = vmatmul.f32.gmra.mxu2 %v2047_v25  ;;  %v7844_v21 = vpop.f32.mrf.mxu1  ;;  %v1816_v25 = vand.u32 2147483647, %v7806_v0  ;;  %v1826_v3 = vadd.f32 %v5066_v46, %v1825_v48 }
 0x3ad   :  { %3211 = vmatmul.f32.gmra.mxu3 %v2048_v53  ;;  %v7848_v61 = vpop.f32.mrf.mxu2  ;;  %v1811_v53 = vadd.f32 %v5064_v60, %v1810_v56  ;;  %v7867_v2 = vpop.eup %5067 }
 0x3ae   :  { %v7837_v47 = vpop.xlane.xlu2 %1505  ;;  %2875 = vmatmul.f32.gmra.mxu0 %v2049_v23  ;;  %vm1817_vm15 = vcmp.eq.f32.partialorder %v1816_v25, 8.507059e+37  ;;  %v1838_v0 = vmul.f32 %v7867_v2, %v7828_v34  ;;  %v1830_v56 = vsel %vm1829_vm3, %v5066_v46, %v1826_v3  ;;  %v1848_v25 = vand.u32 2147483648, %v7828_v34 }
 0x3af   :  { %2988 = vmatmul.f32.gmra.mxu1 %v2050_v5  ;;  %v7850_v27 = vpop.f32.mrf.mxu3  ;;  %v1815_v18 = vsel %vm1814_vm14, %v5064_v60, %v1811_v53  ;;  %5069 = vrcp.f32 %v7837_v47  ;;  %v1831_v60 = vand.u32 2147483647, %v7815_v59  ;;  %vm1843_vm6 = vweird.f32 %v7867_v2 }
 0x3b0   :  { %v1820_v41 = vsel %vm1817_vm15, %v1819_v38, %v1815_v18  ;;  %v1839_v30 = vsub.f32 1.0, %v1838_v0  ;;  %v1846_v38 = vand.u32 2147483647, %v7828_v34  ;;  %v1849_v48 = vor.u32 1.1754944e-38, %v1848_v25  ;;  %vm1844_vm7 = vmor %vm1842_vm5, %vm1843_vm6 }
 0x3b1   :  { %v2053_v40 = vmul.f32 %v9441_v26, %v1820_v41  ;;  %vm1832_vm4 = vcmp.eq.f32.partialorder %v1831_v60, 8.507059e+37  ;;  %vm1857_vm9 = vweird.f32 %v7837_v47 }
 0x3b2   :  { %v1835_v37 = vsel %vm1832_vm4, %v1834_v51, %v1830_v56  ;;  %v1840_v59 = vmul.f32 %v7867_v2, %v1839_v30  ;;  %vm1847_vm8 = vcmp.eq.f32.partialorder %v1846_v38, 8.507059e+37 }
 0x3b3   :  { %v2055_v7 = vmul.f32 %v7291_v62, %v1835_v37  ;;  %v2056_v46 = vmul.f32 %v7306_v32, %v1835_v37  ;;  %v1861_v37 = vand.u32 2147483647, %v7837_v47 }
 0x3b4   :  { %3101 = vmatmul.f32.gmra.mxu2 %v2049_v23  ;;  %v9442_v23 = vld [vmem:[#allocation48_spill] sm:$0xff] }
 0x3b5   :  { %3214 = vmatmul.f32.gmra.mxu3 %v2050_v5  ;;  %v2054_v55 = vmul.f32 %v9442_v23, %v1820_v41  ;;  %v7884_v36 = vpop.eup %5069  ;;  %v1841_v41 = vadd.f32 %v7867_v2, %v1840_v59  ;;  %vm1862_vm12 = vcmp.eq.f32.partialorder %v1861_v37, 8.507059e+37 }
 0x3b6   :  { %v7855_v33 = vpop.xlane.xlu2 %1508  ;;  %v7859_v8 = vpop.f32.mrf.mxu0  ;;  %2878 = vmatmul.f32.gmra.mxu0 %v2051_v1  ;;  %v1853_v4 = vmul.f32 %v7884_v36, %v7837_v47  ;;  %vm1858_vm10 = vweird.f32 %v7884_v36 }
 0x3b7   :  { %2991 = vmatmul.f32.gmra.mxu1 %v2052_v29  ;;  %v7861_v12 = vpop.f32.mrf.mxu1  ;;  %5071 = vrcp.f32 %v7855_v33  ;;  %v1845_v0 = vsel %vm1844_vm7, %v7867_v2, %v1841_v41  ;;  %vm1859_vm11 = vmor %vm1857_vm9, %vm1858_vm10  ;;  %v1878_v38 = vand.u32 2147483648, %v7855_v33  ;;  %vm1872_vm14 = vweird.f32 %v7855_v33 }
 0x3b8   :  { %v1854_v18 = vsub.f32 1.0, %v1853_v4  ;;  %v1876_v41 = vand.u32 2147483647, %v7855_v33 }
 0x3b9   :  { %v7865_v39 = vpop.f32.mrf.mxu2  ;;  %v7869_v42 = vpop.f32.mrf.mxu3 }
 0x3ba   :  { %v1855_v23 = vmul.f32 %v7884_v36, %v1854_v18  ;;  %vm1877_vm1 = vcmp.eq.f32.partialorder %v1876_v41, 8.507059e+37 }
 0x3bc   :  { %3104 = vmatmul.f32.gmra.mxu2 %v2051_v1 }
 0x3bd   :  { %3217 = vmatmul.f32.gmra.mxu3 %v2052_v29  ;;  %v7888_v1 = vpop.eup %5071 }
 0x3be   :  { %v7878_v5 = vpop.xlane.xlu2 %1511  ;;  %2881 = vmatmul.f32.gmra.mxu0 %v2053_v40  ;;  %v1868_v53 = vmul.f32 %v7888_v1, %v7855_v33  ;;  %vm1873_vm13 = vweird.f32 %v7888_v1 }
 0x3bf   :  { %2994 = vmatmul.f32.gmra.mxu1 %v2054_v55  ;;  %5073 = vrcp.f32 %v7878_v5  ;;  %vm1874_vm15 = vmor %vm1872_vm14, %vm1873_vm13  ;;  %vm1887_vm3 = vweird.f32 %v7878_v5 }
 0x3c0   :  { %v1869_v10 = vsub.f32 1.0, %v1868_v53 }
 0x3c1   :  { %v7882_v63 = vpop.f32.mrf.mxu0  ;;  %v7886_v52 = vpop.f32.mrf.mxu1 }
 0x3c2   :  { %v1870_v51 = vmul.f32 %v7888_v1, %v1869_v10 }
 0x3c3   :  { %v3060_v57 = vpop.f32.mrf.mxu2 }
 0x3c4   :  { %3107 = vmatmul.f32.gmra.mxu2 %v2053_v40  ;;  %v3173_v14 = vpop.f32.mrf.mxu3  ;;  %v1850_v40 = vsel %vm1847_vm8, %v1849_v48, %v1845_v0 }
 0x3c5   :  { %3220 = vmatmul.f32.gmra.mxu3 %v2054_v55  ;;  %v7893_v29 = vadd.f32 %v3173_v14, %v3060_v57  ;;  %v7912_v34 = vpop.eup %5073  ;;  %v1863_v55 = vand.u32 2147483648, %v7837_v47  ;;  %v2057_v60 = vmul.f32 %v7369_v58, %v1850_v40  ;;  %v2058_v30 = vmul.f32 %v7384_v19, %v1850_v40 }
 0x3c6   :  { %2884 = vmatmul.f32.gmra.mxu0 %v2055_v7  ;;  %v7905_v62 = vpop.xlane.xlu2 %1514  ;;  %v1883_v56 = vmul.f32 %v7912_v34, %v7878_v5  ;;  %v1856_v58 = vadd.f32 %v7884_v36, %v1855_v23  ;;  %v1871_v47 = vadd.f32 %v7888_v1, %v1870_v51  ;;  %vm1888_vm2 = vweird.f32 %v7912_v34 }
 0x3c7   :  { %2997 = vmatmul.f32.gmra.mxu1 %v2056_v46  ;;  %5075 = vrcp.f32 %v7905_v62  ;;  %v1864_v19 = vor.u32 1.1754944e-38, %v1863_v55  ;;  %v1879_v55 = vor.u32 1.1754944e-38, %v1878_v38  ;;  %vm1889_vm4 = vmor %vm1887_vm3, %vm1888_vm2  ;;  %vm1902_vm7 = vweird.f32 %v7905_v62 }
 0x3c8   :  { %v1860_v59 = vsel %vm1859_vm11, %v7884_v36, %v1856_v58  ;;  %v1884_v4 = vsub.f32 1.0, %v1883_v56  ;;  %v1875_v23 = vsel %vm1874_vm15, %v7888_v1, %v1871_v47  ;;  %v1893_v1 = vand.u32 2147483648, %v7878_v5 }
 0x3c9   :  { %v1880_v33 = vsel %vm1877_vm1, %v1879_v55, %v1875_v23  ;;  %v1891_v58 = vand.u32 2147483647, %v7878_v5  ;;  %v1906_v23 = vand.u32 2147483647, %v7905_v62 }
 0x3ca   :  { %v1885_v0 = vmul.f32 %v7912_v34, %v1884_v4  ;;  %v2061_v56 = vmul.f32 %v7537_v6, %v1880_v33  ;;  %v2062_v37 = vmul.f32 %v7549_v43, %v1880_v33  ;;  %v1894_v38 = vor.u32 1.1754944e-38, %v1893_v1 }
 0x3cb   :  { %v7907_v32 = vpop.f32.mrf.mxu0  ;;  %vm1892_vm5 = vcmp.eq.f32.partialorder %v1891_v58, 8.507059e+37  ;;  %vm1907_vm9 = vcmp.eq.f32.partialorder %v1906_v23, 8.507059e+37 }
 0x3cc   :  { %v7910_v26 = vpop.f32.mrf.mxu1  ;;  %3110 = vmatmul.f32.gmra.mxu2 %v2055_v7 }
 0x3cd   :  { %3223 = vmatmul.f32.gmra.mxu3 %v2056_v46  ;;  %v1865_v46 = vsel %vm1862_vm12, %v1864_v19, %v1860_v59  ;;  %v7937_v53 = vpop.eup %5075 }
 0x3ce   :  { %v3063_v3 = vpop.f32.mrf.mxu2  ;;  %2887 = vmatmul.f32.gmra.mxu0 %v2057_v60  ;;  %v7931_v25 = vpop.xlane.xlu2 %1517  ;;  %v2059_v36 = vmul.f32 %v7460_v17, %v1865_v46  ;;  %v2060_v18 = vmul.f32 %v7466_v9, %v1865_v46  ;;  %v1898_v10 = vmul.f32 %v7937_v53, %v7905_v62  ;;  %vm1903_vm6 = vweird.f32 %v7937_v53 }
 0x3cf   :  { %v3176_v2 = vpop.f32.mrf.mxu3  ;;  %3000 = vmatmul.f32.gmra.mxu1 %v2058_v30  ;;  %5077 = vrcp.f32 %v7931_v25  ;;  %v7951_v9 = vpop.xlane.xlu1 %1520  ;;  %vm1904_vm8 = vmor %vm1902_vm7, %vm1903_vm6  ;;  %vm1917_vm11 = vweird.f32 %v7931_v25 }
 0x3d0   :  { %v7922_v57 = vadd.f32 %v3176_v2, %v3063_v3  ;;  %v1886_v2 = vadd.f32 %v7912_v34, %v1885_v0  ;;  %5079 = vrcp.f32 %v7951_v9  ;;  %vm1932_vm15 = vweird.f32 %v7951_v9 }
 0x3d2   :  { %v1890_v47 = vsel %vm1889_vm4, %v7912_v34, %v1886_v2 }
 0x3d3   :  { %v7928_v14 = vpop.f32.mrf.mxu0  ;;  %v1895_v43 = vsel %vm1892_vm5, %v1894_v38, %v1890_v47  ;;  %v1921_v38 = vand.u32 2147483647, %v7931_v25 }
 0x3d4   :  { %v7933_v7 = vpop.f32.mrf.mxu1  ;;  %3113 = vmatmul.f32.gmra.mxu2 %v2057_v60  ;;  %v1899_v60 = vsub.f32 1.0, %v1898_v10  ;;  %v2063_v10 = vmul.f32 %v7597_v28, %v1895_v43 }
 0x3d5   :  { %3226 = vmatmul.f32.gmra.mxu3 %v2058_v30  ;;  %v7959_v51 = vpop.eup %5077  ;;  %vm1922_vm13 = vcmp.eq.f32.partialorder %v1921_v38, 8.507059e+37 }
 0x3d6   :  { %2890 = vmatmul.f32.gmra.mxu0 %v2059_v36  ;;  %v1900_v59 = vmul.f32 %v7937_v53, %v1899_v60  ;;  %v1913_v4 = vmul.f32 %v7959_v51, %v7931_v25  ;;  %v7977_v41 = vpop.eup %5079  ;;  %vm1918_vm10 = vweird.f32 %v7959_v51 }
 0x3d7   :  { %v3066_v48 = vpop.f32.mrf.mxu2  ;;  %3003 = vmatmul.f32.gmra.mxu1 %v2060_v18  ;;  %v1928_v33 = vmul.f32 %v7977_v41, %v7951_v9  ;;  %vm1919_vm12 = vmor %vm1917_vm11, %vm1918_vm10  ;;  %vm1933_vm14 = vweird.f32 %v7977_v41 }
 0x3d8   :  { %v3179_v40 = vpop.f32.mrf.mxu3  ;;  %v1914_v5 = vsub.f32 1.0, %v1913_v4  ;;  %vm1934_vm1 = vmor %vm1932_vm15, %vm1933_vm14 }
 0x3d9   :  { %v7949_v17 = vadd.f32 %v3179_v40, %v3066_v48  ;;  %v1908_v48 = vand.u32 2147483648, %v7905_v62  ;;  %v2064_v40 = vmul.f32 %v7604_v50, %v1895_v43  ;;  %v1929_v62 = vsub.f32 1.0, %v1928_v33 }
 0x3da   :  { %v1915_v60 = vmul.f32 %v7959_v51, %v1914_v5 }
 0x3db   :  { %v7953_v30 = vpop.f32.mrf.mxu0  ;;  %v1930_v5 = vmul.f32 %v7977_v41, %v1929_v62 }
 0x3dc   :  { %v7955_v3 = vpop.f32.mrf.mxu1  ;;  %3116 = vmatmul.f32.gmra.mxu2 %v2059_v36  ;;  %v7973_v36 = vpop.xlane.xlu2 %1523  ;;  %v1916_v58 = vadd.f32 %v7959_v51, %v1915_v60  ;;  %v1938_v60 = vand.u32 2147483648, %v7951_v9 }
 0x3dd   :  { %3229 = vmatmul.f32.gmra.mxu3 %v2060_v18  ;;  %v1901_v18 = vadd.f32 %v7937_v53, %v1900_v59  ;;  %5081 = vrcp.f32 %v7973_v36  ;;  %v1923_v59 = vand.u32 2147483648, %v7931_v25  ;;  %vm1947_vm4 = vweird.f32 %v7973_v36 }
 0x3de   :  { %2893 = vmatmul.f32.gmra.mxu0 %v2061_v56 }
 0x3df   :  { %v3069_v19 = vpop.f32.mrf.mxu2  ;;  %3006 = vmatmul.f32.gmra.mxu1 %v2062_v37  ;;  %v1905_v1 = vsel %vm1904_vm8, %v7937_v53, %v1901_v18 }
 0x3e0   :  { %v3182_v46 = vpop.f32.mrf.mxu3 }
 0x3e1   :  { %v7971_v6 = vadd.f32 %v3182_v46, %v3069_v19 }
 0x3e3   :  { %v7980_v0 = vpop.f32.mrf.mxu0  ;;  %v7999_v19 = vpop.eup %5081 }
 0x3e4   :  { %3119 = vmatmul.f32.gmra.mxu2 %v2061_v56  ;;  %v7983_v34 = vpop.f32.mrf.mxu1  ;;  %v1909_v56 = vor.u32 1.1754944e-38, %v1908_v48  ;;  %v1943_v18 = vmul.f32 %v7999_v19, %v7973_v36  ;;  %v8017_v23 = vpop.xlane.xlu2 %1529  ;;  %vm1948_vm3 = vweird.f32 %v7999_v19 }
 0x3e5   :  { %3232 = vmatmul.f32.gmra.mxu3 %v2062_v37  ;;  %v7995_v37 = vpop.xlane.xlu1 %1526  ;;  %vm1949_vm5 = vmor %vm1947_vm4, %vm1948_vm3 }
 0x3e6   :  { %2896 = vmatmul.f32.gmra.mxu0 %v2063_v10  ;;  %v1910_v50 = vsel %vm1907_vm9, %v1909_v56, %v1905_v1  ;;  %5083 = vrcp.f32 %v7995_v37  ;;  %v1944_v25 = vsub.f32 1.0, %v1943_v18  ;;  %v1953_v18 = vand.u32 2147483648, %v7973_v36 }
 0x3e7   :  { %v3072_v55 = vpop.f32.mrf.mxu2  ;;  %3009 = vmatmul.f32.gmra.mxu1 %v2064_v40  ;;  %v2065_v46 = vmul.f32 %v7648_v35, %v1910_v50  ;;  %v2066_v47 = vmul.f32 %v7654_v44, %v1910_v50  ;;  %v1936_v50 = vand.u32 2147483647, %v7951_v9  ;;  %5085 = vrcp.f32 %v8017_v23 }
 0x3e8   :  { %v3185_v2 = vpop.f32.mrf.mxu3  ;;  %vm1962_vm8 = vweird.f32 %v7995_v37 }
 0x3e9   :  { %v7993_v28 = vadd.f32 %v3185_v2, %v3072_v55  ;;  %v1931_v55 = vadd.f32 %v7977_v41, %v1930_v5  ;;  %vm1937_vm2 = vcmp.eq.f32.partialorder %v1936_v50, 8.507059e+37 }
 0x3eb   :  { %v8002_v4 = vpop.f32.mrf.mxu0 }
 0x3ec   :  { %3122 = vmatmul.f32.gmra.mxu2 %v2063_v10  ;;  %v8005_v53 = vpop.f32.mrf.mxu1  ;;  %v1920_v10 = vsel %vm1919_vm12, %v7959_v51, %v1916_v58  ;;  %v8021_v33 = vpop.eup %5083  ;;  %vm1977_vm12 = vweird.f32 %v8017_v23 }
 0x3ed   :  { %3235 = vmatmul.f32.gmra.mxu3 %v2064_v40  ;;  %v1924_v40 = vor.u32 1.1754944e-38, %v1923_v59  ;;  %v1958_v58 = vmul.f32 %v8021_v33, %v7995_v37  ;;  %v1945_v59 = vmul.f32 %v7999_v19, %v1944_v25  ;;  %v8041_v38 = vpop.xlane.xlu1 %1532  ;;  %v8045_v5 = vpop.eup %5085  ;;  %vm1963_vm7 = vweird.f32 %v8021_v33 }
 0x3ee   :  { %2899 = vmatmul.f32.gmra.mxu0 %v2065_v46  ;;  %5087 = vrcp.f32 %v8041_v38  ;;  %vm1964_vm9 = vmor %vm1962_vm8, %vm1963_vm7  ;;  %vm1978_vm11 = vweird.f32 %v8045_v5 }
 0x3ef   :  { %v3075_v43 = vpop.f32.mrf.mxu2  ;;  %3012 = vmatmul.f32.gmra.mxu1 %v2066_v47  ;;  %v1925_v44 = vsel %vm1922_vm13, %v1924_v40, %v1920_v10  ;;  %v1959_v9 = vsub.f32 1.0, %v1958_v58  ;;  %v9443_v10 = vld [vmem:[#allocation88_spill] sm:$0xff]  ;;  %vm1979_vm13 = vmor %vm1977_vm12, %vm1978_vm11 }
 0x3f0   :  { %v3188_v48 = vpop.f32.mrf.mxu3  ;;  %v2067_v1 = vmul.f32 %v7681_v11, %v1925_v44  ;;  %v2068_v56 = vmul.f32 %v7683_v45, %v1925_v44  ;;  %v1935_v11 = vsel %vm1934_vm1, %v7977_v41, %v1931_v55  ;;  %v9444_v44 = vld [vmem:[#allocation18_spill] sm:$0xff]  ;;  %v1951_v55 = vand.u32 2147483647, %v7973_v36 }
 0x3f1   :  { %v8015_v35 = vadd.f32 %v3188_v48, %v3075_v43  ;;  %v1946_v43 = vadd.f32 %v7999_v19, %v1945_v59  ;;  %v1954_v59 = vor.u32 1.1754944e-38, %v1953_v18  ;;  %vm1992_vm1 = vweird.f32 %v8041_v38 }
 0x3f2   :  { %vm1952_vm6 = vcmp.eq.f32.partialorder %v1951_v55, 8.507059e+37 }
 0x3f3   :  { %v8024_v2 = vpop.f32.mrf.mxu0  ;;  %v1950_v58 = vsel %vm1949_vm5, %v7999_v19, %v1946_v43 }
 0x3f4   :  { %3125 = vmatmul.f32.gmra.mxu2 %v2065_v46  ;;  %v8027_v51 = vpop.f32.mrf.mxu1 }
 0x3f5   :  { %3238 = vmatmul.f32.gmra.mxu3 %v2066_v47  ;;  %v1939_v47 = vor.u32 1.1754944e-38, %v1938_v60 }
 0x3f6   :  { %2902 = vmatmul.f32.gmra.mxu0 %v2067_v1 }
 0x3f7   :  { %v8033_v62 = vpop.f32.mrf.mxu2  ;;  %3015 = vmatmul.f32.gmra.mxu1 %v2068_v56  ;;  %v1940_v45 = vsel %vm1937_vm2, %v1939_v47, %v1935_v11  ;;  %v1955_v11 = vsel %vm1952_vm6, %v1954_v59, %v1950_v58  ;;  %v8065_v47 = vpop.xlane.xlu2 %1535 }
 0x3f8   :  { %v8038_v46 = vpop.f32.mrf.mxu3  ;;  %v2069_v40 = vmul.f32 %v9443_v10, %v1940_v45  ;;  %v2070_v25 = vmul.f32 %v9444_v44, %v1940_v45  ;;  %v1968_v10 = vand.u32 2147483648, %v7995_v37  ;;  %v2071_v43 = vmul.f32 %v7707_v15, %v1955_v11 }
 0x3f9   :  { %v2072_v18 = vmul.f32 %v7710_v16, %v1955_v11  ;;  %5089 = vrcp.f32 %v8065_v47  ;;  %vm2007_vm5 = vweird.f32 %v8065_v47 }
 0x3fa   :  { %v1969_v58 = vor.u32 1.1754944e-38, %v1968_v10  ;;  %v9449_v10 = vld [vmem:[#allocation92_spill] sm:$0xff] }
 0x3fb   :  { %v8048_v48 = vpop.f32.mrf.mxu0 }
 0x3fc   :  { %3128 = vmatmul.f32.gmra.mxu2 %v2067_v1  ;;  %v8051_v41 = vpop.f32.mrf.mxu1  ;;  %v1960_v1 = vmul.f32 %v8021_v33, %v1959_v9  ;;  %v8069_v9 = vpop.eup %5087 }
 0x3fd   :  { %3241 = vmatmul.f32.gmra.mxu3 %v2068_v56  ;;  %v1973_v56 = vmul.f32 %v8045_v5, %v8017_v23  ;;  %vm1993_vm15 = vweird.f32 %v8069_v9 }
 0x3fe   :  { %2905 = vmatmul.f32.gmra.mxu0 %v2069_v40  ;;  %v1961_v45 = vadd.f32 %v8021_v33, %v1960_v1  ;;  %v1988_v1 = vmul.f32 %v8069_v9, %v8041_v38  ;;  %vm1994_vm2 = vmor %vm1992_vm1, %vm1993_vm15 }
 0x3ff   :  { %v8057_v60 = vpop.f32.mrf.mxu2  ;;  %3018 = vmatmul.f32.gmra.mxu1 %v2070_v25  ;;  %v1974_v36 = vsub.f32 1.0, %v1973_v56  ;;  %v8091_v11 = vpop.eup %5089 }
 0x400   :  { %v8062_v50 = vpop.f32.mrf.mxu3  ;;  %v1965_v15 = vsel %vm1964_vm9, %v8021_v33, %v1961_v45  ;;  %v9448_v33 = vld [vmem:[#allocation101_spill] sm:$0xff]  ;;  %vm2008_vm4 = vweird.f32 %v8091_v11 }
 0x401   :  { %9445 = vst [vmem:[#allocation169_spill] sm:$0xff] %v8062_v50  ;;  %vm2009_vm6 = vmor %vm2007_vm5, %vm2008_vm4 }
 0x403   :  { %v8072_v44 = vpop.f32.mrf.mxu0 }
 0x404   :  { %3131 = vmatmul.f32.gmra.mxu2 %v2069_v40  ;;  %v8075_v19 = vpop.f32.mrf.mxu1  ;;  %v1966_v40 = vand.u32 2147483647, %v7995_v37  ;;  %v1989_v37 = vsub.f32 1.0, %v1988_v1 }
 0x405   :  { %3244 = vmatmul.f32.gmra.mxu3 %v2070_v25  ;;  %v1975_v25 = vmul.f32 %v8045_v5, %v1974_v36 }
 0x406   :  { %2908 = vmatmul.f32.gmra.mxu0 %v2071_v43  ;;  %vm1967_vm10 = vcmp.eq.f32.partialorder %v1966_v40, 8.507059e+37 }
 0x407   :  { %v8081_v55 = vpop.f32.mrf.mxu2  ;;  %3021 = vmatmul.f32.gmra.mxu1 %v2072_v18  ;;  %v1970_v16 = vsel %vm1967_vm10, %v1969_v58, %v1965_v15  ;;  %v1976_v59 = vadd.f32 %v8045_v5, %v1975_v25  ;;  %v1990_v25 = vmul.f32 %v8069_v9, %v1989_v37  ;;  %v2003_v15 = vmul.f32 %v8091_v11, %v8065_v47 }
 0x408   :  { %9446 = vst [vmem:[#allocation71_spill] sm:$0xff] %v8081_v55  ;;  %v8086_v56 = vpop.f32.mrf.mxu3  ;;  %v1983_v55 = vand.u32 2147483648, %v8017_v23  ;;  %v2073_v45 = vmul.f32 %v9448_v33, %v1970_v16  ;;  %v2074_v40 = vmul.f32 %v9449_v10, %v1970_v16  ;;  %v1998_v37 = vand.u32 2147483648, %v8041_v38 }
 0x409   :  { %9447 = vst [vmem:[#allocation22_spill] sm:$0xff] %v8086_v56  ;;  %v1980_v58 = vsel %vm1979_vm13, %v8045_v5, %v1976_v59  ;;  %v2004_v16 = vsub.f32 1.0, %v2003_v15 }
 0x40a   :  { %v1984_v50 = vor.u32 1.1754944e-38, %v1983_v55  ;;  %v1996_v55 = vand.u32 2147483647, %v8041_v38 }
 0x40b   :  { %v8094_v36 = vpop.f32.mrf.mxu0  ;;  %v2005_v59 = vmul.f32 %v8091_v11, %v2004_v16  ;;  %v9454_v16 = vld [vmem:[#allocation94_spill] sm:$0xff] }
 0x40c   :  { %3134 = vmatmul.f32.gmra.mxu2 %v2071_v43  ;;  %v8097_v56 = vpop.f32.mrf.mxu1  ;;  %v1981_v43 = vand.u32 2147483647, %v8017_v23  ;;  %v1991_v23 = vadd.f32 %v8069_v9, %v1990_v25  ;;  %vm1997_vm3 = vcmp.eq.f32.partialorder %v1996_v55, 8.507059e+37 }
 0x40d   :  { %3247 = vmatmul.f32.gmra.mxu3 %v2072_v18 }
 0x40e   :  { %2911 = vmatmul.f32.gmra.mxu0 %v2073_v45  ;;  %vm1982_vm14 = vcmp.eq.f32.partialorder %v1981_v43, 8.507059e+37  ;;  %v1999_v43 = vor.u32 1.1754944e-38, %v1998_v37 }
 0x40f   :  { %v8102_v1 = vpop.f32.mrf.mxu2  ;;  %3024 = vmatmul.f32.gmra.mxu1 %v2074_v40  ;;  %v1985_v33 = vsel %vm1982_vm14, %v1984_v50, %v1980_v58  ;;  %v9453_v58 = vld [vmem:[#allocation95_spill] sm:$0xff] }
 0x410   :  { %9450 = vst [vmem:[#allocation144_spill] sm:$0xff] %v8102_v1  ;;  %v8107_v18 = vpop.f32.mrf.mxu3  ;;  %v2076_v5 = vmul.f32 %v7734_v31, %v1985_v33  ;;  %v2013_v31 = vand.u32 2147483648, %v8065_v47 }
 0x411   :  { %9451 = vst [vmem:[#allocation192_spill] sm:$0xff] %v8107_v18  ;;  %v2075_v18 = vmul.f32 %v7731_v49, %v1985_v33  ;;  %v2006_v49 = vadd.f32 %v8091_v11, %v2005_v59 }
 0x412   :  { %v2014_v55 = vor.u32 1.1754944e-38, %v2013_v31 }
 0x413   :  { %v2867_v10 = vpop.f32.mrf.mxu0  ;;  %v2010_v37 = vsel %vm2009_vm6, %v8091_v11, %v2006_v49  ;;  %v3291_v11 = vld [vmem:[#allocation7 + $0xe0] sm:$0xff] }
 0x414   :  { %3137 = vmatmul.f32.gmra.mxu2 %v2073_v45  ;;  %v2980_v1 = vpop.f32.mrf.mxu1 }
 0x415   :  { %3250 = vmatmul.f32.gmra.mxu3 %v2074_v40  ;;  %v1995_v40 = vsel %vm1994_vm2, %v8069_v9, %v1991_v23  ;;  %v2011_v9 = vand.u32 2147483647, %v8065_v47  ;;  %v2981_v49 = vadd.f32 %v2980_v1, %v2867_v10  ;;  %v3285_v1 = vld [vmem:[#allocation7 + $0xb0] sm:$0xff] }
 0x416   :  { %2914 = vmatmul.f32.gmra.mxu0 %v2075_v18  ;;  %v2000_v25 = vsel %vm1997_vm3, %v1999_v43, %v1995_v40 }
 0x417   :  { %v8117_v50 = vpop.f32.mrf.mxu2  ;;  %3027 = vmatmul.f32.gmra.mxu1 %v2076_v5  ;;  %v2077_v33 = vmul.f32 %v9453_v58, %v2000_v25  ;;  %vm2012_vm7 = vcmp.eq.f32.partialorder %v2011_v9, 8.507059e+37 }
 0x418   :  { %v8120_v45 = vpop.f32.mrf.mxu3 }
 0x419   :  { %9452 = vst [vmem:[#allocation56_spill] sm:$0xff] %v8120_v45  ;;  %v2078_v45 = vmul.f32 %v9454_v16, %v2000_v25  ;;  %v3293_v25 = vld [vmem:[#allocation7 + $0xf0] sm:$0xff] }
 0x41b   :  { %v2870_v38 = vpop.f32.mrf.mxu0 }
 0x41c   :  { %3140 = vmatmul.f32.gmra.mxu2 %v2075_v18  ;;  %v2983_v15 = vpop.f32.mrf.mxu1 }
 0x41d   :  { %3253 = vmatmul.f32.gmra.mxu3 %v2076_v5  ;;  %v2015_v5 = vsel %vm2012_vm7, %v2014_v55, %v2010_v37  ;;  %v2984_v58 = vadd.f32 %v2983_v15, %v2870_v38  ;;  %v2975_v38 = vadd.f32 %v8075_v19, %v8072_v44  ;;  %v3283_v44 = vld [vmem:[#allocation7 + $0xa0] sm:$0xff]  ;;  %v2969_v19 = vadd.f32 %v8027_v51, %v8024_v2 }
 0x41e   :  { %2917 = vmatmul.f32.gmra.mxu0 %v2077_v33  ;;  %v2079_v43 = vmul.f32 %v7749_v24, %v2015_v5  ;;  %v2080_v47 = vmul.f32 %v7752_v20, %v2015_v5  ;;  %v3287_v20 = vld [vmem:[#allocation7 + $0xc0] sm:$0xff]  ;;  %v3168_v2 = vadd.f32 %v7850_v27, %v7848_v61 }
 0x41f   :  { %v8130_v23 = vpop.f32.mrf.mxu2  ;;  %3030 = vmatmul.f32.gmra.mxu1 %v2078_v45  ;;  %v3355_v24 = vmul.f32 %v3291_v11, %v2984_v58  ;;  %v3349_v5 = vmul.f32 %v3285_v1, %v2975_v38  ;;  %v3277_v58 = vld [vmem:[#allocation7 + $0x70] sm:$0xff]  ;;  %v2951_v38 = vadd.f32 %v7886_v52, %v7882_v63  ;;  %v3266_v63 = vld [vmem:[#allocation7 + $0x18] sm:$0xff] }
 0x420   :  { %9455 = vst [vmem:[#allocation57_spill] sm:$0xff] %v8130_v23  ;;  %v8132_v18 = vpop.f32.mrf.mxu3 }
 0x421   :  { %9456 = vst [vmem:[#allocation78_spill] sm:$0xff] %v8132_v18 }
 0x423   :  { %v2873_v59 = vpop.f32.mrf.mxu0 }
 0x424   :  { %3143 = vmatmul.f32.gmra.mxu2 %v2077_v33  ;;  %v2986_v40 = vpop.f32.mrf.mxu1  ;;  %v3289_v33 = vld [vmem:[#allocation7 + $0xd0] sm:$0xff] }
 0x425   :  { %3256 = vmatmul.f32.gmra.mxu3 %v2078_v45  ;;  %v2987_v16 = vadd.f32 %v2986_v40, %v2873_v59  ;;  %v2978_v45 = vadd.f32 %v8097_v56, %v8094_v36  ;;  %v3353_v9 = vmul.f32 %v3289_v33, %v2981_v49  ;;  %v2972_v56 = vadd.f32 %v8051_v41, %v8048_v48  ;;  %v3281_v59 = vld [vmem:[#allocation7 + $0x90] sm:$0xff]  ;;  %v3279_v41 = vld [vmem:[#allocation7 + $0x80] sm:$0xff] }
 0x426   :  { %2920 = vmatmul.f32.gmra.mxu0 %v2079_v43  ;;  %v2966_v40 = vadd.f32 %v8005_v53, %v8002_v4  ;;  %v2960_v4 = vadd.f32 %v7955_v3, %v7953_v30  ;;  %v3275_v49 = vld [vmem:[#allocation7 + $0x60] sm:$0xff] }
 0x427   :  { %v8137_v23 = vpop.f32.mrf.mxu2  ;;  %3033 = vmatmul.f32.gmra.mxu1 %v2080_v47  ;;  %v3357_v31 = vmul.f32 %v3293_v25, %v2987_v16  ;;  %v3351_v36 = vmul.f32 %v3287_v20, %v2978_v45  ;;  %v3347_v48 = vmul.f32 %v3283_v44, %v2972_v56  ;;  %v3345_v25 = vmul.f32 %v3281_v59, %v2969_v19  ;;  %v3264_v16 = vld [vmem:[#allocation7 + $0x8] sm:$0xff]  ;;  %v3273_v45 = vld [vmem:[#allocation7 + $0x50] sm:$0xff]  ;;  %v3271_v20 = vld [vmem:[#allocation7 + $0x40] sm:$0xff] }
 0x428   :  { %v8139_v18 = vpop.f32.mrf.mxu3  ;;  %v3343_v53 = vmul.f32 %v3279_v41, %v2966_v40  ;;  %v3328_v33 = vmul.f32 %v3264_v16, %v3168_v2  ;;  %v3339_v3 = vmul.f32 %v3275_v49, %v2960_v4  ;;  %v3269_v56 = vld [vmem:[#allocation7 + $0x30] sm:$0xff]  ;;  %v3298_v19 = vld [vmem:[#allocation7 + $0x118] sm:$0xff]  ;;  %v2945_v59 = vadd.f32 %v7844_v21, %v7839_v13  ;;  %v3300_v4 = vld [vmem:[#allocation7 + $0x128] sm:$0xff] }
 0x429   :  { %4455 = vmatpush.lsf.msrb.mxu0 %v3357_v31  ;;  %4530 = vmatpush.lsf.msrb.mxu2 %v3357_v31  ;;  %v2957_v31 = vadd.f32 %v7933_v7, %v7928_v14 }
 0x42b   :  { %4456 = vmatpush.lsf.msrb.mxu0 %v3355_v24  ;;  %4531 = vmatpush.lsf.msrb.mxu2 %v3355_v24  ;;  %v8145_v15 = vpop.f32.mrf.mxu0  ;;  %v2954_v24 = vadd.f32 %v7910_v26, %v7907_v32  ;;  %v3337_v7 = vmul.f32 %v3273_v45, %v2957_v31  ;;  %v2948_v32 = vadd.f32 %v7861_v12, %v7859_v8  ;;  %v3265_v12 = vld [vmem:[#allocation7 + $0x10] sm:$0xff]  ;;  %v3302_v45 = vld [vmem:[#allocation7 + $0x138] sm:$0xff] }
 0x42c   :  { %3146 = vmatmul.f32.gmra.mxu2 %v2079_v43  ;;  %v8147_v37 = vpop.f32.mrf.mxu1  ;;  %v2963_v43 = vadd.f32 %v7983_v34, %v7980_v0  ;;  %v3296_v34 = vld [vmem:[#allocation7 + $0x108] sm:$0xff]  ;;  %v3171_v26 = vadd.f32 %v7869_v42, %v7865_v39  ;;  %v2942_v8 = vadd.f32 %v7825_v22, %v7822_v54  ;;  %v3329_v13 = vmul.f32 %v3265_v12, %v2945_v59 }
 0x42d   :  { %3259 = vmatmul.f32.gmra.mxu3 %v2080_v47  ;;  %4457 = vmatpush.lsf.msrb.mxu0 %v3353_v9  ;;  %v3268_v54 = vld [vmem:[#allocation7 + $0x28] sm:$0xff] }
 0x42e   :  { %4532 = vmatpush.lsf.msrb.mxu2 %v3353_v9  ;;  %v3341_v27 = vmul.f32 %v3277_v58, %v2963_v43  ;;  %v3330_v39 = vmul.f32 %v3266_v63, %v3171_v26  ;;  %v3263_v43 = vld [vmem:[#allocation7] sm:$0xff] }
 0x42f   :  { %v8151_v10 = vpop.f32.mrf.mxu2  ;;  %4458 = vmatpush.lsf.msrb.mxu0 %v3351_v36  ;;  %v3327_v58 = vmul.f32 %v3263_v43, %v2942_v8  ;;  %v3276_v43 = vld [vmem:[#allocation7 + $0x68] sm:$0xff] }
 0x430   :  { %v8153_v55 = vpop.f32.mrf.mxu3  ;;  %4533 = vmatpush.lsf.msrb.mxu2 %v3351_v36  ;;  %v3335_v36 = vmul.f32 %v3271_v20, %v2954_v24 }
 0x431   :  { %4459 = vmatpush.lsf.msrb.mxu0 %v3349_v5 }
 0x432   :  { %4534 = vmatpush.lsf.msrb.mxu2 %v3349_v5  ;;  %v3267_v5 = vld [vmem:[#allocation7 + $0x20] sm:$0xff] }
 0x433   :  { %4460 = vmatpush.lsf.msrb.mxu0 %v3347_v48  ;;  %v8161_v47 = vpop.f32.mrf.mxu0  ;;  %v3331_v41 = vmul.f32 %v3267_v5, %v2948_v32  ;;  %v3304_v32 = vld [vmem:[#allocation7 + $0x148] sm:$0xff]  ;;  %v3274_v5 = vld [vmem:[#allocation7 + $0x58] sm:$0xff] }
 0x434   :  { %4535 = vmatpush.lsf.msrb.mxu2 %v3347_v48  ;;  %v8165_v51 = vpop.f32.mrf.mxu1  ;;  %v3333_v48 = vmul.f32 %v3269_v56, %v2951_v38  ;;  %v3338_v8 = vmul.f32 %v3274_v5, %v7971_v6 }
 0x435   :  { %4461 = vmatpush.lsf.msrb.mxu0 %v3345_v25 }
 0x436   :  { %4536 = vmatpush.lsf.msrb.mxu2 %v3345_v25 }
 0x437   :  { %v3102_v11 = vpop.f32.mrf.mxu2  ;;  %4462 = vmatpush.lsf.msrb.mxu0 %v3343_v53 }
 0x438   :  { %v3215_v0 = vpop.f32.mrf.mxu3  ;;  %4537 = vmatpush.lsf.msrb.mxu2 %v3343_v53 }
 0x439   :  { %v3216_v61 = vadd.f32 %v3215_v0, %v3102_v11  ;;  %4463 = vmatpush.lsf.msrb.mxu0 %v3341_v27  ;;  %v3332_v11 = vmul.f32 %v3268_v54, %v7893_v29 }
 0x43a   :  { %4538 = vmatpush.lsf.msrb.mxu2 %v3341_v27  ;;  %v3270_v27 = vld [vmem:[#allocation7 + $0x38] sm:$0xff] }
 0x43b   :  { %v3360_v30 = vmul.f32 %v3296_v34, %v3216_v61  ;;  %4464 = vmatpush.lsf.msrb.mxu0 %v3339_v3  ;;  %v8175_v14 = vpop.f32.mrf.mxu0 }
 0x43c   :  { %4539 = vmatpush.lsf.msrb.mxu2 %v3339_v3  ;;  %v8177_v1 = vpop.f32.mrf.mxu1 }
 0x43d   :  { %v4609_v9 = vpack.i.bf16 %v3360_v30, %v3328_v33  ;;  %4465 = vmatpush.lsf.msrb.mxu0 %v3337_v7  ;;  %v3334_v30 = vmul.f32 %v3270_v27, %v7922_v57 }
 0x43e   :  { %4540 = vmatpush.lsf.msrb.mxu2 %v3337_v7  ;;  %v3272_v7 = vld [vmem:[#allocation7 + $0x48] sm:$0xff] }
 0x43f   :  { %v3105_v44 = vpop.f32.mrf.mxu2  ;;  %4610 = vxpose.xlu1.b32.start [1/16] %v4609_v9, 128  ;;  %4466 = vmatpush.lsf.msrb.mxu0 %v3335_v36 }
 0x440   :  { %v3218_v52 = vpop.f32.mrf.mxu3  ;;  %4541 = vmatpush.lsf.msrb.mxu2 %v3335_v36  ;;  %v3336_v36 = vmul.f32 %v3272_v7, %v7949_v17  ;;  %v3312_v7 = vld [vmem:[#allocation7 + $0x188] sm:$0xff] }
 0x441   :  { %v3219_v40 = vadd.f32 %v3218_v52, %v3105_v44  ;;  %4467 = vmatpush.lsf.msrb.mxu0 %v3333_v48 }
 0x442   :  { %4542 = vmatpush.lsf.msrb.mxu2 %v3333_v48 }
 0x443   :  { %v3362_v42 = vmul.f32 %v3298_v19, %v3219_v40  ;;  %4468 = vmatpush.lsf.msrb.mxu0 %v3331_v41  ;;  %v8187_v2 = vpop.f32.mrf.mxu0  ;;  %v3306_v40 = vld [vmem:[#allocation7 + $0x158] sm:$0xff] }
 0x444   :  { %4543 = vmatpush.lsf.msrb.mxu2 %v3331_v41  ;;  %v8189_v21 = vpop.f32.mrf.mxu1 }
 0x445   :  { %v4611_v25 = vpack.i.bf16 %v3362_v42, %v3330_v39  ;;  %4469 = vmatpush.lsf.msrb.mxu0 %v3329_v13 }
 0x446   :  { %4544 = vmatpush.lsf.msrb.mxu2 %v3329_v13  ;;  %v3308_v13 = vld [vmem:[#allocation7 + $0x168] sm:$0xff] }
 0x447   :  { %v3108_v16 = vpop.f32.mrf.mxu2  ;;  %4612 = vxpose.xlu1.b32.cont [2/16] %v4611_v25, 128  ;;  %4470 = vmatpush.lsf.msrb.mxu0 %v3327_v58 }
 0x448   :  { %v3221_v22 = vpop.f32.mrf.mxu3  ;;  %4545 = vmatpush.lsf.msrb.mxu2 %v3327_v58  ;;  %4471 = vllmr.16.mxu0 }
 0x449   :  { %v3222_v53 = vadd.f32 %v3221_v22, %v3108_v16  ;;  %4546 = vllmr.16.mxu2  ;;  %v3340_v16 = vmul.f32 %v3276_v43, %v7993_v28  ;;  %v9458_v43 = vld [vmem:[#allocation71_spill] sm:$0xff] }
 0x44b   :  { %v3364_v0 = vmul.f32 %v3300_v4, %v3222_v53  ;;  %v8192_v49 = vpop.f32.mrf.mxu0 }
 0x44c   :  { %v8194_v31 = vpop.f32.mrf.mxu1 }
 0x44d   :  { %v4613_v34 = vpack.i.bf16 %v3364_v0, %v3332_v11  ;;  %v3278_v11 = vld [vmem:[#allocation7 + $0x78] sm:$0xff] }
 0x44e   :  { %v3342_v27 = vmul.f32 %v3278_v11, %v8015_v35 }
 0x44f   :  { %v3111_v61 = vpop.f32.mrf.mxu2  ;;  %4614 = vxpose.xlu1.b32.cont [3/16] %v4613_v34, 128  ;;  %v3310_v34 = vld [vmem:[#allocation7 + $0x178] sm:$0xff] }
 0x450   :  { %v3224_v33 = vpop.f32.mrf.mxu3 }
 0x451   :  { %v3225_v24 = vadd.f32 %v3224_v33, %v3111_v61 }
 0x453   :  { %v3366_v3 = vmul.f32 %v3302_v45, %v3225_v24  ;;  %v8197_v38 = vpop.f32.mrf.mxu0 }
 0x454   :  { %v8199_v9 = vpop.f32.mrf.mxu1 }
 0x455   :  { %v4615_v20 = vpack.i.bf16 %v3366_v3, %v3334_v30  ;;  %v3192_v30 = vadd.f32 %v8038_v46, %v8033_v62  ;;  %v3282_v62 = vld [vmem:[#allocation7 + $0x98] sm:$0xff] }
 0x457   :  { %v3114_v29 = vpop.f32.mrf.mxu2  ;;  %4616 = vxpose.xlu1.b32.cont [4/16] %v4615_v20, 128  ;;  %v3280_v20 = vld [vmem:[#allocation7 + $0x88] sm:$0xff] }
 0x458   :  { %v3227_v56 = vpop.f32.mrf.mxu3 }
 0x459   :  { %v3228_v26 = vadd.f32 %v3227_v56, %v3114_v29 }
 0x45b   :  { %v3368_v44 = vmul.f32 %v3304_v32, %v3228_v26  ;;  %v8202_v52 = vpop.f32.mrf.mxu0  ;;  %v3344_v32 = vmul.f32 %v3280_v20, %v3192_v30 }
 0x45c   :  { %v8204_v19 = vpop.f32.mrf.mxu1 }
 0x45d   :  { %v4617_v63 = vpack.i.bf16 %v3368_v44, %v3336_v36 }
 0x45f   :  { %v3117_v57 = vpop.f32.mrf.mxu2  ;;  %4618 = vxpose.xlu1.b32.cont [5/16] %v4617_v63, 128  ;;  %v9457_v63 = vld [vmem:[#allocation169_spill] sm:$0xff] }
 0x460   :  { %v3230_v59 = vpop.f32.mrf.mxu3 }
 0x461   :  { %v3231_v48 = vadd.f32 %v3230_v59, %v3117_v57  ;;  %v3195_v57 = vadd.f32 %v9457_v63, %v8057_v60  ;;  %v3314_v59 = vld [vmem:[#allocation7 + $0x198] sm:$0xff]  ;;  %v3284_v60 = vld [vmem:[#allocation7 + $0xa8] sm:$0xff] }
 0x463   :  { %v3370_v12 = vmul.f32 %v3306_v40, %v3231_v48  ;;  %v8207_v42 = vpop.f32.mrf.mxu0  ;;  %v3346_v48 = vmul.f32 %v3282_v62, %v3195_v57  ;;  %v9462_v57 = vld [vmem:[#allocation56_spill] sm:$0xff] }
 0x464   :  { %v8209_v41 = vpop.f32.mrf.mxu1 }
 0x465   :  { %v4619_v39 = vpack.i.bf16 %v3370_v12, %v3338_v8 }
 0x467   :  { %v3120_v17 = vpop.f32.mrf.mxu2  ;;  %4620 = vxpose.xlu1.b32.cont [6/16] %v4619_v39, 128 }
 0x468   :  { %v3233_v25 = vpop.f32.mrf.mxu3 }
 0x469   :  { %v3234_v58 = vadd.f32 %v3233_v25, %v3120_v17  ;;  %4472 = vmatmul.lmr.bf16.vlgmr.msra.gmra.16.mxu0  ;;  %v9459_v25 = vld [vmem:[#allocation22_spill] sm:$0xff] }
 0x46a   :  { %4547 = vmatmul.lmr.bf16.vlgmr.msra.gmra.16.mxu2 }
 0x46b   :  { %v3372_v54 = vmul.f32 %v3308_v13, %v3234_v58  ;;  %v8212_v4 = vpop.f32.mrf.mxu0  ;;  %v3198_v13 = vadd.f32 %v9459_v25, %v9458_v43 }
 0x46c   :  { %v8214_v6 = vpop.f32.mrf.mxu1 }
 0x46d   :  { %v4621_v22 = vpack.i.bf16 %v3372_v54, %v3340_v16  ;;  %v3316_v54 = vld [vmem:[#allocation7 + $0x1a8] sm:$0xff] }
 0x46f   :  { %v3123_v53 = vpop.f32.mrf.mxu2  ;;  %4622 = vxpose.xlu1.b32.cont [7/16] %v4621_v22, 128 }
 0x470   :  { %v3236_v0 = vpop.f32.mrf.mxu3 }
 0x471   :  { %v3237_v61 = vadd.f32 %v3236_v0, %v3123_v53  ;;  %4473 = vmatmul.lmr.bf16.gmra.16.mxu0  ;;  %v3348_v53 = vmul.f32 %v3284_v60, %v3198_v13  ;;  %v9464_v60 = vld [vmem:[#allocation78_spill] sm:$0xff] }
 0x472   :  { %4548 = vmatmul.lmr.bf16.gmra.16.mxu2 }
 0x473   :  { %v3374_v33 = vmul.f32 %v3310_v34, %v3237_v61  ;;  %v8217_v45 = vpop.f32.mrf.mxu0 }
 0x474   :  { %v8219_v24 = vpop.f32.mrf.mxu1 }
 0x475   :  { %v4623_v28 = vpack.i.bf16 %v3374_v33, %v3342_v27  ;;  %v9460_v27 = vld [vmem:[#allocation144_spill] sm:$0xff] }
 0x476   :  { %v9461_v33 = vld [vmem:[#allocation192_spill] sm:$0xff] }
 0x477   :  { %v3126_v3 = vpop.f32.mrf.mxu2  ;;  %4624 = vxpose.xlu1.b32.cont [8/16] %v4623_v28, 128  ;;  %v3201_v28 = vadd.f32 %v9461_v33, %v9460_v27 }
 0x478   :  { %v3239_v29 = vpop.f32.mrf.mxu3 }
 0x479   :  { %v3240_v56 = vadd.f32 %v3239_v29, %v3126_v3  ;;  %4474 = vmatmul.lmr.bf16.gmra.16.mxu0  ;;  %v3286_v3 = vld [vmem:[#allocation7 + $0xb8] sm:$0xff] }
 0x47a   :  { %4549 = vmatmul.lmr.bf16.gmra.16.mxu2  ;;  %v3318_v29 = vld [vmem:[#allocation7 + $0x1b8] sm:$0xff] }
 0x47b   :  { %v3376_v26 = vmul.f32 %v3312_v7, %v3240_v56  ;;  %v8223_v36 = vpop.f32.mrf.mxu0  ;;  %v3350_v56 = vmul.f32 %v3286_v3, %v3201_v28 }
 0x47c   :  { %v8225_v44 = vpop.f32.mrf.mxu1 }
 0x47d   :  { %v4625_v35 = vpack.i.bf16 %v3376_v26, %v3344_v32 }
 0x47f   :  { %v3129_v5 = vpop.f32.mrf.mxu2  ;;  %4626 = vxpose.xlu1.b32.cont [9/16] %v4625_v35, 128 }
 0x480   :  { %v3242_v46 = vpop.f32.mrf.mxu3 }
 0x481   :  { %v3243_v40 = vadd.f32 %v3242_v46, %v3129_v5  ;;  %4475 = vmatmul.lmr.bf16.gmra.16.mxu0  ;;  %v3204_v5 = vadd.f32 %v9462_v57, %v8117_v50  ;;  %v3288_v46 = vld [vmem:[#allocation7 + $0xc8] sm:$0xff] }
 0x482   :  { %4550 = vmatmul.lmr.bf16.gmra.16.mxu2  ;;  %v3324_v57 = vld [vmem:[#allocation7 + $0x1e8] sm:$0xff] }
 0x483   :  { %v3378_v8 = vmul.f32 %v3314_v59, %v3243_v40  ;;  %v8229_v39 = vpop.f32.mrf.mxu0  ;;  %v3320_v40 = vld [vmem:[#allocation7 + $0x1c8] sm:$0xff] }
 0x484   :  { %v8231_v17 = vpop.f32.mrf.mxu1 }
 0x485   :  { %v4627_v12 = vpack.i.bf16 %v3378_v8, %v3346_v48  ;;  %v3352_v8 = vmul.f32 %v3288_v46, %v3204_v5  ;;  %v3323_v5 = vld [vmem:[#allocation7 + $0x1e0] sm:$0xff] }
 0x487   :  { %v3132_v58 = vpop.f32.mrf.mxu2  ;;  %4628 = vxpose.xlu1.b32.cont [10/16] %v4627_v12, 128 }
 0x488   :  { %v3245_v16 = vpop.f32.mrf.mxu3 }
 0x489   :  { %v3246_v22 = vadd.f32 %v3245_v16, %v3132_v58  ;;  %4476 = vmatmul.lmr.bf16.gmra.16.mxu0  ;;  %v9463_v58 = vld [vmem:[#allocation57_spill] sm:$0xff] }
 0x48a   :  { %4551 = vmatmul.lmr.bf16.gmra.16.mxu2  ;;  %v3207_v16 = vadd.f32 %v9464_v60, %v9463_v58  ;;  %v3213_v58 = vadd.f32 %v8153_v55, %v8151_v10  ;;  %v3315_v60 = vld [vmem:[#allocation7 + $0x1a0] sm:$0xff] }
 0x48b   :  { %v3380_v11 = vmul.f32 %v3316_v54, %v3246_v22  ;;  %v2912_v34 = vpop.f32.mrf.mxu0  ;;  %v3290_v22 = vld [vmem:[#allocation7 + $0xd8] sm:$0xff] }
 0x48c   :  { %v3025_v61 = vpop.f32.mrf.mxu1 }
 0x48d   :  { %v4629_v0 = vpack.i.bf16 %v3380_v11, %v3348_v53  ;;  %v3322_v53 = vld [vmem:[#allocation7 + $0x1d8] sm:$0xff] }
 0x48f   :  { %v3135_v30 = vpop.f32.mrf.mxu2  ;;  %4630 = vxpose.xlu1.b32.cont [11/16] %v4629_v0, 128  ;;  %v3354_v0 = vmul.f32 %v3290_v22, %v3207_v16  ;;  %v3294_v16 = vld [vmem:[#allocation7 + $0xf8] sm:$0xff] }
 0x490   :  { %v3248_v20 = vpop.f32.mrf.mxu3  ;;  %v3358_v10 = vmul.f32 %v3294_v16, %v3213_v58 }
 0x491   :  { %v3249_v7 = vadd.f32 %v3248_v20, %v3135_v30  ;;  %4477 = vmatmul.lmr.bf16.gmra.16.mxu0  ;;  %v3210_v30 = vadd.f32 %v8139_v18, %v8137_v23  ;;  %v3325_v20 = vld [vmem:[#allocation7 + $0x1f0] sm:$0xff]  ;;  %v3319_v18 = vld [vmem:[#allocation7 + $0x1c0] sm:$0xff] }
 0x492   :  { %4552 = vmatmul.lmr.bf16.gmra.16.mxu2 }
 0x493   :  { %v3382_v32 = vmul.f32 %v3318_v29, %v3249_v7  ;;  %v2915_v35 = vpop.f32.mrf.mxu0  ;;  %v3292_v29 = vld [vmem:[#allocation7 + $0xe8] sm:$0xff] }
 0x494   :  { %v3028_v63 = vpop.f32.mrf.mxu1 }
 0x495   :  { %v4631_v26 = vpack.i.bf16 %v3382_v32, %v3350_v56 }
 0x497   :  { %v3138_v62 = vpop.f32.mrf.mxu2  ;;  %4632 = vxpose.xlu1.b32.cont [12/16] %v4631_v26, 128 }
 0x498   :  { %v3251_v59 = vpop.f32.mrf.mxu3 }
 0x499   :  { %v3252_v48 = vadd.f32 %v3251_v59, %v3138_v62  ;;  %4478 = vmatmul.lmr.bf16.gmra.16.mxu0  ;;  %v3029_v62 = vadd.f32 %v3028_v63, %v2915_v35  ;;  %v3317_v35 = vld [vmem:[#allocation7 + $0x1b0] sm:$0xff]  ;;  %v3020_v63 = vadd.f32 %v8225_v44, %v8223_v36  ;;  %v3014_v44 = vadd.f32 %v8214_v6, %v8212_v4  ;;  %v3307_v6 = vld [vmem:[#allocation7 + $0x160] sm:$0xff] }
 0x49a   :  { %4553 = vmatmul.lmr.bf16.gmra.16.mxu2  ;;  %v3313_v36 = vld [vmem:[#allocation7 + $0x190] sm:$0xff] }
 0x49b   :  { %v3384_v12 = vmul.f32 %v3320_v40, %v3252_v48  ;;  %v2918_v25 = vpop.f32.mrf.mxu0  ;;  %v3356_v40 = vmul.f32 %v3292_v29, %v3210_v30  ;;  %v3321_v48 = vld [vmem:[#allocation7 + $0x1d0] sm:$0xff] }
 0x49c   :  { %v3031_v13 = vpop.f32.mrf.mxu1 }
 0x49d   :  { %v4633_v43 = vpack.i.bf16 %v3384_v12, %v3352_v8  ;;  %v3032_v7 = vadd.f32 %v3031_v13, %v2918_v25  ;;  %v3026_v8 = vadd.f32 %v3025_v61, %v2912_v34  ;;  %v3385_v13 = vmul.f32 %v3321_v48, %v3029_v62 }
 0x49f   :  { %v3141_v54 = vpop.f32.mrf.mxu2  ;;  %4634 = vxpose.xlu1.b32.cont [13/16] %v4633_v43, 128  ;;  %v3387_v23 = vmul.f32 %v3323_v5, %v3032_v7  ;;  %v3023_v43 = vadd.f32 %v8231_v17, %v8229_v39  ;;  %v3383_v34 = vmul.f32 %v3319_v18, %v3026_v8  ;;  %v3017_v39 = vadd.f32 %v8219_v24, %v8217_v45 }
 0x4a0   :  { %v3254_v50 = vpop.f32.mrf.mxu3  ;;  %v3011_v45 = vadd.f32 %v8209_v41, %v8207_v42  ;;  %v3305_v42 = vld [vmem:[#allocation7 + $0x150] sm:$0xff]  ;;  %v3002_v41 = vadd.f32 %v8194_v31, %v8192_v49  ;;  %v3299_v49 = vld [vmem:[#allocation7 + $0x120] sm:$0xff]  ;;  %v2993_v31 = vadd.f32 %v8165_v51, %v8161_v47 }
 0x4a1   :  { %v3255_v11 = vadd.f32 %v3254_v50, %v3141_v54  ;;  %4479 = vmatmul.lmr.bf16.gmra.16.mxu0  ;;  %v3326_v54 = vld [vmem:[#allocation7 + $0x1f8] sm:$0xff]  ;;  %v3381_v22 = vmul.f32 %v3317_v35, %v3023_v43  ;;  %v3377_v24 = vmul.f32 %v3313_v36, %v3017_v39 }
 0x4a2   :  { %4554 = vmatmul.lmr.bf16.gmra.16.mxu2 }
 0x4a3   :  { %v3386_v27 = vmul.f32 %v3322_v53, %v3255_v11  ;;  %v2921_v28 = vpop.f32.mrf.mxu0  ;;  %v3379_v53 = vmul.f32 %v3315_v60, %v3020_v63  ;;  %v3311_v11 = vld [vmem:[#allocation7 + $0x180] sm:$0xff] }
 0x4a4   :  { %v3034_v3 = vpop.f32.mrf.mxu1  ;;  %v3375_v4 = vmul.f32 %v3311_v11, %v3014_v44 }
 0x4a5   :  { %v4635_v33 = vpack.i.bf16 %v3386_v27, %v3354_v0  ;;  %v3035_v56 = vadd.f32 %v3034_v3, %v2921_v28  ;;  %v3309_v27 = vld [vmem:[#allocation7 + $0x170] sm:$0xff]  ;;  %v3005_v28 = vadd.f32 %v8199_v9, %v8197_v38  ;;  %v2996_v9 = vadd.f32 %v8177_v1, %v8175_v14 }
 0x4a6   :  { %v3373_v30 = vmul.f32 %v3309_v27, %v3011_v45  ;;  %v3301_v38 = vld [vmem:[#allocation7 + $0x130] sm:$0xff] }
 0x4a7   :  { %v3144_v32 = vpop.f32.mrf.mxu2  ;;  %4636 = vxpose.xlu1.b32.cont [14/16] %v4635_v33, 128  ;;  %v3389_v59 = vmul.f32 %v3325_v20, %v3035_v56  ;;  %v3008_v33 = vadd.f32 %v8204_v19, %v8202_v52  ;;  %v3303_v20 = vld [vmem:[#allocation7 + $0x140] sm:$0xff]  ;;  %v2999_v52 = vadd.f32 %v8189_v21, %v8187_v2  ;;  %v3369_v19 = vmul.f32 %v3305_v42, %v3005_v28  ;;  %v3297_v56 = vld [vmem:[#allocation7 + $0x110] sm:$0xff] }
 0x4a8   :  { %v3257_v26 = vpop.f32.mrf.mxu3  ;;  %v3367_v29 = vmul.f32 %v3303_v20, %v3002_v41  ;;  %v2990_v2 = vadd.f32 %v8147_v37, %v8145_v15  ;;  %v3363_v21 = vmul.f32 %v3299_v49, %v2996_v9  ;;  %v3361_v14 = vmul.f32 %v3297_v56, %v2993_v31 }
 0x4a9   :  { %v3258_v46 = vadd.f32 %v3257_v26, %v3144_v32  ;;  %4494 = vmatpush.lsf.msrb.mxu1 %v3389_v59  ;;  %4566 = vmatpush.lsf.msrb.mxu3 %v3389_v59  ;;  %v3371_v3 = vmul.f32 %v3307_v6, %v3008_v33  ;;  %v3365_v7 = vmul.f32 %v3301_v38, %v2999_v52  ;;  %v3295_v32 = vld [vmem:[#allocation7 + $0x100] sm:$0xff] }
 0x4aa   :  { %4480 = vmatmul.lmr.bf16.gmra.16.mxu0  ;;  %4555 = vmatmul.lmr.bf16.gmra.16.mxu2  ;;  %v3359_v1 = vmul.f32 %v3295_v32, %v2990_v2 }
 0x4ab   :  { %v3388_v12 = vmul.f32 %v3324_v57, %v3258_v46  ;;  %4495 = vmatpush.lsf.msrb.mxu1 %v3387_v23  ;;  %4567 = vmatpush.lsf.msrb.mxu3 %v3387_v23 }
 0x4ad   :  { %v4637_v25 = vpack.i.bf16 %v3388_v12, %v3356_v40  ;;  %4496 = vmatpush.lsf.msrb.mxu1 %v3385_v13  ;;  %4568 = vmatpush.lsf.msrb.mxu3 %v3385_v13 }
 0x4af   :  { %v3147_v61 = vpop.f32.mrf.mxu2  ;;  %4638 = vxpose.xlu1.b32.cont [15/16] %v4637_v25, 128  ;;  %4497 = vmatpush.lsf.msrb.mxu1 %v3383_v34 }
 0x4b0   :  { %4569 = vmatpush.lsf.msrb.mxu3 %v3383_v34  ;;  %v3260_v17 = vpop.f32.mrf.mxu3 }
 0x4b1   :  { %v3261_v50 = vadd.f32 %v3260_v17, %v3147_v61  ;;  %4498 = vmatpush.lsf.msrb.mxu1 %v3381_v22 }
 0x4b2   :  { %4570 = vmatpush.lsf.msrb.mxu3 %v3381_v22  ;;  %4481 = vmatmul.lmr.bf16.gmra.16.mxu0 }
 0x4b3   :  { %v3390_v55 = vmul.f32 %v3326_v54, %v3261_v50  ;;  %4556 = vmatmul.lmr.bf16.gmra.16.mxu2  ;;  %4499 = vmatpush.lsf.msrb.mxu1 %v3379_v53 }
 0x4b4   :  { %4571 = vmatpush.lsf.msrb.mxu3 %v3379_v53 }
 0x4b5   :  { %v4639_v0 = vpack.i.bf16 %v3390_v55, %v3358_v10  ;;  %4500 = vmatpush.lsf.msrb.mxu1 %v3377_v24 }
 0x4b6   :  { %4572 = vmatpush.lsf.msrb.mxu3 %v3377_v24 }
 0x4b7   :  { %4640 = vxpose.xlu1.b32.end [16/16] %v4639_v0, 128  ;;  %4501 = vmatpush.lsf.msrb.mxu1 %v3375_v4 }
 0x4b8   :  { %4573 = vmatpush.lsf.msrb.mxu3 %v3375_v4 }
 0x4b9   :  { %4502 = vmatpush.lsf.msrb.mxu1 %v3373_v30 }
 0x4ba   :  { %4574 = vmatpush.lsf.msrb.mxu3 %v3373_v30  ;;  %4482 = vmatmul.lmr.bf16.gmra.16.mxu0 }
 0x4bb   :  { %4557 = vmatmul.lmr.bf16.gmra.16.mxu2  ;;  %4503 = vmatpush.lsf.msrb.mxu1 %v3371_v3 }
 0x4bc   :  { %4575 = vmatpush.lsf.msrb.mxu3 %v3371_v3 }
 0x4bd   :  { %4504 = vmatpush.lsf.msrb.mxu1 %v3369_v19 }
 0x4be   :  { %4576 = vmatpush.lsf.msrb.mxu3 %v3369_v19 }
 0x4bf   :  { %4505 = vmatpush.lsf.msrb.mxu1 %v3367_v29 }
 0x4c0   :  { %4577 = vmatpush.lsf.msrb.mxu3 %v3367_v29 }
 0x4c1   :  { %4506 = vmatpush.lsf.msrb.mxu1 %v3365_v7 }
 0x4c2   :  { %4578 = vmatpush.lsf.msrb.mxu3 %v3365_v7  ;;  %4483 = vmatmul.lmr.bf16.gmra.16.mxu0 }
 0x4c3   :  { %4558 = vmatmul.lmr.bf16.gmra.16.mxu2  ;;  %4507 = vmatpush.lsf.msrb.mxu1 %v3363_v21 }
 0x4c4   :  { %4579 = vmatpush.lsf.msrb.mxu3 %v3363_v21 }
 0x4c5   :  { %4508 = vmatpush.lsf.msrb.mxu1 %v3361_v14 }
 0x4c6   :  { %4580 = vmatpush.lsf.msrb.mxu3 %v3361_v14 }
 0x4c7   :  { %4509 = vmatpush.lsf.msrb.mxu1 %v3359_v1 }
 0x4c8   :  { %4581 = vmatpush.lsf.msrb.mxu3 %v3359_v1  ;;  %4510 = vllmr.16.mxu1 }
 0x4c9   :  { %4582 = vllmr.16.mxu3 }
 0x4ca   :  { %4484 = vmatmul.lmr.bf16.gmra.16.mxu0 }
 0x4cb   :  { %4559 = vmatmul.lmr.bf16.gmra.16.mxu2 }
 0x4d2   :  { %4485 = vmatmul.lmr.bf16.gmra.16.mxu0 }
 0x4d3   :  { %4560 = vmatmul.lmr.bf16.gmra.16.mxu2 }
 0x4da   :  { %4486 = vmatmul.lmr.bf16.gmra.16.mxu0 }
 0x4db   :  { %4561 = vmatmul.lmr.bf16.gmra.16.mxu2 }
 0x4e2   :  { %4487 = vmatmul.lmr.bf16.gmra.16.mxu0 }
 0x4e3   :  { %4562 = vmatmul.lmr.bf16.gmra.16.mxu2  ;;  %v4641_v15 = vpop.trf.xlu1 }
 0x4e4   :  { %v4642_v47 = vunpack.i.l.bf16 %v4641_v15  ;;  %v4645_v43 = vunpack.i.h.bf16 %v4641_v15 }
 0x4e6   :  { %v8269_v37 = vpop.f32.mrf.mxu0 }
 0x4e7   :  { %9465 = vst [vmem:[#allocation160_spill] sm:$0xff] %v8269_v37 }
 0x4e9   :  { %4511 = vmatmul.lmr.bf16.vlgmr.msra.gmra.16.mxu1 }
 0x4ea   :  { %4583 = vmatmul.lmr.bf16.vlgmr.msra.gmra.16.mxu3  ;;  %3583 = vmatmul.f32.gmra.mxu0 %v4642_v47 }
 0x4eb   :  { %3809 = vmatmul.f32.gmra.mxu2 %v4642_v47  ;;  %v4646_v26 = vpop.trf.xlu1 }
 0x4ec   :  { %v4647_v5 = vunpack.i.l.bf16 %v4646_v26  ;;  %v4650_v60 = vunpack.i.h.bf16 %v4646_v26 }
 0x4ed   :  { %v3762_v51 = vpop.f32.mrf.mxu2 }
 0x4ee   :  { %v8271_v57 = vpop.f32.mrf.mxu0 }
 0x4f1   :  { %4512 = vmatmul.lmr.bf16.gmra.16.mxu1 }
 0x4f2   :  { %4584 = vmatmul.lmr.bf16.gmra.16.mxu3  ;;  %3586 = vmatmul.f32.gmra.mxu0 %v4647_v5 }
 0x4f3   :  { %3812 = vmatmul.f32.gmra.mxu2 %v4647_v5  ;;  %v4651_v46 = vpop.trf.xlu1 }
 0x4f4   :  { %v4652_v40 = vunpack.i.l.bf16 %v4651_v46  ;;  %v4655_v44 = vunpack.i.h.bf16 %v4651_v46 }
 0x4f5   :  { %v3765_v62 = vpop.f32.mrf.mxu2 }
 0x4f6   :  { %v8273_v59 = vpop.f32.mrf.mxu0 }
 0x4f9   :  { %4513 = vmatmul.lmr.bf16.gmra.16.mxu1 }
 0x4fa   :  { %4585 = vmatmul.lmr.bf16.gmra.16.mxu3  ;;  %3589 = vmatmul.f32.gmra.mxu0 %v4652_v40 }
 0x4fb   :  { %3815 = vmatmul.f32.gmra.mxu2 %v4652_v40  ;;  %v4656_v8 = vpop.trf.xlu1 }
 0x4fc   :  { %v4657_v23 = vunpack.i.l.bf16 %v4656_v8  ;;  %v4660_v27 = vunpack.i.h.bf16 %v4656_v8 }
 0x4fd   :  { %v3768_v48 = vpop.f32.mrf.mxu2 }
 0x4fe   :  { %v8275_v12 = vpop.f32.mrf.mxu0 }
 0x501   :  { %4514 = vmatmul.lmr.bf16.gmra.16.mxu1 }
 0x502   :  { %4586 = vmatmul.lmr.bf16.gmra.16.mxu3  ;;  %3592 = vmatmul.f32.gmra.mxu0 %v4657_v23 }
 0x503   :  { %3818 = vmatmul.f32.gmra.mxu2 %v4657_v23  ;;  %v4661_v25 = vpop.trf.xlu1 }
 0x504   :  { %v4662_v63 = vunpack.i.l.bf16 %v4661_v25  ;;  %v4665_v3 = vunpack.i.h.bf16 %v4661_v25 }
 0x505   :  { %v3771_v18 = vpop.f32.mrf.mxu2 }
 0x506   :  { %v8277_v13 = vpop.f32.mrf.mxu0 }
 0x509   :  { %4515 = vmatmul.lmr.bf16.gmra.16.mxu1 }
 0x50a   :  { %4587 = vmatmul.lmr.bf16.gmra.16.mxu3  ;;  %3595 = vmatmul.f32.gmra.mxu0 %v4662_v63 }
 0x50b   :  { %3821 = vmatmul.f32.gmra.mxu2 %v4662_v63  ;;  %v4666_v16 = vpop.trf.xlu1 }
 0x50c   :  { %v4667_v54 = vunpack.i.l.bf16 %v4666_v16  ;;  %v4670_v31 = vunpack.i.h.bf16 %v4666_v16 }
 0x50d   :  { %v3774_v34 = vpop.f32.mrf.mxu2 }
 0x50e   :  { %v8283_v39 = vpop.f32.mrf.mxu0 }
 0x511   :  { %4516 = vmatmul.lmr.bf16.gmra.16.mxu1 }
 0x512   :  { %4588 = vmatmul.lmr.bf16.gmra.16.mxu3  ;;  %3598 = vmatmul.f32.gmra.mxu0 %v4667_v54 }
 0x513   :  { %3824 = vmatmul.f32.gmra.mxu2 %v4667_v54  ;;  %v4671_v53 = vpop.trf.xlu1 }
 0x514   :  { %v4672_v11 = vunpack.i.l.bf16 %v4671_v53  ;;  %v4675_v15 = vunpack.i.h.bf16 %v4671_v53 }
 0x515   :  { %v3777_v22 = vpop.f32.mrf.mxu2 }
 0x516   :  { %v8289_v10 = vpop.f32.mrf.mxu0 }
 0x519   :  { %4517 = vmatmul.lmr.bf16.gmra.16.mxu1 }
 0x51a   :  { %4589 = vmatmul.lmr.bf16.gmra.16.mxu3  ;;  %3601 = vmatmul.f32.gmra.mxu0 %v4672_v11 }
 0x51b   :  { %3827 = vmatmul.f32.gmra.mxu2 %v4672_v11  ;;  %v4676_v33 = vpop.trf.xlu1 }
 0x51c   :  { %v4677_v28 = vunpack.i.l.bf16 %v4676_v33 }
 0x51d   :  { %v3780_v45 = vpop.f32.mrf.mxu2 }
 0x51e   :  { %v8295_v4 = vpop.f32.mrf.mxu0 }
 0x521   :  { %4518 = vmatmul.lmr.bf16.gmra.16.mxu1 }
 0x522   :  { %4590 = vmatmul.lmr.bf16.gmra.16.mxu3  ;;  %3604 = vmatmul.f32.gmra.mxu0 %v4677_v28 }
 0x523   :  { %3830 = vmatmul.f32.gmra.mxu2 %v4677_v28  ;;  %v4681_v20 = vpop.trf.xlu1 }
 0x524   :  { %v4682_v38 = vunpack.i.l.bf16 %v4681_v20 }
 0x525   :  { %v3783_v30 = vpop.f32.mrf.mxu2 }
 0x527   :  { %v8301_v52 = vpop.f32.mrf.mxu0 }
 0x529   :  { %4519 = vmatmul.lmr.bf16.gmra.16.mxu1 }
 0x52a   :  { %4591 = vmatmul.lmr.bf16.gmra.16.mxu3  ;;  %3607 = vmatmul.f32.gmra.mxu0 %v4682_v38 }
 0x52b   :  { %3833 = vmatmul.f32.gmra.mxu2 %v4682_v38  ;;  %v4686_v7 = vpop.trf.xlu1 }
 0x52c   :  { %v4687_v21 = vunpack.i.l.bf16 %v4686_v7  ;;  %v4690_v53 = vunpack.i.h.bf16 %v4686_v7 }
 0x52d   :  { %v8305_v9 = vpop.f32.mrf.mxu2 }
 0x52f   :  { %v8309_v56 = vpop.f32.mrf.mxu0 }
 0x531   :  { %4520 = vmatmul.lmr.bf16.gmra.16.mxu1 }
 0x532   :  { %4592 = vmatmul.lmr.bf16.gmra.16.mxu3  ;;  %3610 = vmatmul.f32.gmra.mxu0 %v4687_v21 }
 0x533   :  { %3836 = vmatmul.f32.gmra.mxu2 %v4687_v21  ;;  %v4691_v47 = vpop.trf.xlu1 }
 0x534   :  { %v4692_v5 = vunpack.i.l.bf16 %v4691_v47 }
 0x536   :  { %v8313_v32 = vpop.f32.mrf.mxu2 }
 0x539   :  { %4521 = vmatmul.lmr.bf16.gmra.16.mxu1 }
 0x53a   :  { %4593 = vmatmul.lmr.bf16.gmra.16.mxu3  ;;  %3613 = vmatmul.f32.gmra.mxu0 %v4692_v5 }
 0x53b   :  { %3839 = vmatmul.f32.gmra.mxu2 %v4692_v5  ;;  %v4696_v8 = vpop.trf.xlu1 }
 0x53c   :  { %v4700_v7 = vunpack.i.h.bf16 %v4696_v8 }
 0x541   :  { %4522 = vmatmul.lmr.bf16.gmra.16.mxu1 }
 0x542   :  { %4594 = vmatmul.lmr.bf16.gmra.16.mxu3 }
 0x549   :  { %4523 = vmatmul.lmr.bf16.gmra.16.mxu1 }
 0x54a   :  { %4595 = vmatmul.lmr.bf16.gmra.16.mxu3 }
 0x551   :  { %4524 = vmatmul.lmr.bf16.gmra.16.mxu1 }
 0x552   :  { %4596 = vmatmul.lmr.bf16.gmra.16.mxu3 }
 0x559   :  { %4525 = vmatmul.lmr.bf16.gmra.16.mxu1 }
 0x55a   :  { %4597 = vmatmul.lmr.bf16.gmra.16.mxu3 }
 0x561   :  { %4526 = vmatmul.lmr.bf16.gmra.16.mxu1 }
 0x562   :  { %4598 = vmatmul.lmr.bf16.gmra.16.mxu3 }
 0x566   :  { %v8279_v35 = vpop.f32.mrf.mxu1 }
 0x567   :  { %9466 = vst [vmem:[#allocation67_spill] sm:$0xff] %v8279_v35 }
 0x569   :  { %3696 = vmatmul.f32.gmra.mxu1 %v4645_v43 }
 0x56a   :  { %3922 = vmatmul.f32.gmra.mxu3 %v4645_v43  ;;  %v4697_v43 = vunpack.i.l.bf16 %v4696_v8 }
 0x56c   :  { %3616 = vmatmul.f32.gmra.mxu0 %v4697_v43  ;;  %3842 = vmatmul.f32.gmra.mxu2 %v4697_v43 }
 0x56d   :  { %v3875_v61 = vpop.f32.mrf.mxu3 }
 0x56e   :  { %v8281_v58 = vadd.f32 %v3875_v61, %v3762_v51  ;;  %v8285_v17 = vpop.f32.mrf.mxu1  ;;  %v8317_v51 = vpop.f32.mrf.mxu0  ;;  %v4685_v61 = vunpack.i.h.bf16 %v4681_v20 }
 0x56f   :  { %9468 = vst [vmem:[#allocation143_spill] sm:$0xff] %v8285_v17 }
 0x570   :  { %9467 = vst [vmem:[#allocation133_spill] sm:$0xff] %v8281_v58 }
 0x571   :  { %3699 = vmatmul.f32.gmra.mxu1 %v4650_v60 }
 0x572   :  { %3925 = vmatmul.f32.gmra.mxu3 %v4650_v60  ;;  %v4701_v60 = vpop.trf.xlu1 }
 0x575   :  { %v3878_v50 = vpop.f32.mrf.mxu3 }
 0x576   :  { %v8287_v36 = vadd.f32 %v3878_v50, %v3765_v62  ;;  %v8291_v55 = vpop.f32.mrf.mxu1  ;;  %v8321_v62 = vpop.f32.mrf.mxu2 }
 0x577   :  { %v8325_v23 = vpop.f32.mrf.mxu0 }
 0x578   :  { %9469 = vst [vmem:[#allocation141_spill] sm:$0xff] %v8287_v36 }
 0x579   :  { %3702 = vmatmul.f32.gmra.mxu1 %v4655_v44 }
 0x57a   :  { %3928 = vmatmul.f32.gmra.mxu3 %v4655_v44  ;;  %v4706_v11 = vpop.trf.xlu1 }
 0x57d   :  { %v3881_v24 = vpop.f32.mrf.mxu3 }
 0x57e   :  { %v8293_v0 = vadd.f32 %v3881_v24, %v3768_v48  ;;  %v8297_v6 = vpop.f32.mrf.mxu1  ;;  %v4680_v48 = vunpack.i.h.bf16 %v4676_v33  ;;  %v8329_v25 = vpop.f32.mrf.mxu2 }
 0x57f   :  { %v8333_v16 = vpop.f32.mrf.mxu0 }
 0x580   :  { %9470 = vst [vmem:[#allocation137_spill] sm:$0xff] %v8293_v0 }
 0x581   :  { %3705 = vmatmul.f32.gmra.mxu1 %v4660_v27 }
 0x582   :  { %3931 = vmatmul.f32.gmra.mxu3 %v4660_v27  ;;  %v4707_v27 = vunpack.i.l.bf16 %v4706_v11 }
 0x585   :  { %v3884_v42 = vpop.f32.mrf.mxu3 }
 0x586   :  { %v8299_v41 = vadd.f32 %v3884_v42, %v3771_v18  ;;  %v8303_v19 = vpop.f32.mrf.mxu1  ;;  %v8337_v50 = vpop.f32.mrf.mxu2 }
 0x587   :  { %v4711_v42 = vpop.trf.xlu1 }
 0x588   :  { %9471 = vst [vmem:[#allocation74_spill] sm:$0xff] %v8299_v41  ;;  %v4712_v38 = vunpack.i.l.bf16 %v4711_v42 }
 0x589   :  { %3708 = vmatmul.f32.gmra.mxu1 %v4665_v3 }
 0x58a   :  { %3934 = vmatmul.f32.gmra.mxu3 %v4665_v3 }
 0x58d   :  { %v3887_v29 = vpop.f32.mrf.mxu3 }
 0x58e   :  { %v8307_v49 = vadd.f32 %v3887_v29, %v3774_v34  ;;  %v8311_v2 = vpop.f32.mrf.mxu1  ;;  %v8343_v33 = vpop.f32.mrf.mxu2 }
 0x58f   :  { %v4716_v21 = vpop.trf.xlu1 }
 0x590   :  { %9472 = vst [vmem:[#allocation153_spill] sm:$0xff] %v8307_v49  ;;  %v4717_v5 = vunpack.i.l.bf16 %v4716_v21 }
 0x591   :  { %3711 = vmatmul.f32.gmra.mxu1 %v4670_v31 }
 0x592   :  { %3937 = vmatmul.f32.gmra.mxu3 %v4670_v31 }
 0x595   :  { %v3890_v14 = vpop.f32.mrf.mxu3 }
 0x596   :  { %v8315_v1 = vadd.f32 %v3890_v14, %v3777_v22  ;;  %v8319_v26 = vpop.f32.mrf.mxu1  ;;  %v4702_v22 = vunpack.i.l.bf16 %v4701_v60  ;;  %v3804_v29 = vpop.f32.mrf.mxu2 }
 0x598   :  { %3619 = vmatmul.f32.gmra.mxu0 %v4702_v22  ;;  %3845 = vmatmul.f32.gmra.mxu2 %v4702_v22  ;;  %v4710_v22 = vunpack.i.h.bf16 %v4706_v11 }
 0x599   :  { %3714 = vmatmul.f32.gmra.mxu1 %v4675_v15 }
 0x59a   :  { %3940 = vmatmul.f32.gmra.mxu3 %v4675_v15 }
 0x59d   :  { %v3893_v46 = vpop.f32.mrf.mxu3 }
 0x59e   :  { %v8323_v40 = vadd.f32 %v3893_v46, %v3780_v45  ;;  %v8327_v18 = vpop.f32.mrf.mxu1  ;;  %v3575_v45 = vpop.f32.mrf.mxu0 }
 0x59f   :  { %v3807_v46 = vpop.f32.mrf.mxu2 }
 0x5a0   :  { %3622 = vmatmul.f32.gmra.mxu0 %v4707_v27  ;;  %3848 = vmatmul.f32.gmra.mxu2 %v4707_v27 }
 0x5a1   :  { %3717 = vmatmul.f32.gmra.mxu1 %v4680_v48 }
 0x5a2   :  { %3943 = vmatmul.f32.gmra.mxu3 %v4680_v48  ;;  %v4705_v48 = vunpack.i.h.bf16 %v4701_v60  ;;  %v4720_v60 = vunpack.i.h.bf16 %v4716_v21 }
 0x5a5   :  { %v3896_v63 = vpop.f32.mrf.mxu3 }
 0x5a6   :  { %v8331_v34 = vadd.f32 %v3896_v63, %v3783_v30  ;;  %v8335_v54 = vpop.f32.mrf.mxu1  ;;  %v4695_v30 = vunpack.i.h.bf16 %v4691_v47  ;;  %v3578_v3 = vpop.f32.mrf.mxu0 }
 0x5a8   :  { %3625 = vmatmul.f32.gmra.mxu0 %v4712_v38  ;;  %3851 = vmatmul.f32.gmra.mxu2 %v4712_v38  ;;  %v4715_v38 = vunpack.i.h.bf16 %v4711_v42 }
 0x5a9   :  { %3720 = vmatmul.f32.gmra.mxu1 %v4685_v61 }
 0x5aa   :  { %3946 = vmatmul.f32.gmra.mxu3 %v4685_v61 }
 0x5ad   :  { %v8339_v44 = vpop.f32.mrf.mxu3 }
 0x5ae   :  { %v8341_v24 = vpop.f32.mrf.mxu1  ;;  %v3581_v14 = vpop.f32.mrf.mxu0 }
 0x5b0   :  { %3628 = vmatmul.f32.gmra.mxu0 %v4717_v5  ;;  %3854 = vmatmul.f32.gmra.mxu2 %v4717_v5 }
 0x5b1   :  { %3723 = vmatmul.f32.gmra.mxu1 %v4690_v53 }
 0x5b2   :  { %3949 = vmatmul.f32.gmra.mxu3 %v4690_v53  ;;  %v3810_v53 = vpop.f32.mrf.mxu2 }
 0x5b5   :  { %v8345_v28 = vpop.f32.mrf.mxu3 }
 0x5b6   :  { %v3679_v20 = vpop.f32.mrf.mxu1  ;;  %v3584_v63 = vpop.f32.mrf.mxu0 }
 0x5b9   :  { %3726 = vmatmul.f32.gmra.mxu1 %v4695_v30 }
 0x5ba   :  { %3952 = vmatmul.f32.gmra.mxu3 %v4695_v30 }
 0x5bd   :  { %v8347_v31 = vpop.f32.mrf.mxu3 }
 0x5be   :  { %v3682_v15 = vpop.f32.mrf.mxu1  ;;  %v3587_v8 = vpop.f32.mrf.mxu0 }
 0x5c1   :  { %3729 = vmatmul.f32.gmra.mxu1 %v4700_v7 }
 0x5c2   :  { %3955 = vmatmul.f32.gmra.mxu3 %v4700_v7  ;;  %v3813_v7 = vpop.f32.mrf.mxu2 }
 0x5c5   :  { %v3908_v47 = vpop.f32.mrf.mxu3 }
 0x5c6   :  { %v3685_v43 = vpop.f32.mrf.mxu1  ;;  %v3590_v5 = vpop.f32.mrf.mxu0 }
 0x5c7   :  { %v3686_v49 = vadd.f32 %v3685_v43, %v8333_v16  ;;  %v3677_v16 = vadd.f32 %v8341_v24, %v8309_v56  ;;  %v3671_v56 = vadd.f32 %v8327_v18, %v8295_v4 }
 0x5c9   :  { %3732 = vmatmul.f32.gmra.mxu1 %v4705_v48 }
 0x5ca   :  { %3958 = vmatmul.f32.gmra.mxu3 %v4705_v48  ;;  %v8349_v35 = vpop.f32.mrf.mxu2 }
 0x5cd   :  { %v3911_v61 = vpop.f32.mrf.mxu3 }
 0x5ce   :  { %v3688_v27 = vpop.f32.mrf.mxu1  ;;  %v8351_v37 = vpop.f32.mrf.mxu0 }
 0x5cf   :  { %v3689_v48 = vadd.f32 %v3688_v27, %v3575_v45 }
 0x5d1   :  { %3735 = vmatmul.f32.gmra.mxu1 %v4710_v22 }
 0x5d2   :  { %3961 = vmatmul.f32.gmra.mxu3 %v4710_v22  ;;  %v3819_v45 = vpop.f32.mrf.mxu2 }
 0x5d5   :  { %v3914_v30 = vpop.f32.mrf.mxu3 }
 0x5d6   :  { %v3691_v58 = vpop.f32.mrf.mxu1 }
 0x5d7   :  { %v3692_v11 = vadd.f32 %v3691_v58, %v3578_v3  ;;  %v3915_v58 = vadd.f32 %v3914_v30, %v8343_v33  ;;  %v3912_v3 = vadd.f32 %v3911_v61, %v8337_v50 }
 0x5d9   :  { %3738 = vmatmul.f32.gmra.mxu1 %v4715_v38 }
 0x5da   :  { %3964 = vmatmul.f32.gmra.mxu3 %v4715_v38  ;;  %v3822_v33 = vpop.f32.mrf.mxu2 }
 0x5dd   :  { %v3917_v36 = vpop.f32.mrf.mxu3 }
 0x5de   :  { %v3694_v0 = vpop.f32.mrf.mxu1  ;;  %v3918_v17 = vadd.f32 %v3917_v36, %v3804_v29  ;;  %v3909_v29 = vadd.f32 %v3908_v47, %v8329_v25  ;;  %v3903_v25 = vadd.f32 %v8345_v28, %v8313_v32  ;;  %v3662_v32 = vadd.f32 %v8303_v19, %v8277_v13  ;;  %v9473_v13 = vld [vmem:[#allocation143_spill] sm:$0xff]  ;;  %v9480_v47 = vld [vmem:[#allocation133_spill] sm:$0xff] }
 0x5df   :  { %v3695_v41 = vadd.f32 %v3694_v0, %v3581_v14  ;;  %v3683_v0 = vadd.f32 %v3682_v15, %v8325_v23  ;;  %v3906_v23 = vadd.f32 %v8347_v31, %v8321_v62  ;;  %v3665_v62 = vadd.f32 %v8311_v2, %v8283_v39  ;;  %v9479_v31 = vld [vmem:[#allocation141_spill] sm:$0xff] }
 0x5e0   :  { %v3656_v2 = vadd.f32 %v8291_v55, %v8273_v59  ;;  %v3653_v19 = vadd.f32 %v9473_v13, %v8271_v57  ;;  %v9477_v55 = vld [vmem:[#allocation74_spill] sm:$0xff]  ;;  %v9478_v57 = vld [vmem:[#allocation137_spill] sm:$0xff] }
 0x5e1   :  { %3741 = vmatmul.f32.gmra.mxu1 %v4720_v60  ;;  %3979 = vmatpush.msra.mxu0 %v3695_v41  ;;  %v3680_v41 = vadd.f32 %v3679_v20, %v8317_v51  ;;  %v3596_v51 = vpop.f32.mrf.mxu0 }
 0x5e2   :  { %3967 = vmatmul.f32.gmra.mxu3 %v4720_v60  ;;  %v3825_v20 = vpop.f32.mrf.mxu2 }
 0x5e3   :  { %3980 = vmatpush.msra.mxu0 %v3692_v11 }
 0x5e5   :  { %v3920_v22 = vpop.f32.mrf.mxu3  ;;  %3981 = vmatpush.msra.mxu0 %v3689_v48 }
 0x5e6   :  { %v3921_v42 = vadd.f32 %v3920_v22, %v3807_v46  ;;  %v3697_v38 = vpop.f32.mrf.mxu1 }
 0x5e7   :  { %v8354_v21 = vadd.f32 %v3697_v38, %v3584_v63  ;;  %3982 = vmatpush.msra.mxu0 %v3686_v49 }
 0x5e8   :  { %3999 = vmatpush.msra.mxu1 %v3921_v42 }
 0x5e9   :  { %3983 = vmatpush.msra.mxu0 %v3683_v0  ;;  %v3599_v39 = vpop.f32.mrf.mxu0 }
 0x5ea   :  { %4000 = vmatpush.msra.mxu1 %v3918_v17  ;;  %v3674_v17 = vadd.f32 %v8335_v54, %v8301_v52  ;;  %v3668_v52 = vadd.f32 %v8319_v26, %v8289_v10  ;;  %v3900_v54 = vadd.f32 %v8339_v44, %v8305_v9  ;;  %v3659_v9 = vadd.f32 %v8297_v6, %v8275_v12  ;;  %v9474_v44 = vld [vmem:[#allocation153_spill] sm:$0xff]  ;;  %v9475_v12 = vld [vmem:[#allocation160_spill] sm:$0xff]  ;;  %v9476_v6 = vld [vmem:[#allocation67_spill] sm:$0xff]  ;;  %v3828_v63 = vpop.f32.mrf.mxu2 }
 0x5eb   :  { %3984 = vmatpush.msra.mxu0 %v3680_v41  ;;  %v3650_v28 = vadd.f32 %v9476_v6, %v9475_v12 }
 0x5ec   :  { %4001 = vmatpush.msra.mxu1 %v3915_v58 }
 0x5ed   :  { %v3923_v36 = vpop.f32.mrf.mxu3  ;;  %3985 = vmatpush.msra.mxu0 %v3677_v16 }
 0x5ee   :  { %v8363_v14 = vadd.f32 %v3923_v36, %v3810_v53  ;;  %4002 = vmatpush.msra.mxu1 %v3912_v3  ;;  %v3700_v49 = vpop.f32.mrf.mxu1 }
 0x5ef   :  { %v8369_v50 = vadd.f32 %v3700_v49, %v3587_v8  ;;  %3986 = vmatpush.msra.mxu0 %v3674_v17 }
 0x5f0   :  { %4003 = vmatpush.msra.mxu1 %v3909_v29 }
 0x5f1   :  { %3987 = vmatpush.msra.mxu0 %v3671_v56 }
 0x5f2   :  { %4004 = vmatpush.msra.mxu1 %v3906_v23  ;;  %v3831_v30 = vpop.f32.mrf.mxu2 }
 0x5f3   :  { %3988 = vmatpush.msra.mxu0 %v3668_v52 }
 0x5f4   :  { %4005 = vmatpush.msra.mxu1 %v3903_v25 }
 0x5f5   :  { %v3926_v24 = vpop.f32.mrf.mxu3  ;;  %3989 = vmatpush.msra.mxu0 %v3665_v62 }
 0x5f6   :  { %v8381_v4 = vadd.f32 %v3926_v24, %v3813_v7  ;;  %4006 = vmatpush.msra.mxu1 %v3900_v54  ;;  %v3703_v18 = vpop.f32.mrf.mxu1 }
 0x5f7   :  { %v8385_v10 = vadd.f32 %v3703_v18, %v3590_v5  ;;  %3990 = vmatpush.msra.mxu0 %v3662_v32 }
 0x5f8   :  { %4007 = vmatpush.msra.mxu1 %v8331_v34 }
 0x5f9   :  { %3991 = vmatpush.msra.mxu0 %v3659_v9 }
 0x5fa   :  { %4008 = vmatpush.msra.mxu1 %v8323_v40  ;;  %v3834_v42 = vpop.f32.mrf.mxu2 }
 0x5fb   :  { %3992 = vmatpush.msra.mxu0 %v3656_v2 }
 0x5fc   :  { %4009 = vmatpush.msra.mxu1 %v8315_v1  ;;  %v3602_v1 = vpop.f32.mrf.mxu0 }
 0x5fd   :  { %v3929_v26 = vpop.f32.mrf.mxu3  ;;  %3993 = vmatpush.msra.mxu0 %v3653_v19 }
 0x5fe   :  { %v8397_v34 = vadd.f32 %v3929_v26, %v8349_v35  ;;  %4010 = vmatpush.msra.mxu1 %v9474_v44  ;;  %v3706_v40 = vpop.f32.mrf.mxu1 }
 0x5ff   :  { %v8403_v59 = vadd.f32 %v3706_v40, %v8351_v37  ;;  %3994 = vmatpush.msra.mxu0 %v3650_v28 }
 0x600   :  { %4011 = vmatpush.msra.mxu1 %v9477_v55 }
 0x602   :  { %4012 = vmatpush.msra.mxu1 %v9478_v57  ;;  %v8427_v36 = vpop.f32.mrf.mxu2 }
 0x604   :  { %4013 = vmatpush.msra.mxu1 %v9479_v31  ;;  %v3605_v37 = vpop.f32.mrf.mxu0 }
 0x605   :  { %v3932_v35 = vpop.f32.mrf.mxu3 }
 0x606   :  { %v8408_v15 = vadd.f32 %v3932_v35, %v3819_v45  ;;  %4014 = vmatpush.msra.mxu1 %v9480_v47  ;;  %v3709_v46 = vpop.f32.mrf.mxu1 }
 0x607   :  { %v8411_v43 = vadd.f32 %v3709_v46, %v3596_v51 }
 0x60a   :  { %v3840_v56 = vpop.f32.mrf.mxu2 }
 0x60c   :  { %v3608_v11 = vpop.f32.mrf.mxu0 }
 0x60d   :  { %v3935_v61 = vpop.f32.mrf.mxu3 }
 0x60e   :  { %v8413_v53 = vadd.f32 %v3935_v61, %v3822_v33  ;;  %v3712_v27 = vpop.f32.mrf.mxu1  ;;  %v3971_v61 = vld [vmem:[%s8507_s2] sm:$0xf]  ;;  %s5217_s2 = smov [#allocation8]  }
 0x60f   :  { %v8415_v8 = vadd.f32 %v3712_v27, %v3599_v39  ;;  %4015 = vmatmul.f32.vlgmr.msra.gmra.mxu1 %v3971_v61  ;;  %3995 = vmatmul.f32.vlgmr.msra.gmra.mxu0 %v3971_v61 }
 0x612   :  { %v3843_v62 = vpop.f32.mrf.mxu2 }
 0x614   :  { %v3611_v41 = vpop.f32.mrf.mxu0 }
 0x615   :  { %v3938_v7 = vpop.f32.mrf.mxu3 }
 0x616   :  { %v8417_v5 = vadd.f32 %v3938_v7, %v3825_v20  ;;  %v3715_v60 = vpop.f32.mrf.mxu1  ;;  %v3973_v7 = vld [vmem:[%s8509_s4] sm:$0xf] }
 0x617   :  { %v8419_v48 = vadd.f32 %v3715_v60, %v3602_v1  ;;  %v5216_v60 = vmov 0  }
 0x618   :  { %4721 = vset.pattern.permute.xlu2 %v5216_v60  ;;  %4722 = vset.pattern.permute.xlu0 %v5216_v60 }
 0x619   :  { %4095 = vperm.xlu0 %4722, %v3973_v7  }
 0x61b   :  { %v3846_v9 = vpop.f32.mrf.mxu2 }
 0x61c   :  { %v3614_v17 = vpop.f32.mrf.mxu0 }
 0x61d   :  { %v3941_v22 = vpop.f32.mrf.mxu3 }
 0x61e   :  { %v8421_v38 = vadd.f32 %v3941_v22, %v3828_v63  ;;  %v3718_v0 = vpop.f32.mrf.mxu1 }
 0x61f   :  { %v8423_v58 = vadd.f32 %v3718_v0, %v3605_v37 }
 0x623   :  { %v3849_v26 = vpop.f32.mrf.mxu2 }
 0x624   :  { %v3617_v52 = vpop.f32.mrf.mxu0 }
 0x625   :  { %v3944_v45 = vpop.f32.mrf.mxu3 }
 0x626   :  { %v8425_v3 = vadd.f32 %v3944_v45, %v3831_v30  ;;  %v3721_v16 = vpop.f32.mrf.mxu1  ;;  %v3972_v30 = vld [vmem:[%s8508_s3] sm:$0xf]  ;;  %s4237_s3 = sshll.u32 %s5217_s2, 4  ;;  %s4238_s3 = int_to_ptr.vmem [resolvable:$true] %s4237_s3 }
 0x627   :  { %v8429_v29 = vadd.f32 %v3721_v16, %v3608_v11  ;;  %3976 = vperm.xlu2 %4721, %v3972_v30  }
 0x62b   :  { %v3852_v28 = vpop.f32.mrf.mxu2 }
 0x62c   :  { %v3620_v32 = vpop.f32.mrf.mxu0 }
 0x62d   :  { %v3947_v49 = vpop.f32.mrf.mxu3 }
 0x62e   :  { %v8431_v51 = vadd.f32 %v3947_v49, %v3834_v42  ;;  %v3724_v23 = vpop.f32.mrf.mxu1 }
 0x62f   :  { %v3725_v42 = vadd.f32 %v3724_v23, %v3611_v41 }
 0x633   :  { %v3855_v31 = vpop.f32.mrf.mxu2 }
 0x634   :  { %v3623_v2 = vpop.f32.mrf.mxu0 }
 0x635   :  { %v3950_v25 = vpop.f32.mrf.mxu3 }
 0x636   :  { %v3727_v54 = vpop.f32.mrf.mxu1  ;;  %v3951_v49 = vadd.f32 %v3950_v25, %v8427_v36 }
 0x637   :  { %v3728_v11 = vadd.f32 %v3727_v54, %v3614_v17 }
 0x63c   :  { %v3626_v44 = vpop.f32.mrf.mxu0 }
 0x63d   :  { %v3953_v24 = vpop.f32.mrf.mxu3 }
 0x63e   :  { %v3730_v33 = vpop.f32.mrf.mxu1  ;;  %v3954_v16 = vadd.f32 %v3953_v24, %v3840_v56 }
 0x63f   :  { %v3731_v37 = vadd.f32 %v3730_v33, %v3617_v52 }
 0x644   :  { %v3629_v20 = vpop.f32.mrf.mxu0 }
 0x645   :  { %v3956_v18 = vpop.f32.mrf.mxu3 }
 0x646   :  { %v3733_v39 = vpop.f32.mrf.mxu1  ;;  %v3957_v45 = vadd.f32 %v3956_v18, %v3843_v62 }
 0x647   :  { %v3734_v46 = vadd.f32 %v3733_v39, %v3620_v32 }
 0x64d   :  { %v3959_v13 = vpop.f32.mrf.mxu3 }
 0x64e   :  { %v3736_v19 = vpop.f32.mrf.mxu1  ;;  %v3960_v0 = vadd.f32 %v3959_v13, %v3846_v9 }
 0x64f   :  { %v3737_v35 = vadd.f32 %v3736_v19, %v3623_v2 }
 0x655   :  { %v3962_v12 = vpop.f32.mrf.mxu3 }
 0x656   :  { %v3739_v6 = vpop.f32.mrf.mxu1  ;;  %v3963_v22 = vadd.f32 %v3962_v12, %v3849_v26 }
 0x657   :  { %v3740_v1 = vadd.f32 %v3739_v6, %v3626_v44 }
 0x65d   :  { %v3965_v40 = vpop.f32.mrf.mxu3 }
 0x65e   :  { %v3742_v55 = vpop.f32.mrf.mxu1  ;;  %v3966_v27 = vadd.f32 %v3965_v40, %v3852_v28 }
 0x65f   :  { %v3743_v57 = vadd.f32 %v3742_v55, %v3629_v20 }
 0x661   :  { %4108 = vmatpush.msra.mxu2 %v3743_v57 }
 0x663   :  { %4109 = vmatpush.msra.mxu2 %v3740_v1 }
 0x665   :  { %v3968_v47 = vpop.f32.mrf.mxu3  ;;  %4110 = vmatpush.msra.mxu2 %v3737_v35 }
 0x666   :  { %v3969_v63 = vadd.f32 %v3968_v47, %v3855_v31 }
 0x667   :  { %4111 = vmatpush.msra.mxu2 %v3734_v46 }
 0x668   :  { %4128 = vmatpush.msra.mxu3 %v3969_v63 }
 0x669   :  { %4112 = vmatpush.msra.mxu2 %v3731_v37 }
 0x66a   :  { %4129 = vmatpush.msra.mxu3 %v3966_v27 }
 0x66b   :  { %4113 = vmatpush.msra.mxu2 %v3728_v11 }
 0x66c   :  { %4130 = vmatpush.msra.mxu3 %v3963_v22 }
 0x66d   :  { %4114 = vmatpush.msra.mxu2 %v3725_v42 }
 0x66e   :  { %4131 = vmatpush.msra.mxu3 %v3960_v0 }
 0x66f   :  { %4115 = vmatpush.msra.mxu2 %v8429_v29 }
 0x670   :  { %4132 = vmatpush.msra.mxu3 %v3957_v45 }
 0x671   :  { %4116 = vmatpush.msra.mxu2 %v8423_v58 }
 0x672   :  { %4133 = vmatpush.msra.mxu3 %v3954_v16 }
 0x673   :  { %4117 = vmatpush.msra.mxu2 %v8419_v48 }
 0x674   :  { %4134 = vmatpush.msra.mxu3 %v3951_v49 }
 0x675   :  { %4118 = vmatpush.msra.mxu2 %v8415_v8 }
 0x676   :  { %4135 = vmatpush.msra.mxu3 %v8431_v51 }
 0x677   :  { %4119 = vmatpush.msra.mxu2 %v8411_v43 }
 0x678   :  { %4136 = vmatpush.msra.mxu3 %v8425_v3 }
 0x679   :  { %4120 = vmatpush.msra.mxu2 %v8403_v59 }
 0x67a   :  { %4137 = vmatpush.msra.mxu3 %v8421_v38 }
 0x67b   :  { %4121 = vmatpush.msra.mxu2 %v8385_v10 }
 0x67c   :  { %4138 = vmatpush.msra.mxu3 %v8417_v5 }
 0x67d   :  { %4122 = vmatpush.msra.mxu2 %v8369_v50 }
 0x67e   :  { %4139 = vmatpush.msra.mxu3 %v8413_v53 }
 0x67f   :  { %4123 = vmatpush.msra.mxu2 %v8354_v21 }
 0x680   :  { %4140 = vmatpush.msra.mxu3 %v8408_v15  ;;  %4124 = vmatmul.f32.vlgmr.msra.gmra.mxu2 %v3971_v61 }
 0x681   :  { %v8461_v59 = vpop.permute.xlu2 %3976 }
 0x682   :  { %4141 = vmatpush.msra.mxu3 %v8397_v34 }
 0x684   :  { %4142 = vmatpush.msra.mxu3 %v8381_v4 }
 0x686   :  { %4143 = vmatpush.msra.mxu3 %v8363_v14 }
 0x687   :  { %4144 = vmatmul.f32.vlgmr.msra.gmra.mxu3 %v3971_v61 }
 0x68c   :  { %v4016_v10 = vpop.f32.mrf.mxu1  ;;  %v3996_v41 = vpop.f32.mrf.mxu0 }
 0x68d   :  { %v8464_v43 = vadd.f32 %v4016_v10, %v8461_v59  ;;  %v8470_v36 = vadd.f32 %v3996_v41, %v8461_v59 }
 0x68f   :  { %v4020_v50 = vmul.f32 %v8464_v43, %v8464_v43  ;;  %v4019_v29 = vmul.f32 %v8470_v36, %v8470_v36 }
 0x691   :  { %v4028_v21 = vsel %vm79_vm0, %v4020_v50, 0.0  ;;  %v4021_v51 = vsel %vm79_vm0, %v4019_v29, 0.0 }
 0x692   :  { %v4029_v15 = vrot.slane %v4028_v21, 4  ;;  %v4022_v23 = vrot.slane %v4021_v51, 4 }
 0x694   :  { %v4030_v53 = vadd.f32 %v4029_v15, %v4028_v21  ;;  %v4023_v52 = vadd.f32 %v4022_v23, %v4021_v51 }
 0x696   :  { %v4031_v8 = vrot.slane %v4030_v53, 2  ;;  %v4024_v62 = vrot.slane %v4023_v52, 2 }
 0x698   :  { %v4032_v34 = vadd.f32 %v4031_v8, %v4030_v53  ;;  %v4025_v18 = vadd.f32 %v4024_v62, %v4023_v52 }
 0x69a   :  { %v4033_v5 = vrot.slane %v4032_v34, 1  ;;  %v4026_v39 = vrot.slane %v4025_v18, 1 }
 0x69c   :  { %v4034_v4 = vadd.f32 %v4033_v5, %v4032_v34  ;;  %v4027_v19 = vadd.f32 %v4026_v39, %v4025_v18 }
 0x69e   :  { %5091 = vrsqrt.f32 %v4034_v4  ;;  %vm4054_vm8 = vcmp.eq.f32.partialorder %v4034_v4, inf  ;;  %v4057_v24 = vand.u32 2147483648, %v4034_v4  ;;  %vm4056_vm9 = vcmp.eq.f32.partialorder %v4034_v4, 0.0 }
 0x69f   :  { %5093 = vrsqrt.f32 %v4027_v19  ;;  %vm4042_vm10 = vcmp.eq.f32.partialorder %v4027_v19, inf  ;;  %v4045_v27 = vand.u32 2147483648, %v4027_v19  ;;  %vm4044_vm11 = vcmp.eq.f32.partialorder %v4027_v19, 0.0 }
 0x6a4   :  { %v5092_v14 = vpop.eup %5091 }
 0x6a5   :  { %v4048_v48 = vmul.f32 %v5092_v14, %v4034_v4  ;;  %v5094_v40 = vpop.eup %5093 }
 0x6a6   :  { %v4036_v55 = vmul.f32 %v5094_v40, %v4027_v19 }
 0x6a7   :  { %v4049_v38 = vmul.f32 %v5092_v14, %v4048_v48 }
 0x6a8   :  { %v4037_v1 = vmul.f32 %v5094_v40, %v4036_v55 }
 0x6a9   :  { %v4050_v58 = vmul.f32 0.5, %v4049_v38 }
 0x6aa   :  { %v4038_v31 = vmul.f32 0.5, %v4037_v1 }
 0x6ab   :  { %v4051_v3 = vsub.f32 1.5, %v4050_v58 }
 0x6ac   :  { %v4039_v47 = vsub.f32 1.5, %v4038_v31 }
 0x6ad   :  { %v4052_v17 = vmul.f32 %v5092_v14, %v4051_v3 }
 0x6ae   :  { %v4040_v61 = vmul.f32 %v5094_v40, %v4039_v47 }
 0x6af   :  { %v4053_v56 = vmul.f32 %v4052_v17, %v4034_v4 }
 0x6b0   :  { %v4041_v60 = vmul.f32 %v4040_v61, %v4027_v19 }
 0x6b1   :  { %v4055_v33 = vsel %vm4054_vm8, %v4034_v4, %v4053_v56 }
 0x6b2   :  { %v4058_v2 = vsel %vm4056_vm9, %v4057_v24, %v4055_v33  ;;  %v4043_v42 = vsel %vm4042_vm10, %v4027_v19, %v4041_v60 }
 0x6b3   :  { %v4060_v44 = vmax.f32 %v4058_v2, 1e-12  ;;  %v4046_v16 = vsel %vm4044_vm11, %v4045_v27, %v4043_v42 }
 0x6b4   :  { %v4059_v10 = vmax.f32 %v4046_v16, 1e-12 }
 0x6b5   :  { %5095 = vrcp.f32 %v4060_v44  ;;  %vm4081_vm12 = vweird.f32 %v4060_v44  ;;  %v4087_v15 = vand.u32 2147483648, %v4060_v44 }
 0x6b6   :  { %vm4066_vm3 = vweird.f32 %v4059_v10  ;;  %v4072_v52 = vand.u32 2147483648, %v4059_v10  ;;  %v4070_v24 = vand.u32 2147483647, %v4059_v10 }
 0x6b7   :  { %v4088_v38 = vor.u32 1.1754944e-38, %v4087_v15 }
 0x6b8   :  { %vm4071_vm6 = vcmp.eq.f32.partialorder %v4070_v24, 8.507059e+37 }
 0x6bb   :  { %v5096_v57 = vpop.eup %5095 }
 0x6bc   :  { %v4077_v35 = vmul.f32 %v5096_v57, %v4060_v44  ;;  %vm4082_vm13 = vweird.f32 %v5096_v57 }
 0x6bd   :  { %vm8487_vm14 = vmor %vm4081_vm12, %vm4082_vm13 }
 0x6be   :  { %v4078_v37 = vsub.f32 1.0, %v4077_v35 }
 0x6c0   :  { %v4079_v45 = vmul.f32 %v5096_v57, %v4078_v37 }
 0x6c2   :  { %v4080_v8 = vadd.f32 %v5096_v57, %v4079_v45 }
 0x6c4   :  { %v4084_v41 = vsel %vm8487_vm14, %v5096_v57, %v4080_v8 }
 0x703   :  { %v4125_v30 = vpop.f32.mrf.mxu2 }
 0x704   :  { %v8482_v11 = vadd.f32 %v4125_v30, %v8461_v59 }
 0x706   :  { %v4148_v0 = vmul.f32 %v8482_v11, %v8482_v11 }
 0x708   :  { %v4150_v50 = vsel %vm79_vm0, %v4148_v0, 0.0 }
 0x709   :  { %v4151_v21 = vrot.slane %v4150_v50, 4 }
 0x70a   :  { %v4145_v25 = vpop.f32.mrf.mxu3 }
 0x70b   :  { %v8476_v54 = vadd.f32 %v4145_v25, %v8461_v59  ;;  %v4085_v59 = vand.u32 2147483647, %v4060_v44  ;;  %v4152_v34 = vadd.f32 %v4151_v21, %v4150_v50 }
 0x70d   :  { %v4149_v32 = vmul.f32 %v8476_v54, %v8476_v54  ;;  %v4153_v48 = vrot.slane %v4152_v34, 2  ;;  %vm4086_vm2 = vcmp.eq.f32.partialorder %v4085_v59, 8.507059e+37 }
 0x70e   :  { %v4089_v25 = vsel %vm4086_vm2, %v4088_v38, %v4084_v41 }
 0x70f   :  { %v4157_v9 = vsel %vm79_vm0, %v4149_v32, 0.0  ;;  %v4154_v29 = vadd.f32 %v4153_v48, %v4152_v34  ;;  %v4092_v18 = vmul.f32 %v4089_v25, %v8464_v43 }
 0x710   :  { %v4158_v13 = vrot.slane %v4157_v9, 4 }
 0x711   :  { %v4155_v56 = vrot.slane %v4154_v29, 1 }
 0x712   :  { %v4159_v26 = vadd.f32 %v4158_v13, %v4157_v9  ;;  %v4073_v9 = vor.u32 1.1754944e-38, %v4072_v52  ;;  %v4096_v13 = vpop.permute.xlu0 %4095 }
 0x713   :  { %v4156_v33 = vadd.f32 %v4155_v56, %v4154_v29  ;;  %v4099_v44 = vmul.f32 %v4096_v13, %v4092_v18 }
 0x714   :  { %v4160_v12 = vrot.slane %v4159_v26, 2 }
 0x715   :  { %v4101_v40 = vmul.f32 2.0, %v4099_v44  ;;  %vm4171_vm7 = vcmp.eq.f32.partialorder %v4156_v33, inf  ;;  %v4174_v27 = vand.u32 2147483648, %v4156_v33  ;;  %vm4173_vm8 = vcmp.eq.f32.partialorder %v4156_v33, 0.0 }
 0x716   :  { %v4161_v6 = vadd.f32 %v4160_v12, %v4159_v26 }
 0x717   :  { %v4104_v1 = vrot.slane %v4101_v40, 4 }
 0x718   :  { %v4162_v28 = vrot.slane %v4161_v6, 1 }
 0x71a   :  { %v4163_v20 = vadd.f32 %v4162_v28, %v4161_v6 }
 0x71c   :  { %5097 = vrsqrt.f32 %v4163_v20  ;;  %vm4183_vm15 = vcmp.eq.f32.partialorder %v4163_v20, inf  ;;  %v4186_v14 = vand.u32 2147483648, %v4163_v20  ;;  %vm4185_vm1 = vcmp.eq.f32.partialorder %v4163_v20, 0.0 }
 0x71d   :  { %5099 = vrcp.f32 %v4059_v10 }
 0x722   :  { %v5098_v46 = vpop.eup %5097 }
 0x723   :  { %v4177_v63 = vmul.f32 %v5098_v46, %v4163_v20  ;;  %v5100_v17 = vpop.eup %5099 }
 0x724   :  { %v4062_v23 = vmul.f32 %v5100_v17, %v4059_v10  ;;  %vm4067_vm4 = vweird.f32 %v5100_v17 }
 0x725   :  { %v4178_v7 = vmul.f32 %v5098_v46, %v4177_v63  ;;  %vm4068_vm5 = vmor %vm4066_vm3, %vm4067_vm4 }
 0x726   :  { %v4063_v62 = vsub.f32 1.0, %v4062_v23 }
 0x727   :  { %v4179_v22 = vmul.f32 0.5, %v4178_v7 }
 0x728   :  { %v4064_v32 = vmul.f32 %v5100_v17, %v4063_v62 }
 0x729   :  { %v4180_v49 = vsub.f32 1.5, %v4179_v22 }
 0x72a   :  { %v4065_v39 = vadd.f32 %v5100_v17, %v4064_v32 }
 0x72b   :  { %v4181_v53 = vmul.f32 %v5098_v46, %v4180_v49 }
 0x72c   :  { %v4069_v2 = vsel %vm4068_vm5, %v5100_v17, %v4065_v39 }
 0x72d   :  { %v4182_v4 = vmul.f32 %v4181_v53, %v4163_v20  ;;  %v4074_v26 = vsel %vm4071_vm6, %v4073_v9, %v4069_v2 }
 0x72e   :  { %v4091_v6 = vmul.f32 %v4074_v26, %v8470_v36 }
 0x72f   :  { %v4184_v58 = vsel %vm4183_vm15, %v4163_v20, %v4182_v4 }
 0x730   :  { %v4187_v3 = vsel %vm4185_vm1, %v4186_v14, %v4184_v58  ;;  %v4098_v55 = vmul.f32 %v4096_v13, %v4091_v6 }
 0x731   :  { %v4189_v51 = vmax.f32 %v4187_v3, 1e-12 }
 0x732   :  { %v4100_v31 = vmul.f32 2.0, %v4098_v55 }
 0x733   :  { %5101 = vrcp.f32 %v4189_v51  ;;  %v4216_v60 = vand.u32 2147483648, %v4189_v51  ;;  %vm4210_vm10 = vweird.f32 %v4189_v51  ;;  %v4214_v42 = vand.u32 2147483647, %v4189_v51 }
 0x734   :  { %5103 = vrsqrt.f32 %v4156_v33  ;;  %v4105_v47 = vsel %vm79_vm0, %v4100_v31, %v4104_v1 }
 0x735   :  { %4107 = vst [vmem:[#allocation8] sm:$0xff] %v4105_v47  ;;  %v4217_v45 = vor.u32 1.1754944e-38, %v4216_v60  ;;  %vm4215_vm12 = vcmp.eq.f32.partialorder %v4214_v42, 8.507059e+37 }
 0x739   :  { %v5102_v19 = vpop.eup %5101 }
 0x73a   :  { %v5104_v12 = vpop.eup %5103  ;;  %v4206_v20 = vmul.f32 %v5102_v19, %v4189_v51  ;;  %vm4211_vm9 = vweird.f32 %v5102_v19 }
 0x73b   :  { %v4165_v28 = vmul.f32 %v5104_v12, %v4156_v33  ;;  %vm4212_vm11 = vmor %vm4210_vm10, %vm4211_vm9 }
 0x73c   :  { %v4207_v35 = vsub.f32 1.0, %v4206_v20 }
 0x73d   :  { %v4166_v57 = vmul.f32 %v5104_v12, %v4165_v28 }
 0x73e   :  { %v4208_v61 = vmul.f32 %v5102_v19, %v4207_v35 }
 0x73f   :  { %v4167_v43 = vmul.f32 0.5, %v4166_v57 }
 0x740   :  { %v4209_v36 = vadd.f32 %v5102_v19, %v4208_v61 }
 0x741   :  { %v4168_v46 = vsub.f32 1.5, %v4167_v43 }
 0x742   :  { %v4213_v0 = vsel %vm4212_vm11, %v5102_v19, %v4209_v36 }
 0x743   :  { %v4169_v63 = vmul.f32 %v5104_v12, %v4168_v46  ;;  %v4218_v16 = vsel %vm4215_vm12, %v4217_v45, %v4213_v0 }
 0x744   :  { %v4221_v10 = vmul.f32 %v4218_v16, %v8476_v54 }
 0x745   :  { %v4170_v37 = vmul.f32 %v4169_v63, %v4156_v33 }
 0x746   :  { %v4223_v59 = vmul.f32 %v4221_v10, %v4096_v13 }
 0x747   :  { %v4172_v30 = vsel %vm4171_vm7, %v4156_v33, %v4170_v37 }
 0x748   :  { %v4175_v7 = vsel %vm4173_vm8, %v4174_v27, %v4172_v30  ;;  %v4225_v14 = vmul.f32 2.0, %v4223_v59 }
 0x749   :  { %v4188_v22 = vmax.f32 %v4175_v7, 1e-12 }
 0x74a   :  { %v4228_v41 = vrot.slane %v4225_v14, 4 }
 0x74b   :  { %5105 = vrcp.f32 %v4188_v22  ;;  %v4201_v15 = vand.u32 2147483648, %v4188_v22  ;;  %v4199_v8 = vand.u32 2147483647, %v4188_v22  ;;  %vm4195_vm14 = vweird.f32 %v4188_v22 }
 0x74d   :  { %v4202_v5 = vor.u32 1.1754944e-38, %v4201_v15  ;;  %vm4200_vm1 = vcmp.eq.f32.partialorder %v4199_v8, 8.507059e+37 }
 0x751   :  { %v5106_v49 = vpop.eup %5105 }
 0x752   :  { %v4191_v50 = vmul.f32 %v5106_v49, %v4188_v22  ;;  %vm4196_vm13 = vweird.f32 %v5106_v49 }
 0x753   :  { %vm4197_vm15 = vmor %vm4195_vm14, %vm4196_vm13 }
 0x754   :  { %v4192_v21 = vsub.f32 1.0, %v4191_v50 }
 0x756   :  { %v4193_v53 = vmul.f32 %v5106_v49, %v4192_v21 }
 0x758   :  { %v4194_v34 = vadd.f32 %v5106_v49, %v4193_v53 }
 0x75a   :  { %v4198_v4 = vsel %vm4197_vm15, %v5106_v49, %v4194_v34 }
 0x75b   :  { %v4203_v48 = vsel %vm4200_vm1, %v4202_v5, %v4198_v4 }
 0x75c   :  { %v4220_v38 = vmul.f32 %v4203_v48, %v8482_v11 }
 0x75e   :  { %v4222_v58 = vmul.f32 %v4220_v38, %v4096_v13 }
 0x760   :  { %v4224_v54 = vmul.f32 2.0, %v4222_v58 }
 0x762   :  { %v4229_v3 = vsel %vm79_vm0, %v4224_v54, %v4228_v41 }
 0x763   :  { %4232 = vst [vmem:[#allocation8 + $0x8] sm:$0xff] %v4229_v3 }
 0x764   :  { %4245 = dma.vmem_to_hbm [thread:$0]  %s4238_s3, 256, %s4240_s20, [#allocation4], %s5211_s7, %s5211_s7, %s5212_s8  }
 0x765   :  { %5207 = dma.done.wait [#allocation4], 256  }
 0x766   :  { %5208 = vsyncadd [#allocation4], 4294967040 }
 0x767   :  { %4250 = vsyncpa [#allocation3], 1 }
 0x768   :  { %4251 = vsyncpa [#allocation6], 1 }
 0x769   :  { %4252 = vsyncpa [#allocation4], 1 }

</bundles_post_ra>
